<compile_context>
chip_gen: v5e
topology: v5e:2x2
jax: 0.10.0
libtpu: 0.0.40
codegen_flags: <defaults>
</compile_context>

<pallas_src>
import jax
import jax.numpy as jnp
from jax.experimental import pallas as pl
from jax.experimental.pallas import tpu as pltpu


def _pad_to(n, m):
    return ((n + m - 1) // m) * m


def mlp_kernel(x_ref,
               w1h, w2h, w3h, w4h, w5h,
               t1, t2, t3, t4, t5,
               o_ref,
               w1v, w2v, w3v, w4v, w5v, sem):
    """Fused 5-layer MLP: (Linear+BN folded -> ReLU) x4 -> Linear.

    Weights arrive as HBM refs; we issue all HBM->VMEM DMAs up front and wait
    per-layer so weight streaming overlaps with compute of earlier layers.
    """
    hbm = (w1h, w2h, w3h, w4h, w5h)
    vmem = (w1v, w2v, w3v, w4v, w5v)
    shifts = (t1, t2, t3, t4, t5)

    copies = [pltpu.make_async_copy(hbm[i], vmem[i], sem.at[i]) for i in range(5)]
    for cp in copies:
        cp.start()

    h = x_ref[...].astype(jnp.bfloat16)
    for i in range(4):
        copies[i].wait()
        y = jnp.dot(h, vmem[i][...], preferred_element_type=jnp.float32)
        y = y + shifts[i][...]
        h = jnp.maximum(y, 0.0).astype(jnp.bfloat16)

    # Dropout(p=0.5) is the identity in eval/inference mode.
    copies[4].wait()
    y = jnp.dot(h, vmem[4][...], preferred_element_type=jnp.float32) + shifts[4][...]
    o_ref[...] = y.astype(o_ref.dtype)


def init_params(key, input_size, n_classes, hidden=(3000, 200, 1000, 200)):
    """Deterministic init matching the PyTorch module:
       Linear: kaiming_normal_(nonlinearity='relu') -> std = sqrt(2/fan_in), bias = 0
       BatchNorm1d: gamma=1, beta=0, running_mean=0, running_var=1."""
    dims = (input_size,) + tuple(hidden) + (n_classes,)
    lin = []
    for i in range(5):
        fan_in, fan_out = dims[i], dims[i + 1]
        key, sub = jax.random.split(key)
        w = jax.random.normal(sub, (fan_out, fan_in), jnp.float32) * jnp.sqrt(2.0 / fan_in)
        b = jnp.zeros((fan_out,), jnp.float32)
        lin.append((w, b))
    bn = []
    for d in hidden:
        bn.append((jnp.ones((d,), jnp.float32),    # gamma
                   jnp.zeros((d,), jnp.float32),   # beta
                   jnp.zeros((d,), jnp.float32),   # running_mean
                   jnp.ones((d,), jnp.float32)))   # running_var
    return lin, bn


def pack_params(lin_params, bn_params, input_size, eps=1e-5):
    """One-time packing: fold BN (eval mode) into each Linear, transpose to
    (in, out), zero-pad feature dims to multiples of 128, cast weights to bf16.

    Zero padding is exact: zero weight rows/cols and zero shifts keep padded
    lanes at exactly 0 through every layer (ReLU(0)=0)."""
    dims = [input_size] + [w.shape[0] for (w, _) in lin_params]
    pdims = [_pad_to(d, 128) for d in dims]

    weights, shifts = [], []
    for i in range(5):
        w, b = lin_params[i]
        out_d, in_d = w.shape
        if i < 4:
            gamma, beta, mean, var = bn_params[i]
            s = gamma / jnp.sqrt(var + eps)              # per-output-feature scale
            w_eff = w.T * s[None, :]                     # fold scale into weight cols
            t_eff = b * s + (beta - mean * s)            # fold bias + BN shift
        else:
            w_eff = w.T
            t_eff = b
        wp = (jnp.zeros((pdims[i], pdims[i + 1]), jnp.bfloat16)
              .at[:in_d, :out_d].set(w_eff.astype(jnp.bfloat16)))
        tp = jnp.zeros((1, pdims[i + 1]), jnp.float32).at[0, :out_d].set(t_eff)
        weights.append(wp)
        shifts.append(tp)
    return {"weights": weights, "shifts": shifts, "dims": dims, "pdims": pdims}


def mlp_forward_pallas(x, packed):
    """Forward pass.  Only the (tiny) input is padded per call; weights are
    already packed.  Output is sliced back to the true (N, n_classes)."""
    dims, pdims = packed["dims"], packed["pdims"]
    ws, ts = packed["weights"], packed["shifts"]

    N, D = x.shape
    Np = _pad_to(max(N, 16), 16)          # 16 = bf16 sublane tile
    xp = jnp.zeros((Np, pdims[0]), jnp.float32).at[:N, :D].set(x)

    vmem_spec = pl.BlockSpec(memory_space=pltpu.MemorySpace.VMEM)
    hbm_spec = pl.BlockSpec(memory_space=pl.ANY)

    scratch = [pltpu.VMEM(w.shape, jnp.bfloat16) for w in ws]
    scratch.append(pltpu.SemaphoreType.DMA((5,)))

    out = pl.pallas_call(
        mlp_kernel,
        out_shape=jax.ShapeDtypeStruct((Np, pdims[-1]), jnp.float32),
        in_specs=[vmem_spec] + [hbm_spec] * 5 + [vmem_spec] * 5,
        out_specs=vmem_spec,
        scratch_shapes=scratch,
        compiler_params=pltpu.CompilerParams(vmem_limit_bytes=24 << 20),
    )(xp, *ws, *ts)
    return out[:N, :dims[-1]]


def mlp_forward_ref(x, lin_params, bn_params):
    """Plain-JAX f32 reference with identical (eval-mode) semantics."""
    eps = 1e-5
    h = x
    for i in range(4):
        w, b = lin_params[i]
        gamma, beta, mean, var = bn_params[i]
        y = h @ w.T + b
        y = (y - mean) / jnp.sqrt(var + eps) * gamma + beta
        h = jnp.maximum(y, 0.0)
    w, b = lin_params[4]
    return h @ w.T + b


if __name__ == "__main__":
    key = jax.random.PRNGKey(0)
    batch, input_size, n_classes = 8, 256, 10
    hidden = (3000, 200, 1000, 200)   # module defaults

    key, kx = jax.random.split(key)
    x = jax.random.normal(kx, (batch, input_size), jnp.float32)

    lin_params, bn_params = init_params(key, input_size, n_classes, hidden)
    packed = pack_params(lin_params, bn_params, input_size)   # one-time packing

    out = mlp_forward_pallas(x, packed)
    out = jax.block_until_ready(out)

    ref = mlp_forward_ref(x, lin_params, bn_params)
    assert out.shape == (batch, n_classes), out.shape
    assert jnp.all(jnp.isfinite(out))
    # bf16 weights + bf16 inter-layer activations over 5 layers: ~1% relative error.
    assert jnp.allclose(out, ref, rtol=3e-2, atol=3e-2), float(jnp.max(jnp.abs(out - ref)))

    print("KERNEL_OK")
</pallas_src>

<mosaic_0001>
module attributes {stable_mosaic.version = 11 : i64} {
  func.func @mlp_kernel(%arg0: memref<16x256xf32, #tpu.memory_space<vmem>>, %arg1: memref<256x3072xbf16, #tpu.memory_space<any>>, %arg2: memref<3072x256xbf16, #tpu.memory_space<any>>, %arg3: memref<256x1024xbf16, #tpu.memory_space<any>>, %arg4: memref<1024x256xbf16, #tpu.memory_space<any>>, %arg5: memref<256x128xbf16, #tpu.memory_space<any>>, %arg6: memref<1x3072xf32, #tpu.memory_space<vmem>>, %arg7: memref<1x256xf32, #tpu.memory_space<vmem>>, %arg8: memref<1x1024xf32, #tpu.memory_space<vmem>>, %arg9: memref<1x256xf32, #tpu.memory_space<vmem>>, %arg10: memref<1x128xf32, #tpu.memory_space<vmem>>, %arg11: memref<16x128xf32, #tpu.memory_space<vmem>>, %arg12: memref<256x3072xbf16, #tpu.memory_space<vmem>>, %arg13: memref<3072x256xbf16, #tpu.memory_space<vmem>>, %arg14: memref<256x1024xbf16, #tpu.memory_space<vmem>>, %arg15: memref<1024x256xbf16, #tpu.memory_space<vmem>>, %arg16: memref<256x128xbf16, #tpu.memory_space<vmem>>, %arg17: memref<5x!tpu.dma_semaphore, #tpu.memory_space<semaphore_mem>>) attributes {dimension_semantics = [], scalar_prefetch = 0 : i64, scratch_operands = 6 : i64, tpu.core_type = #tpu.core_type<tc>} {
    %c0_i32 = arith.constant 0 : i32
    %0 = tpu.memref_slice %arg17[%c0_i32] : memref<5x!tpu.dma_semaphore, #tpu.memory_space<semaphore_mem>> -> memref<1x!tpu.dma_semaphore, #tpu.memory_space<semaphore_mem>>
    %1 = tpu.memref_squeeze %0 : memref<1x!tpu.dma_semaphore, #tpu.memory_space<semaphore_mem>> -> memref<!tpu.dma_semaphore, #tpu.memory_space<semaphore_mem>>
    tpu.enqueue_dma source(%arg1 : memref<256x3072xbf16, #tpu.memory_space<any>>) target(%arg12 : memref<256x3072xbf16, #tpu.memory_space<vmem>>) target_semaphore(%1 : memref<!tpu.dma_semaphore, #tpu.memory_space<semaphore_mem>>)
    %c1_i32 = arith.constant 1 : i32
    %2 = tpu.memref_slice %arg17[%c1_i32] : memref<5x!tpu.dma_semaphore, #tpu.memory_space<semaphore_mem>> -> memref<1x!tpu.dma_semaphore, #tpu.memory_space<semaphore_mem>>
    %3 = tpu.memref_squeeze %2 : memref<1x!tpu.dma_semaphore, #tpu.memory_space<semaphore_mem>> -> memref<!tpu.dma_semaphore, #tpu.memory_space<semaphore_mem>>
    tpu.enqueue_dma source(%arg2 : memref<3072x256xbf16, #tpu.memory_space<any>>) target(%arg13 : memref<3072x256xbf16, #tpu.memory_space<vmem>>) target_semaphore(%3 : memref<!tpu.dma_semaphore, #tpu.memory_space<semaphore_mem>>)
    %c2_i32 = arith.constant 2 : i32
    %4 = tpu.memref_slice %arg17[%c2_i32] : memref<5x!tpu.dma_semaphore, #tpu.memory_space<semaphore_mem>> -> memref<1x!tpu.dma_semaphore, #tpu.memory_space<semaphore_mem>>
    %5 = tpu.memref_squeeze %4 : memref<1x!tpu.dma_semaphore, #tpu.memory_space<semaphore_mem>> -> memref<!tpu.dma_semaphore, #tpu.memory_space<semaphore_mem>>
    tpu.enqueue_dma source(%arg3 : memref<256x1024xbf16, #tpu.memory_space<any>>) target(%arg14 : memref<256x1024xbf16, #tpu.memory_space<vmem>>) target_semaphore(%5 : memref<!tpu.dma_semaphore, #tpu.memory_space<semaphore_mem>>)
    %c3_i32 = arith.constant 3 : i32
    %6 = tpu.memref_slice %arg17[%c3_i32] : memref<5x!tpu.dma_semaphore, #tpu.memory_space<semaphore_mem>> -> memref<1x!tpu.dma_semaphore, #tpu.memory_space<semaphore_mem>>
    %7 = tpu.memref_squeeze %6 : memref<1x!tpu.dma_semaphore, #tpu.memory_space<semaphore_mem>> -> memref<!tpu.dma_semaphore, #tpu.memory_space<semaphore_mem>>
    tpu.enqueue_dma source(%arg4 : memref<1024x256xbf16, #tpu.memory_space<any>>) target(%arg15 : memref<1024x256xbf16, #tpu.memory_space<vmem>>) target_semaphore(%7 : memref<!tpu.dma_semaphore, #tpu.memory_space<semaphore_mem>>)
    %c4_i32 = arith.constant 4 : i32
    %8 = tpu.memref_slice %arg17[%c4_i32] : memref<5x!tpu.dma_semaphore, #tpu.memory_space<semaphore_mem>> -> memref<1x!tpu.dma_semaphore, #tpu.memory_space<semaphore_mem>>
    %9 = tpu.memref_squeeze %8 : memref<1x!tpu.dma_semaphore, #tpu.memory_space<semaphore_mem>> -> memref<!tpu.dma_semaphore, #tpu.memory_space<semaphore_mem>>
    tpu.enqueue_dma source(%arg5 : memref<256x128xbf16, #tpu.memory_space<any>>) target(%arg16 : memref<256x128xbf16, #tpu.memory_space<vmem>>) target_semaphore(%9 : memref<!tpu.dma_semaphore, #tpu.memory_space<semaphore_mem>>)
    %c0 = arith.constant 0 : index
    %c0_0 = arith.constant 0 : index
    %10 = vector.load %arg0[%c0, %c0_0] : memref<16x256xf32, #tpu.memory_space<vmem>>, vector<16x256xf32>
    %11 = arith.truncf %10 : vector<16x256xf32> to vector<16x256xbf16>
    %c0_i32_1 = arith.constant 0 : i32
    %12 = tpu.memref_slice %arg17[%c0_i32_1] : memref<5x!tpu.dma_semaphore, #tpu.memory_space<semaphore_mem>> -> memref<1x!tpu.dma_semaphore, #tpu.memory_space<semaphore_mem>>
    %13 = tpu.memref_squeeze %12 : memref<1x!tpu.dma_semaphore, #tpu.memory_space<semaphore_mem>> -> memref<!tpu.dma_semaphore, #tpu.memory_space<semaphore_mem>>
    tpu.wait_dma2 semaphore(%13 : memref<!tpu.dma_semaphore, #tpu.memory_space<semaphore_mem>>) src(%arg1 : memref<256x3072xbf16, #tpu.memory_space<any>>) dst(%arg12 : memref<256x3072xbf16, #tpu.memory_space<vmem>>)
    %c0_2 = arith.constant 0 : index
    %c0_3 = arith.constant 0 : index
    %14 = vector.load %arg12[%c0_2, %c0_3] : memref<256x3072xbf16, #tpu.memory_space<vmem>>, vector<256x3072xbf16>
    %cst = arith.constant dense<0.000000e+00> : vector<16x3072xf32>
    %15 = tpu.matmul %11, %14, %cst {dimension_numbers = #tpu.dot_dimension_numbers<[1], [0], [0], [1], [0, 0, 1, 1], [], []>} : vector<16x256xbf16>, vector<256x3072xbf16>, vector<16x3072xf32> -> vector<16x3072xf32>
    %c0_4 = arith.constant 0 : index
    %c0_5 = arith.constant 0 : index
    %16 = vector.load %arg6[%c0_4, %c0_5] : memref<1x3072xf32, #tpu.memory_space<vmem>>, vector<1x3072xf32>
    %17 = vector.broadcast %16 : vector<1x3072xf32> to vector<16x3072xf32>
    %18 = arith.addf %15, %17 : vector<16x3072xf32>
    %cst_6 = arith.constant 0.000000e+00 : f32
    %19 = vector.broadcast %cst_6 : f32 to vector<16x3072xf32>
    %20 = arith.maximumf %18, %19 : vector<16x3072xf32>
    %21 = arith.truncf %20 : vector<16x3072xf32> to vector<16x3072xbf16>
    %c1_i32_7 = arith.constant 1 : i32
    %22 = tpu.memref_slice %arg17[%c1_i32_7] : memref<5x!tpu.dma_semaphore, #tpu.memory_space<semaphore_mem>> -> memref<1x!tpu.dma_semaphore, #tpu.memory_space<semaphore_mem>>
    %23 = tpu.memref_squeeze %22 : memref<1x!tpu.dma_semaphore, #tpu.memory_space<semaphore_mem>> -> memref<!tpu.dma_semaphore, #tpu.memory_space<semaphore_mem>>
    tpu.wait_dma2 semaphore(%23 : memref<!tpu.dma_semaphore, #tpu.memory_space<semaphore_mem>>) src(%arg2 : memref<3072x256xbf16, #tpu.memory_space<any>>) dst(%arg13 : memref<3072x256xbf16, #tpu.memory_space<vmem>>)
    %c0_8 = arith.constant 0 : index
    %c0_9 = arith.constant 0 : index
    %24 = vector.load %arg13[%c0_8, %c0_9] : memref<3072x256xbf16, #tpu.memory_space<vmem>>, vector<3072x256xbf16>
    %cst_10 = arith.constant dense<0.000000e+00> : vector<16x256xf32>
    %25 = tpu.matmul %21, %24, %cst_10 {dimension_numbers = #tpu.dot_dimension_numbers<[1], [0], [0], [1], [0, 0, 1, 1], [], []>} : vector<16x3072xbf16>, vector<3072x256xbf16>, vector<16x256xf32> -> vector<16x256xf32>
    %c0_11 = arith.constant 0 : index
    %c0_12 = arith.constant 0 : index
    %26 = vector.load %arg7[%c0_11, %c0_12] : memref<1x256xf32, #tpu.memory_space<vmem>>, vector<1x256xf32>
    %27 = vector.broadcast %26 : vector<1x256xf32> to vector<16x256xf32>
    %28 = arith.addf %25, %27 : vector<16x256xf32>
    %cst_13 = arith.constant 0.000000e+00 : f32
    %29 = vector.broadcast %cst_13 : f32 to vector<16x256xf32>
    %30 = arith.maximumf %28, %29 : vector<16x256xf32>
    %31 = arith.truncf %30 : vector<16x256xf32> to vector<16x256xbf16>
    %c2_i32_14 = arith.constant 2 : i32
    %32 = tpu.memref_slice %arg17[%c2_i32_14] : memref<5x!tpu.dma_semaphore, #tpu.memory_space<semaphore_mem>> -> memref<1x!tpu.dma_semaphore, #tpu.memory_space<semaphore_mem>>
    %33 = tpu.memref_squeeze %32 : memref<1x!tpu.dma_semaphore, #tpu.memory_space<semaphore_mem>> -> memref<!tpu.dma_semaphore, #tpu.memory_space<semaphore_mem>>
    tpu.wait_dma2 semaphore(%33 : memref<!tpu.dma_semaphore, #tpu.memory_space<semaphore_mem>>) src(%arg3 : memref<256x1024xbf16, #tpu.memory_space<any>>) dst(%arg14 : memref<256x1024xbf16, #tpu.memory_space<vmem>>)
    %c0_15 = arith.constant 0 : index
    %c0_16 = arith.constant 0 : index
    %34 = vector.load %arg14[%c0_15, %c0_16] : memref<256x1024xbf16, #tpu.memory_space<vmem>>, vector<256x1024xbf16>
    %cst_17 = arith.constant dense<0.000000e+00> : vector<16x1024xf32>
    %35 = tpu.matmul %31, %34, %cst_17 {dimension_numbers = #tpu.dot_dimension_numbers<[1], [0], [0], [1], [0, 0, 1, 1], [], []>} : vector<16x256xbf16>, vector<256x1024xbf16>, vector<16x1024xf32> -> vector<16x1024xf32>
    %c0_18 = arith.constant 0 : index
    %c0_19 = arith.constant 0 : index
    %36 = vector.load %arg8[%c0_18, %c0_19] : memref<1x1024xf32, #tpu.memory_space<vmem>>, vector<1x1024xf32>
    %37 = vector.broadcast %36 : vector<1x1024xf32> to vector<16x1024xf32>
    %38 = arith.addf %35, %37 : vector<16x1024xf32>
    %cst_20 = arith.constant 0.000000e+00 : f32
    %39 = vector.broadcast %cst_20 : f32 to vector<16x1024xf32>
    %40 = arith.maximumf %38, %39 : vector<16x1024xf32>
    %41 = arith.truncf %40 : vector<16x1024xf32> to vector<16x1024xbf16>
    %c3_i32_21 = arith.constant 3 : i32
    %42 = tpu.memref_slice %arg17[%c3_i32_21] : memref<5x!tpu.dma_semaphore, #tpu.memory_space<semaphore_mem>> -> memref<1x!tpu.dma_semaphore, #tpu.memory_space<semaphore_mem>>
    %43 = tpu.memref_squeeze %42 : memref<1x!tpu.dma_semaphore, #tpu.memory_space<semaphore_mem>> -> memref<!tpu.dma_semaphore, #tpu.memory_space<semaphore_mem>>
    tpu.wait_dma2 semaphore(%43 : memref<!tpu.dma_semaphore, #tpu.memory_space<semaphore_mem>>) src(%arg4 : memref<1024x256xbf16, #tpu.memory_space<any>>) dst(%arg15 : memref<1024x256xbf16, #tpu.memory_space<vmem>>)
    %c0_22 = arith.constant 0 : index
    %c0_23 = arith.constant 0 : index
    %44 = vector.load %arg15[%c0_22, %c0_23] : memref<1024x256xbf16, #tpu.memory_space<vmem>>, vector<1024x256xbf16>
    %cst_24 = arith.constant dense<0.000000e+00> : vector<16x256xf32>
    %45 = tpu.matmul %41, %44, %cst_24 {dimension_numbers = #tpu.dot_dimension_numbers<[1], [0], [0], [1], [0, 0, 1, 1], [], []>} : vector<16x1024xbf16>, vector<1024x256xbf16>, vector<16x256xf32> -> vector<16x256xf32>
    %c0_25 = arith.constant 0 : index
    %c0_26 = arith.constant 0 : index
    %46 = vector.load %arg9[%c0_25, %c0_26] : memref<1x256xf32, #tpu.memory_space<vmem>>, vector<1x256xf32>
    %47 = vector.broadcast %46 : vector<1x256xf32> to vector<16x256xf32>
    %48 = arith.addf %45, %47 : vector<16x256xf32>
    %cst_27 = arith.constant 0.000000e+00 : f32
    %49 = vector.broadcast %cst_27 : f32 to vector<16x256xf32>
    %50 = arith.maximumf %48, %49 : vector<16x256xf32>
    %51 = arith.truncf %50 : vector<16x256xf32> to vector<16x256xbf16>
    %c4_i32_28 = arith.constant 4 : i32
    %52 = tpu.memref_slice %arg17[%c4_i32_28] : memref<5x!tpu.dma_semaphore, #tpu.memory_space<semaphore_mem>> -> memref<1x!tpu.dma_semaphore, #tpu.memory_space<semaphore_mem>>
    %53 = tpu.memref_squeeze %52 : memref<1x!tpu.dma_semaphore, #tpu.memory_space<semaphore_mem>> -> memref<!tpu.dma_semaphore, #tpu.memory_space<semaphore_mem>>
    tpu.wait_dma2 semaphore(%53 : memref<!tpu.dma_semaphore, #tpu.memory_space<semaphore_mem>>) src(%arg5 : memref<256x128xbf16, #tpu.memory_space<any>>) dst(%arg16 : memref<256x128xbf16, #tpu.memory_space<vmem>>)
    %c0_29 = arith.constant 0 : index
    %c0_30 = arith.constant 0 : index
    %54 = vector.load %arg16[%c0_29, %c0_30] : memref<256x128xbf16, #tpu.memory_space<vmem>>, vector<256x128xbf16>
    %cst_31 = arith.constant dense<0.000000e+00> : vector<16x128xf32>
    %55 = tpu.matmul %51, %54, %cst_31 {dimension_numbers = #tpu.dot_dimension_numbers<[1], [0], [0], [1], [0, 0, 1, 1], [], []>} : vector<16x256xbf16>, vector<256x128xbf16>, vector<16x128xf32> -> vector<16x128xf32>
    %c0_32 = arith.constant 0 : index
    %c0_33 = arith.constant 0 : index
    %56 = vector.load %arg10[%c0_32, %c0_33] : memref<1x128xf32, #tpu.memory_space<vmem>>, vector<1x128xf32>
    %57 = vector.broadcast %56 : vector<1x128xf32> to vector<16x128xf32>
    %58 = arith.addf %55, %57 : vector<16x128xf32>
    %c0_34 = arith.constant 0 : index
    %c0_35 = arith.constant 0 : index
    %59 = vector.load %arg11[%c0_34, %c0_35] : memref<16x128xf32, #tpu.memory_space<vmem>>, vector<16x128xf32>
    tpu.vector_store %arg11[%c0_34, %c0_35], %58 {strides = array<i32>} : memref<16x128xf32, #tpu.memory_space<vmem>>, vector<16x128xf32>,
    return
  }
}

</mosaic_0001>

<bundles_post_ra>
// kernel: tpu_custom_call.1
= control target key start
LH: loop header
LB: loop body
LE: loop exit
PB: predicated region body
PF: predicated region fallthrough
CT: control target
= control target key end

     0   :  { %16 = vsyncpa [#allocation9], 0  ;;  %s14537_s0 = inlined_call_operand.hbm [shape: f32[16,256], index: 0, kind: input, shape index: {}]   ;;  %s14538_s1 = inlined_call_operand.hbm [shape: bf16[256,3072], index: 1, kind: input, shape index: {}]   ;;  %s14539_s2 = inlined_call_operand.hbm [shape: bf16[3072,256], index: 2, kind: input, shape index: {}]   ;;  %s14540_s3 = inlined_call_operand.hbm [shape: bf16[256,1024], index: 3, kind: input, shape index: {}]   ;;  %s14541_s4 = inlined_call_operand.hbm [shape: bf16[1024,256], index: 4, kind: input, shape index: {}]   ;;  %s14542_s5 = inlined_call_operand.hbm [shape: bf16[256,128], index: 5, kind: input, shape index: {}]   ;;  %s14543_s6 = inlined_call_operand.hbm [shape: f32[1,3072], index: 6, kind: input, shape index: {}]   ;;  %s14544_s7 = inlined_call_operand.hbm [shape: f32[1,256], index: 7, kind: input, shape index: {}]   ;;  %s14545_s8 = inlined_call_operand.hbm [shape: f32[1,1024], index: 8, kind: input, shape index: {}]   ;;  %s14546_s9 = inlined_call_operand.hbm [shape: f32[1,256], index: 9, kind: input, shape index: {}]   ;;  %s14547_s10 = inlined_call_operand.hbm [shape: f32[1,128], index: 10, kind: input, shape index: {}]   ;;  %s14548_s11 = inlined_call_operand.hbm [shape: f32[16,128], index: 11, kind: output, shape index: {}]  }
   0x1   :  { %17 = vsyncpa [#allocation12], 0 }
   0x2   :  { %18 = vsyncpa [#allocation15], 0 }
   0x3   :  { %19 = vsyncpa [#allocation18], 0  ;;  %s39_s19 = sshll.u32 %s14543_s6, 4  ;;  %s40_s19 = int_to_ptr.hbm [resolvable:$true] %s39_s19 }
   0x4   :  { %20 = vsyncpa [#allocation10], 0  ;;  %s14083_s20 = smov [#allocation11]   ;;  %s61_s24 = sshll.u32 %s14545_s8, 4  ;;  %s62_s24 = int_to_ptr.hbm [resolvable:$true] %s61_s24 }
   0x5   :  { %s41_s21 = sshll.u32 %s14083_s20, 4  ;;  %s14084_s25 = smov [#allocation14]   ;;  %s42_s21 = int_to_ptr.vmem [resolvable:$true] %s41_s21 }
   0x6   :  { %44 = dma.hbm_to_vmem [thread:$0]  %s40_s19, 384, %s42_s21, [#allocation12]  }
   0x7   :  { %s63_s26 = sshll.u32 %s14084_s25, 4  ;;  %s25_s29 = sshll.u32 %s14537_s0, 4  ;;  %s64_s26 = int_to_ptr.vmem [resolvable:$true] %s63_s26  ;;  %s26_s29 = int_to_ptr.hbm [resolvable:$true] %s25_s29 }
   0x8   :  { %66 = dma.hbm_to_vmem [thread:$0]  %s62_s24, 128, %s64_s26, [#allocation15]  }
   0x9   :  { %s14085_s6 = smov [#allocation8]   ;;  %s50_s14 = sshll.u32 %s14544_s7, 4  ;;  %s51_s14 = int_to_ptr.hbm [resolvable:$true] %s50_s14 }
   0xa   :  { %s27_s30 = sshll.u32 %s14085_s6, 4  ;;  %s14086_s15 = smov 256   ;;  %s28_s30 = int_to_ptr.vmem [resolvable:$true] %s27_s30 }
   0xb   :  { %s14087_s8 = smov 16   ;;  %s14088_s16 = smov [#allocation13]  }
   0xc   :  { %33 = dma.hbm_to_vmem [thread:$0]  %s26_s29, 512, %s28_s30, [#allocation9], %s14086_s15, %s14086_s15, %s14087_s8  }
   0xd   :  { %s52_s17 = sshll.u32 %s14088_s16, 4  ;;  %s72_s0 = sshll.u32 %s14546_s9, 4  ;;  %s53_s17 = int_to_ptr.vmem [resolvable:$true] %s52_s17  ;;  %s73_s0 = int_to_ptr.hbm [resolvable:$true] %s72_s0 }
   0xe   :  { %55 = dma.hbm_to_vmem [thread:$0]  %s51_s14, 32, %s53_s17, [#allocation12]  }
   0xf   :  { %s83_s22 = sshll.u32 %s14547_s10, 4  ;;  %s14089_s23 = smov [#allocation16]   ;;  %s84_s22 = int_to_ptr.hbm [resolvable:$true] %s83_s22 }
  0x10   :  { %s74_s24 = sshll.u32 %s14089_s23, 4  ;;  %s14090_s7 = smov [#allocation17]   ;;  %s75_s24 = int_to_ptr.vmem [resolvable:$true] %s74_s24 }
  0x11   :  { %77 = dma.hbm_to_vmem [thread:$0]  %s73_s0, 32, %s75_s24, [#allocation15]  }
  0x12   :  { %s85_s25 = sshll.u32 %s14090_s7, 4  ;;  %s86_s25 = int_to_ptr.vmem [resolvable:$true] %s85_s25 }
  0x13   :  { %88 = dma.hbm_to_vmem [thread:$0]  %s84_s22, 16, %s86_s25, [#allocation18]  }
  0x14   :  { %14063 = dma.done.wait [#allocation9], 512  }
  0x15   :  { %14064 = vsyncadd [#allocation9], 4294966784 }
  0x16   :  { %14065 = dma.done.wait [#allocation12], 416  }
  0x17   :  { %14066 = vsyncadd [#allocation12], 4294966880 }
  0x18   :  { %14067 = dma.done.wait [#allocation15], 160  }
  0x19   :  { %14068 = vsyncadd [#allocation15], 4294967136 }
  0x1a   :  { %14069 = dma.done.wait [#allocation18], 16  }
  0x1b   :  { %14070 = vsyncadd [#allocation18], 4294967280  ;;  %s120_s10 = sshll.u32 %s14538_s1, 4  ;;  %s14091_s27 = smov [#allocation2]   ;;  %v182_v0 = vld [vmem:[#allocation8] sm:$0xff]  ;;  %v183_v1 = vld [vmem:[#allocation8 + $0x8] sm:$0xff]  ;;  %s121_s10 = int_to_ptr.hbm [resolvable:$true] %s120_s10 }
  0x1c   :  { %s122_s28 = sshll.u32 %s14091_s27, 4  ;;  %s134_s30 = sshll.u32 %s14539_s2, 4  ;;  %v184_v2 = vld [vmem:[#allocation8 + $0x10] sm:$0xff]  ;;  %v185_v3 = vld [vmem:[#allocation8 + $0x18] sm:$0xff]  ;;  %s123_s28 = int_to_ptr.vmem [resolvable:$true] %s122_s28  ;;  %s135_s30 = int_to_ptr.hbm [resolvable:$true] %s134_s30 }
  0x1d   :  { %125 = dma.hbm_to_vmem [thread:$0]  %s121_s10, 49152, %s123_s28, [#allocation7]  ;;  %v14186_v4 = vpack.c.bf16 %v184_v2, %v182_v0  ;;  %v14191_v5 = vpack.c.bf16 %v185_v3, %v183_v1 }
  0x1e   :  { %s14092_s12 = smov [#allocation3]   ;;  %s148_s8 = sshll.u32 %s14540_s3, 4  ;;  %s149_s8 = int_to_ptr.hbm [resolvable:$true] %s148_s8 }
  0x1f   :  { %s136_s13 = sshll.u32 %s14092_s12, 4  ;;  %s162_s2 = sshll.u32 %s14541_s4, 4  ;;  %s137_s13 = int_to_ptr.vmem [resolvable:$true] %s136_s13  ;;  %s163_s2 = int_to_ptr.hbm [resolvable:$true] %s162_s2 }
  0x20   :  { %139 = dma.hbm_to_vmem [thread:$0]  %s135_s30, 49152, %s137_s13, [#allocation7 + $0x1] }
  0x21   :  { %s14093_s17 = smov [#allocation4]   ;;  %s14094_s3 = smov [#allocation5]  }
  0x22   :  { %s150_s18 = sshll.u32 %s14093_s17, 4  ;;  %s164_s19 = sshll.u32 %s14094_s3, 4  ;;  %s151_s18 = int_to_ptr.vmem [resolvable:$true] %s150_s18  ;;  %s165_s19 = int_to_ptr.vmem [resolvable:$true] %s164_s19 }
  0x23   :  { %153 = dma.hbm_to_vmem [thread:$0]  %s149_s8, 16384, %s151_s18, [#allocation7 + $0x2] }
  0x24   :  { %s176_s21 = sshll.u32 %s14542_s5, 4  ;;  %s14095_s22 = smov [#allocation6]   ;;  %s177_s21 = int_to_ptr.hbm [resolvable:$true] %s176_s21 }
  0x25   :  { %167 = dma.hbm_to_vmem [thread:$0]  %s163_s2, 16384, %s165_s19, [#allocation7 + $0x3] }
  0x26   :  { %s178_s23 = sshll.u32 %s14095_s22, 4  ;;  %s179_s23 = int_to_ptr.vmem [resolvable:$true] %s178_s23 }
  0x27   :  { %181 = dma.hbm_to_vmem [thread:$0]  %s177_s21, 2048, %s179_s23, [#allocation7 + $0x4] }
  0x28   :  { %14071 = dma.done.wait [#allocation7], 49152 }
  0x29   :  { %14072 = vsyncadd [#allocation7], 4294918144  ;;  %v9226_v6 = vld [vmem:[#allocation2 + $0x540] sm:$0xf]  ;;  %v12885_v11 = vld [vmem:[#allocation2 + $0x544] sm:$0xf] }
  0x2a   :  { %v12897_v7 = vld [vmem:[#allocation2 + $0x59c] sm:$0xf0]  ;;  %v9228_v12 = vld [vmem:[#allocation2 + $0x5a0] sm:$0xf0] }
  0x2b   :  { %v9994_v8 = vld [vmem:[#allocation2 + $0xb40] sm:$0xf]  ;;  %v9227_v9 = vor.u32 %v12897_v7, %v9226_v6  ;;  %v9231_v14 = vor.u32 %v12885_v11, %v9228_v12  ;;  %v13077_v15 = vld [vmem:[#allocation2 + $0xb44] sm:$0xf] }
  0x2c   :  { %v13089_v10 = vld [vmem:[#allocation2 + $0xb9c] sm:$0xf0]  ;;  %v9996_v16 = vld [vmem:[#allocation2 + $0xba0] sm:$0xf0] }
  0x2d   :  { %v9995_v13 = vor.u32 %v13089_v10, %v9994_v8  ;;  %v9130_v17 = vld [vmem:[#allocation2 + $0x480] sm:$0xf]  ;;  %2550 = vmatpush.bf16.msra.mxu0 %v9227_v9  ;;  %v9999_v18 = vor.u32 %v13077_v15, %v9996_v16  ;;  %2578 = vmatpush.bf16.msra.mxu2 %v9231_v14  ;;  %v12861_v24 = vld [vmem:[#allocation2 + $0x484] sm:$0xf] }
  0x2e   :  { %v12873_v19 = vld [vmem:[#allocation2 + $0x4dc] sm:$0xf0]  ;;  %v9132_v25 = vld [vmem:[#allocation2 + $0x4e0] sm:$0xf0] }
  0x2f   :  { %v9898_v20 = vld [vmem:[#allocation2 + $0xa80] sm:$0xf]  ;;  %2564 = vmatpush.bf16.msra.mxu1 %v9995_v13  ;;  %v9131_v22 = vor.u32 %v12873_v19, %v9130_v17  ;;  %v13053_v26 = vld [vmem:[#allocation2 + $0xa84] sm:$0xf]  ;;  %2592 = vmatpush.bf16.msra.mxu3 %v9999_v18  ;;  %v9135_v27 = vor.u32 %v12861_v24, %v9132_v25 }
  0x30   :  { %v13065_v21 = vld [vmem:[#allocation2 + $0xadc] sm:$0xf0]  ;;  %v9900_v28 = vld [vmem:[#allocation2 + $0xae0] sm:$0xf0] }
  0x31   :  { %v9899_v23 = vor.u32 %v13065_v21, %v9898_v20  ;;  %v9034_v29 = vld [vmem:[#allocation2 + $0x3c0] sm:$0xf]  ;;  %v9903_v31 = vor.u32 %v13053_v26, %v9900_v28  ;;  %v12837_v34 = vld [vmem:[#allocation2 + $0x3c4] sm:$0xf]  ;;  %2551 = vmatpush.bf16.msra.mxu0 %v9131_v22  ;;  %2579 = vmatpush.bf16.msra.mxu2 %v9135_v27 }
  0x32   :  { %v12849_v30 = vld [vmem:[#allocation2 + $0x41c] sm:$0xf0]  ;;  %v9036_v36 = vld [vmem:[#allocation2 + $0x420] sm:$0xf0] }
  0x33   :  { %v9802_v32 = vld [vmem:[#allocation2 + $0x9c0] sm:$0xf]  ;;  %v9035_v35 = vor.u32 %v12849_v30, %v9034_v29  ;;  %v13029_v37 = vld [vmem:[#allocation2 + $0x9c4] sm:$0xf]  ;;  %2565 = vmatpush.bf16.msra.mxu1 %v9899_v23  ;;  %v9039_v40 = vor.u32 %v12837_v34, %v9036_v36  ;;  %2593 = vmatpush.bf16.msra.mxu3 %v9903_v31  ;;  %v9234_v36 = vld [vmem:[#allocation2 + $0x548] sm:$0xf] }
  0x34   :  { %v13041_v33 = vld [vmem:[#allocation2 + $0xa1c] sm:$0xf0]  ;;  %v9804_v38 = vld [vmem:[#allocation2 + $0xa20] sm:$0xf0] }
  0x35   :  { %v9803_v39 = vor.u32 %v13041_v33, %v9802_v32  ;;  %v8938_v41 = vld [vmem:[#allocation2 + $0x300] sm:$0xf]  ;;  %v9807_v44 = vor.u32 %v13029_v37, %v9804_v38  ;;  %v12813_v46 = vld [vmem:[#allocation2 + $0x304] sm:$0xf]  ;;  %2552 = vmatpush.bf16.msra.mxu0 %v9035_v35  ;;  %2580 = vmatpush.bf16.msra.mxu2 %v9039_v40  ;;  %v12898_v37 = vld [vmem:[#allocation2 + $0x5a4] sm:$0xf0] }
  0x36   :  { %v12825_v42 = vld [vmem:[#allocation2 + $0x35c] sm:$0xf0]  ;;  %v8940_v47 = vld [vmem:[#allocation2 + $0x360] sm:$0xf0]  ;;  %v10002_v38 = vld [vmem:[#allocation2 + $0xb48] sm:$0xf] }
  0x37   :  { %v9706_v43 = vld [vmem:[#allocation2 + $0x900] sm:$0xf]  ;;  %v13005_v48 = vld [vmem:[#allocation2 + $0x904] sm:$0xf]  ;;  %v8939_v50 = vor.u32 %v12825_v42, %v8938_v41  ;;  %2566 = vmatpush.bf16.msra.mxu1 %v9803_v39  ;;  %v8943_v52 = vor.u32 %v12813_v46, %v8940_v47  ;;  %2594 = vmatpush.bf16.msra.mxu3 %v9807_v44  ;;  %v13090_v40 = vld [vmem:[#allocation2 + $0xba4] sm:$0xf0] }
  0x38   :  { %v13017_v45 = vld [vmem:[#allocation2 + $0x95c] sm:$0xf0]  ;;  %v9708_v49 = vld [vmem:[#allocation2 + $0x960] sm:$0xf0]  ;;  %v12886_v41 = vld [vmem:[#allocation2 + $0x54c] sm:$0xf] }
  0x39   :  { %v9707_v51 = vor.u32 %v13017_v45, %v9706_v43  ;;  %v8842_v53 = vld [vmem:[#allocation2 + $0x240] sm:$0xf]  ;;  %v9711_v56 = vor.u32 %v13005_v48, %v9708_v49  ;;  %v12789_v58 = vld [vmem:[#allocation2 + $0x244] sm:$0xf]  ;;  %2553 = vmatpush.bf16.msra.mxu0 %v8939_v50  ;;  %2581 = vmatpush.bf16.msra.mxu2 %v8943_v52  ;;  %v9236_v42 = vld [vmem:[#allocation2 + $0x5a8] sm:$0xf0]  ;;  %v9235_v48 = vor.u32 %v12898_v37, %v9234_v36 }
  0x3a   :  { %v12801_v54 = vld [vmem:[#allocation2 + $0x29c] sm:$0xf0]  ;;  %v8844_v59 = vld [vmem:[#allocation2 + $0x2a0] sm:$0xf0]  ;;  %v13078_v45 = vld [vmem:[#allocation2 + $0xb4c] sm:$0xf]  ;;  %v10003_v49 = vor.u32 %v13090_v40, %v10002_v38  ;;  %v9239_v50 = vor.u32 %v12886_v41, %v9236_v42 }
  0x3b   :  { %v9610_v55 = vld [vmem:[#allocation2 + $0x840] sm:$0xf]  ;;  %v12981_v60 = vld [vmem:[#allocation2 + $0x844] sm:$0xf]  ;;  %v8843_v62 = vor.u32 %v12801_v54, %v8842_v53  ;;  %2567 = vmatpush.bf16.msra.mxu1 %v9707_v51  ;;  %v8847_v0 = vor.u32 %v12789_v58, %v8844_v59  ;;  %2595 = vmatpush.bf16.msra.mxu3 %v9711_v56  ;;  %v10004_v46 = vld [vmem:[#allocation2 + $0xba8] sm:$0xf0] }
  0x3c   :  { %v12993_v57 = vld [vmem:[#allocation2 + $0x89c] sm:$0xf0]  ;;  %v9612_v61 = vld [vmem:[#allocation2 + $0x8a0] sm:$0xf0]  ;;  %v9138_v51 = vld [vmem:[#allocation2 + $0x488] sm:$0xf]  ;;  %v10007_v54 = vor.u32 %v13078_v45, %v10004_v46 }
  0x3d   :  { %v9611_v63 = vor.u32 %v12993_v57, %v9610_v55  ;;  %v8746_v1 = vld [vmem:[#allocation2 + $0x180] sm:$0xf]  ;;  %v9615_v6 = vor.u32 %v12981_v60, %v9612_v61  ;;  %v12765_v8 = vld [vmem:[#allocation2 + $0x184] sm:$0xf]  ;;  %2554 = vmatpush.bf16.msra.mxu0 %v8843_v62  ;;  %2582 = vmatpush.bf16.msra.mxu2 %v8847_v0  ;;  %v12874_v52 = vld [vmem:[#allocation2 + $0x4e4] sm:$0xf0] }
  0x3e   :  { %v12777_v2 = vld [vmem:[#allocation2 + $0x1dc] sm:$0xf0]  ;;  %v8748_v9 = vld [vmem:[#allocation2 + $0x1e0] sm:$0xf0]  ;;  %v9906_v53 = vld [vmem:[#allocation2 + $0xa88] sm:$0xf]  ;;  %v9139_v60 = vor.u32 %v12874_v52, %v9138_v51 }
  0x3f   :  { %v9514_v3 = vld [vmem:[#allocation2 + $0x780] sm:$0xf]  ;;  %v12957_v10 = vld [vmem:[#allocation2 + $0x784] sm:$0xf]  ;;  %v8747_v12 = vor.u32 %v12777_v2, %v8746_v1  ;;  %2568 = vmatpush.bf16.msra.mxu1 %v9611_v63  ;;  %v8751_v14 = vor.u32 %v12765_v8, %v8748_v9  ;;  %2596 = vmatpush.bf16.msra.mxu3 %v9615_v6  ;;  %v13066_v55 = vld [vmem:[#allocation2 + $0xae4] sm:$0xf0] }
  0x40   :  { %v12969_v7 = vld [vmem:[#allocation2 + $0x7dc] sm:$0xf0]  ;;  %v9516_v11 = vld [vmem:[#allocation2 + $0x7e0] sm:$0xf0]  ;;  %v12862_v56 = vld [vmem:[#allocation2 + $0x48c] sm:$0xf]  ;;  %v9907_v61 = vor.u32 %v13066_v55, %v9906_v53 }
  0x41   :  { %v9515_v13 = vor.u32 %v12969_v7, %v9514_v3  ;;  %v8650_v15 = vld [vmem:[#allocation2 + $0xc0] sm:$0xf]  ;;  %v9519_v18 = vor.u32 %v12957_v10, %v9516_v11  ;;  %v12741_v20 = vld [vmem:[#allocation2 + $0xc4] sm:$0xf]  ;;  %2555 = vmatpush.bf16.msra.mxu0 %v8747_v12  ;;  %2583 = vmatpush.bf16.msra.mxu2 %v8751_v14  ;;  %v9140_v57 = vld [vmem:[#allocation2 + $0x4e8] sm:$0xf0] }
  0x42   :  { %v12753_v16 = vld [vmem:[#allocation2 + $0x11c] sm:$0xf0]  ;;  %v8652_v21 = vld [vmem:[#allocation2 + $0x120] sm:$0xf0]  ;;  %v13054_v58 = vld [vmem:[#allocation2 + $0xa8c] sm:$0xf]  ;;  %v9143_v62 = vor.u32 %v12862_v56, %v9140_v57 }
  0x43   :  { %v9418_v17 = vld [vmem:[#allocation2 + $0x6c0] sm:$0xf]  ;;  %v12933_v22 = vld [vmem:[#allocation2 + $0x6c4] sm:$0xf]  ;;  %v8651_v24 = vor.u32 %v12753_v16, %v8650_v15  ;;  %2569 = vmatpush.bf16.msra.mxu1 %v9515_v13  ;;  %v8655_v28 = vor.u32 %v12741_v20, %v8652_v21  ;;  %2597 = vmatpush.bf16.msra.mxu3 %v9519_v18  ;;  %v9908_v59 = vld [vmem:[#allocation2 + $0xae8] sm:$0xf0] }
  0x44   :  { %v12945_v19 = vld [vmem:[#allocation2 + $0x71c] sm:$0xf0]  ;;  %v9420_v23 = vld [vmem:[#allocation2 + $0x720] sm:$0xf0]  ;;  %v9042_v63 = vld [vmem:[#allocation2 + $0x3c8] sm:$0xf]  ;;  %v9911_v2 = vor.u32 %v13054_v58, %v9908_v59 }
  0x45   :  { %v8554_v25 = vld [vmem:[#allocation2] sm:$0xf]  ;;  %v9419_v27 = vor.u32 %v12945_v19, %v9418_v17  ;;  %v12717_v31 = vld [vmem:[#allocation2 + $0x4] sm:$0xf]  ;;  %v9423_v32 = vor.u32 %v12933_v22, %v9420_v23  ;;  %2556 = vmatpush.bf16.msra.mxu0 %v8651_v24  ;;  %2584 = vmatpush.bf16.msra.mxu2 %v8655_v28  ;;  %v12850_v0 = vld [vmem:[#allocation2 + $0x424] sm:$0xf0] }
  0x46   :  { %v12729_v26 = vld [vmem:[#allocation2 + $0x5c] sm:$0xf0]  ;;  %v8556_v33 = vld [vmem:[#allocation2 + $0x60] sm:$0xf0]  ;;  %v9810_v1 = vld [vmem:[#allocation2 + $0x9c8] sm:$0xf]  ;;  %v9043_v10 = vor.u32 %v12850_v0, %v9042_v63 }
  0x47   :  { %v9322_v29 = vld [vmem:[#allocation2 + $0x600] sm:$0xf]  ;;  %v12909_v34 = vld [vmem:[#allocation2 + $0x604] sm:$0xf]  ;;  %v8555_v39 = vor.u32 %v12729_v26, %v8554_v25  ;;  %2570 = vmatpush.bf16.msra.mxu1 %v9419_v27  ;;  %v8559_v44 = vor.u32 %v12717_v31, %v8556_v33  ;;  %2598 = vmatpush.bf16.msra.mxu3 %v9423_v32  ;;  %v13042_v3 = vld [vmem:[#allocation2 + $0xa24] sm:$0xf0] }
  0x48   :  { %v12921_v30 = vld [vmem:[#allocation2 + $0x65c] sm:$0xf0]  ;;  %v9324_v35 = vld [vmem:[#allocation2 + $0x660] sm:$0xf0]  ;;  %v12838_v6 = vld [vmem:[#allocation2 + $0x3cc] sm:$0xf]  ;;  %v9811_v11 = vor.u32 %v13042_v3, %v9810_v1 }
  0x49   :  { %v9323_v43 = vor.u32 %v12921_v30, %v9322_v29  ;;  %v9327_v47 = vor.u32 %v12909_v34, %v9324_v35  ;;  %2557 = vmatpush.bf16.msra.mxu0 %v8555_v39  ;;  %2585 = vmatpush.bf16.msra.mxu2 %v8559_v44  ;;  %v9044_v7 = vld [vmem:[#allocation2 + $0x428] sm:$0xf0]  ;;  %v8946_v13 = vld [vmem:[#allocation2 + $0x308] sm:$0xf] }
  0x4a   :  { %v13030_v8 = vld [vmem:[#allocation2 + $0x9cc] sm:$0xf]  ;;  %v9047_v12 = vor.u32 %v12838_v6, %v9044_v7  ;;  %v12826_v14 = vld [vmem:[#allocation2 + $0x364] sm:$0xf0] }
  0x4b   :  { %2571 = vmatpush.bf16.msra.mxu1 %v9323_v43  ;;  %2599 = vmatpush.bf16.msra.mxu3 %v9327_v47  ;;  %v9812_v9 = vld [vmem:[#allocation2 + $0xa28] sm:$0xf0]  ;;  %v9714_v15 = vld [vmem:[#allocation2 + $0x908] sm:$0xf]  ;;  %v8947_v22 = vor.u32 %v12826_v14, %v8946_v13  ;;  %v12887_v13 = vld [vmem:[#allocation2 + $0x554] sm:$0xf] }
  0x4c   :  { %2586 = vmatmul.bf16.vlgmr.msra.gmra.mxu2 %v14186_v4  ;;  %2558 = vmatmul.bf16.vlgmr.msra.gmra.mxu0 %v14186_v4  ;;  %v9815_v16 = vor.u32 %v13030_v8, %v9812_v9  ;;  %v13018_v17 = vld [vmem:[#allocation2 + $0x964] sm:$0xf0]  ;;  %v12814_v18 = vld [vmem:[#allocation2 + $0x30c] sm:$0xf]  ;;  %v9242_v8 = vld [vmem:[#allocation2 + $0x550] sm:$0xf] }
  0x4d   :  { %2606 = vmatpush.bf16.msrb.mxu0 %v9235_v48  ;;  %2634 = vmatpush.bf16.msrb.mxu2 %v9239_v50  ;;  %v8948_v19 = vld [vmem:[#allocation2 + $0x368] sm:$0xf0]  ;;  %v9715_v23 = vor.u32 %v13018_v17, %v9714_v15  ;;  %v8850_v25 = vld [vmem:[#allocation2 + $0x248] sm:$0xf]  ;;  %v12899_v9 = vld [vmem:[#allocation2 + $0x5ac] sm:$0xf0] }
  0x4e   :  { %2600 = vmatmul.bf16.vlgmr.msra.gmra.mxu3 %v14191_v5  ;;  %2572 = vmatmul.bf16.vlgmr.msra.gmra.mxu1 %v14191_v5  ;;  %v13006_v20 = vld [vmem:[#allocation2 + $0x90c] sm:$0xf]  ;;  %v8951_v24 = vor.u32 %v12814_v18, %v8948_v19  ;;  %v12802_v26 = vld [vmem:[#allocation2 + $0x2a4] sm:$0xf0]  ;;  %v9244_v14 = vld [vmem:[#allocation2 + $0x5b0] sm:$0xf0] }
  0x4f   :  { %2620 = vmatpush.bf16.msrb.mxu1 %v10003_v49  ;;  %2648 = vmatpush.bf16.msrb.mxu3 %v10007_v54  ;;  %v9716_v21 = vld [vmem:[#allocation2 + $0x968] sm:$0xf0]  ;;  %v9618_v27 = vld [vmem:[#allocation2 + $0x848] sm:$0xf]  ;;  %v8851_v34 = vor.u32 %v12802_v26, %v8850_v25  ;;  %v13079_v17 = vld [vmem:[#allocation2 + $0xb54] sm:$0xf] }
  0x50   :  { %v9719_v28 = vor.u32 %v13006_v20, %v9716_v21  ;;  %v12994_v29 = vld [vmem:[#allocation2 + $0x8a4] sm:$0xf0]  ;;  %v12790_v30 = vld [vmem:[#allocation2 + $0x24c] sm:$0xf]  ;;  %v10012_v18 = vld [vmem:[#allocation2 + $0xbb0] sm:$0xf0]  ;;  %v9243_v20 = vor.u32 %v12899_v9, %v9242_v8 }
  0x51   :  { %2607 = vmatpush.bf16.msrb.mxu0 %v9139_v60  ;;  %2635 = vmatpush.bf16.msrb.mxu2 %v9143_v62  ;;  %v8852_v31 = vld [vmem:[#allocation2 + $0x2a8] sm:$0xf0]  ;;  %v9619_v35 = vor.u32 %v12994_v29, %v9618_v27  ;;  %v8754_v37 = vld [vmem:[#allocation2 + $0x188] sm:$0xf]  ;;  %v9914_v25 = vld [vmem:[#allocation2 + $0xa90] sm:$0xf]  ;;  %v10015_v26 = vor.u32 %v13079_v17, %v10012_v18 }
  0x52   :  { %v12982_v32 = vld [vmem:[#allocation2 + $0x84c] sm:$0xf]  ;;  %v8855_v36 = vor.u32 %v12790_v30, %v8852_v31  ;;  %v12778_v38 = vld [vmem:[#allocation2 + $0x1e4] sm:$0xf0]  ;;  %v13067_v27 = vld [vmem:[#allocation2 + $0xaec] sm:$0xf0] }
  0x53   :  { %2621 = vmatpush.bf16.msrb.mxu1 %v9907_v61  ;;  %2649 = vmatpush.bf16.msrb.mxu3 %v9911_v2  ;;  %v9620_v33 = vld [vmem:[#allocation2 + $0x8a8] sm:$0xf0]  ;;  %v9522_v39 = vld [vmem:[#allocation2 + $0x788] sm:$0xf]  ;;  %v8755_v46 = vor.u32 %v12778_v38, %v8754_v37  ;;  %v9148_v29 = vld [vmem:[#allocation2 + $0x4f0] sm:$0xf0] }
  0x54   :  { %v9623_v40 = vor.u32 %v12982_v32, %v9620_v33  ;;  %v12970_v41 = vld [vmem:[#allocation2 + $0x7e4] sm:$0xf0]  ;;  %v12766_v42 = vld [vmem:[#allocation2 + $0x18c] sm:$0xf]  ;;  %v13055_v30 = vld [vmem:[#allocation2 + $0xa94] sm:$0xf]  ;;  %v9915_v33 = vor.u32 %v13067_v27, %v9914_v25 }
  0x55   :  { %2608 = vmatpush.bf16.msrb.mxu0 %v9043_v10  ;;  %2636 = vmatpush.bf16.msrb.mxu2 %v9047_v12  ;;  %v8756_v43 = vld [vmem:[#allocation2 + $0x1e8] sm:$0xf0]  ;;  %v9523_v47 = vor.u32 %v12970_v41, %v9522_v39  ;;  %v8658_v49 = vld [vmem:[#allocation2 + $0xc8] sm:$0xf]  ;;  %v10010_v10 = vld [vmem:[#allocation2 + $0xb50] sm:$0xf] }
  0x56   :  { %v12958_v44 = vld [vmem:[#allocation2 + $0x78c] sm:$0xf]  ;;  %v8759_v48 = vor.u32 %v12766_v42, %v8756_v43  ;;  %v12754_v50 = vld [vmem:[#allocation2 + $0x124] sm:$0xf0]  ;;  %v13091_v12 = vld [vmem:[#allocation2 + $0xbac] sm:$0xf0] }
  0x57   :  { %2622 = vmatpush.bf16.msrb.mxu1 %v9811_v11  ;;  %2650 = vmatpush.bf16.msrb.mxu3 %v9815_v16  ;;  %v9524_v45 = vld [vmem:[#allocation2 + $0x7e8] sm:$0xf0]  ;;  %v9426_v51 = vld [vmem:[#allocation2 + $0x6c8] sm:$0xf]  ;;  %v8659_v58 = vor.u32 %v12754_v50, %v8658_v49  ;;  %v10011_v21 = vor.u32 %v13091_v12, %v10010_v10  ;;  %v9916_v31 = vld [vmem:[#allocation2 + $0xaf0] sm:$0xf0] }
  0x58   :  { %v9527_v52 = vor.u32 %v12958_v44, %v9524_v45  ;;  %v12946_v53 = vld [vmem:[#allocation2 + $0x724] sm:$0xf0]  ;;  %v12742_v54 = vld [vmem:[#allocation2 + $0xcc] sm:$0xf]  ;;  %v9818_v37 = vld [vmem:[#allocation2 + $0x9d0] sm:$0xf]  ;;  %v9919_v38 = vor.u32 %v13055_v30, %v9916_v31 }
  0x59   :  { %2609 = vmatpush.bf16.msrb.mxu0 %v8947_v22  ;;  %2637 = vmatpush.bf16.msrb.mxu2 %v8951_v24  ;;  %v8660_v55 = vld [vmem:[#allocation2 + $0x128] sm:$0xf0]  ;;  %v8562_v59 = vld [vmem:[#allocation2 + $0x8] sm:$0xf]  ;;  %v9427_v61 = vor.u32 %v12946_v53, %v9426_v51  ;;  %v9247_v22 = vor.u32 %v12887_v13, %v9244_v14  ;;  %v12875_v24 = vld [vmem:[#allocation2 + $0x4ec] sm:$0xf0] }
  0x5a   :  { %v12934_v56 = vld [vmem:[#allocation2 + $0x6cc] sm:$0xf]  ;;  %v12730_v60 = vld [vmem:[#allocation2 + $0x64] sm:$0xf0]  ;;  %v8663_v62 = vor.u32 %v12742_v54, %v8660_v55  ;;  %v13043_v39 = vld [vmem:[#allocation2 + $0xa2c] sm:$0xf0] }
  0x5b   :  { %2623 = vmatpush.bf16.msrb.mxu1 %v9715_v23  ;;  %2651 = vmatpush.bf16.msrb.mxu3 %v9719_v28  ;;  %v9428_v57 = vld [vmem:[#allocation2 + $0x728] sm:$0xf0]  ;;  %v9330_v63 = vld [vmem:[#allocation2 + $0x608] sm:$0xf]  ;;  %v8563_v11 = vor.u32 %v12730_v60, %v8562_v59  ;;  %v9146_v23 = vld [vmem:[#allocation2 + $0x490] sm:$0xf]  ;;  %v9819_v45 = vor.u32 %v13043_v39, %v9818_v37 }
  0x5c   :  { %v12922_v0 = vld [vmem:[#allocation2 + $0x664] sm:$0xf0]  ;;  %v12718_v1 = vld [vmem:[#allocation2 + $0xc] sm:$0xf]  ;;  %v9431_v2 = vor.u32 %v12934_v56, %v9428_v57  ;;  %v12863_v28 = vld [vmem:[#allocation2 + $0x494] sm:$0xf]  ;;  %v9147_v32 = vor.u32 %v12875_v24, %v9146_v23 }
  0x5d   :  { %2610 = vmatpush.bf16.msrb.mxu0 %v8851_v34  ;;  %2638 = vmatpush.bf16.msrb.mxu2 %v8855_v36  ;;  %v8564_v3 = vld [vmem:[#allocation2 + $0x68] sm:$0xf0]  ;;  %v9331_v15 = vor.u32 %v12922_v0, %v9330_v63  ;;  %v9151_v34 = vor.u32 %v12863_v28, %v9148_v29  ;;  %v12851_v36 = vld [vmem:[#allocation2 + $0x42c] sm:$0xf0]  ;;  %v9052_v41 = vld [vmem:[#allocation2 + $0x430] sm:$0xf0] }
  0x5e   :  { %v12910_v6 = vld [vmem:[#allocation2 + $0x60c] sm:$0xf]  ;;  %v8567_v16 = vor.u32 %v12718_v1, %v8564_v3  ;;  %v13031_v42 = vld [vmem:[#allocation2 + $0x9d4] sm:$0xf]  ;;  %v9722_v49 = vld [vmem:[#allocation2 + $0x910] sm:$0xf] }
  0x5f   :  { %2624 = vmatpush.bf16.msrb.mxu1 %v9619_v35  ;;  %2652 = vmatpush.bf16.msrb.mxu3 %v9623_v40  ;;  %v9332_v7 = vld [vmem:[#allocation2 + $0x668] sm:$0xf0]  ;;  %v9050_v35 = vld [vmem:[#allocation2 + $0x3d0] sm:$0xf]  ;;  %v12839_v40 = vld [vmem:[#allocation2 + $0x3d4] sm:$0xf] }
  0x60   :  { %v9335_v19 = vor.u32 %v12910_v6, %v9332_v7  ;;  %v9820_v43 = vld [vmem:[#allocation2 + $0xa30] sm:$0xf0]  ;;  %v9051_v44 = vor.u32 %v12851_v36, %v9050_v35  ;;  %v13019_v51 = vld [vmem:[#allocation2 + $0x96c] sm:$0xf0] }
  0x61   :  { %2611 = vmatpush.bf16.msrb.mxu0 %v8755_v46  ;;  %2639 = vmatpush.bf16.msrb.mxu2 %v8759_v48  ;;  %v9055_v46 = vor.u32 %v12839_v40, %v9052_v41  ;;  %v12827_v48 = vld [vmem:[#allocation2 + $0x36c] sm:$0xf0]  ;;  %v9823_v50 = vor.u32 %v13031_v42, %v9820_v43  ;;  %v8956_v53 = vld [vmem:[#allocation2 + $0x370] sm:$0xf0]  ;;  %v9723_v57 = vor.u32 %v13019_v51, %v9722_v49  ;;  %v9250_v42 = vld [vmem:[#allocation2 + $0x558] sm:$0xf] }
  0x62   :  { %v13007_v54 = vld [vmem:[#allocation2 + $0x914] sm:$0xf]  ;;  %v8858_v59 = vld [vmem:[#allocation2 + $0x250] sm:$0xf]  ;;  %v12900_v43 = vld [vmem:[#allocation2 + $0x5b4] sm:$0xf0] }
  0x63   :  { %2625 = vmatpush.bf16.msrb.mxu1 %v9523_v47  ;;  %2653 = vmatpush.bf16.msrb.mxu3 %v9527_v52  ;;  %v8954_v47 = vld [vmem:[#allocation2 + $0x310] sm:$0xf]  ;;  %v12815_v52 = vld [vmem:[#allocation2 + $0x314] sm:$0xf]  ;;  %v13080_v51 = vld [vmem:[#allocation2 + $0xb5c] sm:$0xf] }
  0x64   :  { %v9724_v55 = vld [vmem:[#allocation2 + $0x970] sm:$0xf0]  ;;  %v8955_v56 = vor.u32 %v12827_v48, %v8954_v47  ;;  %v12803_v60 = vld [vmem:[#allocation2 + $0x2ac] sm:$0xf0]  ;;  %v12888_v47 = vld [vmem:[#allocation2 + $0x55c] sm:$0xf] }
  0x65   :  { %2612 = vmatpush.bf16.msrb.mxu0 %v8659_v58  ;;  %2640 = vmatpush.bf16.msrb.mxu2 %v8663_v62  ;;  %v8959_v58 = vor.u32 %v12815_v52, %v8956_v53  ;;  %v9727_v62 = vor.u32 %v13007_v54, %v9724_v55  ;;  %v12995_v63 = vld [vmem:[#allocation2 + $0x8ac] sm:$0xf0]  ;;  %v12791_v0 = vld [vmem:[#allocation2 + $0x254] sm:$0xf]  ;;  %v8859_v6 = vor.u32 %v12803_v60, %v8858_v59  ;;  %v9252_v48 = vld [vmem:[#allocation2 + $0x5b8] sm:$0xf0] }
  0x66   :  { %v8860_v1 = vld [vmem:[#allocation2 + $0x2b0] sm:$0xf0]  ;;  %v8762_v9 = vld [vmem:[#allocation2 + $0x190] sm:$0xf]  ;;  %v10020_v52 = vld [vmem:[#allocation2 + $0xbb8] sm:$0xf0]  ;;  %v9251_v54 = vor.u32 %v12900_v43, %v9250_v42 }
  0x67   :  { %2626 = vmatpush.bf16.msrb.mxu1 %v9427_v61  ;;  %2654 = vmatpush.bf16.msrb.mxu3 %v9431_v2  ;;  %v9626_v61 = vld [vmem:[#allocation2 + $0x850] sm:$0xf]  ;;  %v12983_v2 = vld [vmem:[#allocation2 + $0x854] sm:$0xf]  ;;  %v8863_v8 = vor.u32 %v12791_v0, %v8860_v1  ;;  %v9922_v59 = vld [vmem:[#allocation2 + $0xa98] sm:$0xf]  ;;  %v10023_v60 = vor.u32 %v13080_v51, %v10020_v52 }
  0x68   :  { %v9628_v3 = vld [vmem:[#allocation2 + $0x8b0] sm:$0xf0]  ;;  %v9627_v7 = vor.u32 %v12995_v63, %v9626_v61  ;;  %v12779_v10 = vld [vmem:[#allocation2 + $0x1ec] sm:$0xf0]  ;;  %v13068_v61 = vld [vmem:[#allocation2 + $0xaf4] sm:$0xf0] }
  0x69   :  { %2613 = vmatpush.bf16.msrb.mxu0 %v8563_v11  ;;  %2641 = vmatpush.bf16.msrb.mxu2 %v8567_v16  ;;  %v9530_v11 = vld [vmem:[#allocation2 + $0x790] sm:$0xf]  ;;  %v9631_v12 = vor.u32 %v12983_v2, %v9628_v3  ;;  %v12767_v14 = vld [vmem:[#allocation2 + $0x194] sm:$0xf]  ;;  %v8763_v18 = vor.u32 %v12779_v10, %v8762_v9  ;;  %v9156_v63 = vld [vmem:[#allocation2 + $0x4f8] sm:$0xf0]  ;;  %v9923_v3 = vor.u32 %v13068_v61, %v9922_v59 }
  0x6a   :  { %v12971_v13 = vld [vmem:[#allocation2 + $0x7ec] sm:$0xf0]  ;;  %v12959_v16 = vld [vmem:[#allocation2 + $0x794] sm:$0xf]  ;;  %v13056_v0 = vld [vmem:[#allocation2 + $0xa9c] sm:$0xf] }
  0x6b   :  { %2627 = vmatpush.bf16.msrb.mxu1 %v9331_v15  ;;  %2655 = vmatpush.bf16.msrb.mxu3 %v9335_v19  ;;  %v8764_v15 = vld [vmem:[#allocation2 + $0x1f0] sm:$0xf0]  ;;  %v9531_v19 = vor.u32 %v12971_v13, %v9530_v11  ;;  %v9434_v23 = vld [vmem:[#allocation2 + $0x6d0] sm:$0xf]  ;;  %v9924_v1 = vld [vmem:[#allocation2 + $0xaf8] sm:$0xf0] }
  0x6c   :  { %2642 = vmatmul.bf16.vlgmr.msrb.gmra.mxu2 %v14186_v4  ;;  %2614 = vmatmul.bf16.vlgmr.msrb.gmra.mxu0 %v14186_v4  ;;  %v9532_v17 = vld [vmem:[#allocation2 + $0x7f0] sm:$0xf0]  ;;  %v12947_v25 = vld [vmem:[#allocation2 + $0x72c] sm:$0xf0]  ;;  %v9826_v9 = vld [vmem:[#allocation2 + $0x9d8] sm:$0xf]  ;;  %v9927_v10 = vor.u32 %v13056_v0, %v9924_v1 }
  0x6d   :  { %2662 = vmatpush.bf16.msra.mxu0 %v9243_v20  ;;  %2690 = vmatpush.bf16.msra.mxu2 %v9247_v22  ;;  %v8767_v20 = vor.u32 %v12767_v14, %v8764_v15  ;;  %v12755_v22 = vld [vmem:[#allocation2 + $0x12c] sm:$0xf0]  ;;  %v9535_v24 = vor.u32 %v12959_v16, %v9532_v17  ;;  %v8668_v27 = vld [vmem:[#allocation2 + $0x130] sm:$0xf0]  ;;  %v13044_v11 = vld [vmem:[#allocation2 + $0xa34] sm:$0xf0] }
  0x6e   :  { %2656 = vmatmul.bf16.vlgmr.msrb.gmra.mxu3 %v14191_v5  ;;  %2628 = vmatmul.bf16.vlgmr.msrb.gmra.mxu1 %v14191_v5  ;;  %v12935_v28 = vld [vmem:[#allocation2 + $0x6d4] sm:$0xf]  ;;  %v8570_v31 = vld [vmem:[#allocation2 + $0x10] sm:$0xf]  ;;  %v9060_v13 = vld [vmem:[#allocation2 + $0x438] sm:$0xf0]  ;;  %v9827_v17 = vor.u32 %v13044_v11, %v9826_v9 }
  0x6f   :  { %2676 = vmatpush.bf16.msra.mxu1 %v10011_v21  ;;  %2704 = vmatpush.bf16.msra.mxu3 %v10015_v26  ;;  %v8666_v21 = vld [vmem:[#allocation2 + $0xd0] sm:$0xf]  ;;  %v12743_v26 = vld [vmem:[#allocation2 + $0xd4] sm:$0xf]  ;;  %v13032_v14 = vld [vmem:[#allocation2 + $0x9dc] sm:$0xf] }
  0x70   :  { %v9436_v29 = vld [vmem:[#allocation2 + $0x730] sm:$0xf0]  ;;  %v8667_v30 = vor.u32 %v12755_v22, %v8666_v21  ;;  %v9338_v35 = vld [vmem:[#allocation2 + $0x610] sm:$0xf]  ;;  %v9828_v15 = vld [vmem:[#allocation2 + $0xa38] sm:$0xf0] }
  0x71   :  { %2663 = vmatpush.bf16.msra.mxu0 %v9147_v32  ;;  %2691 = vmatpush.bf16.msra.mxu2 %v9151_v34  ;;  %v12731_v32 = vld [vmem:[#allocation2 + $0x6c] sm:$0xf0]  ;;  %v8671_v34 = vor.u32 %v12743_v26, %v8668_v27  ;;  %v12719_v37 = vld [vmem:[#allocation2 + $0x14] sm:$0xf]  ;;  %v9730_v21 = vld [vmem:[#allocation2 + $0x918] sm:$0xf]  ;;  %v9831_v22 = vor.u32 %v13032_v14, %v9828_v15 }
  0x72   :  { %v12923_v36 = vld [vmem:[#allocation2 + $0x66c] sm:$0xf0]  ;;  %v8572_v39 = vld [vmem:[#allocation2 + $0x70] sm:$0xf0]  ;;  %v13008_v26 = vld [vmem:[#allocation2 + $0x91c] sm:$0xf] }
  0x73   :  { %2677 = vmatpush.bf16.msra.mxu1 %v9915_v33  ;;  %2705 = vmatpush.bf16.msra.mxu3 %v9919_v38  ;;  %v9435_v33 = vor.u32 %v12947_v25, %v9434_v23  ;;  %v9439_v38 = vor.u32 %v12935_v28, %v9436_v29  ;;  %v12911_v40 = vld [vmem:[#allocation2 + $0x614] sm:$0xf]  ;;  %v9339_v49 = vor.u32 %v12923_v36, %v9338_v35  ;;  %v13020_v23 = vld [vmem:[#allocation2 + $0x974] sm:$0xf0]  ;;  %v8964_v25 = vld [vmem:[#allocation2 + $0x378] sm:$0xf0] }
  0x74   :  { %v9340_v41 = vld [vmem:[#allocation2 + $0x670] sm:$0xf0]  ;;  %v9732_v27 = vld [vmem:[#allocation2 + $0x978] sm:$0xf0]  ;;  %v9731_v29 = vor.u32 %v13020_v23, %v9730_v21  ;;  %v12996_v35 = vld [vmem:[#allocation2 + $0x8b4] sm:$0xf0] }
  0x75   :  { %2664 = vmatpush.bf16.msra.mxu0 %v9051_v44  ;;  %2692 = vmatpush.bf16.msra.mxu2 %v9055_v46  ;;  %v10018_v44 = vld [vmem:[#allocation2 + $0xb58] sm:$0xf]  ;;  %v9343_v53 = vor.u32 %v12911_v40, %v9340_v41  ;;  %v12792_v36 = vld [vmem:[#allocation2 + $0x25c] sm:$0xf]  ;;  %v9258_v14 = vld [vmem:[#allocation2 + $0x560] sm:$0xf] }
  0x76   :  { %v13092_v46 = vld [vmem:[#allocation2 + $0xbb4] sm:$0xf0]  ;;  %v9540_v51 = vld [vmem:[#allocation2 + $0x7f8] sm:$0xf0]  ;;  %v12901_v15 = vld [vmem:[#allocation2 + $0x5bc] sm:$0xf0] }
  0x77   :  { %2678 = vmatpush.bf16.msra.mxu1 %v9819_v45  ;;  %2706 = vmatpush.bf16.msra.mxu3 %v9823_v50  ;;  %v8571_v45 = vor.u32 %v12731_v32, %v8570_v31  ;;  %v8575_v50 = vor.u32 %v12719_v37, %v8572_v39  ;;  %v10019_v55 = vor.u32 %v13092_v46, %v10018_v44  ;;  %v8866_v31 = vld [vmem:[#allocation2 + $0x258] sm:$0xf]  ;;  %v8868_v37 = vld [vmem:[#allocation2 + $0x2b8] sm:$0xf0]  ;;  %v13081_v23 = vld [vmem:[#allocation2 + $0xb64] sm:$0xf] }
  0x78   :  { %v12804_v32 = vld [vmem:[#allocation2 + $0x2b4] sm:$0xf0]  ;;  %v9636_v39 = vld [vmem:[#allocation2 + $0x8b8] sm:$0xf0]  ;;  %v8871_v42 = vor.u32 %v12792_v36, %v8868_v37  ;;  %v13057_v36 = vld [vmem:[#allocation2 + $0xaa4] sm:$0xf] }
  0x79   :  { %2665 = vmatpush.bf16.msra.mxu0 %v8955_v56  ;;  %2693 = vmatpush.bf16.msra.mxu2 %v8959_v58  ;;  %v9255_v56 = vor.u32 %v12888_v47, %v9252_v48  ;;  %v12876_v58 = vld [vmem:[#allocation2 + $0x4f4] sm:$0xf0]  ;;  %v8867_v40 = vor.u32 %v12804_v32, %v8866_v31  ;;  %v12768_v48 = vld [vmem:[#allocation2 + $0x19c] sm:$0xf]  ;;  %v9930_v31 = vld [vmem:[#allocation2 + $0xaa0] sm:$0xf] }
  0x7a   :  { %v8770_v43 = vld [vmem:[#allocation2 + $0x198] sm:$0xf]  ;;  %v8676_v61 = vld [vmem:[#allocation2 + $0x138] sm:$0xf0]  ;;  %v9932_v37 = vld [vmem:[#allocation2 + $0xb00] sm:$0xf0] }
  0x7b   :  { %2679 = vmatpush.bf16.msra.mxu1 %v9723_v57  ;;  %2707 = vmatpush.bf16.msra.mxu3 %v9727_v62  ;;  %v9154_v57 = vld [vmem:[#allocation2 + $0x498] sm:$0xf]  ;;  %v12864_v62 = vld [vmem:[#allocation2 + $0x49c] sm:$0xf] }
  0x7c   :  { %v9155_v2 = vor.u32 %v12876_v58, %v9154_v57  ;;  %v12780_v44 = vld [vmem:[#allocation2 + $0x1f4] sm:$0xf0]  ;;  %v12720_v9 = vld [vmem:[#allocation2 + $0x1c] sm:$0xf] }
  0x7d   :  { %2666 = vmatpush.bf16.msra.mxu0 %v8859_v6  ;;  %2694 = vmatpush.bf16.msra.mxu2 %v8863_v8  ;;  %v9159_v6 = vor.u32 %v12864_v62, %v9156_v63  ;;  %v12852_v8 = vld [vmem:[#allocation2 + $0x434] sm:$0xf0]  ;;  %v8771_v52 = vor.u32 %v12780_v44, %v8770_v43  ;;  %v12936_v62 = vld [vmem:[#allocation2 + $0x6dc] sm:$0xf]  ;;  %v9834_v43 = vld [vmem:[#allocation2 + $0x9e0] sm:$0xf]  ;;  %v9935_v44 = vor.u32 %v13057_v36, %v9932_v37 }
  0x7e   :  { %v12972_v47 = vld [vmem:[#allocation2 + $0x7f4] sm:$0xf0]  ;;  %v9444_v63 = vld [vmem:[#allocation2 + $0x738] sm:$0xf0]  ;;  %v8586_v37 = vld [vmem:[#allocation2 + $0x20] sm:$0xf] }
  0x7f   :  { %2680 = vmatpush.bf16.msra.mxu1 %v9627_v7  ;;  %2708 = vmatpush.bf16.msra.mxu3 %v9631_v12  ;;  %v9058_v7 = vld [vmem:[#allocation2 + $0x3d8] sm:$0xf]  ;;  %v12840_v12 = vld [vmem:[#allocation2 + $0x3dc] sm:$0xf] }
  0x80   :  { %v9059_v16 = vor.u32 %v12852_v8, %v9058_v7  ;;  %v9442_v57 = vld [vmem:[#allocation2 + $0x6d8] sm:$0xf]  ;;  %v8580_v11 = vld [vmem:[#allocation2 + $0x78] sm:$0xf0] }
  0x81   :  { %2667 = vmatpush.bf16.msra.mxu0 %v8763_v18  ;;  %2695 = vmatpush.bf16.msra.mxu2 %v8767_v20  ;;  %v9063_v18 = vor.u32 %v12840_v12, %v9060_v13  ;;  %v12828_v20 = vld [vmem:[#allocation2 + $0x374] sm:$0xf0]  ;;  %v12912_v12 = vld [vmem:[#allocation2 + $0x61c] sm:$0xf] }
  0x82   :  { %v12948_v59 = vld [vmem:[#allocation2 + $0x734] sm:$0xf0]  ;;  %v9348_v13 = vld [vmem:[#allocation2 + $0x678] sm:$0xf0] }
  0x83   :  { %2681 = vmatpush.bf16.msra.mxu1 %v9531_v19  ;;  %2709 = vmatpush.bf16.msra.mxu3 %v9535_v24  ;;  %v8962_v19 = vld [vmem:[#allocation2 + $0x318] sm:$0xf]  ;;  %v12816_v24 = vld [vmem:[#allocation2 + $0x31c] sm:$0xf] }
  0x84   :  { %v8963_v28 = vor.u32 %v12828_v20, %v8962_v19  ;;  %v8578_v1 = vld [vmem:[#allocation2 + $0x18] sm:$0xf]  ;;  %v12889_v19 = vld [vmem:[#allocation2 + $0x564] sm:$0xf] }
  0x85   :  { %2668 = vmatpush.bf16.msra.mxu0 %v8667_v30  ;;  %2696 = vmatpush.bf16.msra.mxu2 %v8671_v34  ;;  %v8967_v30 = vor.u32 %v12816_v24, %v8964_v25  ;;  %v9735_v34 = vor.u32 %v13008_v26, %v9732_v27  ;;  %v9346_v7 = vld [vmem:[#allocation2 + $0x618] sm:$0xf]  ;;  %v9260_v20 = vld [vmem:[#allocation2 + $0x5c0] sm:$0xf0]  ;;  %v9351_v25 = vor.u32 %v12912_v12, %v9348_v13 }
  0x86   :  { %v12924_v8 = vld [vmem:[#allocation2 + $0x674] sm:$0xf0]  ;;  %v10028_v24 = vld [vmem:[#allocation2 + $0xbc0] sm:$0xf0]  ;;  %v9259_v26 = vor.u32 %v12901_v15, %v9258_v14  ;;  %v8778_v15 = vld [vmem:[#allocation2 + $0x1a0] sm:$0xf] }
  0x87   :  { %2682 = vmatpush.bf16.msra.mxu1 %v9435_v33  ;;  %2710 = vmatpush.bf16.msra.mxu3 %v9439_v38  ;;  %v9634_v33 = vld [vmem:[#allocation2 + $0x858] sm:$0xf]  ;;  %v12984_v38 = vld [vmem:[#allocation2 + $0x85c] sm:$0xf]  ;;  %v9347_v21 = vor.u32 %v12924_v8, %v9346_v7  ;;  %v10031_v32 = vor.u32 %v13081_v23, %v10028_v24  ;;  %v12997_v7 = vld [vmem:[#allocation2 + $0x8bc] sm:$0xf0] }
  0x88   :  { %v9635_v41 = vor.u32 %v12996_v35, %v9634_v33  ;;  %v9639_v46 = vor.u32 %v12984_v38, %v9636_v39  ;;  %v13069_v33 = vld [vmem:[#allocation2 + $0xafc] sm:$0xf0]  ;;  %v9164_v35 = vld [vmem:[#allocation2 + $0x500] sm:$0xf0] }
  0x89   :  { %2669 = vmatpush.bf16.msra.mxu0 %v8571_v45  ;;  %2697 = vmatpush.bf16.msra.mxu2 %v8575_v50  ;;  %v9538_v45 = vld [vmem:[#allocation2 + $0x798] sm:$0xf]  ;;  %v12960_v50 = vld [vmem:[#allocation2 + $0x79c] sm:$0xf]  ;;  %v9931_v39 = vor.u32 %v13069_v33, %v9930_v31  ;;  %v12793_v8 = vld [vmem:[#allocation2 + $0x264] sm:$0xf] }
  0x8a   :  { %v9543_v58 = vor.u32 %v12960_v50, %v9540_v51  ;;  %v9548_v23 = vld [vmem:[#allocation2 + $0x800] sm:$0xf0]  ;;  %v12949_v31 = vld [vmem:[#allocation2 + $0x73c] sm:$0xf0] }
  0x8b   :  { %2683 = vmatpush.bf16.msra.mxu1 %v9339_v49  ;;  %2711 = vmatpush.bf16.msra.mxu3 %v9343_v53  ;;  %v8772_v49 = vld [vmem:[#allocation2 + $0x1f8] sm:$0xf0]  ;;  %v9539_v53 = vor.u32 %v12972_v47, %v9538_v45  ;;  %v13045_v45 = vld [vmem:[#allocation2 + $0xa3c] sm:$0xf0]  ;;  %v9068_v47 = vld [vmem:[#allocation2 + $0x440] sm:$0xf0] }
  0x8c   :  { %2698 = vmatmul.bf16.vlgmr.msra.gmra.mxu2 %v14186_v4  ;;  %2670 = vmatmul.bf16.vlgmr.msra.gmra.mxu0 %v14186_v4  ;;  %v9835_v51 = vor.u32 %v13045_v45, %v9834_v43  ;;  %v8684_v33 = vld [vmem:[#allocation2 + $0x140] sm:$0xf0] }
  0x8d   :  { %2718 = vmatpush.bf16.msrb.mxu0 %v9251_v54  ;;  %2746 = vmatpush.bf16.msrb.mxu2 %v9255_v56  ;;  %v8775_v54 = vor.u32 %v12768_v48, %v8772_v49  ;;  %v12756_v56 = vld [vmem:[#allocation2 + $0x134] sm:$0xf0]  ;;  %v13033_v48 = vld [vmem:[#allocation2 + $0x9e4] sm:$0xf] }
  0x8e   :  { %2712 = vmatmul.bf16.vlgmr.msra.gmra.mxu3 %v14191_v5  ;;  %2684 = vmatmul.bf16.vlgmr.msra.gmra.mxu1 %v14191_v5  ;;  %v9836_v49 = vld [vmem:[#allocation2 + $0xa40] sm:$0xf0] }
  0x8f   :  { %2732 = vmatpush.bf16.msrb.mxu1 %v10019_v55  ;;  %2760 = vmatpush.bf16.msrb.mxu3 %v10023_v60  ;;  %v8674_v55 = vld [vmem:[#allocation2 + $0xd8] sm:$0xf]  ;;  %v12744_v60 = vld [vmem:[#allocation2 + $0xdc] sm:$0xf]  ;;  %v12721_v43 = vld [vmem:[#allocation2 + $0x24] sm:$0xf] }
  0x90   :  { %v8675_v0 = vor.u32 %v12756_v56, %v8674_v55  ;;  %v9738_v55 = vld [vmem:[#allocation2 + $0x920] sm:$0xf]  ;;  %v9839_v56 = vor.u32 %v13033_v48, %v9836_v49  ;;  %v8588_v45 = vld [vmem:[#allocation2 + $0x80] sm:$0xf0]  ;;  %v9266_v48 = vld [vmem:[#allocation2 + $0x568] sm:$0xf] }
  0x91   :  { %2719 = vmatpush.bf16.msrb.mxu0 %v9155_v2  ;;  %2747 = vmatpush.bf16.msrb.mxu2 %v9159_v6  ;;  %v12732_v2 = vld [vmem:[#allocation2 + $0x74] sm:$0xf0]  ;;  %v8679_v6 = vor.u32 %v12744_v60, %v8676_v61  ;;  %v13009_v60 = vld [vmem:[#allocation2 + $0x924] sm:$0xf]  ;;  %v12902_v49 = vld [vmem:[#allocation2 + $0x5c4] sm:$0xf0] }
  0x92   :  { %v9740_v61 = vld [vmem:[#allocation2 + $0x980] sm:$0xf0] }
  0x93   :  { %2733 = vmatpush.bf16.msrb.mxu1 %v9923_v3  ;;  %2761 = vmatpush.bf16.msrb.mxu3 %v9927_v10  ;;  %v9443_v3 = vor.u32 %v12948_v59, %v9442_v57  ;;  %v9447_v10 = vor.u32 %v12936_v62, %v9444_v63  ;;  %v13021_v57 = vld [vmem:[#allocation2 + $0x97c] sm:$0xf0]  ;;  %v8972_v59 = vld [vmem:[#allocation2 + $0x380] sm:$0xf0] }
  0x94   :  { %v9739_v63 = vor.u32 %v13021_v57, %v9738_v55  ;;  %v13082_v57 = vld [vmem:[#allocation2 + $0xb6c] sm:$0xf] }
  0x95   :  { %2720 = vmatpush.bf16.msrb.mxu0 %v9059_v16  ;;  %2748 = vmatpush.bf16.msrb.mxu2 %v9063_v18  ;;  %v10026_v16 = vld [vmem:[#allocation2 + $0xb60] sm:$0xf] }
  0x96   :  { %v13093_v18 = vld [vmem:[#allocation2 + $0xbbc] sm:$0xf0] }
  0x97   :  { %2734 = vmatpush.bf16.msrb.mxu1 %v9827_v17  ;;  %2762 = vmatpush.bf16.msrb.mxu3 %v9831_v22  ;;  %v8579_v17 = vor.u32 %v12732_v2, %v8578_v1  ;;  %v8583_v22 = vor.u32 %v12720_v9, %v8580_v11  ;;  %v10027_v27 = vor.u32 %v13093_v18, %v10026_v16  ;;  %v8874_v1 = vld [vmem:[#allocation2 + $0x260] sm:$0xf]  ;;  %v8876_v9 = vld [vmem:[#allocation2 + $0x2c0] sm:$0xf0] }
  0x98   :  { %v12805_v2 = vld [vmem:[#allocation2 + $0x2bc] sm:$0xf0]  ;;  %v9644_v11 = vld [vmem:[#allocation2 + $0x8c0] sm:$0xf0]  ;;  %v8879_v14 = vor.u32 %v12793_v8, %v8876_v9  ;;  %v13058_v8 = vld [vmem:[#allocation2 + $0xaac] sm:$0xf] }
  0x99   :  { %2721 = vmatpush.bf16.msrb.mxu0 %v8963_v28  ;;  %2749 = vmatpush.bf16.msrb.mxu2 %v8967_v30  ;;  %v9263_v28 = vor.u32 %v12889_v19, %v9260_v20  ;;  %v12877_v30 = vld [vmem:[#allocation2 + $0x4fc] sm:$0xf0]  ;;  %v8875_v12 = vor.u32 %v12805_v2, %v8874_v1  ;;  %v12769_v20 = vld [vmem:[#allocation2 + $0x1a4] sm:$0xf]  ;;  %v9938_v1 = vld [vmem:[#allocation2 + $0xaa8] sm:$0xf] }
  0x9a   :  { %v12781_v16 = vld [vmem:[#allocation2 + $0x1fc] sm:$0xf0]  ;;  %v9940_v9 = vld [vmem:[#allocation2 + $0xb08] sm:$0xf0] }
  0x9b   :  { %2735 = vmatpush.bf16.msrb.mxu1 %v9731_v29  ;;  %2763 = vmatpush.bf16.msrb.mxu3 %v9735_v34  ;;  %v9162_v29 = vld [vmem:[#allocation2 + $0x4a0] sm:$0xf]  ;;  %v12865_v34 = vld [vmem:[#allocation2 + $0x4a4] sm:$0xf]  ;;  %v8779_v24 = vor.u32 %v12781_v16, %v8778_v15  ;;  %v9842_v15 = vld [vmem:[#allocation2 + $0x9e8] sm:$0xf]  ;;  %v9943_v16 = vor.u32 %v13058_v8, %v9940_v9 }
  0x9c   :  { %v9163_v38 = vor.u32 %v12877_v30, %v9162_v29  ;;  %v12973_v19 = vld [vmem:[#allocation2 + $0x7fc] sm:$0xf0] }
  0x9d   :  { %2722 = vmatpush.bf16.msrb.mxu0 %v8867_v40  ;;  %2750 = vmatpush.bf16.msrb.mxu2 %v8871_v42  ;;  %v9167_v40 = vor.u32 %v12865_v34, %v9164_v35  ;;  %v12853_v42 = vld [vmem:[#allocation2 + $0x43c] sm:$0xf0]  ;;  %v12937_v34 = vld [vmem:[#allocation2 + $0x6e4] sm:$0xf] }
  0x9e   :  { %v9450_v29 = vld [vmem:[#allocation2 + $0x6e0] sm:$0xf]  ;;  %v9452_v35 = vld [vmem:[#allocation2 + $0x740] sm:$0xf0] }
  0x9f   :  { %2736 = vmatpush.bf16.msrb.mxu1 %v9635_v41  ;;  %2764 = vmatpush.bf16.msrb.mxu3 %v9639_v46  ;;  %v9066_v41 = vld [vmem:[#allocation2 + $0x3e0] sm:$0xf]  ;;  %v12841_v46 = vld [vmem:[#allocation2 + $0x3e4] sm:$0xf] }
  0xa0   :  { %v9067_v50 = vor.u32 %v12853_v42, %v9066_v41  ;;  %v9354_v41 = vld [vmem:[#allocation2 + $0x620] sm:$0xf] }
  0xa1   :  { %2723 = vmatpush.bf16.msrb.mxu0 %v8771_v52  ;;  %2751 = vmatpush.bf16.msrb.mxu2 %v8775_v54  ;;  %v9071_v52 = vor.u32 %v12841_v46, %v9068_v47  ;;  %v12829_v54 = vld [vmem:[#allocation2 + $0x37c] sm:$0xf0]  ;;  %v12913_v46 = vld [vmem:[#allocation2 + $0x624] sm:$0xf] }
  0xa2   :  { %v12925_v42 = vld [vmem:[#allocation2 + $0x67c] sm:$0xf0]  ;;  %v9356_v47 = vld [vmem:[#allocation2 + $0x680] sm:$0xf0] }
  0xa3   :  { %2737 = vmatpush.bf16.msrb.mxu1 %v9539_v53  ;;  %2765 = vmatpush.bf16.msrb.mxu3 %v9543_v58  ;;  %v8970_v53 = vld [vmem:[#allocation2 + $0x320] sm:$0xf]  ;;  %v12817_v58 = vld [vmem:[#allocation2 + $0x324] sm:$0xf]  ;;  %v9355_v55 = vor.u32 %v12925_v42, %v9354_v41  ;;  %v12806_v41 = vld [vmem:[#allocation2 + $0x2c4] sm:$0xf0] }
  0xa4   :  { %v8971_v62 = vor.u32 %v12829_v54, %v8970_v53  ;;  %v12890_v53 = vld [vmem:[#allocation2 + $0x56c] sm:$0xf]  ;;  %v9650_v42 = vld [vmem:[#allocation2 + $0x868] sm:$0xf] }
  0xa5   :  { %2724 = vmatpush.bf16.msrb.mxu0 %v8675_v0  ;;  %2752 = vmatpush.bf16.msrb.mxu2 %v8679_v6  ;;  %v8975_v0 = vor.u32 %v12817_v58, %v8972_v59  ;;  %v9743_v6 = vor.u32 %v13009_v60, %v9740_v61  ;;  %v9268_v54 = vld [vmem:[#allocation2 + $0x5c8] sm:$0xf0]  ;;  %v9359_v59 = vor.u32 %v12913_v46, %v9356_v47 }
  0xa6   :  { %v10036_v58 = vld [vmem:[#allocation2 + $0xbc8] sm:$0xf0]  ;;  %v9267_v60 = vor.u32 %v12902_v49, %v9266_v48 }
  0xa7   :  { %2738 = vmatpush.bf16.msrb.mxu1 %v9443_v3  ;;  %2766 = vmatpush.bf16.msrb.mxu3 %v9447_v10  ;;  %v9642_v3 = vld [vmem:[#allocation2 + $0x860] sm:$0xf]  ;;  %v12985_v10 = vld [vmem:[#allocation2 + $0x864] sm:$0xf]  ;;  %v10039_v2 = vor.u32 %v13082_v57, %v10036_v58  ;;  %v12794_v47 = vld [vmem:[#allocation2 + $0x26c] sm:$0xf] }
  0xa8   :  { %v9643_v13 = vor.u32 %v12997_v7, %v9642_v3  ;;  %v9647_v18 = vor.u32 %v12985_v10, %v9644_v11  ;;  %v13070_v3 = vld [vmem:[#allocation2 + $0xb04] sm:$0xf0]  ;;  %v9172_v7 = vld [vmem:[#allocation2 + $0x508] sm:$0xf0] }
  0xa9   :  { %2725 = vmatpush.bf16.msrb.mxu0 %v8579_v17  ;;  %2753 = vmatpush.bf16.msrb.mxu2 %v8583_v22  ;;  %v9546_v17 = vld [vmem:[#allocation2 + $0x7a0] sm:$0xf]  ;;  %v12961_v22 = vld [vmem:[#allocation2 + $0x7a4] sm:$0xf]  ;;  %v9939_v11 = vor.u32 %v13070_v3, %v9938_v1  ;;  %v8884_v48 = vld [vmem:[#allocation2 + $0x2c8] sm:$0xf0] }
  0xaa   :  { %v9551_v30 = vor.u32 %v12961_v22, %v9548_v23  ;;  %v8978_v23 = vld [vmem:[#allocation2 + $0x328] sm:$0xf]  ;;  %v9556_v3 = vld [vmem:[#allocation2 + $0x808] sm:$0xf0] }
  0xab   :  { %2739 = vmatpush.bf16.msrb.mxu1 %v9347_v21  ;;  %2767 = vmatpush.bf16.msrb.mxu3 %v9351_v25  ;;  %v8780_v21 = vld [vmem:[#allocation2 + $0x200] sm:$0xf0]  ;;  %v9547_v25 = vor.u32 %v12973_v19, %v9546_v17  ;;  %v13046_v17 = vld [vmem:[#allocation2 + $0xa44] sm:$0xf0]  ;;  %v9076_v19 = vld [vmem:[#allocation2 + $0x448] sm:$0xf0] }
  0xac   :  { %2754 = vmatmul.bf16.vlgmr.msrb.gmra.mxu2 %v14186_v4  ;;  %2726 = vmatmul.bf16.vlgmr.msrb.gmra.mxu0 %v14186_v4  ;;  %v12782_v57 = vld [vmem:[#allocation2 + $0x204] sm:$0xf0] }
  0xad   :  { %2774 = vmatpush.bf16.msra.mxu0 %v9259_v26  ;;  %2802 = vmatpush.bf16.msra.mxu2 %v9263_v28  ;;  %v8783_v26 = vor.u32 %v12769_v20, %v8780_v21  ;;  %v12757_v28 = vld [vmem:[#allocation2 + $0x13c] sm:$0xf0]  ;;  %v13034_v20 = vld [vmem:[#allocation2 + $0x9ec] sm:$0xf]  ;;  %v9554_v58 = vld [vmem:[#allocation2 + $0x7a8] sm:$0xf] }
  0xae   :  { %2768 = vmatmul.bf16.vlgmr.msrb.gmra.mxu3 %v14191_v5  ;;  %2740 = vmatmul.bf16.vlgmr.msrb.gmra.mxu1 %v14191_v5  ;;  %v9844_v21 = vld [vmem:[#allocation2 + $0xa48] sm:$0xf0] }
  0xaf   :  { %2788 = vmatpush.bf16.msra.mxu1 %v10027_v27  ;;  %2816 = vmatpush.bf16.msra.mxu3 %v10031_v32  ;;  %v8682_v27 = vld [vmem:[#allocation2 + $0xe0] sm:$0xf]  ;;  %v12745_v32 = vld [vmem:[#allocation2 + $0xe4] sm:$0xf] }
  0xb0   :  { %v8683_v36 = vor.u32 %v12757_v28, %v8682_v27  ;;  %v12830_v27 = vld [vmem:[#allocation2 + $0x384] sm:$0xf0] }
  0xb1   :  { %2775 = vmatpush.bf16.msra.mxu0 %v9163_v38  ;;  %2803 = vmatpush.bf16.msra.mxu2 %v9167_v40  ;;  %v12733_v38 = vld [vmem:[#allocation2 + $0x7c] sm:$0xf0]  ;;  %v8687_v40 = vor.u32 %v12745_v32, %v8684_v33  ;;  %v9746_v28 = vld [vmem:[#allocation2 + $0x928] sm:$0xf]  ;;  %v12818_v32 = vld [vmem:[#allocation2 + $0x32c] sm:$0xf] }
  0xb2   :  { %v8980_v33 = vld [vmem:[#allocation2 + $0x388] sm:$0xf0] }
  0xb3   :  { %2789 = vmatpush.bf16.msra.mxu1 %v9931_v39  ;;  %2817 = vmatpush.bf16.msra.mxu3 %v9935_v44  ;;  %v9451_v39 = vor.u32 %v12949_v31, %v9450_v29  ;;  %v9455_v44 = vor.u32 %v12937_v34, %v9452_v35  ;;  %v13022_v31 = vld [vmem:[#allocation2 + $0x984] sm:$0xf0]  ;;  %v13010_v34 = vld [vmem:[#allocation2 + $0x92c] sm:$0xf] }
  0xb4   :  { %v9748_v35 = vld [vmem:[#allocation2 + $0x988] sm:$0xf0] }
  0xb5   :  { %2776 = vmatpush.bf16.msra.mxu0 %v9067_v50  ;;  %2804 = vmatpush.bf16.msra.mxu2 %v9071_v52  ;;  %v10034_v50 = vld [vmem:[#allocation2 + $0xb68] sm:$0xf]  ;;  %v9751_v46 = vor.u32 %v13010_v34, %v9748_v35 }
  0xb6   :  { %v13094_v52 = vld [vmem:[#allocation2 + $0xbc4] sm:$0xf0] }
  0xb7   :  { %2790 = vmatpush.bf16.msra.mxu1 %v9835_v51  ;;  %2818 = vmatpush.bf16.msra.mxu3 %v9839_v56  ;;  %v8587_v51 = vor.u32 %v12733_v38, %v8586_v37  ;;  %v8591_v56 = vor.u32 %v12721_v43, %v8588_v45  ;;  %v10035_v61 = vor.u32 %v13094_v52, %v10034_v50  ;;  %v8882_v37 = vld [vmem:[#allocation2 + $0x268] sm:$0xf]  ;;  %v12986_v50 = vld [vmem:[#allocation2 + $0x86c] sm:$0xf] }
  0xb8   :  { %v12998_v43 = vld [vmem:[#allocation2 + $0x8c4] sm:$0xf0] }
  0xb9   :  { %2777 = vmatpush.bf16.msra.mxu0 %v8971_v62  ;;  %2805 = vmatpush.bf16.msra.mxu2 %v8975_v0  ;;  %v9271_v62 = vor.u32 %v12890_v53, %v9268_v54  ;;  %v12878_v0 = vld [vmem:[#allocation2 + $0x504] sm:$0xf0]  ;;  %v8883_v53 = vor.u32 %v12806_v41, %v8882_v37  ;;  %v9651_v54 = vor.u32 %v12998_v43, %v9650_v42  ;;  %v12914_v37 = vld [vmem:[#allocation2 + $0x62c] sm:$0xf]  ;;  %v12903_v42 = vld [vmem:[#allocation2 + $0x5cc] sm:$0xf0] }
  0xba   :  { %v10042_v43 = vld [vmem:[#allocation2 + $0xb70] sm:$0xf] }
  0xbb   :  { %2791 = vmatpush.bf16.msra.mxu1 %v9739_v63  ;;  %2819 = vmatpush.bf16.msra.mxu3 %v9743_v6  ;;  %v9170_v63 = vld [vmem:[#allocation2 + $0x4a8] sm:$0xf]  ;;  %v12866_v6 = vld [vmem:[#allocation2 + $0x4ac] sm:$0xf] }
  0xbc   :  { %v9171_v10 = vor.u32 %v12878_v0, %v9170_v63  ;;  %v8788_v63 = vld [vmem:[#allocation2 + $0x208] sm:$0xf0] }
  0xbd   :  { %2778 = vmatpush.bf16.msra.mxu0 %v8875_v12  ;;  %2806 = vmatpush.bf16.msra.mxu2 %v8879_v14  ;;  %v9175_v12 = vor.u32 %v12866_v6, %v9172_v7  ;;  %v12854_v14 = vld [vmem:[#allocation2 + $0x444] sm:$0xf0] }
  0xbe   :  { %v8690_v7 = vld [vmem:[#allocation2 + $0xe8] sm:$0xf] }
  0xbf   :  { %2792 = vmatpush.bf16.msra.mxu1 %v9643_v13  ;;  %2820 = vmatpush.bf16.msra.mxu3 %v9647_v18  ;;  %v9074_v13 = vld [vmem:[#allocation2 + $0x3e8] sm:$0xf]  ;;  %v12842_v18 = vld [vmem:[#allocation2 + $0x3ec] sm:$0xf] }
  0xc0   :  { %v9075_v22 = vor.u32 %v12854_v14, %v9074_v13  ;;  %v9458_v13 = vld [vmem:[#allocation2 + $0x6e8] sm:$0xf] }
  0xc1   :  { %2779 = vmatpush.bf16.msra.mxu0 %v8779_v24  ;;  %2807 = vmatpush.bf16.msra.mxu2 %v8783_v26  ;;  %v14216_v24 = vld [vmem:[#allocation11] sm:$0xff]  ;;  %v9079_v26 = vor.u32 %v12842_v18, %v9076_v19  ;;  %v12950_v14 = vld [vmem:[#allocation2 + $0x744] sm:$0xf0]  ;;  %v12746_v18 = vld [vmem:[#allocation2 + $0xec] sm:$0xf] }
  0xc2   :  { %v582_v29 = vperm.slane %v14216_v24, 0  ;;  %v583_v49 = vperm.slane %v14216_v24, 1  ;;  %v8692_v19 = vld [vmem:[#allocation2 + $0x148] sm:$0xf0] }
  0xc3   :  { %2793 = vmatpush.bf16.msra.mxu1 %v9547_v25  ;;  %2821 = vmatpush.bf16.msra.mxu3 %v9551_v30  ;;  %v9843_v25 = vor.u32 %v13046_v17, %v9842_v15  ;;  %v9847_v30 = vor.u32 %v13034_v20, %v9844_v21  ;;  %v12938_v20 = vld [vmem:[#allocation2 + $0x6ec] sm:$0xf] }
  0xc4   :  { %v9460_v21 = vld [vmem:[#allocation2 + $0x748] sm:$0xf0] }
  0xc5   :  { %2780 = vmatpush.bf16.msra.mxu0 %v8683_v36  ;;  %2808 = vmatpush.bf16.msra.mxu2 %v8687_v40  ;;  %v8979_v36 = vor.u32 %v12830_v27, %v8978_v23  ;;  %v8983_v40 = vor.u32 %v12818_v32, %v8980_v33  ;;  %v12734_v27 = vld [vmem:[#allocation2 + $0x84] sm:$0xf0]  ;;  %v12722_v32 = vld [vmem:[#allocation2 + $0x2c] sm:$0xf] }
  0xc6   :  { %v8596_v33 = vld [vmem:[#allocation2 + $0x88] sm:$0xf0] }
  0xc7   :  { %2794 = vmatpush.bf16.msra.mxu1 %v9451_v39  ;;  %2822 = vmatpush.bf16.msra.mxu3 %v9455_v44  ;;  %v9747_v39 = vor.u32 %v13022_v31, %v9746_v28  ;;  %v9362_v28 = vld [vmem:[#allocation2 + $0x628] sm:$0xf]  ;;  %v9459_v31 = vor.u32 %v12950_v14, %v9458_v13  ;;  %v9850_v13 = vld [vmem:[#allocation2 + $0x9f0] sm:$0xf] }
  0xc9   :  { %2781 = vmatpush.bf16.msra.mxu0 %v8587_v51  ;;  %2809 = vmatpush.bf16.msra.mxu2 %v8591_v56  ;;  %v2559_v38 = vpop.f32.mrf.mxu0  ;;  %v9652_v51 = vld [vmem:[#allocation2 + $0x8c8] sm:$0xf0]  ;;  %v8786_v56 = vld [vmem:[#allocation2 + $0x1a8] sm:$0xf] }
  0xca   :  { %v2560_v44 = vadd.f32 %v2559_v38, %v582_v29  ;;  %v8787_v6 = vor.u32 %v12782_v57, %v8786_v56  ;;  %v9364_v38 = vld [vmem:[#allocation2 + $0x688] sm:$0xf0] }
  0xcb   :  { %2795 = vmatpush.bf16.msra.mxu1 %v9355_v55  ;;  %2823 = vmatpush.bf16.msra.mxu3 %v9359_v59  ;;  %v2573_v45 = vpop.f32.mrf.mxu1  ;;  %v8887_v55 = vor.u32 %v12794_v47, %v8884_v48  ;;  %v12891_v47 = vld [vmem:[#allocation2 + $0x574] sm:$0xf] }
  0xcc   :  { %2810 = vmatmul.bf16.vlgmr.msra.gmra.mxu2 %v14186_v4  ;;  %2782 = vmatmul.bf16.vlgmr.msra.gmra.mxu0 %v14186_v4  ;;  %v14220_v52 = vadd.f32 %v2573_v45, %v2560_v44  ;;  %v13095_v44 = vld [vmem:[#allocation2 + $0xbcc] sm:$0xf0]  ;;  %v9276_v48 = vld [vmem:[#allocation2 + $0x5d0] sm:$0xf0] }
  0xcd   :  { %2830 = vmatpush.bf16.msrb.mxu0 %v9267_v60  ;;  %2858 = vmatpush.bf16.msrb.mxu2 %v9271_v62  ;;  %v9655_v60 = vor.u32 %v12986_v50, %v9652_v51  ;;  %v12770_v62 = vld [vmem:[#allocation2 + $0x1ac] sm:$0xf] }
  0xce   :  { %2824 = vmatmul.bf16.vlgmr.msra.gmra.mxu3 %v14191_v5  ;;  %2796 = vmatmul.bf16.vlgmr.msra.gmra.mxu1 %v14191_v5  ;;  %v3222_v23 = vmax.f32 %v14220_v52, 0.0 }
  0xcf   :  { %2844 = vmatpush.bf16.msrb.mxu1 %v10035_v61  ;;  %2872 = vmatpush.bf16.msrb.mxu3 %v10039_v2  ;;  %v2587_v59 = vpop.f32.mrf.mxu2  ;;  %v12974_v61 = vld [vmem:[#allocation2 + $0x804] sm:$0xf0]  ;;  %v12962_v2 = vld [vmem:[#allocation2 + $0x7ac] sm:$0xf] }
  0xd0   :  { %v2588_v0 = vadd.f32 %v2587_v59, %v583_v49  ;;  %v9559_v17 = vor.u32 %v12962_v2, %v9556_v3  ;;  %v9279_v59 = vor.u32 %v12891_v47, %v9276_v48  ;;  %v9180_v2 = vld [vmem:[#allocation2 + $0x510] sm:$0xf0]  ;;  %v585_v48 = vperm.slane %v14216_v24, 3 }
  0xd1   :  { %2831 = vmatpush.bf16.msrb.mxu0 %v9171_v10  ;;  %2859 = vmatpush.bf16.msrb.mxu2 %v9175_v12  ;;  %v2601_v1 = vpop.f32.mrf.mxu3  ;;  %v2561_v9 = vpop.f32.mrf.mxu0  ;;  %v9555_v10 = vor.u32 %v12974_v61, %v9554_v58  ;;  %v12758_v12 = vld [vmem:[#allocation2 + $0x144] sm:$0xf0]  ;;  %v10043_v58 = vor.u32 %v13095_v44, %v10042_v43  ;;  %v12879_v61 = vld [vmem:[#allocation2 + $0x50c] sm:$0xf0]  ;;  %v8892_v47 = vld [vmem:[#allocation2 + $0x2d0] sm:$0xf0] }
  0xd2   :  { %v14224_v8 = vadd.f32 %v2601_v1, %v2588_v0  ;;  %v2562_v15 = vadd.f32 %v2561_v9, %v582_v29  ;;  %v8695_v29 = vor.u32 %v12746_v18, %v8692_v19  ;;  %v13071_v0 = vld [vmem:[#allocation2 + $0xb0c] sm:$0xf0]  ;;  %v12867_v1 = vld [vmem:[#allocation2 + $0x4b4] sm:$0xf] }
  0xd3   :  { %2845 = vmatpush.bf16.msrb.mxu1 %v9939_v11  ;;  %2873 = vmatpush.bf16.msrb.mxu3 %v9943_v16  ;;  %v8791_v11 = vor.u32 %v12770_v62, %v8788_v63  ;;  %v2575_v16 = vpop.f32.mrf.mxu1  ;;  %v9946_v62 = vld [vmem:[#allocation2 + $0xab0] sm:$0xf]  ;;  %v13035_v18 = vld [vmem:[#allocation2 + $0x9f4] sm:$0xf] }
  0xd4   :  { %v3223_v50 = vmax.f32 %v14224_v8, 0.0  ;;  %v9947_v9 = vor.u32 %v13071_v0, %v9946_v62  ;;  %v9852_v19 = vld [vmem:[#allocation2 + $0xa50] sm:$0xf0] }
  0xd5   :  { %2832 = vmatpush.bf16.msrb.mxu0 %v9075_v22  ;;  %2860 = vmatpush.bf16.msrb.mxu2 %v9079_v26  ;;  %v8594_v22 = vld [vmem:[#allocation2 + $0x28] sm:$0xf]  ;;  %v8691_v26 = vor.u32 %v12758_v12, %v8690_v7  ;;  %v9948_v7 = vld [vmem:[#allocation2 + $0xb10] sm:$0xf0]  ;;  %v12855_v12 = vld [vmem:[#allocation2 + $0x44c] sm:$0xf0] }
  0xd6   :  { %v8796_v62 = vld [vmem:[#allocation2 + $0x210] sm:$0xf0] }
  0xd7   :  { %2846 = vmatpush.bf16.msrb.mxu1 %v9843_v25  ;;  %2874 = vmatpush.bf16.msrb.mxu3 %v9847_v30  ;;  %v2576_v25 = vadd.f32 %v2575_v16, %v2562_v15  ;;  %v12926_v30 = vld [vmem:[#allocation2 + $0x684] sm:$0xf0]  ;;  %v2589_v34 = vpop.f32.mrf.mxu2  ;;  %v13047_v15 = vld [vmem:[#allocation2 + $0xa4c] sm:$0xf0]  ;;  %v12843_v16 = vld [vmem:[#allocation2 + $0x3f4] sm:$0xf] }
  0xd8   :  { %v9363_v52 = vor.u32 %v12926_v30, %v9362_v28  ;;  %v9855_v28 = vor.u32 %v13035_v18, %v9852_v19  ;;  %v13023_v30 = vld [vmem:[#allocation2 + $0x98c] sm:$0xf0]  ;;  %v12747_v18 = vld [vmem:[#allocation2 + $0xf4] sm:$0xf] }
  0xd9   :  { %2833 = vmatpush.bf16.msrb.mxu0 %v8979_v36  ;;  %2861 = vmatpush.bf16.msrb.mxu2 %v8983_v40  ;;  %v3246_v35 = vmax.f32 %v2576_v25, 0.0  ;;  %v9463_v36 = vor.u32 %v12938_v20, %v9460_v21  ;;  %v2590_v40 = vadd.f32 %v2589_v34, %v583_v49  ;;  %v2603_v41 = vpop.f32.mrf.mxu3  ;;  %v9367_v49 = vor.u32 %v12914_v37, %v9364_v38  ;;  %v8986_v21 = vld [vmem:[#allocation2 + $0x330] sm:$0xf]  ;;  %v8700_v19 = vld [vmem:[#allocation2 + $0x150] sm:$0xf0] }
  0xda   :  { %v12831_v25 = vld [vmem:[#allocation2 + $0x38c] sm:$0xf0] }
  0xdb   :  { %2847 = vmatpush.bf16.msrb.mxu1 %v9747_v39  ;;  %2875 = vmatpush.bf16.msrb.mxu3 %v9751_v46  ;;  %v9274_v39 = vld [vmem:[#allocation2 + $0x570] sm:$0xf]  ;;  %v14229_v45 = vpack.c.bf16 %v3246_v35, %v3222_v23  ;;  %v8595_v46 = vor.u32 %v12734_v27, %v8594_v22  ;;  %v2604_v51 = vadd.f32 %v2603_v41, %v2590_v40  ;;  %v584_v27 = vperm.slane %v14216_v24, 2 }
  0xdc   :  { %v9275_v56 = vor.u32 %v12903_v42, %v9274_v39  ;;  %v9851_v22 = vor.u32 %v13047_v15, %v9850_v13  ;;  %v8987_v34 = vor.u32 %v12831_v25, %v8986_v21  ;;  %v8890_v35 = vld [vmem:[#allocation2 + $0x270] sm:$0xf]  ;;  %v9468_v21 = vld [vmem:[#allocation2 + $0x750] sm:$0xf0] }
  0xdd   :  { %2834 = vmatpush.bf16.msrb.mxu0 %v8883_v53  ;;  %2862 = vmatpush.bf16.msrb.mxu2 %v8887_v55  ;;  %v8599_v53 = vor.u32 %v12722_v32, %v8596_v33  ;;  %v10044_v55 = vld [vmem:[#allocation2 + $0xbd0] sm:$0xf0]  ;;  %v3247_v57 = vmax.f32 %v2604_v51, 0.0  ;;  %v12807_v39 = vld [vmem:[#allocation2 + $0x2cc] sm:$0xf0] }
  0xde   :  { %v13011_v32 = vld [vmem:[#allocation2 + $0x934] sm:$0xf]  ;;  %v9658_v40 = vld [vmem:[#allocation2 + $0x870] sm:$0xf] }
  0xdf   :  { %2848 = vmatpush.bf16.msrb.mxu1 %v9651_v54  ;;  %2876 = vmatpush.bf16.msrb.mxu3 %v9655_v60  ;;  %v13083_v54 = vld [vmem:[#allocation2 + $0xb74] sm:$0xf]  ;;  %v9178_v60 = vld [vmem:[#allocation2 + $0x4b0] sm:$0xf]  ;;  %v14232_v3 = vpack.c.bf16 %v3247_v57, %v3223_v50 }
  0xe0   :  { %v10047_v63 = vor.u32 %v13083_v54, %v10044_v55  ;;  %v9179_v8 = vor.u32 %v12879_v61, %v9178_v60  ;;  %v9756_v33 = vld [vmem:[#allocation2 + $0x990] sm:$0xf0]  ;;  %v12999_v41 = vld [vmem:[#allocation2 + $0x8cc] sm:$0xf0] }
  0xe1   :  { %2835 = vmatpush.bf16.msrb.mxu0 %v8787_v6  ;;  %2863 = vmatpush.bf16.msrb.mxu2 %v8791_v11  ;;  %v13059_v6 = vld [vmem:[#allocation2 + $0xab4] sm:$0xf]  ;;  %v9082_v11 = vld [vmem:[#allocation2 + $0x3f0] sm:$0xf]  ;;  %v9759_v44 = vor.u32 %v13011_v32, %v9756_v33  ;;  %v9659_v54 = vor.u32 %v12999_v41, %v9658_v40 }
  0xe2   :  { %v9951_v14 = vor.u32 %v13059_v6, %v9948_v7  ;;  %v9083_v20 = vor.u32 %v12855_v12, %v9082_v11  ;;  %v12987_v50 = vld [vmem:[#allocation2 + $0x874] sm:$0xf]  ;;  %v9562_v57 = vld [vmem:[#allocation2 + $0x7b0] sm:$0xf] }
  0xe3   :  { %2849 = vmatpush.bf16.msrb.mxu1 %v9555_v10  ;;  %2877 = vmatpush.bf16.msrb.mxu3 %v9559_v17  ;;  %v9183_v10 = vor.u32 %v12867_v1, %v9180_v2  ;;  %v9084_v17 = vld [vmem:[#allocation2 + $0x450] sm:$0xf0]  ;;  %v12975_v60 = vld [vmem:[#allocation2 + $0x80c] sm:$0xf0] }
  0xe4   :  { %v9087_v23 = vor.u32 %v12843_v16, %v9084_v17  ;;  %v9660_v51 = vld [vmem:[#allocation2 + $0x8d0] sm:$0xf0]  ;;  %v8698_v7 = vld [vmem:[#allocation2 + $0xf0] sm:$0xf] }
  0xe5   :  { %2836 = vmatpush.bf16.msrb.mxu0 %v8691_v26  ;;  %2864 = vmatpush.bf16.msrb.mxu2 %v8695_v29  ;;  %v9754_v26 = vld [vmem:[#allocation2 + $0x930] sm:$0xf]  ;;  %v8988_v29 = vld [vmem:[#allocation2 + $0x390] sm:$0xf0] }
  0xe6   :  { %v9755_v37 = vor.u32 %v13023_v30, %v9754_v26  ;;  %v12771_v61 = vld [vmem:[#allocation2 + $0x1b4] sm:$0xf]  ;;  %v12759_v12 = vld [vmem:[#allocation2 + $0x14c] sm:$0xf0] }
  0xe7   :  { %2850 = vmatpush.bf16.msrb.mxu1 %v9459_v31  ;;  %2878 = vmatpush.bf16.msrb.mxu3 %v9463_v36  ;;  %v12819_v31 = vld [vmem:[#allocation2 + $0x334] sm:$0xf]  ;;  %v8799_v11 = vor.u32 %v12771_v61, %v8796_v62  ;;  %v9466_v13 = vld [vmem:[#allocation2 + $0x6f0] sm:$0xf]  ;;  %v8699_v26 = vor.u32 %v12759_v12, %v8698_v7  ;;  %v9186_v61 = vld [vmem:[#allocation2 + $0x4b8] sm:$0xf] }
  0xe8   :  { %v8991_v38 = vor.u32 %v12819_v31, %v8988_v29  ;;  %v12963_v1 = vld [vmem:[#allocation2 + $0x7b4] sm:$0xf]  ;;  %v9370_v30 = vld [vmem:[#allocation2 + $0x630] sm:$0xf]  ;;  %v12880_v62 = vld [vmem:[#allocation2 + $0x514] sm:$0xf0] }
  0xe9   :  { %2837 = vmatpush.bf16.msrb.mxu0 %v8595_v46  ;;  %2865 = vmatpush.bf16.msrb.mxu2 %v8599_v53  ;;  %v2615_v36 = vpop.f32.mrf.mxu0  ;;  %v12795_v46 = vld [vmem:[#allocation2 + $0x274] sm:$0xf]  ;;  %v8891_v53 = vor.u32 %v12807_v39, %v8890_v35  ;;  %v12927_v31 = vld [vmem:[#allocation2 + $0x68c] sm:$0xf0]  ;;  %v9282_v39 = vld [vmem:[#allocation2 + $0x578] sm:$0xf] }
  0xea   :  { %v2616_v42 = vadd.f32 %v2615_v36, %v584_v27  ;;  %v8895_v55 = vor.u32 %v12795_v46, %v8892_v47  ;;  %v9564_v2 = vld [vmem:[#allocation2 + $0x810] sm:$0xf0] }
  0xeb   :  { %2851 = vmatpush.bf16.msrb.mxu1 %v9363_v52  ;;  %2879 = vmatpush.bf16.msrb.mxu3 %v9367_v49  ;;  %v2629_v43 = vpop.f32.mrf.mxu1  ;;  %v8794_v49 = vld [vmem:[#allocation2 + $0x1b0] sm:$0xf]  ;;  %v9567_v17 = vor.u32 %v12963_v1, %v9564_v2  ;;  %v12723_v32 = vld [vmem:[#allocation2 + $0x34] sm:$0xf]  ;;  %v13072_v1 = vld [vmem:[#allocation2 + $0xb14] sm:$0xf0] }
  0xec   :  { %2866 = vmatmul.bf16.vlgmr.msrb.gmra.mxu2 %v14186_v4  ;;  %2838 = vmatmul.bf16.vlgmr.msrb.gmra.mxu0 %v14186_v4  ;;  %v14240_v52 = vadd.f32 %v2629_v43, %v2616_v42  ;;  %v8604_v33 = vld [vmem:[#allocation2 + $0x90] sm:$0xf0]  ;;  %v12904_v42 = vld [vmem:[#allocation2 + $0x5d4] sm:$0xf0]  ;;  %v12868_v2 = vld [vmem:[#allocation2 + $0x4bc] sm:$0xf] }
  0xed   :  { %2886 = vmatpush.bf16.msra.mxu0 %v9275_v56  ;;  %2914 = vmatpush.bf16.msra.mxu2 %v9279_v59  ;;  %v12783_v56 = vld [vmem:[#allocation2 + $0x20c] sm:$0xf0]  ;;  %v9663_v59 = vor.u32 %v12987_v50, %v9660_v51  ;;  %v10050_v43 = vld [vmem:[#allocation2 + $0xb78] sm:$0xf]  ;;  %v12892_v50 = vld [vmem:[#allocation2 + $0x57c] sm:$0xf] }
  0xee   :  { %2880 = vmatmul.bf16.vlgmr.msrb.gmra.mxu3 %v14191_v5  ;;  %2852 = vmatmul.bf16.vlgmr.msrb.gmra.mxu1 %v14191_v5  ;;  %v8795_v6 = vor.u32 %v12783_v56, %v8794_v49  ;;  %v9284_v51 = vld [vmem:[#allocation2 + $0x5d8] sm:$0xf0] }
  0xef   :  { %2900 = vmatpush.bf16.msra.mxu1 %v10043_v58  ;;  %2928 = vmatpush.bf16.msra.mxu3 %v10047_v63  ;;  %v2643_v58 = vpop.f32.mrf.mxu2  ;;  %v13084_v49 = vld [vmem:[#allocation2 + $0xb7c] sm:$0xf] }
  0xf0   :  { %v2644_v63 = vadd.f32 %v2643_v58, %v585_v48  ;;  %v10052_v56 = vld [vmem:[#allocation2 + $0xbd8] sm:$0xf0] }
  0xf1   :  { %2887 = vmatpush.bf16.msra.mxu0 %v9179_v8  ;;  %2915 = vmatpush.bf16.msra.mxu2 %v9183_v10  ;;  %v2657_v0 = vpop.f32.mrf.mxu3  ;;  %v9563_v10 = vor.u32 %v12975_v60, %v9562_v57  ;;  %v9283_v57 = vor.u32 %v12904_v42, %v9282_v39  ;;  %v9287_v60 = vor.u32 %v12892_v50, %v9284_v51  ;;  %v9666_v42 = vld [vmem:[#allocation2 + $0x878] sm:$0xf]  ;;  %v12796_v51 = vld [vmem:[#allocation2 + $0x27c] sm:$0xf] }
  0xf2   :  { %v14244_v8 = vadd.f32 %v2657_v0, %v2644_v63  ;;  %v9954_v63 = vld [vmem:[#allocation2 + $0xab8] sm:$0xf]  ;;  %v10055_v0 = vor.u32 %v13084_v49, %v10052_v56 }
  0xf3   :  { %2901 = vmatpush.bf16.msra.mxu1 %v9947_v9  ;;  %2929 = vmatpush.bf16.msra.mxu3 %v9951_v14  ;;  %v2617_v9 = vpop.f32.mrf.mxu0  ;;  %v12951_v14 = vld [vmem:[#allocation2 + $0x74c] sm:$0xf0]  ;;  %v2631_v16 = vpop.f32.mrf.mxu1 }
  0xf4   :  { %v2618_v15 = vadd.f32 %v2617_v9, %v584_v27  ;;  %v9467_v29 = vor.u32 %v12951_v14, %v9466_v13  ;;  %v8703_v27 = vor.u32 %v12747_v18, %v8700_v19  ;;  %v9956_v9 = vld [vmem:[#allocation2 + $0xb18] sm:$0xf0]  ;;  %v9090_v13 = vld [vmem:[#allocation2 + $0x3f8] sm:$0xf] }
  0xf5   :  { %2888 = vmatpush.bf16.msra.mxu0 %v9083_v20  ;;  %2916 = vmatpush.bf16.msra.mxu2 %v9087_v23  ;;  %v12939_v20 = vld [vmem:[#allocation2 + $0x6f4] sm:$0xf]  ;;  %v3224_v23 = vmax.f32 %v14240_v52, 0.0  ;;  %v3225_v52 = vmax.f32 %v14244_v8, 0.0  ;;  %v13060_v8 = vld [vmem:[#allocation2 + $0xabc] sm:$0xf] }
  0xf6   :  { %v2632_v25 = vadd.f32 %v2631_v16, %v2618_v15  ;;  %v9471_v36 = vor.u32 %v12939_v20, %v9468_v21  ;;  %v12856_v14 = vld [vmem:[#allocation2 + $0x454] sm:$0xf0]  ;;  %v9959_v16 = vor.u32 %v13060_v8, %v9956_v9  ;;  %v12844_v18 = vld [vmem:[#allocation2 + $0x3fc] sm:$0xf] }
  0xf7   :  { %2902 = vmatpush.bf16.msra.mxu1 %v9851_v22  ;;  %2930 = vmatpush.bf16.msra.mxu3 %v9855_v28  ;;  %v8602_v22 = vld [vmem:[#allocation2 + $0x30] sm:$0xf]  ;;  %v9858_v15 = vld [vmem:[#allocation2 + $0x9f8] sm:$0xf]  ;;  %v9092_v19 = vld [vmem:[#allocation2 + $0x458] sm:$0xf0] }
  0xf8   :  { %v12735_v28 = vld [vmem:[#allocation2 + $0x8c] sm:$0xf0]  ;;  %v3248_v35 = vmax.f32 %v2632_v25, 0.0  ;;  %v13036_v20 = vld [vmem:[#allocation2 + $0x9fc] sm:$0xf] }
  0xf9   :  { %2889 = vmatpush.bf16.msra.mxu0 %v8987_v34  ;;  %2917 = vmatpush.bf16.msra.mxu2 %v8991_v38  ;;  %v2645_v34 = vpop.f32.mrf.mxu2  ;;  %v9372_v38 = vld [vmem:[#allocation2 + $0x690] sm:$0xf0]  ;;  %v2659_v41 = vpop.f32.mrf.mxu3  ;;  %v8603_v47 = vor.u32 %v12735_v28, %v8602_v22  ;;  %v9860_v21 = vld [vmem:[#allocation2 + $0xa58] sm:$0xf0]  ;;  %v9091_v22 = vor.u32 %v12856_v14, %v9090_v13  ;;  %v12832_v28 = vld [vmem:[#allocation2 + $0x394] sm:$0xf0] }
  0xfa   :  { %v2646_v40 = vadd.f32 %v2645_v34, %v585_v48  ;;  %v14249_v46 = vpack.c.bf16 %v3248_v35, %v3224_v23  ;;  %v8994_v23 = vld [vmem:[#allocation2 + $0x338] sm:$0xf]  ;;  %v13012_v34 = vld [vmem:[#allocation2 + $0x93c] sm:$0xf] }
  0xfb   :  { %2903 = vmatpush.bf16.msra.mxu1 %v9755_v37  ;;  %2931 = vmatpush.bf16.msra.mxu3 %v9759_v44  ;;  %v12915_v37 = vld [vmem:[#allocation2 + $0x634] sm:$0xf]  ;;  %v13096_v44 = vld [vmem:[#allocation2 + $0xbd4] sm:$0xf0]  ;;  %v9764_v35 = vld [vmem:[#allocation2 + $0x998] sm:$0xf0] }
  0xfc   :  { %v9375_v48 = vor.u32 %v12915_v37, %v9372_v38  ;;  %v8898_v37 = vld [vmem:[#allocation2 + $0x278] sm:$0xf]  ;;  %v9767_v50 = vor.u32 %v13012_v34, %v9764_v35  ;;  %v12964_v8 = vld [vmem:[#allocation2 + $0x7bc] sm:$0xf] }
  0xfd   :  { %2890 = vmatpush.bf16.msra.mxu0 %v8891_v53  ;;  %2918 = vmatpush.bf16.msra.mxu2 %v8895_v55  ;;  %v2660_v53 = vadd.f32 %v2659_v41, %v2646_v40  ;;  %v8607_v55 = vor.u32 %v12723_v32, %v8604_v33  ;;  %v12820_v32 = vld [vmem:[#allocation2 + $0x33c] sm:$0xf]  ;;  %v12808_v41 = vld [vmem:[#allocation2 + $0x2d4] sm:$0xf0] }
  0xfe   :  { %v8996_v33 = vld [vmem:[#allocation2 + $0x398] sm:$0xf0]  ;;  %v8899_v56 = vor.u32 %v12808_v41, %v8898_v37  ;;  %v12928_v34 = vld [vmem:[#allocation2 + $0x694] sm:$0xf0] }
  0xff   :  { %2904 = vmatpush.bf16.msra.mxu1 %v9659_v54  ;;  %2932 = vmatpush.bf16.msra.mxu3 %v9663_v59  ;;  %v9371_v54 = vor.u32 %v12927_v31, %v9370_v30  ;;  %v3249_v58 = vmax.f32 %v2660_v53, 0.0  ;;  %v10051_v59 = vor.u32 %v13096_v44, %v10050_v43  ;;  %v9762_v30 = vld [vmem:[#allocation2 + $0x938] sm:$0xf]  ;;  %v586_v31 = vperm.slane %v14216_v24, 4  ;;  %v9572_v9 = vld [vmem:[#allocation2 + $0x818] sm:$0xf0] }
 0x100   :  { %v8999_v40 = vor.u32 %v12820_v32, %v8996_v33  ;;  %v13000_v43 = vld [vmem:[#allocation2 + $0x8d4] sm:$0xf0]  ;;  %v587_v53 = vperm.slane %v14216_v24, 5  ;;  %v8612_v37 = vld [vmem:[#allocation2 + $0x98] sm:$0xf0] }
 0x101   :  { %2891 = vmatpush.bf16.msra.mxu0 %v8795_v6  ;;  %2919 = vmatpush.bf16.msra.mxu2 %v8799_v11  ;;  %v9188_v6 = vld [vmem:[#allocation2 + $0x518] sm:$0xf0]  ;;  %v14252_v7 = vpack.c.bf16 %v3249_v58, %v3225_v52  ;;  %v9955_v11 = vor.u32 %v13072_v1, %v9954_v63  ;;  %v8802_v58 = vld [vmem:[#allocation2 + $0x1b8] sm:$0xf] }
 0x102   :  { %v9191_v12 = vor.u32 %v12868_v2, %v9188_v6  ;;  %v8900_v52 = vld [vmem:[#allocation2 + $0x2d8] sm:$0xf0]  ;;  %v12976_v63 = vld [vmem:[#allocation2 + $0x814] sm:$0xf0] }
 0x103   :  { %2905 = vmatpush.bf16.msra.mxu1 %v9563_v10  ;;  %2933 = vmatpush.bf16.msra.mxu3 %v9567_v17  ;;  %v9187_v10 = vor.u32 %v12880_v62, %v9186_v61  ;;  %v13048_v17 = vld [vmem:[#allocation2 + $0xa54] sm:$0xf0]  ;;  %v8804_v1 = vld [vmem:[#allocation2 + $0x218] sm:$0xf0] }
 0x104   :  { %v9859_v25 = vor.u32 %v13048_v17, %v9858_v15  ;;  %v9474_v17 = vld [vmem:[#allocation2 + $0x6f8] sm:$0xf]  ;;  %v12916_v41 = vld [vmem:[#allocation2 + $0x63c] sm:$0xf] }
 0x105   :  { %2892 = vmatpush.bf16.msra.mxu0 %v8699_v26  ;;  %2920 = vmatpush.bf16.msra.mxu2 %v8703_v27  ;;  %v9095_v26 = vor.u32 %v12844_v18, %v9092_v19  ;;  %v13024_v27 = vld [vmem:[#allocation2 + $0x994] sm:$0xf0] }
 0x106   :  { %v9763_v39 = vor.u32 %v13024_v27, %v9762_v30  ;;  %v12952_v18 = vld [vmem:[#allocation2 + $0x754] sm:$0xf0] }
 0x107   :  { %2906 = vmatpush.bf16.msra.mxu1 %v9467_v29  ;;  %2934 = vmatpush.bf16.msra.mxu3 %v9471_v36  ;;  %v9863_v29 = vor.u32 %v13036_v20, %v9860_v21  ;;  %v8995_v36 = vor.u32 %v12832_v28, %v8994_v23  ;;  %v9575_v21 = vor.u32 %v12964_v8, %v9572_v9  ;;  %v8708_v23 = vld [vmem:[#allocation2 + $0x158] sm:$0xf0]  ;;  %v8610_v28 = vld [vmem:[#allocation2 + $0x38] sm:$0xf]  ;;  %v9962_v8 = vld [vmem:[#allocation2 + $0xac0] sm:$0xf] }
 0x108   :  { %v12736_v32 = vld [vmem:[#allocation2 + $0x94] sm:$0xf0]  ;;  %v9475_v35 = vor.u32 %v12952_v18, %v9474_v17 }
 0x109   :  { %2893 = vmatpush.bf16.msra.mxu0 %v8603_v47  ;;  %2921 = vmatpush.bf16.msra.mxu2 %v8607_v55  ;;  %v2671_v38 = vpop.f32.mrf.mxu0  ;;  %v9668_v55 = vld [vmem:[#allocation2 + $0x8d8] sm:$0xf0]  ;;  %v9378_v33 = vld [vmem:[#allocation2 + $0x638] sm:$0xf] }
 0x10a   :  { %v2672_v44 = vadd.f32 %v2671_v38, %v586_v31 }
 0x10b   :  { %2907 = vmatpush.bf16.msra.mxu1 %v9371_v54  ;;  %2935 = vmatpush.bf16.msra.mxu3 %v9375_v48  ;;  %v2685_v47 = vpop.f32.mrf.mxu1  ;;  %v12988_v54 = vld [vmem:[#allocation2 + $0x87c] sm:$0xf]  ;;  %v9667_v48 = vor.u32 %v13000_v43, %v9666_v42  ;;  %v9290_v43 = vld [vmem:[#allocation2 + $0x580] sm:$0xf] }
 0x10c   :  { %2922 = vmatmul.bf16.vlgmr.msra.gmra.mxu2 %v14186_v4  ;;  %2894 = vmatmul.bf16.vlgmr.msra.gmra.mxu0 %v14186_v4  ;;  %v14260_v49 = vadd.f32 %v2685_v47, %v2672_v44  ;;  %v9671_v62 = vor.u32 %v12988_v54, %v9668_v55  ;;  %v9380_v42 = vld [vmem:[#allocation2 + $0x698] sm:$0xf0]  ;;  %v8611_v55 = vor.u32 %v12736_v32, %v8610_v28  ;;  %v13037_v28 = vld [vmem:[#allocation2 + $0xa04] sm:$0xf] }
 0x10d   :  { %2942 = vmatpush.bf16.msrb.mxu0 %v9283_v57  ;;  %2970 = vmatpush.bf16.msrb.mxu2 %v9287_v60  ;;  %v8903_v57 = vor.u32 %v12796_v51, %v8900_v52  ;;  %v9570_v60 = vld [vmem:[#allocation2 + $0x7b8] sm:$0xf]  ;;  %v10058_v51 = vld [vmem:[#allocation2 + $0xb80] sm:$0xf] }
 0x10e   :  { %2936 = vmatmul.bf16.vlgmr.msra.gmra.mxu3 %v14191_v5  ;;  %2908 = vmatmul.bf16.vlgmr.msra.gmra.mxu1 %v14191_v5  ;;  %v9571_v14 = vor.u32 %v12976_v63, %v9570_v60  ;;  %v3226_v30 = vmax.f32 %v14260_v49, 0.0  ;;  %v13097_v52 = vld [vmem:[#allocation2 + $0xbdc] sm:$0xf0]  ;;  %v12893_v49 = vld [vmem:[#allocation2 + $0x584] sm:$0xf] }
 0x10f   :  { %2956 = vmatpush.bf16.msrb.mxu1 %v10051_v59  ;;  %2984 = vmatpush.bf16.msrb.mxu3 %v10055_v0  ;;  %v12784_v59 = vld [vmem:[#allocation2 + $0x214] sm:$0xf0]  ;;  %v2699_v61 = vpop.f32.mrf.mxu2  ;;  %v12772_v0 = vld [vmem:[#allocation2 + $0x1bc] sm:$0xf]  ;;  %v13085_v60 = vld [vmem:[#allocation2 + $0xb84] sm:$0xf] }
 0x110   :  { %v2700_v2 = vadd.f32 %v2699_v61, %v587_v53  ;;  %v8807_v15 = vor.u32 %v12772_v0, %v8804_v1  ;;  %v10060_v61 = vld [vmem:[#allocation2 + $0xbe0] sm:$0xf0]  ;;  %v10059_v0 = vor.u32 %v13097_v52, %v10058_v51  ;;  %v12809_v51 = vld [vmem:[#allocation2 + $0x2dc] sm:$0xf0] }
 0x111   :  { %2943 = vmatpush.bf16.msrb.mxu0 %v9187_v10  ;;  %2971 = vmatpush.bf16.msrb.mxu2 %v9191_v12  ;;  %v2713_v6 = vpop.f32.mrf.mxu3  ;;  %v8803_v10 = vor.u32 %v12784_v59, %v8802_v58  ;;  %v2673_v13 = vpop.f32.mrf.mxu0  ;;  %v9379_v58 = vor.u32 %v12928_v34, %v9378_v33  ;;  %v10063_v9 = vor.u32 %v13085_v60, %v10060_v61  ;;  %v12833_v34 = vld [vmem:[#allocation2 + $0x39c] sm:$0xf0]  ;;  %v12989_v60 = vld [vmem:[#allocation2 + $0x884] sm:$0xf] }
 0x112   :  { %v14264_v12 = vadd.f32 %v2713_v6, %v2700_v2  ;;  %v2674_v19 = vadd.f32 %v2673_v13, %v586_v31  ;;  %v9194_v2 = vld [vmem:[#allocation2 + $0x4c0] sm:$0xf]  ;;  %v9676_v61 = vld [vmem:[#allocation2 + $0x8e0] sm:$0xf0] }
 0x113   :  { %2957 = vmatpush.bf16.msrb.mxu1 %v9955_v11  ;;  %2985 = vmatpush.bf16.msrb.mxu3 %v9959_v16  ;;  %v8706_v11 = vld [vmem:[#allocation2 + $0xf8] sm:$0xf]  ;;  %v2687_v20 = vpop.f32.mrf.mxu1  ;;  %v12881_v6 = vld [vmem:[#allocation2 + $0x51c] sm:$0xf0] }
 0x114   :  { %v12760_v16 = vld [vmem:[#allocation2 + $0x154] sm:$0xf0]  ;;  %v9674_v52 = vld [vmem:[#allocation2 + $0x880] sm:$0xf] }
 0x115   :  { %2944 = vmatpush.bf16.msrb.mxu0 %v9091_v22  ;;  %2972 = vmatpush.bf16.msrb.mxu2 %v9095_v26  ;;  %v12748_v22 = vld [vmem:[#allocation2 + $0xfc] sm:$0xf]  ;;  %v8707_v27 = vor.u32 %v12760_v16, %v8706_v11  ;;  %v12869_v11 = vld [vmem:[#allocation2 + $0x4c4] sm:$0xf]  ;;  %v9195_v16 = vor.u32 %v12881_v6, %v9194_v2  ;;  %v12785_v2 = vld [vmem:[#allocation2 + $0x21c] sm:$0xf0] }
 0x116   :  { %v9476_v26 = vld [vmem:[#allocation2 + $0x758] sm:$0xf0]  ;;  %v8711_v31 = vor.u32 %v12748_v22, %v8708_v23  ;;  %v13049_v23 = vld [vmem:[#allocation2 + $0xa5c] sm:$0xf0] }
 0x117   :  { %2958 = vmatpush.bf16.msrb.mxu1 %v9859_v25  ;;  %2986 = vmatpush.bf16.msrb.mxu3 %v9863_v29  ;;  %v12940_v25 = vld [vmem:[#allocation2 + $0x6fc] sm:$0xf]  ;;  %v2688_v29 = vadd.f32 %v2687_v20, %v2674_v19  ;;  %v2701_v38 = vpop.f32.mrf.mxu2  ;;  %v9098_v19 = vld [vmem:[#allocation2 + $0x400] sm:$0xf] }
 0x118   :  { %v2702_v44 = vadd.f32 %v2701_v38, %v587_v53  ;;  %v9383_v53 = vor.u32 %v12916_v41, %v9380_v42  ;;  %v12857_v20 = vld [vmem:[#allocation2 + $0x45c] sm:$0xf0]  ;;  %v12821_v38 = vld [vmem:[#allocation2 + $0x344] sm:$0xf] }
 0x119   :  { %2945 = vmatpush.bf16.msrb.mxu0 %v8995_v36  ;;  %2973 = vmatpush.bf16.msrb.mxu2 %v8999_v40  ;;  %v12724_v36 = vld [vmem:[#allocation2 + $0x3c] sm:$0xf]  ;;  %v9479_v40 = vor.u32 %v12940_v25, %v9476_v26  ;;  %v2715_v47 = vpop.f32.mrf.mxu3  ;;  %v12845_v25 = vld [vmem:[#allocation2 + $0x404] sm:$0xf]  ;;  %v9578_v6 = vld [vmem:[#allocation2 + $0x7c0] sm:$0xf] }
 0x11a   :  { %v8615_v59 = vor.u32 %v12724_v36, %v8612_v37  ;;  %v9100_v26 = vld [vmem:[#allocation2 + $0x460] sm:$0xf0]  ;;  %v13025_v37 = vld [vmem:[#allocation2 + $0x99c] sm:$0xf0] }
 0x11b   :  { %2959 = vmatpush.bf16.msrb.mxu1 %v9763_v39  ;;  %2987 = vmatpush.bf16.msrb.mxu3 %v9767_v50  ;;  %v3250_v39 = vmax.f32 %v2688_v29, 0.0  ;;  %v12905_v50 = vld [vmem:[#allocation2 + $0x5dc] sm:$0xf0]  ;;  %v9099_v29 = vor.u32 %v12857_v20, %v9098_v19  ;;  %v9103_v33 = vor.u32 %v12845_v25, %v9100_v26  ;;  %v9772_v41 = vld [vmem:[#allocation2 + $0x9a0] sm:$0xf0] }
 0x11c   :  { %v8714_v19 = vld [vmem:[#allocation2 + $0x100] sm:$0xf] }
 0x11d   :  { %2946 = vmatpush.bf16.msrb.mxu0 %v8899_v56  ;;  %2974 = vmatpush.bf16.msrb.mxu2 %v8903_v57  ;;  %v14269_v54 = vpack.c.bf16 %v3250_v39, %v3226_v30  ;;  %v9292_v56 = vld [vmem:[#allocation2 + $0x5e0] sm:$0xf0]  ;;  %v2716_v57 = vadd.f32 %v2715_v47, %v2702_v44  ;;  %v12761_v25 = vld [vmem:[#allocation2 + $0x15c] sm:$0xf0] }
 0x11e   :  { %v9295_v1 = vor.u32 %v12893_v49, %v9292_v56  ;;  %v9868_v30 = vld [vmem:[#allocation2 + $0xa60] sm:$0xf0]  ;;  %v9482_v26 = vld [vmem:[#allocation2 + $0x700] sm:$0xf] }
 0x11f   :  { %2960 = vmatpush.bf16.msrb.mxu1 %v9667_v48  ;;  %2988 = vmatpush.bf16.msrb.mxu3 %v9671_v62  ;;  %v3227_v48 = vmax.f32 %v14264_v12, 0.0  ;;  %v9291_v62 = vor.u32 %v12905_v50, %v9290_v43  ;;  %v3251_v63 = vmax.f32 %v2716_v57, 0.0  ;;  %v9196_v12 = vld [vmem:[#allocation2 + $0x520] sm:$0xf0]  ;;  %v9871_v36 = vor.u32 %v13037_v28, %v9868_v30  ;;  %v8906_v43 = vld [vmem:[#allocation2 + $0x280] sm:$0xf] }
 0x120   :  { %v9199_v18 = vor.u32 %v12869_v11, %v9196_v12  ;;  %v9004_v39 = vld [vmem:[#allocation2 + $0x3a0] sm:$0xf0]  ;;  %v12953_v28 = vld [vmem:[#allocation2 + $0x75c] sm:$0xf0] }
 0x121   :  { %2947 = vmatpush.bf16.msrb.mxu0 %v8803_v10  ;;  %2975 = vmatpush.bf16.msrb.mxu2 %v8807_v15  ;;  %v13073_v10 = vld [vmem:[#allocation2 + $0xb1c] sm:$0xf0]  ;;  %v14272_v13 = vpack.c.bf16 %v3251_v63, %v3227_v48  ;;  %v9964_v15 = vld [vmem:[#allocation2 + $0xb20] sm:$0xf0]  ;;  %v9007_v50 = vor.u32 %v12821_v38, %v9004_v39  ;;  %v8715_v39 = vor.u32 %v12761_v25, %v8714_v19  ;;  %v13074_v19 = vld [vmem:[#allocation2 + $0xb24] sm:$0xf0] }
 0x122   :  { %v9963_v17 = vor.u32 %v13073_v10, %v9962_v8  ;;  %v12797_v57 = vld [vmem:[#allocation2 + $0x284] sm:$0xf]  ;;  %v12977_v10 = vld [vmem:[#allocation2 + $0x81c] sm:$0xf0]  ;;  %v9972_v25 = vld [vmem:[#allocation2 + $0xb28] sm:$0xf0] }
 0x123   :  { %2961 = vmatpush.bf16.msrb.mxu1 %v9571_v14  ;;  %2989 = vmatpush.bf16.msrb.mxu3 %v9575_v21  ;;  %v13061_v14 = vld [vmem:[#allocation2 + $0xac4] sm:$0xf]  ;;  %v9866_v21 = vld [vmem:[#allocation2 + $0xa00] sm:$0xf] }
 0x124   :  { %v9967_v22 = vor.u32 %v13061_v14, %v9964_v15  ;;  %v9867_v32 = vor.u32 %v13049_v23, %v9866_v21  ;;  %v12773_v11 = vld [vmem:[#allocation2 + $0x1c4] sm:$0xf] }
 0x125   :  { %2948 = vmatpush.bf16.msrb.mxu0 %v8707_v27  ;;  %2976 = vmatpush.bf16.msrb.mxu2 %v8711_v31  ;;  %v9002_v27 = vld [vmem:[#allocation2 + $0x340] sm:$0xf]  ;;  %v588_v31 = vperm.slane %v14216_v24, 6  ;;  %v8812_v12 = vld [vmem:[#allocation2 + $0x220] sm:$0xf0] }
 0x126   :  { %v9003_v42 = vor.u32 %v12833_v34, %v9002_v27  ;;  %v8815_v23 = vor.u32 %v12773_v11, %v8812_v12  ;;  %v12941_v34 = vld [vmem:[#allocation2 + $0x704] sm:$0xf] }
 0x127   :  { %2962 = vmatpush.bf16.msrb.mxu1 %v9475_v35  ;;  %2990 = vmatpush.bf16.msrb.mxu3 %v9479_v40  ;;  %v9770_v35 = vld [vmem:[#allocation2 + $0x940] sm:$0xf]  ;;  %v13013_v40 = vld [vmem:[#allocation2 + $0x944] sm:$0xf] }
 0x128   :  { %v9771_v47 = vor.u32 %v13025_v37, %v9770_v35  ;;  %v9775_v48 = vor.u32 %v13013_v40, %v9772_v41  ;;  %v9484_v35 = vld [vmem:[#allocation2 + $0x760] sm:$0xf0]  ;;  %v12737_v40 = vld [vmem:[#allocation2 + $0x9c] sm:$0xf0] }
 0x129   :  { %2949 = vmatpush.bf16.msrb.mxu0 %v8611_v55  ;;  %2977 = vmatpush.bf16.msrb.mxu2 %v8615_v59  ;;  %v2727_v44 = vpop.f32.mrf.mxu0  ;;  %v13001_v55 = vld [vmem:[#allocation2 + $0x8dc] sm:$0xf0]  ;;  %v589_v59 = vperm.slane %v14216_v24, 7  ;;  %v10068_v24 = vld [vmem:[#allocation2 + $0xbe8] sm:$0xf0] }
 0x12a   :  { %v2728_v49 = vadd.f32 %v2727_v44, %v588_v31  ;;  %v9675_v63 = vor.u32 %v13001_v55, %v9674_v52  ;;  %v9386_v41 = vld [vmem:[#allocation2 + $0x640] sm:$0xf]  ;;  %v12725_v44 = vld [vmem:[#allocation2 + $0x44] sm:$0xf]  ;;  %v9487_v52 = vor.u32 %v12941_v34, %v9484_v35  ;;  %v13050_v34 = vld [vmem:[#allocation2 + $0xa64] sm:$0xf0] }
 0x12b   :  { %2963 = vmatpush.bf16.msrb.mxu1 %v9379_v58  ;;  %2991 = vmatpush.bf16.msrb.mxu3 %v9383_v53  ;;  %v2741_v56 = vpop.f32.mrf.mxu1  ;;  %v8908_v58 = vld [vmem:[#allocation2 + $0x2e0] sm:$0xf0]  ;;  %v12846_v35 = vld [vmem:[#allocation2 + $0x40c] sm:$0xf] }
 0x12c   :  { %2978 = vmatmul.bf16.vlgmr.msrb.gmra.mxu2 %v14186_v4  ;;  %2950 = vmatmul.bf16.vlgmr.msrb.gmra.mxu0 %v14186_v4  ;;  %v14280_v53 = vadd.f32 %v2741_v56, %v2728_v49  ;;  %v12917_v55 = vld [vmem:[#allocation2 + $0x644] sm:$0xf]  ;;  %v9298_v56 = vld [vmem:[#allocation2 + $0x588] sm:$0xf] }
 0x12d   :  { %2998 = vmatpush.bf16.msra.mxu0 %v9291_v62  ;;  %3026 = vmatpush.bf16.msra.mxu2 %v9295_v1  ;;  %v8907_v62 = vor.u32 %v12809_v51, %v8906_v43  ;;  %v8810_v1 = vld [vmem:[#allocation2 + $0x1c0] sm:$0xf]  ;;  %v9483_v43 = vor.u32 %v12953_v28, %v9482_v26  ;;  %v9388_v49 = vld [vmem:[#allocation2 + $0x6a0] sm:$0xf0] }
 0x12e   :  { %2992 = vmatmul.bf16.vlgmr.msrb.gmra.mxu3 %v14191_v5  ;;  %2964 = vmatmul.bf16.vlgmr.msrb.gmra.mxu1 %v14191_v5  ;;  %v3228_v37 = vmax.f32 %v14280_v53, 0.0 }
 0x12f   :  { %3012 = vmatpush.bf16.msra.mxu1 %v10059_v0  ;;  %3040 = vmatpush.bf16.msra.mxu3 %v10063_v9  ;;  %v8911_v0 = vor.u32 %v12797_v57, %v8908_v58  ;;  %v2755_v8 = vpop.f32.mrf.mxu2  ;;  %v9679_v9 = vor.u32 %v12989_v60, %v9676_v61  ;;  %v12906_v58 = vld [vmem:[#allocation2 + $0x5e4] sm:$0xf0] }
 0x130   :  { %v2756_v14 = vadd.f32 %v2755_v8, %v589_v59  ;;  %v10066_v60 = vld [vmem:[#allocation2 + $0xb88] sm:$0xf] }
 0x131   :  { %2999 = vmatpush.bf16.msra.mxu0 %v9195_v16  ;;  %3027 = vmatpush.bf16.msra.mxu2 %v9199_v18  ;;  %v2769_v15 = vpop.f32.mrf.mxu3  ;;  %v12965_v16 = vld [vmem:[#allocation2 + $0x7c4] sm:$0xf]  ;;  %v8811_v18 = vor.u32 %v12785_v2, %v8810_v1  ;;  %v2729_v21 = vpop.f32.mrf.mxu0  ;;  %v13098_v61 = vld [vmem:[#allocation2 + $0xbe4] sm:$0xf0] }
 0x132   :  { %v14284_v20 = vadd.f32 %v2769_v15, %v2756_v14  ;;  %v2730_v30 = vadd.f32 %v2729_v21, %v588_v31  ;;  %v10067_v12 = vor.u32 %v13098_v61, %v10066_v60  ;;  %v9202_v15 = vld [vmem:[#allocation2 + $0x4c8] sm:$0xf]  ;;  %v9204_v21 = vld [vmem:[#allocation2 + $0x528] sm:$0xf0] }
 0x133   :  { %3013 = vmatpush.bf16.msra.mxu1 %v9963_v17  ;;  %3041 = vmatpush.bf16.msra.mxu3 %v9967_v22  ;;  %v9580_v17 = vld [vmem:[#allocation2 + $0x820] sm:$0xf0]  ;;  %v9579_v22 = vor.u32 %v12977_v10, %v9578_v6  ;;  %v9299_v10 = vor.u32 %v12906_v58, %v9298_v56  ;;  %v9780_v56 = vld [vmem:[#allocation2 + $0x9a8] sm:$0xf0] }
 0x134   :  { %v9583_v27 = vor.u32 %v12965_v16, %v9580_v17  ;;  %v3229_v1 = vmax.f32 %v14284_v20, 0.0  ;;  %v12882_v16 = vld [vmem:[#allocation2 + $0x524] sm:$0xf0]  ;;  %v12870_v20 = vld [vmem:[#allocation2 + $0x4cc] sm:$0xf] }
 0x135   :  { %3000 = vmatpush.bf16.msra.mxu0 %v9099_v29  ;;  %3028 = vmatpush.bf16.msra.mxu2 %v9103_v33  ;;  %v2743_v29 = vpop.f32.mrf.mxu1  ;;  %v8716_v33 = vld [vmem:[#allocation2 + $0x160] sm:$0xf0]  ;;  %v9970_v17 = vld [vmem:[#allocation2 + $0xac8] sm:$0xf]  ;;  %v9203_v26 = vor.u32 %v12882_v16, %v9202_v15 }
 0x136   :  { %v2744_v38 = vadd.f32 %v2743_v29, %v2730_v30  ;;  %v9971_v28 = vor.u32 %v13074_v19, %v9970_v17  ;;  %v9207_v30 = vor.u32 %v12870_v20, %v9204_v21  ;;  %v9106_v29 = vld [vmem:[#allocation2 + $0x408] sm:$0xf] }
 0x137   :  { %3014 = vmatpush.bf16.msra.mxu1 %v9867_v32  ;;  %3042 = vmatpush.bf16.msra.mxu3 %v9871_v36  ;;  %v12749_v32 = vld [vmem:[#allocation2 + $0x104] sm:$0xf]  ;;  %v8618_v36 = vld [vmem:[#allocation2 + $0x40] sm:$0xf]  ;;  %v8818_v16 = vld [vmem:[#allocation2 + $0x1c8] sm:$0xf] }
 0x138   :  { %v8719_v31 = vor.u32 %v12749_v32, %v8716_v33  ;;  %v3252_v51 = vmax.f32 %v2744_v38, 0.0  ;;  %v9874_v32 = vld [vmem:[#allocation2 + $0xa08] sm:$0xf]  ;;  %v9876_v38 = vld [vmem:[#allocation2 + $0xa68] sm:$0xf0] }
 0x139   :  { %3001 = vmatpush.bf16.msra.mxu0 %v9003_v42  ;;  %3029 = vmatpush.bf16.msra.mxu2 %v9007_v50  ;;  %v12929_v42 = vld [vmem:[#allocation2 + $0x69c] sm:$0xf0]  ;;  %v2757_v50 = vpop.f32.mrf.mxu2  ;;  %v2771_v57 = vpop.f32.mrf.mxu3  ;;  %v12786_v17 = vld [vmem:[#allocation2 + $0x224] sm:$0xf0] }
 0x13a   :  { %v14289_v53 = vpack.c.bf16 %v3252_v51, %v3228_v37  ;;  %v9387_v6 = vor.u32 %v12929_v42, %v9386_v41  ;;  %v13038_v37 = vld [vmem:[#allocation2 + $0xa0c] sm:$0xf]  ;;  %v9875_v42 = vor.u32 %v13050_v34, %v9874_v32  ;;  %v13026_v51 = vld [vmem:[#allocation2 + $0x9a4] sm:$0xf0] }
 0x13b   :  { %3015 = vmatpush.bf16.msra.mxu1 %v9771_v47  ;;  %3043 = vmatpush.bf16.msra.mxu3 %v9775_v48  ;;  %v8620_v47 = vld [vmem:[#allocation2 + $0xa0] sm:$0xf0]  ;;  %v2758_v48 = vadd.f32 %v2757_v50, %v589_v59  ;;  %v9391_v59 = vor.u32 %v12917_v55, %v9388_v49  ;;  %v14298_v41 = vld [vmem:[#allocation11 + $0x8] sm:$0xff]  ;;  %v9879_v50 = vor.u32 %v13038_v37, %v9876_v38 }
 0x13c   :  { %v8623_v8 = vor.u32 %v12725_v44, %v8620_v47  ;;  %v9778_v44 = vld [vmem:[#allocation2 + $0x948] sm:$0xf]  ;;  %v590_v47 = vperm.slane %v14298_v41, 0  ;;  %v9012_v55 = vld [vmem:[#allocation2 + $0x3a8] sm:$0xf0] }
 0x13d   :  { %3002 = vmatpush.bf16.msra.mxu0 %v8907_v62  ;;  %3030 = vmatpush.bf16.msra.mxu2 %v8911_v0  ;;  %v8619_v62 = vor.u32 %v12737_v40, %v8618_v36  ;;  %v9300_v0 = vld [vmem:[#allocation2 + $0x5e8] sm:$0xf0]  ;;  %v2772_v2 = vadd.f32 %v2771_v57, %v2758_v48  ;;  %v9010_v40 = vld [vmem:[#allocation2 + $0x348] sm:$0xf]  ;;  %v9779_v60 = vor.u32 %v13026_v51, %v9778_v44 }
 0x13e   :  { %v9108_v36 = vld [vmem:[#allocation2 + $0x468] sm:$0xf0]  ;;  %v8914_v57 = vld [vmem:[#allocation2 + $0x288] sm:$0xf] }
 0x13f   :  { %3016 = vmatpush.bf16.msra.mxu1 %v9675_v63  ;;  %3044 = vmatpush.bf16.msra.mxu3 %v9679_v9  ;;  %v12894_v63 = vld [vmem:[#allocation2 + $0x58c] sm:$0xf]  ;;  %v3253_v11 = vmax.f32 %v2772_v2, 0.0  ;;  %v12978_v21 = vld [vmem:[#allocation2 + $0x824] sm:$0xf0] }
 0x140   :  { %v13086_v9 = vld [vmem:[#allocation2 + $0xb8c] sm:$0xf]  ;;  %v9303_v14 = vor.u32 %v12894_v63, %v9300_v0  ;;  %v9682_v63 = vld [vmem:[#allocation2 + $0x888] sm:$0xf] }
 0x141   :  { %3003 = vmatpush.bf16.msra.mxu0 %v8811_v18  ;;  %3031 = vmatpush.bf16.msra.mxu2 %v8815_v23  ;;  %v10071_v18 = vor.u32 %v13086_v9, %v10068_v24  ;;  %v13062_v23 = vld [vmem:[#allocation2 + $0xacc] sm:$0xf]  ;;  %v13002_v0 = vld [vmem:[#allocation2 + $0x8e4] sm:$0xf0]  ;;  %v591_v24 = vperm.slane %v14298_v41, 1 }
 0x142   :  { %v9975_v33 = vor.u32 %v13062_v23, %v9972_v25  ;;  %v13014_v49 = vld [vmem:[#allocation2 + $0x94c] sm:$0xf]  ;;  %v8722_v32 = vld [vmem:[#allocation2 + $0x108] sm:$0xf] }
 0x143   :  { %3017 = vmatpush.bf16.msra.mxu1 %v9579_v22  ;;  %3045 = vmatpush.bf16.msra.mxu3 %v9583_v27  ;;  %v14292_v22 = vpack.c.bf16 %v3253_v11, %v3229_v1  ;;  %v12858_v27 = vld [vmem:[#allocation2 + $0x464] sm:$0xf0]  ;;  %v8916_v9 = vld [vmem:[#allocation2 + $0x2e8] sm:$0xf0] }
 0x144   :  { %v12774_v23 = vld [vmem:[#allocation2 + $0x1cc] sm:$0xf]  ;;  %v12762_v37 = vld [vmem:[#allocation2 + $0x164] sm:$0xf0] }
 0x145   :  { %3004 = vmatpush.bf16.msra.mxu0 %v8715_v39  ;;  %3032 = vmatpush.bf16.msra.mxu2 %v8719_v31  ;;  %v9107_v39 = vor.u32 %v12858_v27, %v9106_v29  ;;  %v12834_v31 = vld [vmem:[#allocation2 + $0x3a4] sm:$0xf0]  ;;  %v8820_v25 = vld [vmem:[#allocation2 + $0x228] sm:$0xf0]  ;;  %v8819_v27 = vor.u32 %v12786_v17, %v8818_v16  ;;  %v12895_v16 = vld [vmem:[#allocation2 + $0x594] sm:$0xf] }
 0x146   :  { %v9011_v48 = vor.u32 %v12834_v31, %v9010_v40  ;;  %v9588_v29 = vld [vmem:[#allocation2 + $0x828] sm:$0xf0]  ;;  %v9490_v38 = vld [vmem:[#allocation2 + $0x708] sm:$0xf]  ;;  %v9308_v17 = vld [vmem:[#allocation2 + $0x5f0] sm:$0xf0] }
 0x147   :  { %3018 = vmatpush.bf16.msra.mxu1 %v9483_v43  ;;  %3046 = vmatpush.bf16.msra.mxu3 %v9487_v52  ;;  %v9111_v43 = vor.u32 %v12846_v35, %v9108_v36  ;;  %v12822_v52 = vld [vmem:[#allocation2 + $0x34c] sm:$0xf]  ;;  %v8823_v36 = vor.u32 %v12774_v23, %v8820_v25  ;;  %v13087_v23 = vld [vmem:[#allocation2 + $0xb94] sm:$0xf] }
 0x148   :  { %v9015_v61 = vor.u32 %v12822_v52, %v9012_v55  ;;  %v12750_v31 = vld [vmem:[#allocation2 + $0x10c] sm:$0xf]  ;;  %v8626_v52 = vld [vmem:[#allocation2 + $0x48] sm:$0xf]  ;;  %v10076_v25 = vld [vmem:[#allocation2 + $0xbf0] sm:$0xf0] }
 0x149   :  { %3005 = vmatpush.bf16.msra.mxu0 %v8619_v62  ;;  %3033 = vmatpush.bf16.msra.mxu2 %v8623_v8  ;;  %v2783_v58 = vpop.f32.mrf.mxu0  ;;  %v12810_v62 = vld [vmem:[#allocation2 + $0x2e4] sm:$0xf0]  ;;  %v12798_v8 = vld [vmem:[#allocation2 + $0x28c] sm:$0xf] }
 0x14a   :  { %v2784_v1 = vadd.f32 %v2783_v58, %v590_v47  ;;  %v8919_v15 = vor.u32 %v12798_v8, %v8916_v9  ;;  %v8724_v44 = vld [vmem:[#allocation2 + $0x168] sm:$0xf0]  ;;  %v12930_v58 = vld [vmem:[#allocation2 + $0x6a4] sm:$0xf0]  ;;  %v9306_v8 = vld [vmem:[#allocation2 + $0x590] sm:$0xf] }
 0x14b   :  { %3019 = vmatpush.bf16.msra.mxu1 %v9387_v6  ;;  %3047 = vmatpush.bf16.msra.mxu3 %v9391_v59  ;;  %v2797_v2 = vpop.f32.mrf.mxu1  ;;  %v9783_v6 = vor.u32 %v13014_v49, %v9780_v56  ;;  %v12990_v59 = vld [vmem:[#allocation2 + $0x88c] sm:$0xf]  ;;  %v8723_v56 = vor.u32 %v12762_v37, %v8722_v32  ;;  %v12883_v32 = vld [vmem:[#allocation2 + $0x52c] sm:$0xf0]  ;;  %v9212_v37 = vld [vmem:[#allocation2 + $0x530] sm:$0xf0] }
 0x14c   :  { %3034 = vmatmul.bf16.vlgmr.msra.gmra.mxu2 %v14186_v4  ;;  %3006 = vmatmul.bf16.vlgmr.msra.gmra.mxu0 %v14186_v4  ;;  %v14302_v11 = vadd.f32 %v2797_v2, %v2784_v1  ;;  %v9492_v51 = vld [vmem:[#allocation2 + $0x768] sm:$0xf0] }
 0x14d   :  { %3054 = vmatpush.bf16.msrb.mxu0 %v9299_v10  ;;  %3082 = vmatpush.bf16.msrb.mxu2 %v9303_v14  ;;  %v9684_v10 = vld [vmem:[#allocation2 + $0x8e8] sm:$0xf0]  ;;  %v9683_v14 = vor.u32 %v13002_v0, %v9682_v63 }
 0x14e   :  { %3048 = vmatmul.bf16.vlgmr.msra.gmra.mxu3 %v14191_v5  ;;  %3020 = vmatmul.bf16.vlgmr.msra.gmra.mxu1 %v14191_v5  ;;  %v9687_v20 = vor.u32 %v12990_v59, %v9684_v10  ;;  %v3230_v55 = vmax.f32 %v14302_v11, 0.0  ;;  %v12918_v2 = vld [vmem:[#allocation2 + $0x64c] sm:$0xf]  ;;  %v12907_v10 = vld [vmem:[#allocation2 + $0x5ec] sm:$0xf0] }
 0x14f   :  { %3068 = vmatpush.bf16.msrb.mxu1 %v10067_v12  ;;  %3096 = vmatpush.bf16.msrb.mxu3 %v10071_v18  ;;  %v8915_v12 = vor.u32 %v12810_v62, %v8914_v57  ;;  %v9586_v18 = vld [vmem:[#allocation2 + $0x7c8] sm:$0xf]  ;;  %v2811_v19 = vpop.f32.mrf.mxu2  ;;  %v8628_v62 = vld [vmem:[#allocation2 + $0xa8] sm:$0xf0]  ;;  %v10074_v11 = vld [vmem:[#allocation2 + $0xb90] sm:$0xf] }
 0x150   :  { %v9587_v35 = vor.u32 %v12978_v21, %v9586_v18  ;;  %v9394_v57 = vld [vmem:[#allocation2 + $0x648] sm:$0xf] }
 0x151   :  { %3055 = vmatpush.bf16.msrb.mxu0 %v9203_v26  ;;  %3083 = vmatpush.bf16.msrb.mxu2 %v9207_v30  ;;  %v2812_v26 = vadd.f32 %v2811_v19, %v591_v24  ;;  %v12966_v30 = vld [vmem:[#allocation2 + $0x7cc] sm:$0xf]  ;;  %v2785_v34 = vpop.f32.mrf.mxu0 }
 0x152   :  { %v2786_v40 = vadd.f32 %v2785_v34, %v590_v47  ;;  %v8727_v47 = vor.u32 %v12750_v31, %v8724_v44  ;;  %v9978_v34 = vld [vmem:[#allocation2 + $0xad0] sm:$0xf] }
 0x153   :  { %3069 = vmatpush.bf16.msrb.mxu1 %v9971_v28  ;;  %3097 = vmatpush.bf16.msrb.mxu3 %v9975_v33  ;;  %v2825_v28 = vpop.f32.mrf.mxu3  ;;  %v9114_v44 = vld [vmem:[#allocation2 + $0x410] sm:$0xf] }
 0x154   :  { %v14306_v33 = vadd.f32 %v2825_v28, %v2812_v26  ;;  %v9307_v26 = vor.u32 %v12907_v10, %v9306_v8  ;;  %v9020_v8 = vld [vmem:[#allocation2 + $0x3b0] sm:$0xf0] }
 0x155   :  { %3056 = vmatpush.bf16.msrb.mxu0 %v9107_v39  ;;  %3084 = vmatpush.bf16.msrb.mxu2 %v9111_v43  ;;  %v12954_v39 = vld [vmem:[#allocation2 + $0x764] sm:$0xf0]  ;;  %v9591_v43 = vor.u32 %v12966_v30, %v9588_v29  ;;  %v9311_v29 = vor.u32 %v12895_v16, %v9308_v17  ;;  %v12811_v17 = vld [vmem:[#allocation2 + $0x2ec] sm:$0xf0] }
 0x156   :  { %v3231_v18 = vmax.f32 %v14306_v33, 0.0  ;;  %v12871_v33 = vld [vmem:[#allocation2 + $0x4d4] sm:$0xf] }
 0x157   :  { %3070 = vmatpush.bf16.msrb.mxu1 %v9875_v42  ;;  %3098 = vmatpush.bf16.msrb.mxu3 %v9879_v50  ;;  %v2799_v42 = vpop.f32.mrf.mxu1  ;;  %v12942_v50 = vld [vmem:[#allocation2 + $0x70c] sm:$0xf]  ;;  %v2813_v63 = vpop.f32.mrf.mxu2  ;;  %v9215_v31 = vor.u32 %v12871_v33, %v9212_v37  ;;  %v9594_v33 = vld [vmem:[#allocation2 + $0x7d0] sm:$0xf] }
 0x158   :  { %v2800_v49 = vadd.f32 %v2799_v42, %v2786_v40  ;;  %v9495_v1 = vor.u32 %v12942_v50, %v9492_v51  ;;  %v2814_v9 = vadd.f32 %v2813_v63, %v591_v24  ;;  %v9980_v40 = vld [vmem:[#allocation2 + $0xb30] sm:$0xf0]  ;;  %v12859_v50 = vld [vmem:[#allocation2 + $0x46c] sm:$0xf0] }
 0x159   :  { %3057 = vmatpush.bf16.msrb.mxu0 %v9011_v48  ;;  %3085 = vmatpush.bf16.msrb.mxu2 %v9015_v61  ;;  %v12738_v48 = vld [vmem:[#allocation2 + $0xa4] sm:$0xf0]  ;;  %v12726_v61 = vld [vmem:[#allocation2 + $0x4c] sm:$0xf]  ;;  %v9882_v51 = vld [vmem:[#allocation2 + $0xa10] sm:$0xf] }
 0x15a   :  { %v3254_v0 = vmax.f32 %v2800_v49, 0.0  ;;  %v8631_v21 = vor.u32 %v12726_v61, %v8628_v62  ;;  %v12847_v49 = vld [vmem:[#allocation2 + $0x414] sm:$0xf]  ;;  %v12835_v62 = vld [vmem:[#allocation2 + $0x3ac] sm:$0xf0] }
 0x15b   :  { %3071 = vmatpush.bf16.msrb.mxu1 %v9779_v60  ;;  %3099 = vmatpush.bf16.msrb.mxu3 %v9783_v6  ;;  %v9491_v60 = vor.u32 %v12954_v39, %v9490_v38  ;;  %v9396_v6 = vld [vmem:[#allocation2 + $0x6a8] sm:$0xf0]  ;;  %v2827_v59 = vpop.f32.mrf.mxu3  ;;  %v13063_v39 = vld [vmem:[#allocation2 + $0xad4] sm:$0xf]  ;;  %v9786_v63 = vld [vmem:[#allocation2 + $0x950] sm:$0xf] }
 0x15c   :  { %v2828_v19 = vadd.f32 %v2827_v59, %v2814_v9  ;;  %v9399_v24 = vor.u32 %v12918_v2, %v9396_v6  ;;  %v13027_v2 = vld [vmem:[#allocation2 + $0x9ac] sm:$0xf0]  ;;  %v12823_v6 = vld [vmem:[#allocation2 + $0x354] sm:$0xf] }
 0x15d   :  { %3058 = vmatpush.bf16.msrb.mxu0 %v8915_v12  ;;  %3086 = vmatpush.bf16.msrb.mxu2 %v8919_v15  ;;  %v13099_v12 = vld [vmem:[#allocation2 + $0xbec] sm:$0xf0]  ;;  %v8627_v15 = vor.u32 %v12738_v48, %v8626_v52  ;;  %v9983_v52 = vor.u32 %v13063_v39, %v9980_v40  ;;  %v13039_v48 = vld [vmem:[#allocation2 + $0xa14] sm:$0xf]  ;;  %v9023_v16 = vor.u32 %v12823_v6, %v9020_v8 }
 0x15e   :  { %v3255_v28 = vmax.f32 %v2828_v19, 0.0  ;;  %v10075_v30 = vor.u32 %v13099_v12, %v10074_v11  ;;  %v13015_v9 = vld [vmem:[#allocation2 + $0x954] sm:$0xf]  ;;  %v8922_v11 = vld [vmem:[#allocation2 + $0x290] sm:$0xf] }
 0x15f   :  { %3072 = vmatpush.bf16.msrb.mxu1 %v9683_v14  ;;  %3100 = vmatpush.bf16.msrb.mxu3 %v9687_v20  ;;  %v14311_v14 = vpack.c.bf16 %v3254_v0, %v3230_v55  ;;  %v9395_v20 = vor.u32 %v12930_v58, %v9394_v57  ;;  %v13051_v55 = vld [vmem:[#allocation2 + $0xa6c] sm:$0xf0]  ;;  %v9884_v57 = vld [vmem:[#allocation2 + $0xa70] sm:$0xf0]  ;;  %v9115_v58 = vor.u32 %v12859_v50, %v9114_v44  ;;  %v592_v0 = vperm.slane %v14298_v41, 2 }
 0x160   :  { %v14314_v38 = vpack.c.bf16 %v3255_v28, %v3231_v18  ;;  %v9788_v59 = vld [vmem:[#allocation2 + $0x9b0] sm:$0xf0]  ;;  %v9690_v18 = vld [vmem:[#allocation2 + $0x890] sm:$0xf] }
 0x161   :  { %3059 = vmatpush.bf16.msrb.mxu0 %v8819_v27  ;;  %3087 = vmatpush.bf16.msrb.mxu2 %v8823_v36  ;;  %v9210_v27 = vld [vmem:[#allocation2 + $0x4d0] sm:$0xf]  ;;  %v12991_v28 = vld [vmem:[#allocation2 + $0x894] sm:$0xf] }
 0x162   :  { %v13075_v36 = vld [vmem:[#allocation2 + $0xb2c] sm:$0xf0]  ;;  %v9211_v42 = vor.u32 %v12883_v32, %v9210_v27  ;;  %v8923_v27 = vor.u32 %v12811_v17, %v8922_v11  ;;  %v12967_v50 = vld [vmem:[#allocation2 + $0x7d4] sm:$0xf] }
 0x163   :  { %3073 = vmatpush.bf16.msrb.mxu1 %v9587_v35  ;;  %3101 = vmatpush.bf16.msrb.mxu3 %v9591_v43  ;;  %v10079_v35 = vor.u32 %v13087_v23, %v10076_v25  ;;  %v9979_v43 = vor.u32 %v13075_v36, %v9978_v34  ;;  %v13003_v19 = vld [vmem:[#allocation2 + $0x8ec] sm:$0xf0]  ;;  %v9791_v23 = vor.u32 %v13015_v9, %v9788_v59  ;;  %v12799_v25 = vld [vmem:[#allocation2 + $0x294] sm:$0xf] }
 0x164   :  { %v9691_v32 = vor.u32 %v13003_v19, %v9690_v18  ;;  %v12787_v36 = vld [vmem:[#allocation2 + $0x22c] sm:$0xf0]  ;;  %v12943_v6 = vld [vmem:[#allocation2 + $0x714] sm:$0xf] }
 0x165   :  { %3060 = vmatpush.bf16.msrb.mxu0 %v8723_v56  ;;  %3088 = vmatpush.bf16.msrb.mxu2 %v8727_v47  ;;  %v9116_v56 = vld [vmem:[#allocation2 + $0x470] sm:$0xf0]  ;;  %v9883_v47 = vor.u32 %v13051_v55, %v9882_v51  ;;  %v12979_v40 = vld [vmem:[#allocation2 + $0x82c] sm:$0xf0] }
 0x166   :  { %v9119_v61 = vor.u32 %v12847_v49, %v9116_v56  ;;  %v9596_v51 = vld [vmem:[#allocation2 + $0x830] sm:$0xf0]  ;;  %v8730_v55 = vld [vmem:[#allocation2 + $0x110] sm:$0xf] }
 0x167   :  { %3074 = vmatpush.bf16.msrb.mxu1 %v9491_v60  ;;  %3102 = vmatpush.bf16.msrb.mxu3 %v9495_v1  ;;  %v9018_v60 = vld [vmem:[#allocation2 + $0x350] sm:$0xf]  ;;  %v9887_v1 = vor.u32 %v13039_v48, %v9884_v57  ;;  %v9595_v48 = vor.u32 %v12979_v40, %v9594_v33  ;;  %v9500_v8 = vld [vmem:[#allocation2 + $0x770] sm:$0xf0]  ;;  %v12896_v33 = vld [vmem:[#allocation2 + $0x59c] sm:$0xf] }
 0x168   :  { %v9019_v10 = vor.u32 %v12835_v62, %v9018_v60  ;;  %v9498_v60 = vld [vmem:[#allocation2 + $0x710] sm:$0xf]  ;;  %v12727_v18 = vld [vmem:[#allocation2 + $0x54] sm:$0xf] }
 0x169   :  { %3061 = vmatpush.bf16.msrb.mxu0 %v8627_v15  ;;  %3089 = vmatpush.bf16.msrb.mxu2 %v8631_v21  ;;  %v2839_v12 = vpop.f32.mrf.mxu0  ;;  %v9787_v15 = vor.u32 %v13027_v2, %v9786_v63  ;;  %v9599_v63 = vor.u32 %v12967_v50, %v9596_v51  ;;  %v8732_v2 = vld [vmem:[#allocation2 + $0x170] sm:$0xf0]  ;;  %v8634_v9 = vld [vmem:[#allocation2 + $0x50] sm:$0xf] }
 0x16a   :  { %v8636_v19 = vld [vmem:[#allocation2 + $0xb0] sm:$0xf0] }
 0x16b   :  { %3075 = vmatpush.bf16.msrb.mxu1 %v9395_v20  ;;  %3103 = vmatpush.bf16.msrb.mxu3 %v9399_v24  ;;  %v2840_v20 = vadd.f32 %v2839_v12, %v592_v0  ;;  %v2853_v21 = vpop.f32.mrf.mxu1  ;;  %v8924_v24 = vld [vmem:[#allocation2 + $0x2f0] sm:$0xf0]  ;;  %v12739_v12 = vld [vmem:[#allocation2 + $0xac] sm:$0xf0] }
 0x16c   :  { %3090 = vmatmul.bf16.vlgmr.msrb.gmra.mxu2 %v14186_v4  ;;  %3062 = vmatmul.bf16.vlgmr.msrb.gmra.mxu0 %v14186_v4  ;;  %v8927_v34 = vor.u32 %v12799_v25, %v8924_v24  ;;  %v12919_v25 = vld [vmem:[#allocation2 + $0x654] sm:$0xf] }
 0x16d   :  { %3110 = vmatpush.bf16.msra.mxu0 %v9307_v26  ;;  %3138 = vmatpush.bf16.msra.mxu2 %v9311_v29  ;;  %v593_v26 = vperm.slane %v14298_v41, 3  ;;  %v14322_v29 = vadd.f32 %v2853_v21, %v2840_v20  ;;  %v9404_v24 = vld [vmem:[#allocation2 + $0x6b0] sm:$0xf0] }
 0x16e   :  { %3104 = vmatmul.bf16.vlgmr.msrb.gmra.mxu3 %v14191_v5  ;;  %3076 = vmatmul.bf16.vlgmr.msrb.gmra.mxu1 %v14191_v5 }
 0x16f   :  { %3124 = vmatpush.bf16.msra.mxu1 %v10075_v30  ;;  %3152 = vmatpush.bf16.msra.mxu3 %v10079_v35  ;;  %v9692_v30 = vld [vmem:[#allocation2 + $0x8f0] sm:$0xf0]  ;;  %v8826_v35 = vld [vmem:[#allocation2 + $0x1d0] sm:$0xf]  ;;  %v2867_v37 = vpop.f32.mrf.mxu2  ;;  %v3232_v59 = vmax.f32 %v14322_v29, 0.0 }
 0x170   :  { %v9695_v39 = vor.u32 %v12991_v28, %v9692_v30  ;;  %v9314_v28 = vld [vmem:[#allocation2 + $0x598] sm:$0xf] }
 0x171   :  { %3111 = vmatpush.bf16.msra.mxu0 %v9211_v42  ;;  %3139 = vmatpush.bf16.msra.mxu2 %v9215_v31  ;;  %v12775_v42 = vld [vmem:[#allocation2 + $0x1d4] sm:$0xf]  ;;  %v2868_v31 = vadd.f32 %v2867_v37, %v593_v26  ;;  %v2881_v44 = vpop.f32.mrf.mxu3  ;;  %v2841_v56 = vpop.f32.mrf.mxu0  ;;  %v9316_v37 = vld [vmem:[#allocation2 + $0x5f8] sm:$0xf0] }
 0x173   :  { %3125 = vmatpush.bf16.msra.mxu1 %v9979_v43  ;;  %3153 = vmatpush.bf16.msra.mxu3 %v9983_v52  ;;  %v8828_v43 = vld [vmem:[#allocation2 + $0x230] sm:$0xf0]  ;;  %v8827_v52 = vor.u32 %v12787_v36, %v8826_v35  ;;  %v14326_v49 = vadd.f32 %v2881_v44, %v2868_v31  ;;  %v2855_v62 = vpop.f32.mrf.mxu1  ;;  %v8635_v36 = vor.u32 %v12739_v12, %v8634_v9  ;;  %v13088_v31 = vld [vmem:[#allocation2 + $0xb9c] sm:$0xf]  ;;  %v12860_v9 = vld [vmem:[#allocation2 + $0x474] sm:$0xf0] }
 0x174   :  { %v8831_v57 = vor.u32 %v12775_v42, %v8828_v43  ;;  %v8639_v43 = vor.u32 %v12727_v18, %v8636_v19  ;;  %v10084_v44 = vld [vmem:[#allocation2 + $0xbf8] sm:$0xf0]  ;;  %v9026_v18 = vld [vmem:[#allocation2 + $0x358] sm:$0xf] }
 0x175   :  { %3112 = vmatpush.bf16.msra.mxu0 %v9115_v58  ;;  %3140 = vmatpush.bf16.msra.mxu2 %v9119_v61  ;;  %v12763_v58 = vld [vmem:[#allocation2 + $0x16c] sm:$0xf0]  ;;  %v2842_v61 = vadd.f32 %v2841_v56, %v592_v0  ;;  %v9218_v56 = vld [vmem:[#allocation2 + $0x4d8] sm:$0xf]  ;;  %v12848_v12 = vld [vmem:[#allocation2 + $0x41c] sm:$0xf] }
 0x176   :  { %v8731_v11 = vor.u32 %v12763_v58, %v8730_v55  ;;  %v9319_v55 = vor.u32 %v12896_v33, %v9316_v37  ;;  %v10087_v58 = vor.u32 %v13088_v31, %v10084_v44 }
 0x177   :  { %3126 = vmatpush.bf16.msra.mxu1 %v9883_v47  ;;  %3154 = vmatpush.bf16.msra.mxu3 %v9887_v1  ;;  %v12955_v47 = vld [vmem:[#allocation2 + $0x76c] sm:$0xf0]  ;;  %v12751_v1 = vld [vmem:[#allocation2 + $0x114] sm:$0xf]  ;;  %v2869_v20 = vpop.f32.mrf.mxu2 }
 0x178   :  { %v9499_v17 = vor.u32 %v12955_v47, %v9498_v60  ;;  %v8735_v0 = vor.u32 %v12751_v1, %v8732_v2  ;;  %v2870_v30 = vadd.f32 %v2869_v20, %v593_v26  ;;  %v9407_v26 = vor.u32 %v12919_v25, %v9404_v24  ;;  %v13076_v60 = vld [vmem:[#allocation2 + $0xb34] sm:$0xf0]  ;;  %v9220_v47 = vld [vmem:[#allocation2 + $0x538] sm:$0xf0] }
 0x179   :  { %3113 = vmatpush.bf16.msra.mxu0 %v9019_v10  ;;  %3141 = vmatpush.bf16.msra.mxu2 %v9023_v16  ;;  %v2856_v10 = vadd.f32 %v2855_v62, %v2842_v61  ;;  %v12931_v16 = vld [vmem:[#allocation2 + $0x6ac] sm:$0xf0]  ;;  %v2883_v29 = vpop.f32.mrf.mxu3  ;;  %v13064_v62 = vld [vmem:[#allocation2 + $0xadc] sm:$0xf]  ;;  %v594_v25 = vperm.slane %v14298_v41, 4 }
 0x17a   :  { %v2884_v40 = vadd.f32 %v2883_v29, %v2870_v30  ;;  %v12824_v30 = vld [vmem:[#allocation2 + $0x35c] sm:$0xf] }
 0x17b   :  { %3127 = vmatpush.bf16.msra.mxu1 %v9787_v15  ;;  %3155 = vmatpush.bf16.msra.mxu3 %v9791_v23  ;;  %v9402_v15 = vld [vmem:[#allocation2 + $0x650] sm:$0xf]  ;;  %v3256_v21 = vmax.f32 %v2856_v10, 0.0  ;;  %v9503_v23 = vor.u32 %v12943_v6, %v9500_v8  ;;  %v9122_v8 = vld [vmem:[#allocation2 + $0x418] sm:$0xf] }
 0x17c   :  { %v9403_v42 = vor.u32 %v12931_v16, %v9402_v15  ;;  %v3257_v51 = vmax.f32 %v2884_v40, 0.0  ;;  %v9124_v15 = vld [vmem:[#allocation2 + $0x478] sm:$0xf0]  ;;  %v12812_v40 = vld [vmem:[#allocation2 + $0x2f4] sm:$0xf0] }
 0x17d   :  { %3114 = vmatpush.bf16.msra.mxu0 %v8923_v27  ;;  %3142 = vmatpush.bf16.msra.mxu2 %v8927_v34  ;;  %v12908_v27 = vld [vmem:[#allocation2 + $0x5f4] sm:$0xf0]  ;;  %v14331_v35 = vpack.c.bf16 %v3256_v21, %v3232_v59  ;;  %v13040_v16 = vld [vmem:[#allocation2 + $0xa1c] sm:$0xf]  ;;  %v9127_v20 = vor.u32 %v12848_v12, %v9124_v15 }
 0x17e   :  { %v13100_v34 = vld [vmem:[#allocation2 + $0xbf4] sm:$0xf0]  ;;  %v9315_v50 = vor.u32 %v12908_v27, %v9314_v28  ;;  %v9028_v29 = vld [vmem:[#allocation2 + $0x3b8] sm:$0xf0] }
 0x17f   :  { %3128 = vmatpush.bf16.msra.mxu1 %v9691_v32  ;;  %3156 = vmatpush.bf16.msra.mxu3 %v9695_v39  ;;  %v10082_v32 = vld [vmem:[#allocation2 + $0xb98] sm:$0xf]  ;;  %v3233_v39 = vmax.f32 %v14326_v49, 0.0  ;;  %v12872_v49 = vld [vmem:[#allocation2 + $0x4dc] sm:$0xf] }
 0x180   :  { %v9223_v6 = vor.u32 %v12872_v49, %v9220_v47  ;;  %v9890_v59 = vld [vmem:[#allocation2 + $0xa18] sm:$0xf]  ;;  %v13016_v27 = vld [vmem:[#allocation2 + $0x95c] sm:$0xf] }
 0x181   :  { %3115 = vmatpush.bf16.msra.mxu0 %v8827_v52  ;;  %3143 = vmatpush.bf16.msra.mxu2 %v8831_v57  ;;  %v10083_v52 = vor.u32 %v13100_v34, %v10082_v32  ;;  %v9986_v57 = vld [vmem:[#allocation2 + $0xad8] sm:$0xf]  ;;  %v14334_v61 = vpack.c.bf16 %v3257_v51, %v3233_v39  ;;  %v9796_v32 = vld [vmem:[#allocation2 + $0x9b8] sm:$0xf0]  ;;  %v9031_v39 = vor.u32 %v12824_v30, %v9028_v29 }
 0x182   :  { %v9987_v2 = vor.u32 %v13076_v60, %v9986_v57  ;;  %v12836_v21 = vld [vmem:[#allocation2 + $0x3b4] sm:$0xf0]  ;;  %v8932_v51 = vld [vmem:[#allocation2 + $0x2f8] sm:$0xf0] }
 0x183   :  { %3129 = vmatpush.bf16.msra.mxu1 %v9595_v48  ;;  %3157 = vmatpush.bf16.msra.mxu3 %v9599_v63  ;;  %v12884_v48 = vld [vmem:[#allocation2 + $0x534] sm:$0xf0]  ;;  %v9988_v63 = vld [vmem:[#allocation2 + $0xb38] sm:$0xf0]  ;;  %v9027_v34 = vor.u32 %v12836_v21, %v9026_v18 }
 0x184   :  { %v9219_v1 = vor.u32 %v12884_v48, %v9218_v56  ;;  %v9991_v10 = vor.u32 %v13064_v62, %v9988_v63  ;;  %v13028_v28 = vld [vmem:[#allocation2 + $0x9b4] sm:$0xf0]  ;;  %v9700_v56 = vld [vmem:[#allocation2 + $0x8f8] sm:$0xf0] }
 0x185   :  { %3116 = vmatpush.bf16.msra.mxu0 %v8731_v11  ;;  %3144 = vmatpush.bf16.msra.mxu2 %v8735_v0  ;;  %v13052_v11 = vld [vmem:[#allocation2 + $0xa74] sm:$0xf0]  ;;  %v9123_v0 = vor.u32 %v12860_v9, %v9122_v8  ;;  %v8836_v8 = vld [vmem:[#allocation2 + $0x238] sm:$0xf0] }
 0x186   :  { %v9891_v19 = vor.u32 %v13052_v11, %v9890_v59  ;;  %v8834_v49 = vld [vmem:[#allocation2 + $0x1d8] sm:$0xf]  ;;  %v9604_v11 = vld [vmem:[#allocation2 + $0x838] sm:$0xf0] }
 0x187   :  { %3130 = vmatpush.bf16.msra.mxu1 %v9499_v17  ;;  %3158 = vmatpush.bf16.msra.mxu3 %v9503_v23  ;;  %v9892_v17 = vld [vmem:[#allocation2 + $0xa78] sm:$0xf0]  ;;  %v9794_v23 = vld [vmem:[#allocation2 + $0x958] sm:$0xf] }
 0x188   :  { %v9895_v24 = vor.u32 %v13040_v16, %v9892_v17  ;;  %v9795_v37 = vor.u32 %v13028_v28, %v9794_v23  ;;  %v12788_v47 = vld [vmem:[#allocation2 + $0x234] sm:$0xf0]  ;;  %v12752_v30 = vld [vmem:[#allocation2 + $0x11c] sm:$0xf] }
 0x189   :  { %3117 = vmatpush.bf16.msra.mxu0 %v8635_v36  ;;  %3145 = vmatpush.bf16.msra.mxu2 %v8639_v43  ;;  %v8930_v36 = vld [vmem:[#allocation2 + $0x298] sm:$0xf]  ;;  %v2895_v33 = vpop.f32.mrf.mxu0  ;;  %v8835_v12 = vor.u32 %v12788_v47, %v8834_v49  ;;  %v8740_v29 = vld [vmem:[#allocation2 + $0x178] sm:$0xf0] }
 0x18a   :  { %v13004_v43 = vld [vmem:[#allocation2 + $0x8f4] sm:$0xf0]  ;;  %v2896_v31 = vadd.f32 %v2895_v33, %v594_v25  ;;  %v8931_v57 = vor.u32 %v12812_v40, %v8930_v36  ;;  %v8743_v40 = vor.u32 %v12752_v30, %v8740_v29 }
 0x18b   :  { %3131 = vmatpush.bf16.msra.mxu1 %v9403_v42  ;;  %3159 = vmatpush.bf16.msra.mxu3 %v9407_v26  ;;  %v9698_v42 = vld [vmem:[#allocation2 + $0x898] sm:$0xf]  ;;  %v2909_v44 = vpop.f32.mrf.mxu1  ;;  %v9799_v26 = vor.u32 %v13016_v27, %v9796_v32  ;;  %v12944_v27 = vld [vmem:[#allocation2 + $0x71c] sm:$0xf] }
 0x18c   :  { %3146 = vmatmul.bf16.vlgmr.msra.gmra.mxu2 %v14186_v4  ;;  %3118 = vmatmul.bf16.vlgmr.msra.gmra.mxu0 %v14186_v4  ;;  %v14342_v48 = vadd.f32 %v2909_v44, %v2896_v31  ;;  %v9602_v62 = vld [vmem:[#allocation2 + $0x7d8] sm:$0xf]  ;;  %v9508_v32 = vld [vmem:[#allocation2 + $0x778] sm:$0xf0] }
 0x18d   :  { %3166 = vmatpush.bf16.msrb.mxu0 %v9315_v50  ;;  %3194 = vmatpush.bf16.msrb.mxu2 %v9319_v55  ;;  %v12800_v50 = vld [vmem:[#allocation2 + $0x29c] sm:$0xf]  ;;  %v8738_v18 = vld [vmem:[#allocation2 + $0x118] sm:$0xf]  ;;  %v9511_v44 = vor.u32 %v12944_v27, %v9508_v32  ;;  %v14359_v32 = vld [vmem:[#allocation11 + $0x10] sm:$0xff] }
 0x18e   :  { %3160 = vmatmul.bf16.vlgmr.msra.gmra.mxu3 %v14191_v5  ;;  %3132 = vmatmul.bf16.vlgmr.msra.gmra.mxu1 %v14191_v5  ;;  %v12992_v55 = vld [vmem:[#allocation2 + $0x89c] sm:$0xf]  ;;  %v8935_v60 = vor.u32 %v12800_v50, %v8932_v51  ;;  %v12956_v28 = vld [vmem:[#allocation2 + $0x774] sm:$0xf0] }
 0x18f   :  { %3180 = vmatpush.bf16.msrb.mxu1 %v10083_v52  ;;  %3208 = vmatpush.bf16.msrb.mxu3 %v10087_v58  ;;  %v595_v52 = vperm.slane %v14298_v41, 5  ;;  %v9699_v58 = vor.u32 %v13004_v43, %v9698_v42  ;;  %v2923_v63 = vpop.f32.mrf.mxu2  ;;  %v12740_v42 = vld [vmem:[#allocation2 + $0xb4] sm:$0xf0]  ;;  %v12728_v50 = vld [vmem:[#allocation2 + $0x5c] sm:$0xf] }
 0x190   :  { %v8644_v51 = vld [vmem:[#allocation2 + $0xb8] sm:$0xf0] }
 0x191   :  { %3167 = vmatpush.bf16.msrb.mxu0 %v9219_v1  ;;  %3195 = vmatpush.bf16.msrb.mxu2 %v9223_v6  ;;  %v9703_v1 = vor.u32 %v12992_v55, %v9700_v56  ;;  %v12776_v6 = vld [vmem:[#allocation2 + $0x1dc] sm:$0xf]  ;;  %v2924_v9 = vadd.f32 %v2923_v63, %v595_v52  ;;  %v2937_v59 = vpop.f32.mrf.mxu3  ;;  %v2897_v16 = vpop.f32.mrf.mxu0  ;;  %v8647_v63 = vor.u32 %v12728_v50, %v8644_v51 }
 0x192   :  { %v2898_v21 = vadd.f32 %v2897_v16, %v594_v25  ;;  %v9410_v25 = vld [vmem:[#allocation2 + $0x658] sm:$0xf] }
 0x193   :  { %3181 = vmatpush.bf16.msrb.mxu1 %v9987_v2  ;;  %3209 = vmatpush.bf16.msrb.mxu3 %v9991_v10  ;;  %v12980_v2 = vld [vmem:[#allocation2 + $0x834] sm:$0xf0]  ;;  %v12968_v10 = vld [vmem:[#allocation2 + $0x7dc] sm:$0xf]  ;;  %v2938_v15 = vadd.f32 %v2937_v59, %v2924_v9  ;;  %v2911_v23 = vpop.f32.mrf.mxu1 }
 0x194   :  { %v9603_v17 = vor.u32 %v12980_v2, %v9602_v62  ;;  %v2912_v36 = vadd.f32 %v2911_v23, %v2898_v21 }
 0x195   :  { %3168 = vmatpush.bf16.msrb.mxu0 %v9123_v0  ;;  %3196 = vmatpush.bf16.msrb.mxu2 %v9127_v20  ;;  %v8839_v0 = vor.u32 %v12776_v6, %v8836_v8  ;;  %v9506_v20 = vld [vmem:[#allocation2 + $0x718] sm:$0xf]  ;;  %v3235_v49 = vmax.f32 %v2938_v15, 0.0 }
 0x196   :  { %v3258_v31 = vmax.f32 %v2912_v36, 0.0 }
 0x197   :  { %3182 = vmatpush.bf16.msrb.mxu1 %v9891_v19  ;;  %3210 = vmatpush.bf16.msrb.mxu3 %v9895_v24  ;;  %v12764_v19 = vld [vmem:[#allocation2 + $0x174] sm:$0xf0]  ;;  %v9607_v24 = vor.u32 %v12968_v10, %v9604_v11  ;;  %v2925_v43 = vpop.f32.mrf.mxu2  ;;  %v597_v10 = vperm.slane %v14298_v41, 7 }
 0x198   :  { %v8739_v33 = vor.u32 %v12764_v19, %v8738_v18  ;;  %v2926_v55 = vadd.f32 %v2925_v43, %v595_v52  ;;  %v596_v52 = vperm.slane %v14298_v41, 6 }
 0x199   :  { %3169 = vmatpush.bf16.msrb.mxu0 %v9027_v34  ;;  %3197 = vmatpush.bf16.msrb.mxu2 %v9031_v39  ;;  %v3234_v34 = vmax.f32 %v14342_v48, 0.0  ;;  %v9507_v39 = vor.u32 %v12956_v28, %v9506_v20  ;;  %v2939_v56 = vpop.f32.mrf.mxu3  ;;  %v12920_v48 = vld [vmem:[#allocation2 + $0x65c] sm:$0xf] }
 0x19a   :  { %v2940_v47 = vadd.f32 %v2939_v56, %v2926_v55 }
 0x19b   :  { %3183 = vmatpush.bf16.msrb.mxu1 %v9795_v37  ;;  %3211 = vmatpush.bf16.msrb.mxu3 %v9799_v26  ;;  %v8642_v37 = vld [vmem:[#allocation2 + $0x58] sm:$0xf] }
 0x19c   :  { %v12932_v26 = vld [vmem:[#allocation2 + $0x6b4] sm:$0xf0]  ;;  %v3259_v2 = vmax.f32 %v2940_v47, 0.0 }
 0x19d   :  { %3170 = vmatpush.bf16.msrb.mxu0 %v8931_v57  ;;  %3198 = vmatpush.bf16.msrb.mxu2 %v8935_v60  ;;  %v9412_v57 = vld [vmem:[#allocation2 + $0x6b8] sm:$0xf0]  ;;  %v8643_v60 = vor.u32 %v12740_v42, %v8642_v37  ;;  %v9411_v62 = vor.u32 %v12932_v26, %v9410_v25 }
 0x19e   :  { %v14347_v6 = vpack.c.bf16 %v3259_v2, %v3235_v49  ;;  %v600_v2 = vperm.slane %v14359_v32, 2 }
 0x19f   :  { %3184 = vmatpush.bf16.msrb.mxu1 %v9699_v58  ;;  %3212 = vmatpush.bf16.msrb.mxu3 %v9703_v1  ;;  %v14345_v58 = vpack.c.bf16 %v3258_v31, %v3234_v34  ;;  %v9415_v1 = vor.u32 %v12920_v48, %v9412_v57  ;;  %v598_v34 = vperm.slane %v14359_v32, 0 }
 0x1a1   :  { %3171 = vmatpush.bf16.msrb.mxu0 %v8835_v12  ;;  %3199 = vmatpush.bf16.msrb.mxu2 %v8839_v0 }
 0x1a3   :  { %3185 = vmatpush.bf16.msrb.mxu1 %v9603_v17  ;;  %3213 = vmatpush.bf16.msrb.mxu3 %v9607_v24 }
 0x1a5   :  { %3172 = vmatpush.bf16.msrb.mxu0 %v8739_v33  ;;  %3200 = vmatpush.bf16.msrb.mxu2 %v8743_v40 }
 0x1a7   :  { %3186 = vmatpush.bf16.msrb.mxu1 %v9507_v39  ;;  %3214 = vmatpush.bf16.msrb.mxu3 %v9511_v44  ;;  %v599_v39 = vperm.slane %v14359_v32, 1 }
 0x1a9   :  { %3173 = vmatpush.bf16.msrb.mxu0 %v8643_v60  ;;  %3201 = vmatpush.bf16.msrb.mxu2 %v8647_v63  ;;  %v2951_v8 = vpop.f32.mrf.mxu0 }
 0x1aa   :  { %v2952_v9 = vadd.f32 %v2951_v8, %v596_v52 }
 0x1ab   :  { %3187 = vmatpush.bf16.msrb.mxu1 %v9411_v62  ;;  %3215 = vmatpush.bf16.msrb.mxu3 %v9415_v1  ;;  %v2965_v59 = vpop.f32.mrf.mxu1 }
 0x1ac   :  { %3174 = vmatmul.bf16.vlgmr.msrb.gmra.mxu0 %v14186_v4  ;;  %3202 = vmatmul.bf16.vlgmr.msrb.gmra.mxu2 %v14186_v4  ;;  %v2966_v11 = vadd.f32 %v2965_v59, %v2952_v9  ;;  %v601_v59 = vperm.slane %v14359_v32, 3 }
 0x1ae   :  { %3188 = vmatmul.bf16.vlgmr.msrb.gmra.mxu1 %v14191_v5  ;;  %3216 = vmatmul.bf16.vlgmr.msrb.gmra.mxu3 %v14191_v5  ;;  %v3236_v20 = vmax.f32 %v2966_v11, 0.0 }
 0x1af   :  { %v2979_v12 = vpop.f32.mrf.mxu2 }
 0x1b0   :  { %v2980_v15 = vadd.f32 %v2979_v12, %v597_v10 }
 0x1b1   :  { %v2993_v16 = vpop.f32.mrf.mxu3  ;;  %v2953_v0 = vpop.f32.mrf.mxu0 }
 0x1b2   :  { %v2994_v17 = vadd.f32 %v2993_v16, %v2980_v15  ;;  %v2954_v18 = vadd.f32 %v2953_v0, %v596_v52 }
 0x1b3   :  { %v2967_v19 = vpop.f32.mrf.mxu1 }
 0x1b4   :  { %v2968_v21 = vadd.f32 %v2967_v19, %v2954_v18  ;;  %v3237_v30 = vmax.f32 %v2994_v17, 0.0 }
 0x1b6   :  { %v3260_v23 = vmax.f32 %v2968_v21, 0.0 }
 0x1b7   :  { %v2981_v4 = vpop.f32.mrf.mxu2 }
 0x1b8   :  { %v2982_v5 = vadd.f32 %v2981_v4, %v597_v10  ;;  %v14355_v28 = vpack.c.bf16 %v3260_v23, %v3236_v20 }
 0x1b9   :  { %v2995_v24 = vpop.f32.mrf.mxu3 }
 0x1ba   :  { %v2996_v29 = vadd.f32 %v2995_v24, %v2982_v5 }
 0x1bc   :  { %v3261_v27 = vmax.f32 %v2996_v29, 0.0 }
 0x1be   :  { %v14357_v41 = vpack.c.bf16 %v3261_v27, %v3237_v30 }
 0x1c9   :  { %v3007_v36 = vpop.f32.mrf.mxu0 }
 0x1ca   :  { %v3008_v37 = vadd.f32 %v3007_v36, %v598_v34  ;;  %v602_v36 = vperm.slane %v14359_v32, 4 }
 0x1cb   :  { %v3021_v33 = vpop.f32.mrf.mxu1 }
 0x1cc   :  { %v3022_v25 = vadd.f32 %v3021_v33, %v3008_v37 }
 0x1ce   :  { %v3238_v50 = vmax.f32 %v3022_v25, 0.0 }
 0x1cf   :  { %v3035_v40 = vpop.f32.mrf.mxu2 }
 0x1d0   :  { %v3036_v43 = vadd.f32 %v3035_v40, %v599_v39  ;;  %v603_v40 = vperm.slane %v14359_v32, 5 }
 0x1d1   :  { %v3049_v42 = vpop.f32.mrf.mxu3  ;;  %v3009_v31 = vpop.f32.mrf.mxu0 }
 0x1d2   :  { %v3010_v44 = vadd.f32 %v3009_v31, %v598_v34  ;;  %v3050_v55 = vadd.f32 %v3049_v42, %v3036_v43 }
 0x1d3   :  { %v3023_v26 = vpop.f32.mrf.mxu1 }
 0x1d4   :  { %v3024_v51 = vadd.f32 %v3023_v26, %v3010_v44  ;;  %v3239_v47 = vmax.f32 %v3050_v55, 0.0 }
 0x1d6   :  { %v3262_v48 = vmax.f32 %v3024_v51, 0.0 }
 0x1d7   :  { %v3037_v56 = vpop.f32.mrf.mxu2 }
 0x1d8   :  { %v3038_v57 = vadd.f32 %v3037_v56, %v599_v39  ;;  %v14363_v49 = vpack.c.bf16 %v3262_v48, %v3238_v50 }
 0x1d9   :  { %v3051_v60 = vpop.f32.mrf.mxu3 }
 0x1da   :  { %v3052_v62 = vadd.f32 %v3051_v60, %v3038_v57 }
 0x1dc   :  { %v3263_v63 = vmax.f32 %v3052_v62, 0.0 }
 0x1de   :  { %v14365_v1 = vpack.c.bf16 %v3263_v63, %v3239_v47 }
 0x1e9   :  { %v3063_v52 = vpop.f32.mrf.mxu0 }
 0x1ea   :  { %v3064_v9 = vadd.f32 %v3063_v52, %v600_v2 }
 0x1eb   :  { %v3077_v8 = vpop.f32.mrf.mxu1 }
 0x1ec   :  { %v3078_v12 = vadd.f32 %v3077_v8, %v3064_v9 }
 0x1ee   :  { %v3240_v18 = vmax.f32 %v3078_v12, 0.0 }
 0x1ef   :  { %v3091_v10 = vpop.f32.mrf.mxu2 }
 0x1f0   :  { %v3092_v15 = vadd.f32 %v3091_v10, %v601_v59 }
 0x1f1   :  { %v3105_v11 = vpop.f32.mrf.mxu3  ;;  %v3065_v16 = vpop.f32.mrf.mxu0 }
 0x1f2   :  { %v3066_v17 = vadd.f32 %v3065_v16, %v600_v2  ;;  %v3106_v20 = vadd.f32 %v3105_v11, %v3092_v15  ;;  %v605_v15 = vperm.slane %v14359_v32, 7 }
 0x1f3   :  { %v3079_v0 = vpop.f32.mrf.mxu1 }
 0x1f4   :  { %v3080_v19 = vadd.f32 %v3079_v0, %v3066_v17  ;;  %v3241_v30 = vmax.f32 %v3106_v20, 0.0 }
 0x1f6   :  { %v3264_v4 = vmax.f32 %v3080_v19, 0.0 }
 0x1f7   :  { %v3093_v21 = vpop.f32.mrf.mxu2 }
 0x1f8   :  { %v3094_v23 = vadd.f32 %v3093_v21, %v601_v59  ;;  %v14369_v24 = vpack.c.bf16 %v3264_v4, %v3240_v18  ;;  %v604_v59 = vperm.slane %v14359_v32, 6 }
 0x1f9   :  { %v3107_v5 = vpop.f32.mrf.mxu3 }
 0x1fa   :  { %v3108_v29 = vadd.f32 %v3107_v5, %v3094_v23 }
 0x1fc   :  { %v3265_v27 = vmax.f32 %v3108_v29, 0.0 }
 0x1fe   :  { %v14371_v34 = vpack.c.bf16 %v3265_v27, %v3241_v30 }
 0x209   :  { %v3119_v33 = vpop.f32.mrf.mxu0 }
 0x20a   :  { %v3120_v39 = vadd.f32 %v3119_v33, %v602_v36 }
 0x20b   :  { %v3133_v37 = vpop.f32.mrf.mxu1 }
 0x20c   :  { %v3134_v43 = vadd.f32 %v3133_v37, %v3120_v39 }
 0x20e   :  { %v3242_v51 = vmax.f32 %v3134_v43, 0.0 }
 0x20f   :  { %v3147_v42 = vpop.f32.mrf.mxu2 }
 0x210   :  { %v3148_v31 = vadd.f32 %v3147_v42, %v603_v40 }
 0x211   :  { %v3161_v25 = vpop.f32.mrf.mxu3  ;;  %v3121_v44 = vpop.f32.mrf.mxu0 }
 0x212   :  { %v3122_v26 = vadd.f32 %v3121_v44, %v602_v36  ;;  %v3162_v56 = vadd.f32 %v3161_v25, %v3148_v31 }
 0x213   :  { %v3135_v50 = vpop.f32.mrf.mxu1 }
 0x214   :  { %v3136_v55 = vadd.f32 %v3135_v50, %v3122_v26  ;;  %v3243_v63 = vmax.f32 %v3162_v56, 0.0 }
 0x216   :  { %v3266_v57 = vmax.f32 %v3136_v55, 0.0 }
 0x217   :  { %v3149_v48 = vpop.f32.mrf.mxu2 }
 0x218   :  { %v3150_v60 = vadd.f32 %v3149_v48, %v603_v40  ;;  %v14375_v62 = vpack.c.bf16 %v3266_v57, %v3242_v51 }
 0x219   :  { %v3163_v47 = vpop.f32.mrf.mxu3 }
 0x21a   :  { %v3164_v2 = vadd.f32 %v3163_v47, %v3150_v60 }
 0x21c   :  { %v3267_v52 = vmax.f32 %v3164_v2, 0.0 }
 0x21e   :  { %v14377_v8 = vpack.c.bf16 %v3267_v52, %v3243_v63 }
 0x229   :  { %v3175_v9 = vpop.f32.mrf.mxu0 }
 0x22a   :  { %v3176_v11 = vadd.f32 %v3175_v9, %v604_v59 }
 0x22b   :  { %v3189_v10 = vpop.f32.mrf.mxu1 }
 0x22c   :  { %v3190_v0 = vadd.f32 %v3189_v10, %v3176_v11 }
 0x22e   :  { %v3244_v4 = vmax.f32 %v3190_v0, 0.0 }
 0x22f   :  { %v3203_v12 = vpop.f32.mrf.mxu2 }
 0x230   :  { %v3204_v21 = vadd.f32 %v3203_v12, %v605_v15 }
 0x231   :  { %v3217_v16 = vpop.f32.mrf.mxu3  ;;  %v3177_v17 = vpop.f32.mrf.mxu0 }
 0x232   :  { %v3178_v18 = vadd.f32 %v3177_v17, %v604_v59  ;;  %v3218_v29 = vadd.f32 %v3217_v16, %v3204_v21 }
 0x233   :  { %v3191_v19 = vpop.f32.mrf.mxu1 }
 0x234   :  { %v3192_v20 = vadd.f32 %v3191_v19, %v3178_v18  ;;  %v3245_v37 = vmax.f32 %v3218_v29, 0.0 }
 0x236   :  { %v3268_v23 = vmax.f32 %v3192_v20, 0.0 }
 0x237   :  { %v3205_v30 = vpop.f32.mrf.mxu2 }
 0x238   :  { %v14381_v5 = vpack.c.bf16 %v3268_v23, %v3244_v4  ;;  %v3206_v27 = vadd.f32 %v3205_v30, %v605_v15 }
 0x239   :  { %v3219_v36 = vpop.f32.mrf.mxu3 }
 0x23a   :  { %v3220_v33 = vadd.f32 %v3219_v36, %v3206_v27 }
 0x23c   :  { %v3269_v39 = vmax.f32 %v3220_v33, 0.0 }
 0x23e   :  { %v14383_v40 = vpack.c.bf16 %v3269_v39, %v3245_v37 }
 0x23f   :  { %14073 = dma.done.wait [#allocation7 + $0x1], 49152 }
 0x240   :  { %14074 = vsyncadd [#allocation7 + $0x1], 4294918144  ;;  %v10146_v32 = vld [vmem:[#allocation3 + $0x70] sm:$0xf]  ;;  %v13116_v42 = vld [vmem:[#allocation3 + $0x74] sm:$0xf0] }
 0x241   :  { %v10210_v25 = vld [vmem:[#allocation3 + $0xf0] sm:$0xf]  ;;  %v10147_v43 = vor.u32 %v13116_v42, %v10146_v32  ;;  %v13132_v31 = vld [vmem:[#allocation3 + $0xf4] sm:$0xf0]  ;;  %v10138_v48 = vld [vmem:[#allocation3 + $0x60] sm:$0xf] }
 0x242   :  { %v10274_v44 = vld [vmem:[#allocation3 + $0x170] sm:$0xf]  ;;  %v13148_v26 = vld [vmem:[#allocation3 + $0x174] sm:$0xf0]  ;;  %v10211_v50 = vor.u32 %v13132_v31, %v10210_v25  ;;  %v13114_v60 = vld [vmem:[#allocation3 + $0x64] sm:$0xf0] }
 0x243   :  { %v10275_v51 = vor.u32 %v13148_v26, %v10274_v44  ;;  %v10338_v55 = vld [vmem:[#allocation3 + $0x1f0] sm:$0xf]  ;;  %v13164_v56 = vld [vmem:[#allocation3 + $0x1f4] sm:$0xf0]  ;;  %5608 = vmatpush.bf16.msra.mxu0 %v10147_v43  ;;  %v10202_v47 = vld [vmem:[#allocation3 + $0xe0] sm:$0xf]  ;;  %v10139_v2 = vor.u32 %v13114_v60, %v10138_v48 }
 0x244   :  { %v10339_v57 = vor.u32 %v13164_v56, %v10338_v55  ;;  %v13130_v63 = vld [vmem:[#allocation3 + $0xe4] sm:$0xf0]  ;;  %5622 = vmatpush.bf16.msra.mxu1 %v10211_v50  ;;  %v10266_v9 = vld [vmem:[#allocation3 + $0x160] sm:$0xf]  ;;  %v10130_v15 = vld [vmem:[#allocation3 + $0x50] sm:$0xf] }
 0x245   :  { %5636 = vmatpush.bf16.msra.mxu2 %v10275_v51  ;;  %v10203_v52 = vor.u32 %v13130_v63, %v10202_v47  ;;  %v13146_v59 = vld [vmem:[#allocation3 + $0x164] sm:$0xf0]  ;;  %v10330_v10 = vld [vmem:[#allocation3 + $0x1e0] sm:$0xf]  ;;  %v13112_v16 = vld [vmem:[#allocation3 + $0x54] sm:$0xf0] }
 0x246   :  { %5650 = vmatpush.bf16.msra.mxu3 %v10339_v57  ;;  %v10267_v11 = vor.u32 %v13146_v59, %v10266_v9  ;;  %v13162_v12 = vld [vmem:[#allocation3 + $0x1e4] sm:$0xf0]  ;;  %v10194_v0 = vld [vmem:[#allocation3 + $0xd0] sm:$0xf]  ;;  %v13128_v18 = vld [vmem:[#allocation3 + $0xd4] sm:$0xf0]  ;;  %v10131_v20 = vor.u32 %v13112_v16, %v10130_v15 }
 0x247   :  { %v10331_v17 = vor.u32 %v13162_v12, %v10330_v10  ;;  %v10258_v19 = vld [vmem:[#allocation3 + $0x150] sm:$0xf]  ;;  %5609 = vmatpush.bf16.msra.mxu0 %v10139_v2  ;;  %v13144_v21 = vld [vmem:[#allocation3 + $0x154] sm:$0xf0]  ;;  %v10195_v30 = vor.u32 %v13128_v18, %v10194_v0  ;;  %v10122_v27 = vld [vmem:[#allocation3 + $0x40] sm:$0xf] }
 0x248   :  { %v10322_v4 = vld [vmem:[#allocation3 + $0x1d0] sm:$0xf]  ;;  %v13160_v23 = vld [vmem:[#allocation3 + $0x1d4] sm:$0xf0]  ;;  %5623 = vmatpush.bf16.msra.mxu1 %v10203_v52  ;;  %v10259_v29 = vor.u32 %v13144_v21, %v10258_v19  ;;  %v13110_v36 = vld [vmem:[#allocation3 + $0x44] sm:$0xf0] }
 0x249   :  { %5637 = vmatpush.bf16.msra.mxu2 %v10267_v11  ;;  %v10186_v33 = vld [vmem:[#allocation3 + $0xc0] sm:$0xf]  ;;  %v10323_v37 = vor.u32 %v13160_v23, %v10322_v4  ;;  %v13126_v39 = vld [vmem:[#allocation3 + $0xc4] sm:$0xf0]  ;;  %v10123_v31 = vor.u32 %v13110_v36, %v10122_v27  ;;  %v10114_v50 = vld [vmem:[#allocation3 + $0x30] sm:$0xf] }
 0x24a   :  { %5651 = vmatpush.bf16.msra.mxu3 %v10331_v17  ;;  %v10250_v32 = vld [vmem:[#allocation3 + $0x140] sm:$0xf]  ;;  %v13142_v42 = vld [vmem:[#allocation3 + $0x144] sm:$0xf0]  ;;  %v10187_v44 = vor.u32 %v13126_v39, %v10186_v33  ;;  %v13108_v51 = vld [vmem:[#allocation3 + $0x34] sm:$0xf0] }
 0x24b   :  { %v10314_v25 = vld [vmem:[#allocation3 + $0x1c0] sm:$0xf]  ;;  %v13158_v43 = vld [vmem:[#allocation3 + $0x1c4] sm:$0xf0]  ;;  %5610 = vmatpush.bf16.msra.mxu0 %v10131_v20  ;;  %v10251_v26 = vor.u32 %v13142_v42, %v10250_v32  ;;  %v10178_v55 = vld [vmem:[#allocation3 + $0xb0] sm:$0xf]  ;;  %v10115_v2 = vor.u32 %v13108_v51, %v10114_v50 }
 0x24c   :  { %5624 = vmatpush.bf16.msra.mxu1 %v10195_v30  ;;  %v10315_v56 = vor.u32 %v13158_v43, %v10314_v25  ;;  %v13124_v48 = vld [vmem:[#allocation3 + $0xb4] sm:$0xf0]  ;;  %v10242_v57 = vld [vmem:[#allocation3 + $0x130] sm:$0xf]  ;;  %v10106_v59 = vld [vmem:[#allocation3 + $0x20] sm:$0xf] }
 0x24d   :  { %5638 = vmatpush.bf16.msra.mxu2 %v10259_v29  ;;  %v13140_v60 = vld [vmem:[#allocation3 + $0x134] sm:$0xf0]  ;;  %v10306_v47 = vld [vmem:[#allocation3 + $0x1b0] sm:$0xf]  ;;  %v10179_v52 = vor.u32 %v13124_v48, %v10178_v55  ;;  %v13106_v10 = vld [vmem:[#allocation3 + $0x24] sm:$0xf0] }
 0x24e   :  { %5652 = vmatpush.bf16.msra.mxu3 %v10323_v37  ;;  %v13156_v63 = vld [vmem:[#allocation3 + $0x1b4] sm:$0xf0]  ;;  %v10243_v9 = vor.u32 %v13140_v60, %v10242_v57  ;;  %v10170_v11 = vld [vmem:[#allocation3 + $0xa0] sm:$0xf]  ;;  %v13122_v15 = vld [vmem:[#allocation3 + $0xa4] sm:$0xf0]  ;;  %v10107_v19 = vor.u32 %v13106_v10, %v10106_v59 }
 0x24f   :  { %5611 = vmatpush.bf16.msra.mxu0 %v10123_v31  ;;  %v10307_v12 = vor.u32 %v13156_v63, %v10306_v47  ;;  %v10234_v16 = vld [vmem:[#allocation3 + $0x120] sm:$0xf]  ;;  %v13138_v17 = vld [vmem:[#allocation3 + $0x124] sm:$0xf0]  ;;  %v10171_v20 = vor.u32 %v13122_v15, %v10170_v11  ;;  %v10098_v4 = vld [vmem:[#allocation3 + $0x10] sm:$0xf] }
 0x250   :  { %5625 = vmatpush.bf16.msra.mxu1 %v10187_v44  ;;  %v10298_v0 = vld [vmem:[#allocation3 + $0x1a0] sm:$0xf]  ;;  %v13154_v18 = vld [vmem:[#allocation3 + $0x1a4] sm:$0xf0]  ;;  %v10235_v21 = vor.u32 %v13138_v17, %v10234_v16  ;;  %v13104_v23 = vld [vmem:[#allocation3 + $0x14] sm:$0xf0] }
 0x251   :  { %5639 = vmatpush.bf16.msra.mxu2 %v10251_v26  ;;  %v10162_v30 = vld [vmem:[#allocation3 + $0x90] sm:$0xf]  ;;  %v10299_v29 = vor.u32 %v13154_v18, %v10298_v0  ;;  %v13120_v27 = vld [vmem:[#allocation3 + $0x94] sm:$0xf0]  ;;  %v10099_v32 = vor.u32 %v13104_v23, %v10098_v4  ;;  %v10090_v42 = vld [vmem:[#allocation3] sm:$0xf] }
 0x252   :  { %5653 = vmatpush.bf16.msra.mxu3 %v10315_v56  ;;  %v10226_v36 = vld [vmem:[#allocation3 + $0x110] sm:$0xf]  ;;  %v13136_v33 = vld [vmem:[#allocation3 + $0x114] sm:$0xf0]  ;;  %v13102_v25 = vld [vmem:[#allocation3 + $0x4] sm:$0xf0]  ;;  %v10163_v43 = vor.u32 %v13120_v27, %v10162_v30 }
 0x253   :  { %5612 = vmatpush.bf16.msra.mxu0 %v10115_v2  ;;  %v10290_v37 = vld [vmem:[#allocation3 + $0x190] sm:$0xf]  ;;  %v13152_v39 = vld [vmem:[#allocation3 + $0x194] sm:$0xf0]  ;;  %v10227_v31 = vor.u32 %v13136_v33, %v10226_v36  ;;  %v10154_v44 = vld [vmem:[#allocation3 + $0x80] sm:$0xf]  ;;  %v10091_v63 = vor.u32 %v13102_v25, %v10090_v42 }
 0x254   :  { %5626 = vmatpush.bf16.msra.mxu1 %v10179_v52  ;;  %v13118_v26 = vld [vmem:[#allocation3 + $0x84] sm:$0xf0]  ;;  %v10218_v50 = vld [vmem:[#allocation3 + $0x100] sm:$0xf]  ;;  %v10291_v51 = vor.u32 %v13152_v39, %v10290_v37  ;;  %v10402_v57 = vld [vmem:[#allocation3 + $0x270] sm:$0xf] }
 0x255   :  { %5640 = vmatpush.bf16.msra.mxu2 %v10243_v9  ;;  %v13134_v55 = vld [vmem:[#allocation3 + $0x104] sm:$0xf0]  ;;  %v10282_v56 = vld [vmem:[#allocation3 + $0x180] sm:$0xf]  ;;  %v13180_v60 = vld [vmem:[#allocation3 + $0x274] sm:$0xf0]  ;;  %v10155_v59 = vor.u32 %v13118_v26, %v10154_v44 }
 0x256   :  { %5654 = vmatpush.bf16.msra.mxu3 %v10307_v12  ;;  %v13150_v48 = vld [vmem:[#allocation3 + $0x184] sm:$0xf0]  ;;  %v10466_v47 = vld [vmem:[#allocation3 + $0x2f0] sm:$0xf]  ;;  %v13196_v2 = vld [vmem:[#allocation3 + $0x2f4] sm:$0xf0]  ;;  %v10219_v10 = vor.u32 %v13134_v55, %v10218_v50  ;;  %v10403_v16 = vor.u32 %v13180_v60, %v10402_v57 }
 0x257   :  { %5613 = vmatpush.bf16.msra.mxu0 %v10107_v19  ;;  %v10530_v52 = vld [vmem:[#allocation3 + $0x370] sm:$0xf]  ;;  %v13212_v9 = vld [vmem:[#allocation3 + $0x374] sm:$0xf0]  ;;  %v10283_v15 = vor.u32 %v13150_v48, %v10282_v56  ;;  %v10467_v17 = vor.u32 %v13196_v2, %v10466_v47  ;;  %v10394_v18 = vld [vmem:[#allocation3 + $0x260] sm:$0xf] }
 0x258   :  { %5627 = vmatpush.bf16.msra.mxu1 %v10171_v20  ;;  %v10594_v11 = vld [vmem:[#allocation3 + $0x3f0] sm:$0xf]  ;;  %v13228_v12 = vld [vmem:[#allocation3 + $0x3f4] sm:$0xf0]  ;;  %v10531_v0 = vor.u32 %v13212_v9, %v10530_v52  ;;  %v13178_v19 = vld [vmem:[#allocation3 + $0x264] sm:$0xf0] }
 0x259   :  { %5641 = vmatpush.bf16.msra.mxu2 %v10235_v21  ;;  %v10458_v20 = vld [vmem:[#allocation3 + $0x2e0] sm:$0xf]  ;;  %v10595_v21 = vor.u32 %v13228_v12, %v10594_v11  ;;  %v13194_v4 = vld [vmem:[#allocation3 + $0x2e4] sm:$0xf0]  ;;  %v10395_v36 = vor.u32 %v13178_v19, %v10394_v18  ;;  %v10386_v39 = vld [vmem:[#allocation3 + $0x250] sm:$0xf] }
 0x25a   :  { %5655 = vmatpush.bf16.msra.mxu3 %v10299_v29  ;;  %v10522_v23 = vld [vmem:[#allocation3 + $0x360] sm:$0xf]  ;;  %v13210_v30 = vld [vmem:[#allocation3 + $0x364] sm:$0xf0]  ;;  %v10459_v33 = vor.u32 %v13194_v4, %v10458_v20  ;;  %v10450_v42 = vld [vmem:[#allocation3 + $0x2d0] sm:$0xf] }
 0x25b   :  { %5614 = vmatpush.bf16.msra.mxu0 %v10099_v32  ;;  %v10586_v29 = vld [vmem:[#allocation3 + $0x3e0] sm:$0xf]  ;;  %v13226_v27 = vld [vmem:[#allocation3 + $0x3e4] sm:$0xf0]  ;;  %v10523_v37 = vor.u32 %v13210_v30, %v10522_v23  ;;  %v13176_v32 = vld [vmem:[#allocation3 + $0x254] sm:$0xf0] }
 0x25c   :  { %5628 = vmatpush.bf16.msra.mxu1 %v10163_v43  ;;  %v10587_v25 = vor.u32 %v13226_v27, %v10586_v29  ;;  %v13192_v43 = vld [vmem:[#allocation3 + $0x2d4] sm:$0xf0]  ;;  %v10578_v26 = vld [vmem:[#allocation3 + $0x3d0] sm:$0xf]  ;;  %v10378_v48 = vld [vmem:[#allocation3 + $0x240] sm:$0xf] }
 0x25d   :  { %5642 = vmatpush.bf16.msra.mxu2 %v10227_v31  ;;  %v10514_v31 = vld [vmem:[#allocation3 + $0x350] sm:$0xf]  ;;  %v13208_v44 = vld [vmem:[#allocation3 + $0x354] sm:$0xf0]  ;;  %v10451_v55 = vor.u32 %v13192_v43, %v10450_v42  ;;  %v13174_v57 = vld [vmem:[#allocation3 + $0x244] sm:$0xf0] }
 0x25e   :  { %5656 = vmatpush.bf16.msra.mxu3 %v10291_v51  ;;  %v13224_v50 = vld [vmem:[#allocation3 + $0x3d4] sm:$0xf0]  ;;  %v10387_v51 = vor.u32 %v13176_v32, %v10386_v39  ;;  %v10515_v56 = vor.u32 %v13208_v44, %v10514_v31  ;;  %v10442_v60 = vld [vmem:[#allocation3 + $0x2c0] sm:$0xf]  ;;  %v13206_v52 = vld [vmem:[#allocation3 + $0x344] sm:$0xf0] }
 0x25f   :  { %5615 = vmatpush.bf16.msra.mxu0 %v10091_v63  ;;  %v10579_v47 = vor.u32 %v13224_v50, %v10578_v26  ;;  %v13190_v63 = vld [vmem:[#allocation3 + $0x2c4] sm:$0xf0]  ;;  %v10506_v2 = vld [vmem:[#allocation3 + $0x340] sm:$0xf]  ;;  %v13188_v18 = vld [vmem:[#allocation3 + $0x2b4] sm:$0xf0] }
 0x260   :  { %5629 = vmatpush.bf16.msra.mxu1 %v10155_v59  ;;  %v10570_v9 = vld [vmem:[#allocation3 + $0x3c0] sm:$0xf]  ;;  %v13222_v59 = vld [vmem:[#allocation3 + $0x3c4] sm:$0xf0]  ;;  %v10443_v11 = vor.u32 %v13190_v63, %v10442_v60  ;;  %v10507_v12 = vor.u32 %v13206_v52, %v10506_v2  ;;  %v10498_v19 = vld [vmem:[#allocation3 + $0x330] sm:$0xf] }
 0x261   :  { %5643 = vmatpush.bf16.msra.mxu2 %v10219_v10  ;;  %v10379_v10 = vor.u32 %v13174_v57, %v10378_v48  ;;  %v13204_v20 = vld [vmem:[#allocation3 + $0x334] sm:$0xf0]  ;;  %v10362_v27 = vld [vmem:[#allocation3 + $0x220] sm:$0xf]  ;;  %v13186_v39 = vld [vmem:[#allocation3 + $0x2a4] sm:$0xf0] }
 0x262   :  { %5657 = vmatpush.bf16.msra.mxu3 %v10283_v15  ;;  %5616 = vmatmul.bf16.vlgmr.msra.gmra.mxu0 %v14229_v45  ;;  %v10370_v15 = vld [vmem:[#allocation3 + $0x230] sm:$0xf]  ;;  %v13220_v4 = vld [vmem:[#allocation3 + $0x3b4] sm:$0xf0]  ;;  %v10499_v29 = vor.u32 %v13204_v20, %v10498_v19  ;;  %v10490_v32 = vld [vmem:[#allocation3 + $0x320] sm:$0xf] }
 0x263   :  { %5664 = vmatpush.bf16.msrb.mxu0 %v10403_v16  ;;  %5630 = vmatmul.bf16.vlgmr.msra.gmra.mxu1 %v14232_v3  ;;  %v13172_v16 = vld [vmem:[#allocation3 + $0x234] sm:$0xf0]  ;;  %v13202_v42 = vld [vmem:[#allocation3 + $0x324] sm:$0xf0]  ;;  %v10354_v50 = vld [vmem:[#allocation3 + $0x210] sm:$0xf] }
 0x264   :  { %5678 = vmatpush.bf16.msrb.mxu1 %v10467_v17  ;;  %5644 = vmatmul.bf16.vlgmr.msra.gmra.mxu2 %v14249_v46  ;;  %v10434_v17 = vld [vmem:[#allocation3 + $0x2b0] sm:$0xf]  ;;  %v10371_v23 = vor.u32 %v13172_v16, %v10370_v15  ;;  %v13218_v43 = vld [vmem:[#allocation3 + $0x3a4] sm:$0xf0]  ;;  %v10491_v26 = vor.u32 %v13202_v42, %v10490_v32  ;;  %v13184_v48 = vld [vmem:[#allocation3 + $0x294] sm:$0xf0] }
 0x265   :  { %5692 = vmatpush.bf16.msrb.mxu2 %v10531_v0  ;;  %5658 = vmatmul.bf16.vlgmr.msra.gmra.mxu3 %v14252_v7  ;;  %v10571_v0 = vor.u32 %v13222_v59, %v10570_v9  ;;  %v10435_v30 = vor.u32 %v13188_v18, %v10434_v17  ;;  %v10482_v57 = vld [vmem:[#allocation3 + $0x310] sm:$0xf]  ;;  %v13200_v60 = vld [vmem:[#allocation3 + $0x314] sm:$0xf0]  ;;  %v10346_v52 = vld [vmem:[#allocation3 + $0x200] sm:$0xf] }
 0x266   :  { %5706 = vmatpush.bf16.msrb.mxu3 %v10595_v21  ;;  %v10562_v21 = vld [vmem:[#allocation3 + $0x3b0] sm:$0xf]  ;;  %v13216_v63 = vld [vmem:[#allocation3 + $0x394] sm:$0xf0]  ;;  %v13166_v9 = vld [vmem:[#allocation3 + $0x204] sm:$0xf0] }
 0x267   :  { %5665 = vmatpush.bf16.msrb.mxu0 %v10395_v36  ;;  %v13170_v36 = vld [vmem:[#allocation3 + $0x224] sm:$0xf0]  ;;  %v10474_v15 = vld [vmem:[#allocation3 + $0x300] sm:$0xf]  ;;  %v10658_v19 = vld [vmem:[#allocation3 + $0x470] sm:$0xf] }
 0x268   :  { %5679 = vmatpush.bf16.msrb.mxu1 %v10459_v33  ;;  %v10426_v33 = vld [vmem:[#allocation3 + $0x2a0] sm:$0xf]  ;;  %v10363_v31 = vor.u32 %v13170_v36, %v10362_v27  ;;  %v13198_v17 = vld [vmem:[#allocation3 + $0x304] sm:$0xf0]  ;;  %v13244_v20 = vld [vmem:[#allocation3 + $0x474] sm:$0xf0] }
 0x269   :  { %5693 = vmatpush.bf16.msrb.mxu2 %v10523_v37  ;;  %v10563_v37 = vor.u32 %v13220_v4, %v10562_v21  ;;  %v10427_v44 = vor.u32 %v13186_v39, %v10426_v33  ;;  %v13214_v18 = vld [vmem:[#allocation3 + $0x384] sm:$0xf0]  ;;  %v10722_v21 = vld [vmem:[#allocation3 + $0x4f0] sm:$0xf]  ;;  %v10347_v4 = vor.u32 %v13166_v9, %v10346_v52  ;;  %v10475_v36 = vor.u32 %v13198_v17, %v10474_v15  ;;  %v13288_v15 = vld [vmem:[#allocation3 + $0x5d4] sm:$0xf0] }
 0x26a   :  { %5707 = vmatpush.bf16.msrb.mxu3 %v10587_v25  ;;  %v10554_v25 = vld [vmem:[#allocation3 + $0x3a0] sm:$0xf]  ;;  %v10850_v33 = vld [vmem:[#allocation3 + $0x5f0] sm:$0xf]  ;;  %v10659_v32 = vor.u32 %v13244_v20, %v10658_v19  ;;  %v13238_v19 = vld [vmem:[#allocation3 + $0x444] sm:$0xf0] }
 0x26b   :  { %5666 = vmatpush.bf16.msrb.mxu0 %v10387_v51  ;;  %v13168_v51 = vld [vmem:[#allocation3 + $0x214] sm:$0xf0]  ;;  %v10706_v52 = vld [vmem:[#allocation3 + $0x4d0] sm:$0xf]  ;;  %v10698_v20 = vld [vmem:[#allocation3 + $0x4c0] sm:$0xf] }
 0x26c   :  { %5680 = vmatpush.bf16.msrb.mxu1 %v10451_v55  ;;  %v10418_v55 = vld [vmem:[#allocation3 + $0x290] sm:$0xf]  ;;  %v10355_v2 = vor.u32 %v13168_v51, %v10354_v50  ;;  %v13258_v50 = vld [vmem:[#allocation3 + $0x4e4] sm:$0xf0]  ;;  %v10778_v51 = vld [vmem:[#allocation3 + $0x560] sm:$0xf] }
 0x26d   :  { %5694 = vmatpush.bf16.msrb.mxu2 %v10515_v56  ;;  %v10555_v56 = vor.u32 %v13218_v43, %v10554_v25  ;;  %v10419_v59 = vor.u32 %v13184_v48, %v10418_v55  ;;  %v10650_v43 = vld [vmem:[#allocation3 + $0x460] sm:$0xf]  ;;  %v13274_v55 = vld [vmem:[#allocation3 + $0x564] sm:$0xf0] }
 0x26e   :  { %5708 = vmatpush.bf16.msrb.mxu3 %v10579_v47  ;;  %v10546_v47 = vld [vmem:[#allocation3 + $0x390] sm:$0xf]  ;;  %v13290_v48 = vld [vmem:[#allocation3 + $0x5e4] sm:$0xf0] }
 0x26f   :  { %5667 = vmatpush.bf16.msrb.mxu0 %v10379_v10  ;;  %v10483_v10 = vor.u32 %v13200_v60, %v10482_v57  ;;  %v10547_v16 = vor.u32 %v13216_v63, %v10546_v47  ;;  %v10779_v47 = vor.u32 %v13274_v55, %v10778_v51  ;;  %v10642_v63 = vld [vmem:[#allocation3 + $0x450] sm:$0xf] }
 0x270   :  { %5681 = vmatpush.bf16.msrb.mxu1 %v10443_v11  ;;  %v10410_v11 = vld [vmem:[#allocation3 + $0x280] sm:$0xf] }
 0x271   :  { %5695 = vmatpush.bf16.msrb.mxu2 %v10507_v12  ;;  %v13182_v12 = vld [vmem:[#allocation3 + $0x284] sm:$0xf0] }
 0x272   :  { %5709 = vmatpush.bf16.msrb.mxu3 %v10571_v0  ;;  %v10538_v0 = vld [vmem:[#allocation3 + $0x380] sm:$0xf]  ;;  %v10411_v27 = vor.u32 %v13182_v12, %v10410_v11  ;;  %v13272_v11 = vld [vmem:[#allocation3 + $0x554] sm:$0xf0]  ;;  %v10834_v12 = vld [vmem:[#allocation3 + $0x5d0] sm:$0xf] }
 0x273   :  { %5668 = vmatpush.bf16.msrb.mxu0 %v10371_v23  ;;  %v13260_v23 = vld [vmem:[#allocation3 + $0x4f4] sm:$0xf0]  ;;  %v10539_v39 = vor.u32 %v13214_v18, %v10538_v0  ;;  %v10634_v18 = vld [vmem:[#allocation3 + $0x440] sm:$0xf] }
 0x274   :  { %5682 = vmatpush.bf16.msrb.mxu1 %v10435_v30  ;;  %v10786_v30 = vld [vmem:[#allocation3 + $0x570] sm:$0xf]  ;;  %v10723_v42 = vor.u32 %v13260_v23, %v10722_v21  ;;  %v10835_v21 = vor.u32 %v13288_v15, %v10834_v12  ;;  %v10762_v23 = vld [vmem:[#allocation3 + $0x540] sm:$0xf] }
 0x275   :  { %5696 = vmatpush.bf16.msrb.mxu2 %v10499_v29  ;;  %v13276_v29 = vld [vmem:[#allocation3 + $0x574] sm:$0xf0]  ;;  %v10610_v15 = vld [vmem:[#allocation3 + $0x410] sm:$0xf] }
 0x276   :  { %5710 = vmatpush.bf16.msrb.mxu3 %v10563_v37  ;;  %v13292_v37 = vld [vmem:[#allocation3 + $0x5f4] sm:$0xf0]  ;;  %v10787_v25 = vor.u32 %v13276_v29, %v10786_v30  ;;  %v13270_v30 = vld [vmem:[#allocation3 + $0x544] sm:$0xf0]  ;;  %v10826_v29 = vld [vmem:[#allocation3 + $0x5c0] sm:$0xf] }
 0x277   :  { %5669 = vmatpush.bf16.msrb.mxu0 %v10363_v31  ;;  %v13242_v31 = vld [vmem:[#allocation3 + $0x464] sm:$0xf0] }
 0x278   :  { %5683 = vmatpush.bf16.msrb.mxu1 %v10427_v44  ;;  %v10714_v44 = vld [vmem:[#allocation3 + $0x4e0] sm:$0xf]  ;;  %v10651_v57 = vor.u32 %v13242_v31, %v10650_v43  ;;  %v13252_v43 = vld [vmem:[#allocation3 + $0x4b4] sm:$0xf0]  ;;  %v10754_v31 = vld [vmem:[#allocation3 + $0x530] sm:$0xf] }
 0x279   :  { %5697 = vmatpush.bf16.msrb.mxu2 %v10491_v26  ;;  %v10851_v26 = vor.u32 %v13292_v37, %v10850_v33  ;;  %v10715_v60 = vor.u32 %v13258_v50, %v10714_v44  ;;  %v10763_v37 = vor.u32 %v13270_v30, %v10762_v23  ;;  %v13268_v44 = vld [vmem:[#allocation3 + $0x534] sm:$0xf0]  ;;  %v10602_v30 = vld [vmem:[#allocation3 + $0x400] sm:$0xf] }
 0x27a   :  { %5711 = vmatpush.bf16.msrb.mxu3 %v10555_v56  ;;  %v10842_v56 = vld [vmem:[#allocation3 + $0x5e0] sm:$0xf]  ;;  %v13284_v50 = vld [vmem:[#allocation3 + $0x5b4] sm:$0xf0] }
 0x27b   :  { %5670 = vmatpush.bf16.msrb.mxu0 %v10355_v2  ;;  %v13240_v2 = vld [vmem:[#allocation3 + $0x454] sm:$0xf0]  ;;  %v10843_v9 = vor.u32 %v13290_v48, %v10842_v56  ;;  %v10755_v56 = vor.u32 %v13268_v44, %v10754_v31  ;;  %v10618_v48 = vld [vmem:[#allocation3 + $0x420] sm:$0xf]  ;;  %v10914_v31 = vld [vmem:[#allocation3 + $0x670] sm:$0xf] }
 0x27c   :  { %5684 = vmatpush.bf16.msrb.mxu1 %v10419_v59  ;;  %v13256_v59 = vld [vmem:[#allocation3 + $0x4d4] sm:$0xf0] }
 0x27d   :  { %5698 = vmatpush.bf16.msrb.mxu2 %v10483_v10  ;;  %v10770_v10 = vld [vmem:[#allocation3 + $0x550] sm:$0xf]  ;;  %v10707_v17 = vor.u32 %v13256_v59, %v10706_v52  ;;  %v13266_v52 = vld [vmem:[#allocation3 + $0x524] sm:$0xf0]  ;;  %v13308_v44 = vld [vmem:[#allocation3 + $0x674] sm:$0xf0] }
 0x27e   :  { %5712 = vmatpush.bf16.msrb.mxu3 %v10547_v16  ;;  %v10643_v16 = vor.u32 %v13240_v2, %v10642_v63  ;;  %v10771_v0 = vor.u32 %v13272_v11, %v10770_v10  ;;  %v13250_v63 = vld [vmem:[#allocation3 + $0x4a4] sm:$0xf0]  ;;  %v10746_v2 = vld [vmem:[#allocation3 + $0x520] sm:$0xf] }
 0x27f   :  { %5671 = vmatpush.bf16.msrb.mxu0 %v10347_v4  ;;  %v13254_v4 = vld [vmem:[#allocation3 + $0x4c4] sm:$0xf0]  ;;  %v10747_v12 = vor.u32 %v13266_v52, %v10746_v2  ;;  %v10915_v2 = vor.u32 %v13308_v44, %v10914_v31  ;;  %v10954_v44 = vld [vmem:[#allocation3 + $0x6c0] sm:$0xf] }
 0x280   :  { %5685 = vmatpush.bf16.msrb.mxu1 %v10411_v27  ;;  %v13286_v27 = vld [vmem:[#allocation3 + $0x5c4] sm:$0xf0]  ;;  %v10699_v33 = vor.u32 %v13254_v4, %v10698_v20  ;;  %v13264_v20 = vld [vmem:[#allocation3 + $0x514] sm:$0xf0] }
 0x281   :  { %5699 = vmatpush.bf16.msrb.mxu2 %v10475_v36  ;;  %v10635_v36 = vor.u32 %v13238_v19, %v10634_v18  ;;  %v13282_v59 = vld [vmem:[#allocation3 + $0x5a4] sm:$0xf0]  ;;  %v13248_v18 = vld [vmem:[#allocation3 + $0x494] sm:$0xf0]  ;;  %v10738_v19 = vld [vmem:[#allocation3 + $0x510] sm:$0xf] }
 0x282   :  { %5713 = vmatpush.bf16.msrb.mxu3 %v10539_v39  ;;  %5672 = vmatmul.bf16.vlgmr.msrb.gmra.mxu0 %v14269_v54  ;;  %v10626_v39 = vld [vmem:[#allocation3 + $0x430] sm:$0xf]  ;;  %v13280_v4 = vld [vmem:[#allocation3 + $0x594] sm:$0xf0]  ;;  %v13302_v31 = vld [vmem:[#allocation3 + $0x644] sm:$0xf0] }
 0x283   :  { %5720 = vmatpush.bf16.msra.mxu0 %v10659_v32  ;;  %5686 = vmatmul.bf16.vlgmr.msrb.gmra.mxu1 %v14272_v13  ;;  %v13236_v32 = vld [vmem:[#allocation3 + $0x434] sm:$0xf0] }
 0x284   :  { %5734 = vmatpush.bf16.msra.mxu1 %v10723_v42  ;;  %5700 = vmatmul.bf16.vlgmr.msrb.gmra.mxu2 %v14289_v53  ;;  %v10690_v42 = vld [vmem:[#allocation3 + $0x4b0] sm:$0xf]  ;;  %v10627_v51 = vor.u32 %v13236_v32, %v10626_v39  ;;  %v10730_v39 = vld [vmem:[#allocation3 + $0x500] sm:$0xf] }
 0x285   :  { %5748 = vmatpush.bf16.msra.mxu2 %v10787_v25  ;;  %5714 = vmatmul.bf16.vlgmr.msrb.gmra.mxu3 %v14292_v22  ;;  %v10827_v25 = vor.u32 %v13286_v27, %v10826_v29  ;;  %v10691_v55 = vor.u32 %v13252_v43, %v10690_v42  ;;  %v13230_v29 = vld [vmem:[#allocation3 + $0x404] sm:$0xf0] }
 0x286   :  { %5762 = vmatpush.bf16.msra.mxu3 %v10851_v26  ;;  %v10818_v26 = vld [vmem:[#allocation3 + $0x5b0] sm:$0xf]  ;;  %v13262_v42 = vld [vmem:[#allocation3 + $0x504] sm:$0xf0] }
 0x287   :  { %5721 = vmatpush.bf16.msra.mxu0 %v10651_v57  ;;  %v13234_v57 = vld [vmem:[#allocation3 + $0x424] sm:$0xf0] }
 0x288   :  { %5735 = vmatpush.bf16.msra.mxu1 %v10715_v60  ;;  %v10682_v60 = vld [vmem:[#allocation3 + $0x4a0] sm:$0xf]  ;;  %v10619_v10 = vor.u32 %v13234_v57, %v10618_v48  ;;  %v13278_v43 = vld [vmem:[#allocation3 + $0x584] sm:$0xf0]  ;;  %v10731_v57 = vor.u32 %v13262_v42, %v10730_v39  ;;  %v13352_v39 = vld [vmem:[#allocation3 + $0x7d4] sm:$0xf0] }
 0x289   :  { %5749 = vmatpush.bf16.msra.mxu2 %v10779_v47  ;;  %v10819_v47 = vor.u32 %v13284_v50, %v10818_v26  ;;  %v10683_v11 = vor.u32 %v13250_v63, %v10682_v60  ;;  %v10978_v26 = vld [vmem:[#allocation3 + $0x6f0] sm:$0xf]  ;;  %v10603_v50 = vor.u32 %v13230_v29, %v10602_v30 }
 0x28a   :  { %5763 = vmatpush.bf16.msra.mxu3 %v10843_v9  ;;  %v10810_v9 = vld [vmem:[#allocation3 + $0x5a0] sm:$0xf]  ;;  %v11106_v60 = vld [vmem:[#allocation3 + $0x7f0] sm:$0xf] }
 0x28b   :  { %5722 = vmatpush.bf16.msra.mxu0 %v10643_v16  ;;  %v13232_v16 = vld [vmem:[#allocation3 + $0x414] sm:$0xf0]  ;;  %v10962_v30 = vld [vmem:[#allocation3 + $0x6d0] sm:$0xf] }
 0x28c   :  { %5736 = vmatpush.bf16.msra.mxu1 %v10707_v17  ;;  %v10674_v17 = vld [vmem:[#allocation3 + $0x490] sm:$0xf]  ;;  %v10611_v23 = vor.u32 %v13232_v16, %v10610_v15  ;;  %v13322_v15 = vld [vmem:[#allocation3 + $0x6e4] sm:$0xf0]  ;;  %v11034_v16 = vld [vmem:[#allocation3 + $0x760] sm:$0xf] }
 0x28d   :  { %5750 = vmatpush.bf16.msra.mxu2 %v10771_v0  ;;  %v10811_v0 = vor.u32 %v13282_v59, %v10810_v9  ;;  %v10675_v27 = vor.u32 %v13248_v18, %v10674_v17  ;;  %v10906_v59 = vld [vmem:[#allocation3 + $0x660] sm:$0xf]  ;;  %v13338_v17 = vld [vmem:[#allocation3 + $0x764] sm:$0xf0] }
 0x28e   :  { %5764 = vmatpush.bf16.msra.mxu3 %v10835_v21  ;;  %v10802_v21 = vld [vmem:[#allocation3 + $0x590] sm:$0xf]  ;;  %v13354_v18 = vld [vmem:[#allocation3 + $0x7e4] sm:$0xf0] }
 0x28f   :  { %5723 = vmatpush.bf16.msra.mxu0 %v10635_v36  ;;  %v10739_v36 = vor.u32 %v13264_v20, %v10738_v19  ;;  %v10803_v32 = vor.u32 %v13280_v4, %v10802_v21  ;;  %v11035_v21 = vor.u32 %v13338_v17, %v11034_v16  ;;  %v10898_v4 = vld [vmem:[#allocation3 + $0x650] sm:$0xf] }
 0x290   :  { %5737 = vmatpush.bf16.msra.mxu1 %v10699_v33  ;;  %v10666_v33 = vld [vmem:[#allocation3 + $0x480] sm:$0xf] }
 0x291   :  { %5751 = vmatpush.bf16.msra.mxu2 %v10763_v37  ;;  %v13246_v37 = vld [vmem:[#allocation3 + $0x484] sm:$0xf0] }
 0x292   :  { %5765 = vmatpush.bf16.msra.mxu3 %v10827_v25  ;;  %v10794_v25 = vld [vmem:[#allocation3 + $0x580] sm:$0xf]  ;;  %v10667_v48 = vor.u32 %v13246_v37, %v10666_v33  ;;  %v13336_v33 = vld [vmem:[#allocation3 + $0x754] sm:$0xf0]  ;;  %v11090_v37 = vld [vmem:[#allocation3 + $0x7d0] sm:$0xf] }
 0x293   :  { %5724 = vmatpush.bf16.msra.mxu0 %v10627_v51  ;;  %v13324_v51 = vld [vmem:[#allocation3 + $0x6f4] sm:$0xf0]  ;;  %v10795_v63 = vor.u32 %v13278_v43, %v10794_v25  ;;  %v10890_v43 = vld [vmem:[#allocation3 + $0x640] sm:$0xf] }
 0x294   :  { %5738 = vmatpush.bf16.msra.mxu1 %v10691_v55  ;;  %v11042_v55 = vld [vmem:[#allocation3 + $0x770] sm:$0xf]  ;;  %v10979_v52 = vor.u32 %v13324_v51, %v10978_v26  ;;  %v11091_v26 = vor.u32 %v13352_v39, %v11090_v37  ;;  %v11018_v51 = vld [vmem:[#allocation3 + $0x740] sm:$0xf] }
 0x295   :  { %5752 = vmatpush.bf16.msra.mxu2 %v10755_v56  ;;  %v13340_v56 = vld [vmem:[#allocation3 + $0x774] sm:$0xf0]  ;;  %v10866_v39 = vld [vmem:[#allocation3 + $0x610] sm:$0xf] }
 0x296   :  { %5766 = vmatpush.bf16.msra.mxu3 %v10819_v47  ;;  %v13356_v47 = vld [vmem:[#allocation3 + $0x7f4] sm:$0xf0]  ;;  %v11043_v9 = vor.u32 %v13340_v56, %v11042_v55  ;;  %v13334_v55 = vld [vmem:[#allocation3 + $0x744] sm:$0xf0]  ;;  %v11082_v56 = vld [vmem:[#allocation3 + $0x7c0] sm:$0xf] }
 0x297   :  { %5725 = vmatpush.bf16.msra.mxu0 %v10619_v10  ;;  %v13306_v10 = vld [vmem:[#allocation3 + $0x664] sm:$0xf0] }
 0x298   :  { %5739 = vmatpush.bf16.msra.mxu1 %v10683_v11  ;;  %v10970_v11 = vld [vmem:[#allocation3 + $0x6e0] sm:$0xf]  ;;  %v10907_v19 = vor.u32 %v13306_v10, %v10906_v59  ;;  %v13316_v59 = vld [vmem:[#allocation3 + $0x6b4] sm:$0xf0]  ;;  %v11010_v10 = vld [vmem:[#allocation3 + $0x730] sm:$0xf] }
 0x299   :  { %5753 = vmatpush.bf16.msra.mxu2 %v10747_v12  ;;  %v11107_v12 = vor.u32 %v13356_v47, %v11106_v60  ;;  %v10971_v20 = vor.u32 %v13322_v15, %v10970_v11  ;;  %v11019_v47 = vor.u32 %v13334_v55, %v11018_v51  ;;  %v13332_v11 = vld [vmem:[#allocation3 + $0x734] sm:$0xf0]  ;;  %v10858_v55 = vld [vmem:[#allocation3 + $0x600] sm:$0xf] }
 0x29a   :  { %5767 = vmatpush.bf16.msra.mxu3 %v10811_v0  ;;  %v11098_v0 = vld [vmem:[#allocation3 + $0x7e0] sm:$0xf]  ;;  %v13348_v15 = vld [vmem:[#allocation3 + $0x7b4] sm:$0xf0] }
 0x29b   :  { %5726 = vmatpush.bf16.msra.mxu0 %v10611_v23  ;;  %v13304_v23 = vld [vmem:[#allocation3 + $0x654] sm:$0xf0]  ;;  %v11099_v29 = vor.u32 %v13354_v18, %v11098_v0  ;;  %v11011_v0 = vor.u32 %v13332_v11, %v11010_v10  ;;  %v10874_v18 = vld [vmem:[#allocation3 + $0x620] sm:$0xf]  ;;  %v11170_v10 = vld [vmem:[#allocation3 + $0x870] sm:$0xf] }
 0x29c   :  { %5740 = vmatpush.bf16.msra.mxu1 %v10675_v27  ;;  %v13320_v27 = vld [vmem:[#allocation3 + $0x6d4] sm:$0xf0] }
 0x29d   :  { %5754 = vmatpush.bf16.msra.mxu2 %v10739_v36  ;;  %v11026_v36 = vld [vmem:[#allocation3 + $0x750] sm:$0xf]  ;;  %v10963_v42 = vor.u32 %v13320_v27, %v10962_v30  ;;  %v13330_v30 = vld [vmem:[#allocation3 + $0x724] sm:$0xf0]  ;;  %v13372_v11 = vld [vmem:[#allocation3 + $0x874] sm:$0xf0] }
 0x29e   :  { %5768 = vmatpush.bf16.msra.mxu3 %v10803_v32  ;;  %v10899_v32 = vor.u32 %v13304_v23, %v10898_v4  ;;  %v11027_v25 = vor.u32 %v13336_v33, %v11026_v36  ;;  %v13314_v4 = vld [vmem:[#allocation3 + $0x6a4] sm:$0xf0]  ;;  %v11002_v23 = vld [vmem:[#allocation3 + $0x720] sm:$0xf] }
 0x29f   :  { %5727 = vmatpush.bf16.msra.mxu0 %v10603_v50  ;;  %v13318_v50 = vld [vmem:[#allocation3 + $0x6c4] sm:$0xf0]  ;;  %v11003_v37 = vor.u32 %v13330_v30, %v11002_v23  ;;  %v11171_v23 = vor.u32 %v13372_v11, %v11170_v10  ;;  %v11210_v11 = vld [vmem:[#allocation3 + $0x8c0] sm:$0xf] }
 0x2a0   :  { %5741 = vmatpush.bf16.msra.mxu1 %v10667_v48  ;;  %v13350_v48 = vld [vmem:[#allocation3 + $0x7c4] sm:$0xf0]  ;;  %v10955_v60 = vor.u32 %v13318_v50, %v10954_v44  ;;  %v13328_v44 = vld [vmem:[#allocation3 + $0x714] sm:$0xf0] }
 0x2a1   :  { %5755 = vmatpush.bf16.msra.mxu2 %v10731_v57  ;;  %v10891_v57 = vor.u32 %v13302_v31, %v10890_v43  ;;  %v13346_v27 = vld [vmem:[#allocation3 + $0x7a4] sm:$0xf0]  ;;  %v13312_v43 = vld [vmem:[#allocation3 + $0x694] sm:$0xf0]  ;;  %v10994_v31 = vld [vmem:[#allocation3 + $0x710] sm:$0xf] }
 0x2a2   :  { %5769 = vmatpush.bf16.msra.mxu3 %v10795_v63  ;;  %5728 = vmatmul.bf16.vlgmr.msra.gmra.mxu0 %v14311_v14  ;;  %v10882_v63 = vld [vmem:[#allocation3 + $0x630] sm:$0xf]  ;;  %v13344_v50 = vld [vmem:[#allocation3 + $0x794] sm:$0xf0]  ;;  %v13366_v10 = vld [vmem:[#allocation3 + $0x844] sm:$0xf0] }
 0x2a3   :  { %5776 = vmatpush.bf16.msrb.mxu0 %v10915_v2  ;;  %5742 = vmatmul.bf16.vlgmr.msra.gmra.mxu1 %v14314_v38  ;;  %v13300_v2 = vld [vmem:[#allocation3 + $0x634] sm:$0xf0] }
 0x2a4   :  { %5790 = vmatpush.bf16.msrb.mxu1 %v10979_v52  ;;  %5756 = vmatmul.bf16.vlgmr.msra.gmra.mxu2 %v14331_v35  ;;  %v10946_v52 = vld [vmem:[#allocation3 + $0x6b0] sm:$0xf]  ;;  %v10883_v16 = vor.u32 %v13300_v2, %v10882_v63  ;;  %v10986_v63 = vld [vmem:[#allocation3 + $0x700] sm:$0xf] }
 0x2a5   :  { %5804 = vmatpush.bf16.msrb.mxu2 %v11043_v9  ;;  %5770 = vmatmul.bf16.vlgmr.msra.gmra.mxu3 %v14334_v61  ;;  %v11083_v9 = vor.u32 %v13350_v48, %v11082_v56  ;;  %v10947_v17 = vor.u32 %v13316_v59, %v10946_v52  ;;  %v13294_v56 = vld [vmem:[#allocation3 + $0x604] sm:$0xf0] }
 0x2a6   :  { %5818 = vmatpush.bf16.msrb.mxu3 %v11107_v12  ;;  %v11074_v12 = vld [vmem:[#allocation3 + $0x7b0] sm:$0xf]  ;;  %v13326_v52 = vld [vmem:[#allocation3 + $0x704] sm:$0xf0] }
 0x2a7   :  { %5777 = vmatpush.bf16.msrb.mxu0 %v10907_v19  ;;  %v13298_v19 = vld [vmem:[#allocation3 + $0x624] sm:$0xf0] }
 0x2a8   :  { %5791 = vmatpush.bf16.msrb.mxu1 %v10971_v20  ;;  %v10938_v20 = vld [vmem:[#allocation3 + $0x6a0] sm:$0xf]  ;;  %v10875_v36 = vor.u32 %v13298_v19, %v10874_v18  ;;  %v13342_v59 = vld [vmem:[#allocation3 + $0x784] sm:$0xf0]  ;;  %v10987_v19 = vor.u32 %v13326_v52, %v10986_v63  ;;  %v13416_v63 = vld [vmem:[#allocation3 + $0x9d4] sm:$0xf0] }
 0x2a9   :  { %5805 = vmatpush.bf16.msrb.mxu2 %v11035_v21  ;;  %v11075_v21 = vor.u32 %v13348_v15, %v11074_v12  ;;  %v10939_v33 = vor.u32 %v13314_v4, %v10938_v20  ;;  %v11234_v12 = vld [vmem:[#allocation3 + $0x8f0] sm:$0xf]  ;;  %v10859_v15 = vor.u32 %v13294_v56, %v10858_v55 }
 0x2aa   :  { %5819 = vmatpush.bf16.msrb.mxu3 %v11099_v29  ;;  %v11066_v29 = vld [vmem:[#allocation3 + $0x7a0] sm:$0xf]  ;;  %v11362_v20 = vld [vmem:[#allocation3 + $0x9f0] sm:$0xf] }
 0x2ab   :  { %5778 = vmatpush.bf16.msrb.mxu0 %v10899_v32  ;;  %v13296_v32 = vld [vmem:[#allocation3 + $0x614] sm:$0xf0]  ;;  %v11218_v55 = vld [vmem:[#allocation3 + $0x8d0] sm:$0xf] }
 0x2ac   :  { %5792 = vmatpush.bf16.msrb.mxu1 %v10963_v42  ;;  %v10930_v42 = vld [vmem:[#allocation3 + $0x690] sm:$0xf]  ;;  %v10867_v51 = vor.u32 %v13296_v32, %v10866_v39  ;;  %v13386_v39 = vld [vmem:[#allocation3 + $0x8e4] sm:$0xf0]  ;;  %v11290_v32 = vld [vmem:[#allocation3 + $0x960] sm:$0xf] }
 0x2ad   :  { %5806 = vmatpush.bf16.msrb.mxu2 %v11027_v25  ;;  %v11067_v25 = vor.u32 %v13346_v27, %v11066_v29  ;;  %v10931_v48 = vor.u32 %v13312_v43, %v10930_v42  ;;  %v11162_v27 = vld [vmem:[#allocation3 + $0x860] sm:$0xf]  ;;  %v13402_v42 = vld [vmem:[#allocation3 + $0x964] sm:$0xf0] }
 0x2ae   :  { %5820 = vmatpush.bf16.msrb.mxu3 %v11091_v26  ;;  %v11058_v26 = vld [vmem:[#allocation3 + $0x790] sm:$0xf]  ;;  %v13418_v43 = vld [vmem:[#allocation3 + $0x9e4] sm:$0xf0] }
 0x2af   :  { %5779 = vmatpush.bf16.msrb.mxu0 %v10891_v57  ;;  %v10995_v57 = vor.u32 %v13328_v44, %v10994_v31  ;;  %v11059_v2 = vor.u32 %v13344_v50, %v11058_v26  ;;  %v11291_v26 = vor.u32 %v13402_v42, %v11290_v32  ;;  %v11154_v50 = vld [vmem:[#allocation3 + $0x850] sm:$0xf] }
 0x2b0   :  { %5793 = vmatpush.bf16.msrb.mxu1 %v10955_v60  ;;  %v10922_v60 = vld [vmem:[#allocation3 + $0x680] sm:$0xf] }
 0x2b1   :  { %5807 = vmatpush.bf16.msrb.mxu2 %v11019_v47  ;;  %v13310_v47 = vld [vmem:[#allocation3 + $0x684] sm:$0xf0] }
 0x2b2   :  { %5821 = vmatpush.bf16.msrb.mxu3 %v11083_v9  ;;  %v11050_v9 = vld [vmem:[#allocation3 + $0x780] sm:$0xf]  ;;  %v10923_v18 = vor.u32 %v13310_v47, %v10922_v60  ;;  %v13400_v60 = vld [vmem:[#allocation3 + $0x954] sm:$0xf0]  ;;  %v11346_v47 = vld [vmem:[#allocation3 + $0x9d0] sm:$0xf] }
 0x2b3   :  { %5780 = vmatpush.bf16.msrb.mxu0 %v10883_v16  ;;  %v13388_v16 = vld [vmem:[#allocation3 + $0x8f4] sm:$0xf0]  ;;  %v11051_v4 = vor.u32 %v13342_v59, %v11050_v9  ;;  %v11146_v59 = vld [vmem:[#allocation3 + $0x840] sm:$0xf] }
 0x2b4   :  { %5794 = vmatpush.bf16.msrb.mxu1 %v10947_v17  ;;  %v11298_v17 = vld [vmem:[#allocation3 + $0x970] sm:$0xf]  ;;  %v11235_v30 = vor.u32 %v13388_v16, %v11234_v12  ;;  %v11347_v12 = vor.u32 %v13416_v63, %v11346_v47  ;;  %v11274_v16 = vld [vmem:[#allocation3 + $0x940] sm:$0xf] }
 0x2b5   :  { %5808 = vmatpush.bf16.msrb.mxu2 %v11011_v0  ;;  %v13404_v0 = vld [vmem:[#allocation3 + $0x974] sm:$0xf0]  ;;  %v11122_v63 = vld [vmem:[#allocation3 + $0x810] sm:$0xf] }
 0x2b6   :  { %5822 = vmatpush.bf16.msrb.mxu3 %v11075_v21  ;;  %v13420_v21 = vld [vmem:[#allocation3 + $0x9f4] sm:$0xf0]  ;;  %v11299_v29 = vor.u32 %v13404_v0, %v11298_v17  ;;  %v13398_v17 = vld [vmem:[#allocation3 + $0x944] sm:$0xf0]  ;;  %v11338_v0 = vld [vmem:[#allocation3 + $0x9c0] sm:$0xf] }
 0x2b7   :  { %5781 = vmatpush.bf16.msrb.mxu0 %v10875_v36  ;;  %v13370_v36 = vld [vmem:[#allocation3 + $0x864] sm:$0xf0] }
 0x2b8   :  { %5795 = vmatpush.bf16.msrb.mxu1 %v10939_v33  ;;  %v11226_v33 = vld [vmem:[#allocation3 + $0x8e0] sm:$0xf]  ;;  %v11163_v31 = vor.u32 %v13370_v36, %v11162_v27  ;;  %v13380_v27 = vld [vmem:[#allocation3 + $0x8b4] sm:$0xf0]  ;;  %v11266_v36 = vld [vmem:[#allocation3 + $0x930] sm:$0xf] }
 0x2b9   :  { %5809 = vmatpush.bf16.msrb.mxu2 %v11003_v37  ;;  %v11363_v37 = vor.u32 %v13420_v21, %v11362_v20  ;;  %v11227_v44 = vor.u32 %v13386_v39, %v11226_v33  ;;  %v11275_v21 = vor.u32 %v13398_v17, %v11274_v16  ;;  %v13396_v33 = vld [vmem:[#allocation3 + $0x934] sm:$0xf0]  ;;  %v11114_v17 = vld [vmem:[#allocation3 + $0x800] sm:$0xf] }
 0x2ba   :  { %5823 = vmatpush.bf16.msrb.mxu3 %v11067_v25  ;;  %v11354_v25 = vld [vmem:[#allocation3 + $0x9e0] sm:$0xf]  ;;  %v13412_v39 = vld [vmem:[#allocation3 + $0x9b4] sm:$0xf0] }
 0x2bb   :  { %5782 = vmatpush.bf16.msrb.mxu0 %v10867_v51  ;;  %v13368_v51 = vld [vmem:[#allocation3 + $0x854] sm:$0xf0]  ;;  %v11355_v56 = vor.u32 %v13418_v43, %v11354_v25  ;;  %v11267_v25 = vor.u32 %v13396_v33, %v11266_v36  ;;  %v11130_v43 = vld [vmem:[#allocation3 + $0x820] sm:$0xf]  ;;  %v11426_v36 = vld [vmem:[#allocation3 + $0xa70] sm:$0xf] }
 0x2bc   :  { %5796 = vmatpush.bf16.msrb.mxu1 %v10931_v48  ;;  %v13384_v48 = vld [vmem:[#allocation3 + $0x8d4] sm:$0xf0] }
 0x2bd   :  { %5810 = vmatpush.bf16.msrb.mxu2 %v10995_v57  ;;  %v11282_v57 = vld [vmem:[#allocation3 + $0x950] sm:$0xf]  ;;  %v11219_v52 = vor.u32 %v13384_v48, %v11218_v55  ;;  %v13394_v55 = vld [vmem:[#allocation3 + $0x924] sm:$0xf0]  ;;  %v13436_v33 = vld [vmem:[#allocation3 + $0xa74] sm:$0xf0] }
 0x2be   :  { %5824 = vmatpush.bf16.msrb.mxu3 %v11059_v2  ;;  %v11155_v2 = vor.u32 %v13368_v51, %v11154_v50  ;;  %v11283_v9 = vor.u32 %v13400_v60, %v11282_v57  ;;  %v13378_v50 = vld [vmem:[#allocation3 + $0x8a4] sm:$0xf0]  ;;  %v11258_v51 = vld [vmem:[#allocation3 + $0x920] sm:$0xf] }
 0x2bf   :  { %5783 = vmatpush.bf16.msrb.mxu0 %v10859_v15  ;;  %v13382_v15 = vld [vmem:[#allocation3 + $0x8c4] sm:$0xf0]  ;;  %v11259_v47 = vor.u32 %v13394_v55, %v11258_v51  ;;  %v11427_v51 = vor.u32 %v13436_v33, %v11426_v36  ;;  %v11402_v33 = vld [vmem:[#allocation3 + $0xa40] sm:$0xf] }
 0x2c0   :  { %5797 = vmatpush.bf16.msrb.mxu1 %v10923_v18  ;;  %v13414_v18 = vld [vmem:[#allocation3 + $0x9c4] sm:$0xf0]  ;;  %v11211_v20 = vor.u32 %v13382_v15, %v11210_v11  ;;  %v13392_v11 = vld [vmem:[#allocation3 + $0x914] sm:$0xf0] }
 0x2c1   :  { %5811 = vmatpush.bf16.msrb.mxu2 %v10987_v19  ;;  %v11147_v19 = vor.u32 %v13366_v10, %v11146_v59  ;;  %v13410_v48 = vld [vmem:[#allocation3 + $0x9a4] sm:$0xf0]  ;;  %v13376_v59 = vld [vmem:[#allocation3 + $0x894] sm:$0xf0]  ;;  %v11250_v10 = vld [vmem:[#allocation3 + $0x910] sm:$0xf] }
 0x2c2   :  { %5825 = vmatpush.bf16.msrb.mxu3 %v11051_v4  ;;  %5784 = vmatmul.bf16.vlgmr.msrb.gmra.mxu0 %v14345_v58  ;;  %v11138_v4 = vld [vmem:[#allocation3 + $0x830] sm:$0xf]  ;;  %v13408_v15 = vld [vmem:[#allocation3 + $0x994] sm:$0xf0] }
 0x2c3   :  { %5832 = vmatpush.bf16.msra.mxu0 %v11171_v23  ;;  %5798 = vmatmul.bf16.vlgmr.msrb.gmra.mxu1 %v14347_v6  ;;  %v13364_v23 = vld [vmem:[#allocation3 + $0x834] sm:$0xf0] }
 0x2c4   :  { %5846 = vmatpush.bf16.msra.mxu1 %v11235_v30  ;;  %5812 = vmatmul.bf16.vlgmr.msrb.gmra.mxu2 %v14355_v28  ;;  %v11202_v30 = vld [vmem:[#allocation3 + $0x8b0] sm:$0xf]  ;;  %v11139_v32 = vor.u32 %v13364_v23, %v11138_v4  ;;  %v11242_v4 = vld [vmem:[#allocation3 + $0x900] sm:$0xf] }
 0x2c5   :  { %5860 = vmatpush.bf16.msra.mxu2 %v11299_v29  ;;  %5826 = vmatmul.bf16.vlgmr.msrb.gmra.mxu3 %v14357_v41  ;;  %v11339_v29 = vor.u32 %v13414_v18, %v11338_v0  ;;  %v11203_v42 = vor.u32 %v13380_v27, %v11202_v30  ;;  %v13358_v0 = vld [vmem:[#allocation3 + $0x804] sm:$0xf0] }
 0x2c6   :  { %5874 = vmatpush.bf16.msra.mxu3 %v11363_v37  ;;  %v11330_v37 = vld [vmem:[#allocation3 + $0x9b0] sm:$0xf]  ;;  %v13390_v30 = vld [vmem:[#allocation3 + $0x904] sm:$0xf0] }
 0x2c7   :  { %5833 = vmatpush.bf16.msra.mxu0 %v11163_v31  ;;  %v13362_v31 = vld [vmem:[#allocation3 + $0x824] sm:$0xf0] }
 0x2c8   :  { %5847 = vmatpush.bf16.msra.mxu1 %v11227_v44  ;;  %v11194_v44 = vld [vmem:[#allocation3 + $0x8a0] sm:$0xf]  ;;  %v11131_v57 = vor.u32 %v13362_v31, %v11130_v43  ;;  %v13406_v27 = vld [vmem:[#allocation3 + $0x984] sm:$0xf0]  ;;  %v11243_v31 = vor.u32 %v13390_v30, %v11242_v4  ;;  %v11602_v4 = vld [vmem:[#allocation3 + $0xbd0] sm:$0xf] }
 0x2c9   :  { %5861 = vmatpush.bf16.msra.mxu2 %v11291_v26  ;;  %v11331_v26 = vor.u32 %v13412_v39, %v11330_v37  ;;  %v11195_v60 = vor.u32 %v13378_v50, %v11194_v44  ;;  %v11490_v37 = vld [vmem:[#allocation3 + $0xaf0] sm:$0xf]  ;;  %v11115_v39 = vor.u32 %v13358_v0, %v11114_v17  ;;  %v14401_v0 = vld [vmem:[#allocation13] sm:$0x3] }
 0x2ca   :  { %5875 = vmatpush.bf16.msra.mxu3 %v11355_v56  ;;  %v11322_v56 = vld [vmem:[#allocation3 + $0x9a0] sm:$0xf]  ;;  %v11618_v44 = vld [vmem:[#allocation3 + $0xbf0] sm:$0xf] }
 0x2cb   :  { %5834 = vmatpush.bf16.msra.mxu0 %v11155_v2  ;;  %v13360_v2 = vld [vmem:[#allocation3 + $0x814] sm:$0xf0]  ;;  %v11474_v17 = vld [vmem:[#allocation3 + $0xad0] sm:$0xf] }
 0x2cc   :  { %5848 = vmatpush.bf16.msra.mxu1 %v11219_v52  ;;  %v11186_v52 = vld [vmem:[#allocation3 + $0x890] sm:$0xf]  ;;  %v11123_v16 = vor.u32 %v13360_v2, %v11122_v63  ;;  %v13450_v63 = vld [vmem:[#allocation3 + $0xae4] sm:$0xf0]  ;;  %v11546_v2 = vld [vmem:[#allocation3 + $0xb60] sm:$0xf] }
 0x2cd   :  { %5862 = vmatpush.bf16.msra.mxu2 %v11283_v9  ;;  %v11323_v9 = vor.u32 %v13410_v48, %v11322_v56  ;;  %v11187_v18 = vor.u32 %v13376_v59, %v11186_v52  ;;  %v11418_v48 = vld [vmem:[#allocation3 + $0xa60] sm:$0xf]  ;;  %v13466_v52 = vld [vmem:[#allocation3 + $0xb64] sm:$0xf0] }
 0x2ce   :  { %5876 = vmatpush.bf16.msra.mxu3 %v11347_v12  ;;  %v11314_v12 = vld [vmem:[#allocation3 + $0x990] sm:$0xf]  ;;  %v13482_v59 = vld [vmem:[#allocation3 + $0xbe4] sm:$0xf0] }
 0x2cf   :  { %5835 = vmatpush.bf16.msra.mxu0 %v11147_v19  ;;  %v11251_v19 = vor.u32 %v13392_v11, %v11250_v10  ;;  %v11315_v23 = vor.u32 %v13408_v15, %v11314_v12  ;;  %v11410_v11 = vld [vmem:[#allocation3 + $0xa50] sm:$0xf]  ;;  %v11547_v15 = vor.u32 %v13466_v52, %v11546_v2  ;;  %v13444_v2 = vld [vmem:[#allocation3 + $0xab4] sm:$0xf0] }
 0x2d0   :  { %5849 = vmatpush.bf16.msra.mxu1 %v11211_v20  ;;  %v11178_v20 = vld [vmem:[#allocation3 + $0x880] sm:$0xf]  ;;  %v11522_v52 = vld [vmem:[#allocation3 + $0xb30] sm:$0xf] }
 0x2d1   :  { %5863 = vmatpush.bf16.msra.mxu2 %v11275_v21  ;;  %v13374_v21 = vld [vmem:[#allocation3 + $0x884] sm:$0xf0] }
 0x2d2   :  { %5877 = vmatpush.bf16.msra.mxu3 %v11339_v29  ;;  %v11306_v29 = vld [vmem:[#allocation3 + $0x980] sm:$0xf]  ;;  %v11179_v43 = vor.u32 %v13374_v21, %v11178_v20  ;;  %v11538_v20 = vld [vmem:[#allocation3 + $0xb50] sm:$0xf]  ;;  %v13464_v21 = vld [vmem:[#allocation3 + $0xb54] sm:$0xf0] }
 0x2d3   :  { %5836 = vmatpush.bf16.msra.mxu0 %v11139_v32  ;;  %v13452_v32 = vld [vmem:[#allocation3 + $0xaf4] sm:$0xf0]  ;;  %v11307_v50 = vor.u32 %v13406_v27, %v11306_v29  ;;  %v3684_v29 = vperm.slane %v14401_v0, 0  ;;  %v11539_v36 = vor.u32 %v13464_v21, %v11538_v20  ;;  %v13426_v0 = vld [vmem:[#allocation3 + $0xa24] sm:$0xf0] }
 0x2d4   :  { %5850 = vmatpush.bf16.msra.mxu1 %v11203_v42  ;;  %v11554_v42 = vld [vmem:[#allocation3 + $0xb70] sm:$0xf]  ;;  %v11491_v55 = vor.u32 %v13452_v32, %v11490_v37  ;;  %v13430_v37 = vld [vmem:[#allocation3 + $0xa44] sm:$0xf0]  ;;  %v11514_v21 = vld [vmem:[#allocation3 + $0xb20] sm:$0xf] }
 0x2d5   :  { %5864 = vmatpush.bf16.msra.mxu2 %v11267_v25  ;;  %v13468_v25 = vld [vmem:[#allocation3 + $0xb74] sm:$0xf0]  ;;  %v13442_v20 = vld [vmem:[#allocation3 + $0xaa4] sm:$0xf0] }
 0x2d6   :  { %5878 = vmatpush.bf16.msra.mxu3 %v11331_v26  ;;  %v13484_v26 = vld [vmem:[#allocation3 + $0xbf4] sm:$0xf0]  ;;  %v11555_v56 = vor.u32 %v13468_v25, %v11554_v42  ;;  %v13446_v42 = vld [vmem:[#allocation3 + $0xac4] sm:$0xf0]  ;;  %v11530_v25 = vld [vmem:[#allocation3 + $0xb40] sm:$0xf] }
 0x2d7   :  { %5837 = vmatpush.bf16.msra.mxu0 %v11131_v57  ;;  %v13434_v57 = vld [vmem:[#allocation3 + $0xa64] sm:$0xf0] }
 0x2d8   :  { %5851 = vmatpush.bf16.msra.mxu1 %v11195_v60  ;;  %v11482_v60 = vld [vmem:[#allocation3 + $0xae0] sm:$0xf]  ;;  %v11419_v10 = vor.u32 %v13434_v57, %v11418_v48  ;;  %v11394_v57 = vld [vmem:[#allocation3 + $0xa30] sm:$0xf] }
 0x2d9   :  { %5865 = vmatpush.bf16.msra.mxu2 %v11259_v47  ;;  %v11619_v47 = vor.u32 %v13484_v26, %v11618_v44  ;;  %v11483_v12 = vor.u32 %v13450_v63, %v11482_v60  ;;  %v13478_v44 = vld [vmem:[#allocation3 + $0xbc4] sm:$0xf0]  ;;  %v13428_v60 = vld [vmem:[#allocation3 + $0xa34] sm:$0xf0] }
 0x2da   :  { %5879 = vmatpush.bf16.msra.mxu3 %v11323_v9  ;;  %v11610_v9 = vld [vmem:[#allocation3 + $0xbe0] sm:$0xf] }
 0x2db   :  { %5838 = vmatpush.bf16.msra.mxu0 %v11123_v16  ;;  %v13432_v16 = vld [vmem:[#allocation3 + $0xa54] sm:$0xf0] }
 0x2dc   :  { %5852 = vmatpush.bf16.msra.mxu1 %v11187_v18  ;;  %v11611_v18 = vor.u32 %v13482_v59, %v11610_v9  ;;  %v11411_v30 = vor.u32 %v13432_v16, %v11410_v11  ;;  %v13460_v9 = vld [vmem:[#allocation3 + $0xb34] sm:$0xf0] }
 0x2dd   :  { %5866 = vmatpush.bf16.msra.mxu2 %v11251_v19  ;;  %v13448_v19 = vld [vmem:[#allocation3 + $0xad4] sm:$0xf0]  ;;  %v11523_v16 = vor.u32 %v13460_v9, %v11522_v52 }
 0x2de   :  { %5880 = vmatpush.bf16.msra.mxu3 %v11315_v23  ;;  %v13480_v23 = vld [vmem:[#allocation3 + $0xbd4] sm:$0xf0]  ;;  %v11475_v27 = vor.u32 %v13448_v19, %v11474_v17  ;;  %v11386_v17 = vld [vmem:[#allocation3 + $0xa20] sm:$0xf] }
 0x2df   :  { %5839 = vmatpush.bf16.msra.mxu0 %v11115_v39  ;;  %v11466_v39 = vld [vmem:[#allocation3 + $0xac0] sm:$0xf]  ;;  %v11603_v32 = vor.u32 %v13480_v23, %v11602_v4  ;;  %v5617_v26 = vpop.f32.mrf.mxu0  ;;  %v13476_v11 = vld [vmem:[#allocation3 + $0xbb4] sm:$0xf0]  ;;  %v13458_v4 = vld [vmem:[#allocation3 + $0xb24] sm:$0xf0] }
 0x2e0   :  { %5853 = vmatpush.bf16.msra.mxu1 %v11179_v43  ;;  %v13462_v43 = vld [vmem:[#allocation3 + $0xb44] sm:$0xf0] }
 0x2e1   :  { %5867 = vmatpush.bf16.msra.mxu2 %v11243_v31  ;;  %v11594_v31 = vld [vmem:[#allocation3 + $0xbc0] sm:$0xf]  ;;  %v11531_v48 = vor.u32 %v13462_v43, %v11530_v25  ;;  %v11515_v25 = vor.u32 %v13458_v4, %v11514_v21  ;;  %v11378_v43 = vld [vmem:[#allocation3 + $0xa10] sm:$0xf] }
 0x2e2   :  { %5881 = vmatpush.bf16.msra.mxu3 %v11307_v50  ;;  %5840 = vmatmul.bf16.vlgmr.msra.gmra.mxu0 %v14363_v49  ;;  %v11403_v50 = vor.u32 %v13430_v37, %v11402_v33  ;;  %v11595_v63 = vor.u32 %v13478_v44, %v11594_v31  ;;  %v13424_v31 = vld [vmem:[#allocation3 + $0xa14] sm:$0xf0]  ;;  %v11442_v44 = vld [vmem:[#allocation3 + $0xa90] sm:$0xf] }
 0x2e3   :  { %5888 = vmatpush.bf16.msrb.mxu0 %v11427_v51  ;;  %5854 = vmatmul.bf16.vlgmr.msra.gmra.mxu1 %v14365_v1  ;;  %v5618_v51 = vadd.f32 %v5617_v26, %v3684_v29 }
 0x2e4   :  { %5902 = vmatpush.bf16.msrb.mxu1 %v11491_v55  ;;  %5868 = vmatmul.bf16.vlgmr.msra.gmra.mxu2 %v14369_v24  ;;  %v5631_v55 = vpop.f32.mrf.mxu1 }
 0x2e5   :  { %5916 = vmatpush.bf16.msrb.mxu2 %v11555_v56  ;;  %5882 = vmatmul.bf16.vlgmr.msra.gmra.mxu3 %v14371_v34  ;;  %v11467_v56 = vor.u32 %v13446_v42, %v11466_v39  ;;  %v5632_v59 = vadd.f32 %v5631_v55, %v5618_v51  ;;  %v11387_v39 = vor.u32 %v13426_v0, %v11386_v17  ;;  %v13440_v55 = vld [vmem:[#allocation3 + $0xa94] sm:$0xf0]  ;;  %v13470_v17 = vld [vmem:[#allocation3 + $0xb84] sm:$0xf0] }
 0x2e6   :  { %5930 = vmatpush.bf16.msrb.mxu3 %v11619_v47  ;;  %v11458_v47 = vld [vmem:[#allocation3 + $0xab0] sm:$0xf]  ;;  %v11443_v52 = vor.u32 %v13440_v55, %v11442_v44  ;;  %v13129_v55 = vld [vmem:[#allocation3 + $0xe4] sm:$0xf] }
 0x2e7   :  { %5889 = vmatpush.bf16.msrb.mxu0 %v11419_v10  ;;  %v11586_v10 = vld [vmem:[#allocation3 + $0xbb0] sm:$0xf]  ;;  %v5645_v23 = vpop.f32.mrf.mxu2  ;;  %v5619_v33 = vpop.f32.mrf.mxu0 }
 0x2e8   :  { %5903 = vmatpush.bf16.msrb.mxu1 %v11483_v12  ;;  %v11395_v12 = vor.u32 %v13428_v60, %v11394_v57  ;;  %v11587_v19 = vor.u32 %v13476_v11, %v11586_v10  ;;  %v5659_v37 = vpop.f32.mrf.mxu3  ;;  %v11570_v60 = vld [vmem:[#allocation3 + $0xb90] sm:$0xf]  ;;  %v13438_v10 = vld [vmem:[#allocation3 + $0xa84] sm:$0xf0]  ;;  %v11498_v11 = vld [vmem:[#allocation3 + $0xb00] sm:$0xf] }
 0x2e9   :  { %5917 = vmatpush.bf16.msrb.mxu2 %v11547_v15  ;;  %v11459_v15 = vor.u32 %v13444_v2, %v11458_v47  ;;  %v13472_v47 = vld [vmem:[#allocation3 + $0xb94] sm:$0xf0]  ;;  %v13422_v2 = vld [vmem:[#allocation3 + $0xa04] sm:$0xf0] }
 0x2ea   :  { %5931 = vmatpush.bf16.msrb.mxu3 %v11611_v18  ;;  %v11450_v18 = vld [vmem:[#allocation3 + $0xaa0] sm:$0xf] }
 0x2eb   :  { %5890 = vmatpush.bf16.msrb.mxu0 %v11411_v30  ;;  %v11578_v30 = vld [vmem:[#allocation3 + $0xba0] sm:$0xf]  ;;  %v11451_v42 = vor.u32 %v13442_v20, %v11450_v18  ;;  %v13115_v18 = vld [vmem:[#allocation3 + $0x74] sm:$0xf] }
 0x2ec   :  { %5904 = vmatpush.bf16.msrb.mxu1 %v11475_v27  ;;  %v13474_v27 = vld [vmem:[#allocation3 + $0xba4] sm:$0xf0]  ;;  %v13131_v20 = vld [vmem:[#allocation3 + $0xf4] sm:$0xf] }
 0x2ed   :  { %5918 = vmatpush.bf16.msrb.mxu2 %v11539_v36  ;;  %v5646_v36 = vadd.f32 %v5645_v23, %v5632_v59  ;;  %v11579_v51 = vor.u32 %v13474_v27, %v11578_v30  ;;  %v11434_v59 = vld [vmem:[#allocation3 + $0xa80] sm:$0xf]  ;;  %v10212_v23 = vld [vmem:[#allocation3 + $0xf8] sm:$0xf0]  ;;  %v13147_v30 = vld [vmem:[#allocation3 + $0x174] sm:$0xf] }
 0x2ee   :  { %5932 = vmatpush.bf16.msrb.mxu3 %v11603_v32  ;;  %v5620_v32 = vadd.f32 %v5619_v33, %v3684_v29  ;;  %v11379_v29 = vor.u32 %v13424_v31, %v11378_v43  ;;  %v10276_v27 = vld [vmem:[#allocation3 + $0x178] sm:$0xf0]  ;;  %v11435_v33 = vor.u32 %v13438_v10, %v11434_v59  ;;  %v10215_v31 = vor.u32 %v13131_v20, %v10212_v23  ;;  %v13127_v10 = vld [vmem:[#allocation3 + $0xd4] sm:$0xf]  ;;  %v13125_v23 = vld [vmem:[#allocation3 + $0xc4] sm:$0xf] }
 0x2ef   :  { %5891 = vmatpush.bf16.msrb.mxu0 %v11403_v50  ;;  %v14408_v26 = vadd.f32 %v5659_v37, %v5646_v36  ;;  %v5633_v50 = vpop.f32.mrf.mxu1  ;;  %v5647_v0 = vpop.f32.mrf.mxu2  ;;  %v10279_v44 = vor.u32 %v13147_v30, %v10276_v27  ;;  %v10132_v59 = vld [vmem:[#allocation3 + $0x58] sm:$0xf0]  ;;  %v10188_v27 = vld [vmem:[#allocation3 + $0xc8] sm:$0xf0] }
 0x2f0   :  { %5905 = vmatpush.bf16.msrb.mxu1 %v11467_v56  ;;  %v11506_v56 = vld [vmem:[#allocation3 + $0xb10] sm:$0xf]  ;;  %v5634_v57 = vadd.f32 %v5633_v50, %v5620_v32  ;;  %v5661_v36 = vpop.f32.mrf.mxu3  ;;  %v10340_v32 = vld [vmem:[#allocation3 + $0x1f8] sm:$0xf0]  ;;  %v13113_v50 = vld [vmem:[#allocation3 + $0x64] sm:$0xf] }
 0x2f1   :  { %5919 = vmatpush.bf16.msrb.mxu2 %v11531_v48  ;;  %v13456_v48 = vld [vmem:[#allocation3 + $0xb14] sm:$0xf0] }
 0x2f2   :  { %5933 = vmatpush.bf16.msrb.mxu3 %v11595_v63  ;;  %v11370_v63 = vld [vmem:[#allocation3 + $0xa00] sm:$0xf]  ;;  %v11507_v9 = vor.u32 %v13456_v48, %v11506_v56  ;;  %v5648_v21 = vadd.f32 %v5647_v0, %v5634_v57  ;;  %v10204_v48 = vld [vmem:[#allocation3 + $0xe8] sm:$0xf0]  ;;  %v13145_v57 = vld [vmem:[#allocation3 + $0x164] sm:$0xf] }
 0x2f3   :  { %5892 = vmatpush.bf16.msrb.mxu0 %v11395_v12  ;;  %v11571_v12 = vor.u32 %v13472_v47, %v11570_v60  ;;  %v11371_v4 = vor.u32 %v13422_v2, %v11370_v63  ;;  %v10268_v60 = vld [vmem:[#allocation3 + $0x168] sm:$0xf0]  ;;  %v13161_v47 = vld [vmem:[#allocation3 + $0x1e4] sm:$0xf]  ;;  %v10207_v2 = vor.u32 %v13129_v55, %v10204_v48  ;;  %v10324_v0 = vld [vmem:[#allocation3 + $0x1d8] sm:$0xf0] }
 0x2f4   :  { %5906 = vmatpush.bf16.msrb.mxu1 %v11459_v15  ;;  %v13454_v15 = vld [vmem:[#allocation3 + $0xb04] sm:$0xf0]  ;;  %v10116_v55 = vld [vmem:[#allocation3 + $0x38] sm:$0xf0] }
 0x2f5   :  { %5920 = vmatpush.bf16.msrb.mxu2 %v11523_v16  ;;  %v11562_v16 = vld [vmem:[#allocation3 + $0xb80] sm:$0xf]  ;;  %v11499_v37 = vor.u32 %v13454_v15, %v11498_v11  ;;  %v13143_v15 = vld [vmem:[#allocation3 + $0x154] sm:$0xf] }
 0x2f6   :  { %5934 = vmatpush.bf16.msrb.mxu3 %v11587_v19  ;;  %v10148_v19 = vld [vmem:[#allocation3 + $0x78] sm:$0xf0] }
 0x2f7   :  { %5893 = vmatpush.bf16.msrb.mxu0 %v11387_v39  ;;  %v13163_v39 = vld [vmem:[#allocation3 + $0x1f4] sm:$0xf]  ;;  %v10151_v43 = vor.u32 %v13115_v18, %v10148_v19 }
 0x2f8   :  { %5907 = vmatpush.bf16.msrb.mxu1 %v11451_v42  ;;  %v14410_v42 = vadd.f32 %v5661_v36, %v5648_v21  ;;  %v10343_v56 = vor.u32 %v13163_v39, %v10340_v32  ;;  %v13109_v21 = vld [vmem:[#allocation3 + $0x44] sm:$0xf]  ;;  %v10316_v32 = vld [vmem:[#allocation3 + $0x1c8] sm:$0xf0] }
 0x2f9   :  { %5921 = vmatpush.bf16.msrb.mxu2 %v11515_v25  ;;  %v11563_v25 = vor.u32 %v13470_v17, %v11562_v16  ;;  %v10260_v16 = vld [vmem:[#allocation3 + $0x158] sm:$0xf0]  ;;  %v13159_v17 = vld [vmem:[#allocation3 + $0x1d4] sm:$0xf]  ;;  %v13141_v36 = vld [vmem:[#allocation3 + $0x144] sm:$0xf] }
 0x2fa   :  { %5935 = vmatpush.bf16.msrb.mxu3 %v11579_v51  ;;  %v10140_v51 = vld [vmem:[#allocation3 + $0x68] sm:$0xf0]  ;;  %v10263_v20 = vor.u32 %v13143_v15, %v10260_v16  ;;  %v10327_v30 = vor.u32 %v13159_v17, %v10324_v0  ;;  %v13157_v39 = vld [vmem:[#allocation3 + $0x1c4] sm:$0xf] }
 0x2fb   :  { %5894 = vmatpush.bf16.msrb.mxu0 %v11379_v29  ;;  %v10332_v29 = vld [vmem:[#allocation3 + $0x1e8] sm:$0xf0]  ;;  %v10143_v63 = vor.u32 %v13113_v50, %v10140_v51  ;;  %v13107_v51 = vld [vmem:[#allocation3 + $0x34] sm:$0xf]  ;;  %v10319_v48 = vor.u32 %v13157_v39, %v10316_v32  ;;  %v13137_v17 = vld [vmem:[#allocation3 + $0x124] sm:$0xf] }
 0x2fc   :  { %5908 = vmatpush.bf16.msrb.mxu1 %v11443_v52  ;;  %v10271_v52 = vor.u32 %v13145_v57, %v10268_v60  ;;  %v10335_v11 = vor.u32 %v13161_v47, %v10332_v29  ;;  %v10180_v60 = vld [vmem:[#allocation3 + $0xb8] sm:$0xf0]  ;;  %v13139_v47 = vld [vmem:[#allocation3 + $0x134] sm:$0xf]  ;;  %v10172_v16 = vld [vmem:[#allocation3 + $0xa8] sm:$0xf0] }
 0x2fd   :  { %5922 = vmatpush.bf16.msrb.mxu2 %v11507_v9  ;;  %v13111_v9 = vld [vmem:[#allocation3 + $0x54] sm:$0xf]  ;;  %v10244_v29 = vld [vmem:[#allocation3 + $0x138] sm:$0xf0]  ;;  %v10236_v0 = vld [vmem:[#allocation3 + $0x128] sm:$0xf0] }
 0x2fe   :  { %5936 = vmatpush.bf16.msrb.mxu3 %v11571_v12  ;;  %v10196_v12 = vld [vmem:[#allocation3 + $0xd8] sm:$0xf0]  ;;  %v10135_v18 = vor.u32 %v13111_v9, %v10132_v59  ;;  %v10247_v9 = vor.u32 %v13139_v47, %v10244_v29  ;;  %v13105_v59 = vld [vmem:[#allocation3 + $0x24] sm:$0xf]  ;;  %v13103_v39 = vld [vmem:[#allocation3 + $0x14] sm:$0xf] }
 0x2ff   :  { %5895 = vmatpush.bf16.msrb.mxu0 %v11371_v4  ;;  %v10199_v19 = vor.u32 %v13127_v10, %v10196_v12  ;;  %v10124_v4 = vld [vmem:[#allocation3 + $0x48] sm:$0xf0]  ;;  %v10100_v32 = vld [vmem:[#allocation3 + $0x18] sm:$0xf0]  ;;  %v13117_v29 = vld [vmem:[#allocation3 + $0x84] sm:$0xf] }
 0x300   :  { %5909 = vmatpush.bf16.msrb.mxu1 %v11435_v33  ;;  %v10252_v33 = vld [vmem:[#allocation3 + $0x148] sm:$0xf0] }
 0x301   :  { %5923 = vmatpush.bf16.msrb.mxu2 %v11499_v37  ;;  %v5673_v37 = vpop.f32.mrf.mxu0  ;;  %v10255_v50 = vor.u32 %v13141_v36, %v10252_v33  ;;  %v10108_v10 = vld [vmem:[#allocation3 + $0x28] sm:$0xf0] }
 0x302   :  { %5937 = vmatpush.bf16.msrb.mxu3 %v11563_v25  ;;  %5896 = vmatmul.bf16.vlgmr.msrb.gmra.mxu0 %v14375_v62  ;;  %v5674_v25 = vadd.f32 %v5673_v37, %v14408_v26  ;;  %v10239_v37 = vor.u32 %v13137_v17, %v10236_v0  ;;  %v13195_v17 = vld [vmem:[#allocation3 + $0x2f4] sm:$0xf] }
 0x303   :  { %5944 = vmatpush.bf16.msra.mxu0 %v10151_v43  ;;  %5910 = vmatmul.bf16.vlgmr.msrb.gmra.mxu1 %v14377_v8  ;;  %v10127_v43 = vor.u32 %v13109_v21, %v10124_v4  ;;  %v13153_v21 = vld [vmem:[#allocation3 + $0x1a4] sm:$0xf]  ;;  %v10300_v4 = vld [vmem:[#allocation3 + $0x1a8] sm:$0xf0] }
 0x304   :  { %5958 = vmatpush.bf16.msra.mxu1 %v10215_v31  ;;  %5924 = vmatmul.bf16.vlgmr.msrb.gmra.mxu2 %v14381_v5  ;;  %v5687_v31 = vpop.f32.mrf.mxu1 }
 0x305   :  { %5972 = vmatpush.bf16.msra.mxu2 %v10279_v44  ;;  %5938 = vmatmul.bf16.vlgmr.msrb.gmra.mxu3 %v14383_v40  ;;  %v10191_v44 = vor.u32 %v13125_v23, %v10188_v27  ;;  %v5688_v57 = vadd.f32 %v5687_v31, %v5674_v25  ;;  %v13119_v25 = vld [vmem:[#allocation3 + $0x94] sm:$0xf] }
 0x306   :  { %5986 = vmatpush.bf16.msra.mxu3 %v10343_v56  ;;  %v13123_v56 = vld [vmem:[#allocation3 + $0xb4] sm:$0xf] }
 0x307   :  { %5945 = vmatpush.bf16.msra.mxu0 %v10143_v63  ;;  %v13155_v63 = vld [vmem:[#allocation3 + $0x1b4] sm:$0xf]  ;;  %v10183_v26 = vor.u32 %v13123_v56, %v10180_v60  ;;  %v5701_v15 = vpop.f32.mrf.mxu2  ;;  %v10292_v56 = vld [vmem:[#allocation3 + $0x198] sm:$0xf0] }
 0x308   :  { %5959 = vmatpush.bf16.msra.mxu1 %v10207_v2  ;;  %v10308_v2 = vld [vmem:[#allocation3 + $0x1b8] sm:$0xf0] }
 0x309   :  { %5973 = vmatpush.bf16.msra.mxu2 %v10271_v52  ;;  %v10119_v52 = vor.u32 %v13107_v51, %v10116_v55  ;;  %v10311_v12 = vor.u32 %v13155_v63, %v10308_v2  ;;  %v10228_v51 = vld [vmem:[#allocation3 + $0x118] sm:$0xf0]  ;;  %v13151_v55 = vld [vmem:[#allocation3 + $0x194] sm:$0xf]  ;;  %v10156_v63 = vld [vmem:[#allocation3 + $0x88] sm:$0xf0] }
 0x30a   :  { %5987 = vmatpush.bf16.msra.mxu3 %v10335_v11  ;;  %v13121_v11 = vld [vmem:[#allocation3 + $0xa4] sm:$0xf] }
 0x30b   :  { %5946 = vmatpush.bf16.msra.mxu0 %v10135_v18  ;;  %v5702_v18 = vadd.f32 %v5701_v15, %v5688_v57  ;;  %v10175_v33 = vor.u32 %v13121_v11, %v10172_v16  ;;  %v10092_v57 = vld [vmem:[#allocation3 + $0x8] sm:$0xf0]  ;;  %v13133_v2 = vld [vmem:[#allocation3 + $0x104] sm:$0xf]  ;;  %v13179_v15 = vld [vmem:[#allocation3 + $0x274] sm:$0xf] }
 0x30c   :  { %5960 = vmatpush.bf16.msra.mxu1 %v10199_v19  ;;  %v5675_v19 = vpop.f32.mrf.mxu0  ;;  %v5689_v27 = vpop.f32.mrf.mxu1  ;;  %v10404_v16 = vld [vmem:[#allocation3 + $0x278] sm:$0xf0] }
 0x30d   :  { %5974 = vmatpush.bf16.msra.mxu2 %v10263_v20  ;;  %v5715_v20 = vpop.f32.mrf.mxu3  ;;  %v5676_v23 = vadd.f32 %v5675_v19, %v14410_v42  ;;  %v10103_v42 = vor.u32 %v13103_v39, %v10100_v32  ;;  %v13211_v19 = vld [vmem:[#allocation3 + $0x374] sm:$0xf] }
 0x30e   :  { %5988 = vmatpush.bf16.msra.mxu3 %v10327_v30  ;;  %v10111_v30 = vor.u32 %v13105_v59, %v10108_v10  ;;  %v14418_v36 = vadd.f32 %v5715_v20, %v5702_v18  ;;  %v13149_v59 = vld [vmem:[#allocation3 + $0x184] sm:$0xf]  ;;  %v10284_v10 = vld [vmem:[#allocation3 + $0x188] sm:$0xf0]  ;;  %v10468_v18 = vld [vmem:[#allocation3 + $0x2f8] sm:$0xf0] }
 0x30f   :  { %5947 = vmatpush.bf16.msra.mxu0 %v10127_v43  ;;  %v10303_v43 = vor.u32 %v13153_v21, %v10300_v4  ;;  %v5690_v31 = vadd.f32 %v5689_v27, %v5676_v23  ;;  %v10532_v20 = vld [vmem:[#allocation3 + $0x378] sm:$0xf0]  ;;  %v10159_v4 = vor.u32 %v13117_v29, %v10156_v63  ;;  %v10471_v39 = vor.u32 %v13195_v17, %v10468_v18  ;;  %v13191_v63 = vld [vmem:[#allocation3 + $0x2d4] sm:$0xf]  ;;  %v10380_v17 = vld [vmem:[#allocation3 + $0x248] sm:$0xf0] }
 0x310   :  { %5961 = vmatpush.bf16.msra.mxu1 %v10191_v44  ;;  %v10164_v44 = vld [vmem:[#allocation3 + $0x98] sm:$0xf0]  ;;  %v10535_v32 = vor.u32 %v13211_v19, %v10532_v20  ;;  %v13205_v19 = vld [vmem:[#allocation3 + $0x344] sm:$0xf]  ;;  %v10508_v20 = vld [vmem:[#allocation3 + $0x348] sm:$0xf0] }
 0x311   :  { %5975 = vmatpush.bf16.msra.mxu2 %v10255_v50  ;;  %v13135_v50 = vld [vmem:[#allocation3 + $0x114] sm:$0xf]  ;;  %v10167_v60 = vor.u32 %v13119_v25, %v10164_v44  ;;  %v10596_v27 = vld [vmem:[#allocation3 + $0x3f8] sm:$0xf0]  ;;  %v13177_v25 = vld [vmem:[#allocation3 + $0x264] sm:$0xf] }
 0x312   :  { %5989 = vmatpush.bf16.msra.mxu3 %v10319_v48  ;;  %v13101_v48 = vld [vmem:[#allocation3 + $0x4] sm:$0xf]  ;;  %v10231_v47 = vor.u32 %v13135_v50, %v10228_v51  ;;  %v10460_v50 = vld [vmem:[#allocation3 + $0x2e8] sm:$0xf0]  ;;  %v10388_v29 = vld [vmem:[#allocation3 + $0x258] sm:$0xf0] }
 0x313   :  { %5948 = vmatpush.bf16.msra.mxu0 %v10119_v52  ;;  %v10295_v52 = vor.u32 %v13151_v55, %v10292_v56  ;;  %v10095_v0 = vor.u32 %v13101_v48, %v10092_v57  ;;  %v13209_v51 = vld [vmem:[#allocation3 + $0x364] sm:$0xf]  ;;  %v10524_v55 = vld [vmem:[#allocation3 + $0x368] sm:$0xf0] }
 0x314   :  { %5962 = vmatpush.bf16.msra.mxu1 %v10183_v26  ;;  %v5703_v26 = vpop.f32.mrf.mxu2  ;;  %v13225_v56 = vld [vmem:[#allocation3 + $0x3e4] sm:$0xf] }
 0x315   :  { %5976 = vmatpush.bf16.msra.mxu2 %v10247_v9  ;;  %v10220_v9 = vld [vmem:[#allocation3 + $0x108] sm:$0xf0]  ;;  %v5704_v11 = vadd.f32 %v5703_v26, %v5690_v31  ;;  %v13193_v31 = vld [vmem:[#allocation3 + $0x2e4] sm:$0xf]  ;;  %v13207_v26 = vld [vmem:[#allocation3 + $0x354] sm:$0xf] }
 0x316   :  { %5990 = vmatpush.bf16.msra.mxu3 %v10311_v12  ;;  %v5717_v12 = vpop.f32.mrf.mxu3  ;;  %v10223_v23 = vor.u32 %v13133_v2, %v10220_v9  ;;  %v10463_v57 = vor.u32 %v13193_v31, %v10460_v50  ;;  %v10516_v9 = vld [vmem:[#allocation3 + $0x358] sm:$0xf0] }
 0x317   :  { %5949 = vmatpush.bf16.msra.mxu0 %v10111_v30  ;;  %v14420_v21 = vadd.f32 %v5717_v12, %v5704_v11  ;;  %v13227_v30 = vld [vmem:[#allocation3 + $0x3f4] sm:$0xf]  ;;  %v10436_v31 = vld [vmem:[#allocation3 + $0x2b8] sm:$0xf0] }
 0x318   :  { %5963 = vmatpush.bf16.msra.mxu1 %v10175_v33  ;;  %v10287_v33 = vor.u32 %v13149_v59, %v10284_v10  ;;  %v10599_v44 = vor.u32 %v13227_v30, %v10596_v27  ;;  %v13223_v59 = vld [vmem:[#allocation3 + $0x3d4] sm:$0xf]  ;;  %v10580_v10 = vld [vmem:[#allocation3 + $0x3d8] sm:$0xf0] }
 0x319   :  { %5977 = vmatpush.bf16.msra.mxu2 %v10239_v37  ;;  %v10407_v37 = vor.u32 %v13179_v15, %v10404_v16  ;;  %v10519_v15 = vor.u32 %v13207_v26, %v10516_v9  ;;  %v13173_v16 = vld [vmem:[#allocation3 + $0x244] sm:$0xf]  ;;  %v10583_v18 = vor.u32 %v13223_v59, %v10580_v10  ;;  %v10500_v50 = vld [vmem:[#allocation3 + $0x338] sm:$0xf0] }
 0x31a   :  { %5991 = vmatpush.bf16.msra.mxu3 %v10303_v43  ;;  %v10396_v43 = vld [vmem:[#allocation3 + $0x268] sm:$0xf0]  ;;  %v10383_v30 = vor.u32 %v13173_v16, %v10380_v17  ;;  %v13217_v10 = vld [vmem:[#allocation3 + $0x3a4] sm:$0xf] }
 0x31b   :  { %5950 = vmatpush.bf16.msra.mxu0 %v10103_v42  ;;  %v10588_v42 = vld [vmem:[#allocation3 + $0x3e8] sm:$0xf0]  ;;  %v10399_v48 = vor.u32 %v13177_v25, %v10396_v43 }
 0x31c   :  { %5964 = vmatpush.bf16.msra.mxu1 %v10167_v60  ;;  %v10527_v60 = vor.u32 %v13209_v51, %v10524_v55  ;;  %v10591_v2 = vor.u32 %v13225_v56, %v10588_v42  ;;  %v13219_v51 = vld [vmem:[#allocation3 + $0x3b4] sm:$0xf]  ;;  %v10564_v55 = vld [vmem:[#allocation3 + $0x3b8] sm:$0xf0] }
 0x31d   :  { %5978 = vmatpush.bf16.msra.mxu2 %v10231_v47  ;;  %v13175_v47 = vld [vmem:[#allocation3 + $0x254] sm:$0xf] }
 0x31e   :  { %5992 = vmatpush.bf16.msra.mxu3 %v10295_v52  ;;  %v10452_v52 = vld [vmem:[#allocation3 + $0x2d8] sm:$0xf0]  ;;  %v10391_v11 = vor.u32 %v13175_v47, %v10388_v29  ;;  %v10567_v47 = vor.u32 %v13219_v51, %v10564_v55  ;;  %v10476_v51 = vld [vmem:[#allocation3 + $0x308] sm:$0xf0]  ;;  %v13213_v55 = vld [vmem:[#allocation3 + $0x384] sm:$0xf] }
 0x31f   :  { %5951 = vmatpush.bf16.msra.mxu0 %v10095_v0  ;;  %v10455_v12 = vor.u32 %v13191_v63, %v10452_v52  ;;  %v13189_v0 = vld [vmem:[#allocation3 + $0x2c4] sm:$0xf]  ;;  %v10428_v63 = vld [vmem:[#allocation3 + $0x2a8] sm:$0xf0] }
 0x320   :  { %5965 = vmatpush.bf16.msra.mxu1 %v10159_v4  ;;  %v5729_v4 = vpop.f32.mrf.mxu0  ;;  %v10492_v52 = vld [vmem:[#allocation3 + $0x328] sm:$0xf0] }
 0x321   :  { %5979 = vmatpush.bf16.msra.mxu2 %v10223_v23  ;;  %v10572_v23 = vld [vmem:[#allocation3 + $0x3c8] sm:$0xf0] }
 0x322   :  { %5993 = vmatpush.bf16.msra.mxu3 %v10287_v33  ;;  %5952 = vmatmul.bf16.vlgmr.msra.gmra.mxu0 %v14229_v45  ;;  %v10444_v45 = vld [vmem:[#allocation3 + $0x2c8] sm:$0xf0]  ;;  %v10511_v33 = vor.u32 %v13205_v19, %v10508_v20  ;;  %v10356_v19 = vld [vmem:[#allocation3 + $0x218] sm:$0xf0]  ;;  %v13183_v20 = vld [vmem:[#allocation3 + $0x294] sm:$0xf] }
 0x323   :  { %6000 = vmatpush.bf16.msrb.mxu0 %v10407_v37  ;;  %5966 = vmatmul.bf16.vlgmr.msra.gmra.mxu1 %v14232_v3  ;;  %v5730_v3 = vadd.f32 %v5729_v4, %v14418_v36  ;;  %v10447_v27 = vor.u32 %v13189_v0, %v10444_v45  ;;  %v13171_v37 = vld [vmem:[#allocation3 + $0x234] sm:$0xf] }
 0x324   :  { %6014 = vmatpush.bf16.msrb.mxu1 %v10471_v39  ;;  %5980 = vmatmul.bf16.vlgmr.msra.gmra.mxu2 %v14249_v46  ;;  %v13221_v46 = vld [vmem:[#allocation3 + $0x3c4] sm:$0xf]  ;;  %v10372_v39 = vld [vmem:[#allocation3 + $0x238] sm:$0xf0]  ;;  %v13167_v45 = vld [vmem:[#allocation3 + $0x214] sm:$0xf] }
 0x325   :  { %6028 = vmatpush.bf16.msrb.mxu2 %v10535_v32  ;;  %5994 = vmatmul.bf16.vlgmr.msra.gmra.mxu3 %v14252_v7  ;;  %v5743_v7 = vpop.f32.mrf.mxu1  ;;  %v13187_v32 = vld [vmem:[#allocation3 + $0x2b4] sm:$0xf]  ;;  %v10575_v25 = vor.u32 %v13221_v46, %v10572_v23  ;;  %v10375_v56 = vor.u32 %v13171_v37, %v10372_v39  ;;  %v10420_v23 = vld [vmem:[#allocation3 + $0x298] sm:$0xf0]  ;;  %v10348_v37 = vld [vmem:[#allocation3 + $0x208] sm:$0xf0] }
 0x326   :  { %6042 = vmatpush.bf16.msrb.mxu3 %v10599_v44  ;;  %v5744_v43 = vadd.f32 %v5743_v7, %v5730_v3  ;;  %v13203_v44 = vld [vmem:[#allocation3 + $0x334] sm:$0xf]  ;;  %v10439_v36 = vor.u32 %v13187_v32, %v10436_v31  ;;  %v10423_v39 = vor.u32 %v13183_v20, %v10420_v23  ;;  %v13197_v31 = vld [vmem:[#allocation3 + $0x304] sm:$0xf]  ;;  %v10716_v20 = vld [vmem:[#allocation3 + $0x4e8] sm:$0xf0] }
 0x327   :  { %6001 = vmatpush.bf16.msrb.mxu0 %v10399_v48  ;;  %v10503_v42 = vor.u32 %v13203_v44, %v10500_v50  ;;  %v13169_v48 = vld [vmem:[#allocation3 + $0x224] sm:$0xf]  ;;  %v5757_v29 = vpop.f32.mrf.mxu2  ;;  %v13199_v3 = vld [vmem:[#allocation3 + $0x314] sm:$0xf] }
 0x328   :  { %6015 = vmatpush.bf16.msrb.mxu1 %v10463_v57  ;;  %v10364_v57 = vld [vmem:[#allocation3 + $0x228] sm:$0xf0]  ;;  %v5758_v26 = vadd.f32 %v5757_v29, %v5744_v43  ;;  %v5731_v9 = vpop.f32.mrf.mxu0  ;;  %v5771_v59 = vpop.f32.mrf.mxu3  ;;  %v13215_v7 = vld [vmem:[#allocation3 + $0x394] sm:$0xf]  ;;  %v10724_v29 = vld [vmem:[#allocation3 + $0x4f8] sm:$0xf0] }
 0x329   :  { %6029 = vmatpush.bf16.msrb.mxu2 %v10527_v60  ;;  %v13185_v60 = vld [vmem:[#allocation3 + $0x2a4] sm:$0xf]  ;;  %v10412_v43 = vld [vmem:[#allocation3 + $0x288] sm:$0xf0] }
 0x32a   :  { %6043 = vmatpush.bf16.msrb.mxu3 %v10591_v2  ;;  %v13201_v2 = vld [vmem:[#allocation3 + $0x324] sm:$0xf]  ;;  %v14428_v17 = vadd.f32 %v5771_v59, %v5758_v26  ;;  %v10431_v0 = vor.u32 %v13185_v60, %v10428_v63  ;;  %v13259_v60 = vld [vmem:[#allocation3 + $0x4f4] sm:$0xf] }
 0x32b   :  { %6002 = vmatpush.bf16.msrb.mxu0 %v10391_v11  ;;  %v10556_v11 = vld [vmem:[#allocation3 + $0x3a8] sm:$0xf0]  ;;  %v13275_v63 = vld [vmem:[#allocation3 + $0x574] sm:$0xf]  ;;  %v13289_v23 = vld [vmem:[#allocation3 + $0x5e4] sm:$0xf] }
 0x32c   :  { %6016 = vmatpush.bf16.msrb.mxu1 %v10455_v12  ;;  %v5732_v12 = vadd.f32 %v5731_v9, %v14420_v21  ;;  %v10559_v4 = vor.u32 %v13217_v10, %v10556_v11  ;;  %v10359_v21 = vor.u32 %v13167_v45, %v10356_v19  ;;  %v10479_v9 = vor.u32 %v13197_v31, %v10476_v51  ;;  %v13291_v59 = vld [vmem:[#allocation3 + $0x5f4] sm:$0xf]  ;;  %v10852_v10 = vld [vmem:[#allocation3 + $0x5f8] sm:$0xf0]  ;;  %v13257_v45 = vld [vmem:[#allocation3 + $0x4e4] sm:$0xf] }
 0x32d   :  { %6030 = vmatpush.bf16.msrb.mxu2 %v10519_v15  ;;  %v10367_v15 = vor.u32 %v13169_v48, %v10364_v57  ;;  %v5745_v16 = vpop.f32.mrf.mxu1  ;;  %v13243_v48 = vld [vmem:[#allocation3 + $0x474] sm:$0xf]  ;;  %v10660_v57 = vld [vmem:[#allocation3 + $0x478] sm:$0xf0]  ;;  %v10855_v19 = vor.u32 %v13291_v59, %v10852_v10 }
 0x32e   :  { %6044 = vmatpush.bf16.msrb.mxu3 %v10583_v18  ;;  %v10495_v18 = vor.u32 %v13201_v2, %v10492_v52  ;;  %v5746_v46 = vadd.f32 %v5745_v16, %v5732_v12  ;;  %v10788_v2 = vld [vmem:[#allocation3 + $0x578] sm:$0xf0]  ;;  %v10663_v12 = vor.u32 %v13243_v48, %v10660_v57  ;;  %v13287_v31 = vld [vmem:[#allocation3 + $0x5d4] sm:$0xf]  ;;  %v10700_v48 = vld [vmem:[#allocation3 + $0x4c8] sm:$0xf0] }
 0x32f   :  { %6003 = vmatpush.bf16.msrb.mxu0 %v10383_v30  ;;  %v10484_v30 = vld [vmem:[#allocation3 + $0x318] sm:$0xf0]  ;;  %v5759_v50 = vpop.f32.mrf.mxu2  ;;  %v10791_v16 = vor.u32 %v13275_v63, %v10788_v2  ;;  %v13269_v57 = vld [vmem:[#allocation3 + $0x544] sm:$0xf]  ;;  %v13251_v10 = vld [vmem:[#allocation3 + $0x4b4] sm:$0xf] }
 0x330   :  { %6017 = vmatpush.bf16.msrb.mxu1 %v10447_v27  ;;  %v10548_v27 = vld [vmem:[#allocation3 + $0x398] sm:$0xf0]  ;;  %v10487_v32 = vor.u32 %v13199_v3, %v10484_v30  ;;  %v10844_v3 = vld [vmem:[#allocation3 + $0x5e8] sm:$0xf0] }
 0x331   :  { %6031 = vmatpush.bf16.msrb.mxu2 %v10511_v33  ;;  %v13165_v33 = vld [vmem:[#allocation3 + $0x204] sm:$0xf]  ;;  %v10551_v44 = vor.u32 %v13215_v7, %v10548_v27  ;;  %v10719_v7 = vor.u32 %v13257_v45, %v10716_v20  ;;  %v10628_v59 = vld [vmem:[#allocation3 + $0x438] sm:$0xf0] }
 0x332   :  { %6045 = vmatpush.bf16.msrb.mxu3 %v10575_v25  ;;  %v13181_v25 = vld [vmem:[#allocation3 + $0x284] sm:$0xf]  ;;  %v10820_v45 = vld [vmem:[#allocation3 + $0x5b8] sm:$0xf0] }
 0x333   :  { %6004 = vmatpush.bf16.msrb.mxu0 %v10375_v56  ;;  %v10540_v56 = vld [vmem:[#allocation3 + $0x388] sm:$0xf0]  ;;  %v10415_v26 = vor.u32 %v13181_v25, %v10412_v43  ;;  %v13271_v25 = vld [vmem:[#allocation3 + $0x554] sm:$0xf]  ;;  %v10772_v43 = vld [vmem:[#allocation3 + $0x558] sm:$0xf0] }
 0x334   :  { %6018 = vmatpush.bf16.msrb.mxu1 %v10439_v36  ;;  %v5760_v36 = vadd.f32 %v5759_v50, %v5746_v46  ;;  %v10543_v11 = vor.u32 %v13213_v55, %v10540_v56  ;;  %v10780_v46 = vld [vmem:[#allocation3 + $0x568] sm:$0xf0]  ;;  %v10775_v55 = vor.u32 %v13271_v25, %v10772_v43  ;;  %v13237_v56 = vld [vmem:[#allocation3 + $0x444] sm:$0xf] }
 0x335   :  { %6032 = vmatpush.bf16.msrb.mxu2 %v10503_v42  ;;  %v5773_v42 = vpop.f32.mrf.mxu3  ;;  %v10812_v25 = vld [vmem:[#allocation3 + $0x5a8] sm:$0xf0] }
 0x336   :  { %6046 = vmatpush.bf16.msrb.mxu3 %v10567_v47  ;;  %v10351_v47 = vor.u32 %v13165_v33, %v10348_v37  ;;  %v14430_v52 = vadd.f32 %v5773_v42, %v5760_v36  ;;  %v10644_v33 = vld [vmem:[#allocation3 + $0x458] sm:$0xf0]  ;;  %v13255_v37 = vld [vmem:[#allocation3 + $0x4d4] sm:$0xf]  ;;  %v13253_v36 = vld [vmem:[#allocation3 + $0x4c4] sm:$0xf] }
 0x337   :  { %6005 = vmatpush.bf16.msrb.mxu0 %v10367_v15  ;;  %v10727_v15 = vor.u32 %v13259_v60, %v10724_v29  ;;  %v10703_v2 = vor.u32 %v13253_v36, %v10700_v48  ;;  %v13247_v36 = vld [vmem:[#allocation3 + $0x494] sm:$0xf] }
 0x338   :  { %6019 = vmatpush.bf16.msrb.mxu1 %v10431_v0  ;;  %v13241_v0 = vld [vmem:[#allocation3 + $0x464] sm:$0xf] }
 0x339   :  { %6033 = vmatpush.bf16.msrb.mxu2 %v10495_v18  ;;  %v10652_v18 = vld [vmem:[#allocation3 + $0x468] sm:$0xf0] }
 0x33a   :  { %6047 = vmatpush.bf16.msrb.mxu3 %v10559_v4  ;;  %v13273_v4 = vld [vmem:[#allocation3 + $0x564] sm:$0xf]  ;;  %v10655_v30 = vor.u32 %v13241_v0, %v10652_v18  ;;  %v10756_v0 = vld [vmem:[#allocation3 + $0x538] sm:$0xf0]  ;;  %v13283_v18 = vld [vmem:[#allocation3 + $0x5b4] sm:$0xf] }
 0x33b   :  { %6006 = vmatpush.bf16.msrb.mxu0 %v10359_v21  ;;  %v10783_v27 = vor.u32 %v13273_v4, %v10780_v46  ;;  %v13239_v21 = vld [vmem:[#allocation3 + $0x454] sm:$0xf]  ;;  %v13233_v4 = vld [vmem:[#allocation3 + $0x424] sm:$0xf]  ;;  %v10620_v46 = vld [vmem:[#allocation3 + $0x428] sm:$0xf0] }
 0x33c   :  { %6020 = vmatpush.bf16.msrb.mxu1 %v10423_v39  ;;  %v10847_v39 = vor.u32 %v13289_v23, %v10844_v3  ;;  %v10647_v50 = vor.u32 %v13239_v21, %v10644_v33  ;;  %v13249_v23 = vld [vmem:[#allocation3 + $0x4a4] sm:$0xf]  ;;  %v10823_v3 = vor.u32 %v13283_v18, %v10820_v45  ;;  %v10748_v21 = vld [vmem:[#allocation3 + $0x528] sm:$0xf0]  ;;  %v13307_v45 = vld [vmem:[#allocation3 + $0x674] sm:$0xf] }
 0x33d   :  { %6034 = vmatpush.bf16.msrb.mxu2 %v10487_v32  ;;  %v10708_v32 = vld [vmem:[#allocation3 + $0x4d8] sm:$0xf0] }
 0x33e   :  { %6048 = vmatpush.bf16.msrb.mxu3 %v10551_v44  ;;  %v10836_v44 = vld [vmem:[#allocation3 + $0x5d8] sm:$0xf0]  ;;  %v10711_v51 = vor.u32 %v13255_v37, %v10708_v32  ;;  %v13281_v32 = vld [vmem:[#allocation3 + $0x5a4] sm:$0xf] }
 0x33f   :  { %6007 = vmatpush.bf16.msrb.mxu0 %v10351_v47  ;;  %v10839_v42 = vor.u32 %v13287_v31, %v10836_v44  ;;  %v5785_v60 = vpop.f32.mrf.mxu0  ;;  %v10828_v47 = vld [vmem:[#allocation3 + $0x5c8] sm:$0xf0]  ;;  %v10623_v31 = vor.u32 %v13233_v4, %v10620_v46  ;;  %v10980_v4 = vld [vmem:[#allocation3 + $0x6f8] sm:$0xf0]  ;;  %v13339_v46 = vld [vmem:[#allocation3 + $0x774] sm:$0xf] }
 0x340   :  { %6021 = vmatpush.bf16.msrb.mxu1 %v10415_v26  ;;  %v5799_v63 = vpop.f32.mrf.mxu1 }
 0x341   :  { %6035 = vmatpush.bf16.msrb.mxu2 %v10479_v9  ;;  %v13235_v9 = vld [vmem:[#allocation3 + $0x434] sm:$0xf] }
 0x342   :  { %6049 = vmatpush.bf16.msrb.mxu3 %v10543_v11  ;;  %6008 = vmatmul.bf16.vlgmr.msrb.gmra.mxu0 %v14269_v54  ;;  %v10636_v54 = vld [vmem:[#allocation3 + $0x448] sm:$0xf0] }
 0x343   :  { %6056 = vmatpush.bf16.msra.mxu0 %v10663_v12  ;;  %6022 = vmatmul.bf16.vlgmr.msrb.gmra.mxu1 %v14272_v13  ;;  %v13285_v13 = vld [vmem:[#allocation3 + $0x5c4] sm:$0xf]  ;;  %v10639_v29 = vor.u32 %v13237_v56, %v10636_v54  ;;  %v13231_v56 = vld [vmem:[#allocation3 + $0x414] sm:$0xf]  ;;  %v10612_v54 = vld [vmem:[#allocation3 + $0x418] sm:$0xf0] }
 0x344   :  { %6070 = vmatpush.bf16.msra.mxu1 %v10727_v15  ;;  %6036 = vmatmul.bf16.vlgmr.msrb.gmra.mxu2 %v14289_v53  ;;  %v10764_v53 = vld [vmem:[#allocation3 + $0x548] sm:$0xf0]  ;;  %v10831_v11 = vor.u32 %v13285_v13, %v10828_v47  ;;  %v10692_v15 = vld [vmem:[#allocation3 + $0x4b8] sm:$0xf0]  ;;  %v13279_v13 = vld [vmem:[#allocation3 + $0x594] sm:$0xf] }
 0x345   :  { %6084 = vmatpush.bf16.msra.mxu2 %v10791_v16  ;;  %6050 = vmatmul.bf16.vlgmr.msrb.gmra.mxu3 %v14292_v22  ;;  %v5786_v22 = vadd.f32 %v5785_v60, %v14428_v17  ;;  %v10767_v26 = vor.u32 %v13269_v57, %v10764_v53  ;;  %v13267_v16 = vld [vmem:[#allocation3 + $0x534] sm:$0xf]  ;;  %v10695_v17 = vor.u32 %v13251_v10, %v10692_v15  ;;  %v10676_v57 = vld [vmem:[#allocation3 + $0x498] sm:$0xf0]  ;;  %v13277_v15 = vld [vmem:[#allocation3 + $0x584] sm:$0xf] }
 0x346   :  { %6098 = vmatpush.bf16.msra.mxu3 %v10855_v19  ;;  %v10631_v19 = vor.u32 %v13235_v9, %v10628_v59  ;;  %v10759_v20 = vor.u32 %v13267_v16, %v10756_v0  ;;  %v13263_v53 = vld [vmem:[#allocation3 + $0x514] sm:$0xf]  ;;  %v10740_v60 = vld [vmem:[#allocation3 + $0x518] sm:$0xf0]  ;;  %v10668_v9 = vld [vmem:[#allocation3 + $0x488] sm:$0xf0] }
 0x347   :  { %6057 = vmatpush.bf16.msra.mxu0 %v10655_v30  ;;  %v5800_v12 = vadd.f32 %v5799_v63, %v5786_v22  ;;  %v5813_v30 = vpop.f32.mrf.mxu2  ;;  %v5787_v37 = vpop.f32.mrf.mxu0  ;;  %v10804_v47 = vld [vmem:[#allocation3 + $0x598] sm:$0xf0]  ;;  %v13229_v22 = vld [vmem:[#allocation3 + $0x404] sm:$0xf]  ;;  %v10679_v63 = vor.u32 %v13247_v36, %v10676_v57  ;;  %v10796_v16 = vld [vmem:[#allocation3 + $0x588] sm:$0xf0] }
 0x348   :  { %6071 = vmatpush.bf16.msra.mxu1 %v10719_v7  ;;  %v10684_v7 = vld [vmem:[#allocation3 + $0x4a8] sm:$0xf0]  ;;  %v5788_v43 = vadd.f32 %v5787_v37, %v14430_v52  ;;  %v5801_v44 = vpop.f32.mrf.mxu1  ;;  %v10615_v52 = vor.u32 %v13231_v56, %v10612_v54  ;;  %v13261_v59 = vld [vmem:[#allocation3 + $0x504] sm:$0xf]  ;;  %v10807_v10 = vor.u32 %v13279_v13, %v10804_v47  ;;  %v13319_v13 = vld [vmem:[#allocation3 + $0x6d4] sm:$0xf] }
 0x349   :  { %6085 = vmatpush.bf16.msra.mxu2 %v10783_v27  ;;  %v13265_v27 = vld [vmem:[#allocation3 + $0x524] sm:$0xf]  ;;  %v5814_v33 = vadd.f32 %v5813_v30, %v5800_v12  ;;  %v10732_v12 = vld [vmem:[#allocation3 + $0x508] sm:$0xf0] }
 0x34a   :  { %6099 = vmatpush.bf16.msra.mxu3 %v10847_v39  ;;  %v5827_v39 = vpop.f32.mrf.mxu3  ;;  %v5802_v48 = vadd.f32 %v5801_v44, %v5788_v43  ;;  %v10908_v43 = vld [vmem:[#allocation3 + $0x668] sm:$0xf0]  ;;  %v13353_v54 = vld [vmem:[#allocation3 + $0x7e4] sm:$0xf] }
 0x34b   :  { %6058 = vmatpush.bf16.msra.mxu0 %v10647_v50  ;;  %v14438_v50 = vadd.f32 %v5827_v39, %v5814_v33  ;;  %v10799_v33 = vor.u32 %v13277_v15, %v10796_v16  ;;  %v11036_v56 = vld [vmem:[#allocation3 + $0x768] sm:$0xf0]  ;;  %v13333_v16 = vld [vmem:[#allocation3 + $0x744] sm:$0xf] }
 0x34c   :  { %6072 = vmatpush.bf16.msra.mxu1 %v10711_v51  ;;  %v10687_v51 = vor.u32 %v13249_v23, %v10684_v7  ;;  %v11044_v23 = vld [vmem:[#allocation3 + $0x778] sm:$0xf0]  ;;  %v10735_v7 = vor.u32 %v13261_v59, %v10732_v12  ;;  %v11100_v36 = vld [vmem:[#allocation3 + $0x7e8] sm:$0xf0] }
 0x34d   :  { %6086 = vmatpush.bf16.msra.mxu2 %v10775_v55  ;;  %v10751_v55 = vor.u32 %v13265_v27, %v10748_v21  ;;  %v13355_v27 = vld [vmem:[#allocation3 + $0x7f4] sm:$0xf]  ;;  %v11108_v21 = vld [vmem:[#allocation3 + $0x7f8] sm:$0xf0]  ;;  %v11103_v47 = vor.u32 %v13353_v54, %v11100_v36  ;;  %v10956_v15 = vld [vmem:[#allocation3 + $0x6c8] sm:$0xf0] }
 0x34e   :  { %6100 = vmatpush.bf16.msra.mxu3 %v10839_v42  ;;  %v10815_v42 = vor.u32 %v13281_v32, %v10812_v25  ;;  %v11047_v32 = vor.u32 %v13339_v46, %v11044_v23  ;;  %v13305_v25 = vld [vmem:[#allocation3 + $0x664] sm:$0xf]  ;;  %v11111_v44 = vor.u32 %v13355_v27, %v11108_v21  ;;  %v10884_v46 = vld [vmem:[#allocation3 + $0x638] sm:$0xf0]  ;;  %v13315_v23 = vld [vmem:[#allocation3 + $0x6b4] sm:$0xf] }
 0x34f   :  { %6059 = vmatpush.bf16.msra.mxu0 %v10639_v29  ;;  %v10604_v29 = vld [vmem:[#allocation3 + $0x408] sm:$0xf0]  ;;  %v10948_v27 = vld [vmem:[#allocation3 + $0x6b8] sm:$0xf0]  ;;  %v13331_v21 = vld [vmem:[#allocation3 + $0x734] sm:$0xf] }
 0x350   :  { %6073 = vmatpush.bf16.msra.mxu1 %v10703_v2  ;;  %v10743_v2 = vor.u32 %v13263_v53, %v10740_v60  ;;  %v13303_v53 = vld [vmem:[#allocation3 + $0x654] sm:$0xf]  ;;  %v10900_v60 = vld [vmem:[#allocation3 + $0x658] sm:$0xf0]  ;;  %v13329_v54 = vld [vmem:[#allocation3 + $0x724] sm:$0xf] }
 0x351   :  { %6087 = vmatpush.bf16.msra.mxu2 %v10767_v26  ;;  %v13245_v26 = vld [vmem:[#allocation3 + $0x484] sm:$0xf]  ;;  %v11004_v36 = vld [vmem:[#allocation3 + $0x728] sm:$0xf0] }
 0x352   :  { %6101 = vmatpush.bf16.msra.mxu3 %v10831_v11  ;;  %v5815_v11 = vpop.f32.mrf.mxu2  ;;  %v5829_v18 = vpop.f32.mrf.mxu3  ;;  %v10671_v30 = vor.u32 %v13245_v26, %v10668_v9  ;;  %v10903_v26 = vor.u32 %v13303_v53, %v10900_v60  ;;  %v13345_v53 = vld [vmem:[#allocation3 + $0x7a4] sm:$0xf]  ;;  %v11068_v60 = vld [vmem:[#allocation3 + $0x7a8] sm:$0xf0] }
 0x353   :  { %6060 = vmatpush.bf16.msra.mxu0 %v10631_v19  ;;  %v5816_v0 = vadd.f32 %v5815_v11, %v5802_v48  ;;  %v10916_v19 = vld [vmem:[#allocation3 + $0x678] sm:$0xf0]  ;;  %v13317_v11 = vld [vmem:[#allocation3 + $0x6c4] sm:$0xf] }
 0x354   :  { %6074 = vmatpush.bf16.msra.mxu1 %v10695_v17  ;;  %v13323_v17 = vld [vmem:[#allocation3 + $0x6f4] sm:$0xf]  ;;  %v10919_v37 = vor.u32 %v13307_v45, %v10916_v19 }
 0x355   :  { %6088 = vmatpush.bf16.msra.mxu2 %v10759_v20  ;;  %v10607_v20 = vor.u32 %v13229_v22, %v10604_v29  ;;  %v10983_v39 = vor.u32 %v13323_v17, %v10980_v4  ;;  %v13335_v22 = vld [vmem:[#allocation3 + $0x754] sm:$0xf]  ;;  %v11028_v29 = vld [vmem:[#allocation3 + $0x758] sm:$0xf0]  ;;  %v10959_v17 = vor.u32 %v13317_v11, %v10956_v15 }
 0x356   :  { %6102 = vmatpush.bf16.msra.mxu3 %v10823_v3  ;;  %v14440_v3 = vadd.f32 %v5829_v18, %v5816_v0  ;;  %v11031_v59 = vor.u32 %v13335_v22, %v11028_v29  ;;  %v11084_v18 = vld [vmem:[#allocation3 + $0x7c8] sm:$0xf0]  ;;  %v13299_v4 = vld [vmem:[#allocation3 + $0x634] sm:$0xf] }
 0x357   :  { %6061 = vmatpush.bf16.msra.mxu0 %v10623_v31  ;;  %v13321_v31 = vld [vmem:[#allocation3 + $0x6e4] sm:$0xf]  ;;  %v13327_v11 = vld [vmem:[#allocation3 + $0x714] sm:$0xf] }
 0x358   :  { %6075 = vmatpush.bf16.msra.mxu1 %v10687_v51  ;;  %v10972_v51 = vld [vmem:[#allocation3 + $0x6e8] sm:$0xf0]  ;;  %v13343_v15 = vld [vmem:[#allocation3 + $0x794] sm:$0xf] }
 0x359   :  { %6089 = vmatpush.bf16.msra.mxu2 %v10751_v55  ;;  %v13337_v55 = vld [vmem:[#allocation3 + $0x764] sm:$0xf]  ;;  %v10975_v48 = vor.u32 %v13321_v31, %v10972_v51  ;;  %v10876_v31 = vld [vmem:[#allocation3 + $0x628] sm:$0xf0] }
 0x35a   :  { %6103 = vmatpush.bf16.msra.mxu3 %v10815_v42  ;;  %v10911_v42 = vor.u32 %v13305_v25, %v10908_v43  ;;  %v11039_v57 = vor.u32 %v13337_v55, %v11036_v56  ;;  %v13297_v43 = vld [vmem:[#allocation3 + $0x624] sm:$0xf]  ;;  %v10940_v56 = vld [vmem:[#allocation3 + $0x6a8] sm:$0xf0] }
 0x35b   :  { %6062 = vmatpush.bf16.msra.mxu0 %v10615_v52  ;;  %v10964_v52 = vld [vmem:[#allocation3 + $0x6d8] sm:$0xf0] }
 0x35c   :  { %6076 = vmatpush.bf16.msra.mxu1 %v10679_v63  ;;  %v13351_v63 = vld [vmem:[#allocation3 + $0x7d4] sm:$0xf]  ;;  %v10967_v9 = vor.u32 %v13319_v13, %v10964_v52 }
 0x35d   :  { %6090 = vmatpush.bf16.msra.mxu2 %v10743_v2  ;;  %v11092_v2 = vld [vmem:[#allocation3 + $0x7d8] sm:$0xf0] }
 0x35e   :  { %6104 = vmatpush.bf16.msra.mxu3 %v10807_v10  ;;  %v13301_v10 = vld [vmem:[#allocation3 + $0x644] sm:$0xf]  ;;  %v11095_v12 = vor.u32 %v13351_v63, %v11092_v2  ;;  %v11007_v63 = vor.u32 %v13329_v54, %v11004_v36  ;;  %v13295_v2 = vld [vmem:[#allocation3 + $0x614] sm:$0xf] }
 0x35f   :  { %6063 = vmatpush.bf16.msra.mxu0 %v10607_v20  ;;  %v5841_v0 = vpop.f32.mrf.mxu0 }
 0x360   :  { %6077 = vmatpush.bf16.msra.mxu1 %v10671_v30  ;;  %v5855_v19 = vpop.f32.mrf.mxu1 }
 0x361   :  { %6091 = vmatpush.bf16.msra.mxu2 %v10735_v7 }
 0x362   :  { %6105 = vmatpush.bf16.msra.mxu3 %v10799_v33  ;;  %6064 = vmatmul.bf16.vlgmr.msra.gmra.mxu0 %v14311_v14  ;;  %v10892_v14 = vld [vmem:[#allocation3 + $0x648] sm:$0xf0]  ;;  %v11012_v33 = vld [vmem:[#allocation3 + $0x738] sm:$0xf0] }
 0x363   :  { %6112 = vmatpush.bf16.msrb.mxu0 %v10919_v37  ;;  %6078 = vmatmul.bf16.vlgmr.msra.gmra.mxu1 %v14314_v38  ;;  %v13349_v38 = vld [vmem:[#allocation3 + $0x7c4] sm:$0xf]  ;;  %v10895_v45 = vor.u32 %v13301_v10, %v10892_v14  ;;  %v13347_v37 = vld [vmem:[#allocation3 + $0x7b4] sm:$0xf]  ;;  %v11015_v25 = vor.u32 %v13331_v21, %v11012_v33  ;;  %v10932_v14 = vld [vmem:[#allocation3 + $0x698] sm:$0xf0] }
 0x364   :  { %6126 = vmatpush.bf16.msrb.mxu1 %v10983_v39  ;;  %6092 = vmatmul.bf16.vlgmr.msra.gmra.mxu2 %v14331_v35  ;;  %v11020_v35 = vld [vmem:[#allocation3 + $0x748] sm:$0xf0]  ;;  %v11087_v30 = vor.u32 %v13349_v38, %v11084_v18  ;;  %v11076_v39 = vld [vmem:[#allocation3 + $0x7b8] sm:$0xf0]  ;;  %v13387_v33 = vld [vmem:[#allocation3 + $0x8f4] sm:$0xf] }
 0x365   :  { %6140 = vmatpush.bf16.msrb.mxu2 %v11047_v32  ;;  %6106 = vmatmul.bf16.vlgmr.msra.gmra.mxu3 %v14334_v61  ;;  %v5842_v61 = vadd.f32 %v5841_v0, %v14438_v50  ;;  %v11023_v20 = vor.u32 %v13333_v16, %v11020_v35  ;;  %v10887_v32 = vor.u32 %v13299_v4, %v10884_v46  ;;  %v11060_v16 = vld [vmem:[#allocation3 + $0x798] sm:$0xf0]  ;;  %v13293_v35 = vld [vmem:[#allocation3 + $0x604] sm:$0xf]  ;;  %v10860_v0 = vld [vmem:[#allocation3 + $0x608] sm:$0xf0] }
 0x366   :  { %6154 = vmatpush.bf16.msrb.mxu3 %v11111_v44  ;;  %v10951_v50 = vor.u32 %v13315_v23, %v10948_v27  ;;  %v13313_v44 = vld [vmem:[#allocation3 + $0x6a4] sm:$0xf]  ;;  %v11079_v51 = vor.u32 %v13347_v37, %v11076_v39  ;;  %v10988_v4 = vld [vmem:[#allocation3 + $0x708] sm:$0xf0]  ;;  %v13371_v27 = vld [vmem:[#allocation3 + $0x874] sm:$0xf]  ;;  %v10863_v37 = vor.u32 %v13293_v35, %v10860_v0 }
 0x367   :  { %6113 = vmatpush.bf16.msrb.mxu0 %v10911_v42  ;;  %v5856_v7 = vadd.f32 %v5855_v19, %v5842_v61  ;;  %v5869_v55 = vpop.f32.mrf.mxu2  ;;  %v10943_v29 = vor.u32 %v13313_v44, %v10940_v56  ;;  %v13309_v61 = vld [vmem:[#allocation3 + $0x684] sm:$0xf]  ;;  %v11052_v23 = vld [vmem:[#allocation3 + $0x788] sm:$0xf0]  ;;  %v11172_v21 = vld [vmem:[#allocation3 + $0x878] sm:$0xf0] }
 0x368   :  { %6127 = vmatpush.bf16.msrb.mxu1 %v10975_v48  ;;  %v5843_v48 = vpop.f32.mrf.mxu0  ;;  %v5857_v52 = vpop.f32.mrf.mxu1  ;;  %v13325_v19 = vld [vmem:[#allocation3 + $0x704] sm:$0xf]  ;;  %v11236_v39 = vld [vmem:[#allocation3 + $0x8f8] sm:$0xf0]  ;;  %v13419_v44 = vld [vmem:[#allocation3 + $0x9f4] sm:$0xf]  ;;  %v11175_v56 = vor.u32 %v13371_v27, %v11172_v21 }
 0x369   :  { %6141 = vmatpush.bf16.msrb.mxu2 %v11039_v57  ;;  %v5870_v42 = vadd.f32 %v5869_v55, %v5856_v7  ;;  %v5883_v57 = vpop.f32.mrf.mxu3  ;;  %v5844_v13 = vadd.f32 %v5843_v48, %v14440_v3  ;;  %v13341_v46 = vld [vmem:[#allocation3 + $0x784] sm:$0xf]  ;;  %v11239_v54 = vor.u32 %v13387_v33, %v11236_v39  ;;  %v11164_v48 = vld [vmem:[#allocation3 + $0x868] sm:$0xf0]  ;;  %v13363_v27 = vld [vmem:[#allocation3 + $0x834] sm:$0xf] }
 0x36a   :  { %6155 = vmatpush.bf16.msrb.mxu3 %v11103_v47  ;;  %v10879_v47 = vor.u32 %v13297_v43, %v10876_v31  ;;  %v10991_v31 = vor.u32 %v13325_v19, %v10988_v4  ;;  %v11055_v55 = vor.u32 %v13341_v46, %v11052_v23  ;;  %v11212_v19 = vld [vmem:[#allocation3 + $0x8c8] sm:$0xf0]  ;;  %v11140_v21 = vld [vmem:[#allocation3 + $0x838] sm:$0xf0]  ;;  %v13379_v33 = vld [vmem:[#allocation3 + $0x8b4] sm:$0xf] }
 0x36b   :  { %6114 = vmatpush.bf16.msrb.mxu0 %v10903_v26  ;;  %v14448_v22 = vadd.f32 %v5883_v57, %v5870_v42  ;;  %v10868_v26 = vld [vmem:[#allocation3 + $0x618] sm:$0xf0]  ;;  %v5858_v10 = vadd.f32 %v5857_v52, %v5844_v13  ;;  %v13369_v42 = vld [vmem:[#allocation3 + $0x864] sm:$0xf]  ;;  %v11340_v4 = vld [vmem:[#allocation3 + $0x9c8] sm:$0xf0] }
 0x36c   :  { %6128 = vmatpush.bf16.msrb.mxu1 %v10967_v9  ;;  %v13311_v9 = vld [vmem:[#allocation3 + $0x694] sm:$0xf]  ;;  %v10871_v3 = vor.u32 %v13295_v2, %v10868_v26  ;;  %v13385_v57 = vld [vmem:[#allocation3 + $0x8e4] sm:$0xf] }
 0x36d   :  { %6142 = vmatpush.bf16.msrb.mxu2 %v11031_v59  ;;  %v11071_v59 = vor.u32 %v13345_v53, %v11068_v60  ;;  %v10935_v38 = vor.u32 %v13311_v9, %v10932_v14  ;;  %v11228_v60 = vld [vmem:[#allocation3 + $0x8e8] sm:$0xf0]  ;;  %v13401_v13 = vld [vmem:[#allocation3 + $0x964] sm:$0xf]  ;;  %v13367_v9 = vld [vmem:[#allocation3 + $0x854] sm:$0xf] }
 0x36e   :  { %6156 = vmatpush.bf16.msrb.mxu3 %v11095_v12  ;;  %v10996_v12 = vld [vmem:[#allocation3 + $0x718] sm:$0xf0]  ;;  %v13417_v52 = vld [vmem:[#allocation3 + $0x9e4] sm:$0xf]  ;;  %v11231_v2 = vor.u32 %v13385_v57, %v11228_v60  ;;  %v11196_v57 = vld [vmem:[#allocation3 + $0x8a8] sm:$0xf0] }
 0x36f   :  { %6115 = vmatpush.bf16.msrb.mxu0 %v10895_v45  ;;  %v10999_v18 = vor.u32 %v13327_v11, %v10996_v12  ;;  %v10924_v45 = vld [vmem:[#allocation3 + $0x688] sm:$0xf0]  ;;  %v11220_v11 = vld [vmem:[#allocation3 + $0x8d8] sm:$0xf0]  ;;  %v13399_v12 = vld [vmem:[#allocation3 + $0x954] sm:$0xf] }
 0x370   :  { %6129 = vmatpush.bf16.msrb.mxu1 %v10959_v17  ;;  %v11063_v17 = vor.u32 %v13343_v15, %v11060_v16  ;;  %v10927_v43 = vor.u32 %v13309_v61, %v10924_v45  ;;  %v11284_v15 = vld [vmem:[#allocation3 + $0x958] sm:$0xf0]  ;;  %v13415_v16 = vld [vmem:[#allocation3 + $0x9d4] sm:$0xf]  ;;  %v13381_v61 = vld [vmem:[#allocation3 + $0x8c4] sm:$0xf] }
 0x371   :  { %6143 = vmatpush.bf16.msrb.mxu2 %v11023_v20  ;;  %v5871_v20 = vpop.f32.mrf.mxu2  ;;  %v5885_v7 = vpop.f32.mrf.mxu3  ;;  %v11260_v60 = vld [vmem:[#allocation3 + $0x928] sm:$0xf0] }
 0x372   :  { %6157 = vmatpush.bf16.msrb.mxu3 %v11087_v30  ;;  %v5872_v30 = vadd.f32 %v5871_v20, %v5858_v10  ;;  %v13383_v10 = vld [vmem:[#allocation3 + $0x8d4] sm:$0xf] }
 0x373   :  { %6116 = vmatpush.bf16.msrb.mxu0 %v10887_v32  ;;  %v13403_v32 = vld [vmem:[#allocation3 + $0x974] sm:$0xf]  ;;  %v11223_v0 = vor.u32 %v13383_v10, %v11220_v11 }
 0x374   :  { %6130 = vmatpush.bf16.msrb.mxu1 %v10951_v50  ;;  %v11300_v50 = vld [vmem:[#allocation3 + $0x978] sm:$0xf0]  ;;  %v13359_v11 = vld [vmem:[#allocation3 + $0x814] sm:$0xf] }
 0x375   :  { %6144 = vmatpush.bf16.msrb.mxu2 %v11015_v25  ;;  %v14450_v25 = vadd.f32 %v5885_v7, %v5872_v30  ;;  %v11303_v36 = vor.u32 %v13403_v32, %v11300_v50  ;;  %v11215_v30 = vor.u32 %v13381_v61, %v11212_v19  ;;  %v11204_v32 = vld [vmem:[#allocation3 + $0x8b8] sm:$0xf0]  ;;  %v13395_v50 = vld [vmem:[#allocation3 + $0x934] sm:$0xf]  ;;  %v13357_v61 = vld [vmem:[#allocation3 + $0x804] sm:$0xf] }
 0x376   :  { %6158 = vmatpush.bf16.msrb.mxu3 %v11079_v51  ;;  %v11364_v51 = vld [vmem:[#allocation3 + $0x9f8] sm:$0xf0] }
 0x377   :  { %6117 = vmatpush.bf16.msrb.mxu0 %v10879_v47  ;;  %v11367_v53 = vor.u32 %v13419_v44, %v11364_v51  ;;  %v11292_v47 = vld [vmem:[#allocation3 + $0x968] sm:$0xf0]  ;;  %v11332_v44 = vld [vmem:[#allocation3 + $0x9b8] sm:$0xf0]  ;;  %v11143_v51 = vor.u32 %v13363_v27, %v11140_v21  ;;  %v13435_v21 = vld [vmem:[#allocation3 + $0xa74] sm:$0xf] }
 0x378   :  { %6131 = vmatpush.bf16.msrb.mxu1 %v10943_v29  ;;  %v11356_v29 = vld [vmem:[#allocation3 + $0x9e8] sm:$0xf0]  ;;  %v11295_v26 = vor.u32 %v13401_v13, %v11292_v47 }
 0x379   :  { %6145 = vmatpush.bf16.msrb.mxu2 %v11007_v63  ;;  %v11167_v63 = vor.u32 %v13369_v42, %v11164_v48  ;;  %v11359_v14 = vor.u32 %v13417_v52, %v11356_v29  ;;  %v13409_v29 = vld [vmem:[#allocation3 + $0x9a4] sm:$0xf] }
 0x37a   :  { %6159 = vmatpush.bf16.msrb.mxu3 %v11071_v59  ;;  %v11156_v59 = vld [vmem:[#allocation3 + $0x858] sm:$0xf0] }
 0x37b   :  { %6118 = vmatpush.bf16.msrb.mxu0 %v10871_v3  ;;  %v11348_v3 = vld [vmem:[#allocation3 + $0x9d8] sm:$0xf0]  ;;  %v11159_v35 = vor.u32 %v13367_v9, %v11156_v59 }
 0x37c   :  { %6132 = vmatpush.bf16.msrb.mxu1 %v10935_v38  ;;  %v11287_v38 = vor.u32 %v13399_v12, %v11284_v15  ;;  %v11351_v45 = vor.u32 %v13415_v16, %v11348_v3  ;;  %v11124_v12 = vld [vmem:[#allocation3 + $0x818] sm:$0xf0]  ;;  %v13375_v15 = vld [vmem:[#allocation3 + $0x894] sm:$0xf] }
 0x37d   :  { %6146 = vmatpush.bf16.msrb.mxu2 %v10999_v18  ;;  %v13365_v18 = vld [vmem:[#allocation3 + $0x844] sm:$0xf] }
 0x37e   :  { %6160 = vmatpush.bf16.msrb.mxu3 %v11063_v17  ;;  %v13397_v17 = vld [vmem:[#allocation3 + $0x944] sm:$0xf] }
 0x37f   :  { %6119 = vmatpush.bf16.msrb.mxu0 %v10863_v37  ;;  %v5897_v20 = vpop.f32.mrf.mxu0 }
 0x380   :  { %6133 = vmatpush.bf16.msrb.mxu1 %v10927_v43  ;;  %v5911_v23 = vpop.f32.mrf.mxu1  ;;  %v11268_v43 = vld [vmem:[#allocation3 + $0x938] sm:$0xf0] }
 0x381   :  { %6147 = vmatpush.bf16.msrb.mxu2 %v10991_v31  ;;  %v13411_v31 = vld [vmem:[#allocation3 + $0x9b4] sm:$0xf] }
 0x382   :  { %6161 = vmatpush.bf16.msrb.mxu3 %v11055_v55  ;;  %6120 = vmatmul.bf16.vlgmr.msrb.gmra.mxu0 %v14345_v58  ;;  %v11148_v58 = vld [vmem:[#allocation3 + $0x848] sm:$0xf0]  ;;  %v11271_v55 = vor.u32 %v13395_v50, %v11268_v43  ;;  %v11335_v42 = vor.u32 %v13411_v31, %v11332_v44  ;;  %v13467_v50 = vld [vmem:[#allocation3 + $0xb74] sm:$0xf]  ;;  %v11556_v43 = vld [vmem:[#allocation3 + $0xb78] sm:$0xf0] }
 0x383   :  { %6168 = vmatpush.bf16.msra.mxu0 %v11175_v56  ;;  %6134 = vmatmul.bf16.vlgmr.msrb.gmra.mxu1 %v14347_v6  ;;  %v13413_v6 = vld [vmem:[#allocation3 + $0x9c4] sm:$0xf]  ;;  %v11151_v46 = vor.u32 %v13365_v18, %v11148_v58  ;;  %v13407_v18 = vld [vmem:[#allocation3 + $0x994] sm:$0xf]  ;;  %v11316_v58 = vld [vmem:[#allocation3 + $0x998] sm:$0xf0] }
 0x384   :  { %6182 = vmatpush.bf16.msra.mxu1 %v11239_v54  ;;  %6148 = vmatmul.bf16.vlgmr.msrb.gmra.mxu2 %v14355_v28  ;;  %v11276_v28 = vld [vmem:[#allocation3 + $0x948] sm:$0xf0]  ;;  %v11343_v37 = vor.u32 %v13413_v6, %v11340_v4  ;;  %v13361_v56 = vld [vmem:[#allocation3 + $0x824] sm:$0xf]  ;;  %v11319_v4 = vor.u32 %v13407_v18, %v11316_v58  ;;  %v11604_v18 = vld [vmem:[#allocation3 + $0xbd8] sm:$0xf0] }
 0x385   :  { %6196 = vmatpush.bf16.msra.mxu2 %v11303_v36  ;;  %6162 = vmatmul.bf16.vlgmr.msrb.gmra.mxu3 %v14357_v41  ;;  %v5898_v41 = vadd.f32 %v5897_v20, %v14448_v22  ;;  %v11279_v7 = vor.u32 %v13397_v17, %v11276_v28  ;;  %v11207_v22 = vor.u32 %v13379_v33, %v11204_v32  ;;  %v11132_v54 = vld [vmem:[#allocation3 + $0x828] sm:$0xf0]  ;;  %v13377_v36 = vld [vmem:[#allocation3 + $0x8a4] sm:$0xf]  ;;  %v11428_v33 = vld [vmem:[#allocation3 + $0xa78] sm:$0xf0] }
 0x386   :  { %6210 = vmatpush.bf16.msra.mxu3 %v11367_v53  ;;  %v13393_v53 = vld [vmem:[#allocation3 + $0x924] sm:$0xf]  ;;  %v11199_v10 = vor.u32 %v13377_v36, %v11196_v57  ;;  %v11180_v20 = vld [vmem:[#allocation3 + $0x888] sm:$0xf0]  ;;  %v11492_v32 = vld [vmem:[#allocation3 + $0xaf8] sm:$0xf0] }
 0x387   :  { %6169 = vmatpush.bf16.msra.mxu0 %v11167_v63  ;;  %v5912_v39 = vadd.f32 %v5911_v23, %v5898_v41  ;;  %v5925_v48 = vpop.f32.mrf.mxu2  ;;  %v5899_v47 = vpop.f32.mrf.mxu0  ;;  %v11324_v63 = vld [vmem:[#allocation3 + $0x9a8] sm:$0xf0]  ;;  %v13373_v28 = vld [vmem:[#allocation3 + $0x884] sm:$0xf] }
 0x388   :  { %6183 = vmatpush.bf16.msra.mxu1 %v11231_v2  ;;  %v5939_v52 = vpop.f32.mrf.mxu3  ;;  %v5900_v2 = vadd.f32 %v5899_v47, %v14450_v25  ;;  %v5913_v9 = vpop.f32.mrf.mxu1  ;;  %v11327_v16 = vor.u32 %v13409_v29, %v11324_v63  ;;  %v11127_v25 = vor.u32 %v13359_v11, %v11124_v12  ;;  %v13389_v6 = vld [vmem:[#allocation3 + $0x904] sm:$0xf]  ;;  %v11183_v44 = vor.u32 %v13373_v28, %v11180_v20  ;;  %v11548_v63 = vld [vmem:[#allocation3 + $0xb68] sm:$0xf0]  ;;  %v13431_v11 = vld [vmem:[#allocation3 + $0xa54] sm:$0xf] }
 0x389   :  { %6197 = vmatpush.bf16.msra.mxu2 %v11295_v26  ;;  %v5926_v13 = vadd.f32 %v5925_v48, %v5912_v39  ;;  %v11135_v26 = vor.u32 %v13361_v56, %v11132_v54  ;;  %v13405_v23 = vld [vmem:[#allocation3 + $0x984] sm:$0xf]  ;;  %v11431_v54 = vor.u32 %v13435_v21, %v11428_v33  ;;  %v11412_v12 = vld [vmem:[#allocation3 + $0xa58] sm:$0xf0]  ;;  %v11468_v28 = vld [vmem:[#allocation3 + $0xac8] sm:$0xf0] }
 0x38a   :  { %6211 = vmatpush.bf16.msra.mxu3 %v11359_v14  ;;  %v11263_v14 = vor.u32 %v13393_v53, %v11260_v60  ;;  %v5914_v3 = vadd.f32 %v5913_v9, %v5900_v2  ;;  %v13433_v36 = vld [vmem:[#allocation3 + $0xa64] sm:$0xf]  ;;  %v11559_v53 = vor.u32 %v13467_v50, %v11556_v43  ;;  %v11420_v60 = vld [vmem:[#allocation3 + $0xa68] sm:$0xf0]  ;;  %v11415_v58 = vor.u32 %v13431_v11, %v11412_v12  ;;  %v13459_v21 = vld [vmem:[#allocation3 + $0xb34] sm:$0xf] }
 0x38b   :  { %6170 = vmatpush.bf16.msra.mxu0 %v11159_v35  ;;  %v14458_v59 = vadd.f32 %v5939_v52, %v5926_v13  ;;  %v11188_v35 = vld [vmem:[#allocation3 + $0x898] sm:$0xf0]  ;;  %v13449_v13 = vld [vmem:[#allocation3 + $0xae4] sm:$0xf]  ;;  %v11484_v52 = vld [vmem:[#allocation3 + $0xae8] sm:$0xf0] }
 0x38c   :  { %6184 = vmatpush.bf16.msra.mxu1 %v11223_v0  ;;  %v13391_v0 = vld [vmem:[#allocation3 + $0x914] sm:$0xf]  ;;  %v11191_v19 = vor.u32 %v13375_v15, %v11188_v35  ;;  %v13465_v29 = vld [vmem:[#allocation3 + $0xb64] sm:$0xf]  ;;  %v11612_v9 = vld [vmem:[#allocation3 + $0xbe8] sm:$0xf0] }
 0x38d   :  { %6198 = vmatpush.bf16.msra.mxu2 %v11287_v38  ;;  %v11252_v38 = vld [vmem:[#allocation3 + $0x918] sm:$0xf0]  ;;  %v13447_v15 = vld [vmem:[#allocation3 + $0xad4] sm:$0xf]  ;;  %v13461_v20 = vld [vmem:[#allocation3 + $0xb44] sm:$0xf] }
 0x38e   :  { %6212 = vmatpush.bf16.msra.mxu3 %v11351_v45  ;;  %v11116_v45 = vld [vmem:[#allocation3 + $0x808] sm:$0xf0]  ;;  %v11255_v17 = vor.u32 %v13391_v0, %v11252_v38  ;;  %v13463_v35 = vld [vmem:[#allocation3 + $0xb54] sm:$0xf]  ;;  %v11540_v0 = vld [vmem:[#allocation3 + $0xb58] sm:$0xf0] }
 0x38f   :  { %6171 = vmatpush.bf16.msra.mxu0 %v11151_v46  ;;  %v5927_v41 = vpop.f32.mrf.mxu2  ;;  %v11244_v46 = vld [vmem:[#allocation3 + $0x908] sm:$0xf0]  ;;  %v11119_v39 = vor.u32 %v13357_v61, %v11116_v45  ;;  %v13479_v38 = vld [vmem:[#allocation3 + $0xbd4] sm:$0xf]  ;;  %v11543_v61 = vor.u32 %v13463_v35, %v11540_v0  ;;  %v13429_v45 = vld [vmem:[#allocation3 + $0xa44] sm:$0xf] }
 0x390   :  { %6185 = vmatpush.bf16.msra.mxu1 %v11215_v30  ;;  %v11308_v30 = vld [vmem:[#allocation3 + $0x988] sm:$0xf0]  ;;  %v5941_v27 = vpop.f32.mrf.mxu3  ;;  %v11524_v33 = vld [vmem:[#allocation3 + $0xb38] sm:$0xf0]  ;;  %v13421_v12 = vld [vmem:[#allocation3 + $0xa04] sm:$0xf] }
 0x391   :  { %6199 = vmatpush.bf16.msra.mxu2 %v11279_v7  ;;  %v5928_v7 = vadd.f32 %v5927_v41, %v5914_v3  ;;  %v11311_v56 = vor.u32 %v13405_v23, %v11308_v30  ;;  %v11476_v3 = vld [vmem:[#allocation3 + $0xad8] sm:$0xf0]  ;;  %v13443_v30 = vld [vmem:[#allocation3 + $0xab4] sm:$0xf]  ;;  %v11527_v43 = vor.u32 %v13459_v21, %v11524_v33  ;;  %v11436_v35 = vld [vmem:[#allocation3 + $0xa88] sm:$0xf0] }
 0x392   :  { %6213 = vmatpush.bf16.msra.mxu3 %v11343_v37  ;;  %v13451_v37 = vld [vmem:[#allocation3 + $0xaf4] sm:$0xf]  ;;  %v11396_v23 = vld [vmem:[#allocation3 + $0xa38] sm:$0xf0]  ;;  %v13453_v0 = vld [vmem:[#allocation3 + $0xb04] sm:$0xf] }
 0x393   :  { %6172 = vmatpush.bf16.msra.mxu0 %v11143_v51  ;;  %v5942_v31 = vadd.f32 %v5941_v27, %v5928_v7  ;;  %v11247_v51 = vor.u32 %v13389_v6, %v11244_v46  ;;  %v11495_v57 = vor.u32 %v13451_v37, %v11492_v32  ;;  %v13477_v6 = vld [vmem:[#allocation3 + $0xbc4] sm:$0xf]  ;;  %v13427_v46 = vld [vmem:[#allocation3 + $0xa34] sm:$0xf]  ;;  %v11460_v27 = vld [vmem:[#allocation3 + $0xab8] sm:$0xf0] }
 0x394   :  { %6186 = vmatpush.bf16.msra.mxu1 %v11207_v22  ;;  %v13483_v22 = vld [vmem:[#allocation3 + $0xbf4] sm:$0xf]  ;;  %v11399_v32 = vor.u32 %v13427_v46, %v11396_v23  ;;  %v11463_v50 = vor.u32 %v13443_v30, %v11460_v27  ;;  %v13773_v23 = vld [vmem:[#allocation13] sm:$0x3] }
 0x395   :  { %6200 = vmatpush.bf16.msra.mxu2 %v11271_v55  ;;  %v11620_v55 = vld [vmem:[#allocation3 + $0xbf8] sm:$0xf0]  ;;  %v6282_v48 = vmax.f32 %v5942_v31, 0.0  ;;  %v13475_v37 = vld [vmem:[#allocation3 + $0xbb4] sm:$0xf]  ;;  %v3685_v30 = vperm.slane %v13773_v23, 1 }
 0x396   :  { %6214 = vmatpush.bf16.msra.mxu3 %v11335_v42  ;;  %v6280_v42 = vmax.f32 %v14458_v59, 0.0  ;;  %v11623_v47 = vor.u32 %v13483_v22, %v11620_v55  ;;  %v11487_v59 = vor.u32 %v13449_v13, %v11484_v52  ;;  %v13425_v31 = vld [vmem:[#allocation3 + $0xa24] sm:$0xf]  ;;  %v11452_v55 = vld [vmem:[#allocation3 + $0xaa8] sm:$0xf0] }
 0x397   :  { %6173 = vmatpush.bf16.msra.mxu0 %v11135_v26  ;;  %v13481_v26 = vld [vmem:[#allocation3 + $0xbe4] sm:$0xf]  ;;  %v11380_v13 = vld [vmem:[#allocation3 + $0xa18] sm:$0xf0] }
 0x398   :  { %6187 = vmatpush.bf16.msra.mxu1 %v11199_v10  ;;  %v14461_v2 = vpack.c.bf16 %v6282_v48, %v6280_v42  ;;  %v11423_v10 = vor.u32 %v13433_v36, %v11420_v60  ;;  %v13473_v36 = vld [vmem:[#allocation3 + $0xba4] sm:$0xf]  ;;  %v11580_v42 = vld [vmem:[#allocation3 + $0xba8] sm:$0xf0]  ;;  %v13423_v60 = vld [vmem:[#allocation3 + $0xa14] sm:$0xf] }
 0x399   :  { %6201 = vmatpush.bf16.msra.mxu2 %v11263_v14  ;;  %v11551_v14 = vor.u32 %v13465_v29, %v11548_v63  ;;  %v11583_v52 = vor.u32 %v13473_v36, %v11580_v42  ;;  %v11444_v29 = vld [vmem:[#allocation3 + $0xa98] sm:$0xf0]  ;;  %v13455_v63 = vld [vmem:[#allocation3 + $0xb14] sm:$0xf] }
 0x39a   :  { %6215 = vmatpush.bf16.msra.mxu3 %v11327_v16  ;;  %v11615_v16 = vor.u32 %v13481_v26, %v11612_v9  ;;  %v11508_v26 = vld [vmem:[#allocation3 + $0xb18] sm:$0xf0]  ;;  %v13471_v9 = vld [vmem:[#allocation3 + $0xb94] sm:$0xf] }
 0x39b   :  { %6174 = vmatpush.bf16.msra.mxu0 %v11127_v25  ;;  %v11479_v25 = vor.u32 %v13447_v15, %v11476_v3  ;;  %v11511_v11 = vor.u32 %v13455_v63, %v11508_v26  ;;  %v11372_v15 = vld [vmem:[#allocation3 + $0xa08] sm:$0xf0] }
 0x39c   :  { %6188 = vmatpush.bf16.msra.mxu1 %v11191_v19  ;;  %v13445_v19 = vld [vmem:[#allocation3 + $0xac4] sm:$0xf] }
 0x39d   :  { %6202 = vmatpush.bf16.msra.mxu2 %v11255_v17  ;;  %v11607_v17 = vor.u32 %v13479_v38, %v11604_v18  ;;  %v11500_v38 = vld [vmem:[#allocation3 + $0xb08] sm:$0xf0]  ;;  %v13469_v18 = vld [vmem:[#allocation3 + $0xb84] sm:$0xf] }
 0x39e   :  { %6216 = vmatpush.bf16.msra.mxu3 %v11319_v4 }
 0x39f   :  { %6175 = vmatpush.bf16.msra.mxu0 %v11119_v39  ;;  %v11588_v39 = vld [vmem:[#allocation3 + $0xbb8] sm:$0xf0] }
 0x3a0   :  { %6189 = vmatpush.bf16.msra.mxu1 %v11183_v44  ;;  %v11388_v44 = vld [vmem:[#allocation3 + $0xa28] sm:$0xf0]  ;;  %v11591_v22 = vor.u32 %v13475_v37, %v11588_v39 }
 0x3a1   :  { %6203 = vmatpush.bf16.msra.mxu2 %v11247_v51  ;;  %v13441_v51 = vld [vmem:[#allocation3 + $0xaa4] sm:$0xf]  ;;  %v11391_v48 = vor.u32 %v13425_v31, %v11388_v44 }
 0x3a2   :  { %6217 = vmatpush.bf16.msra.mxu3 %v11311_v56  ;;  %6176 = vmatmul.bf16.vlgmr.msra.gmra.mxu0 %v14363_v49  ;;  %v11404_v49 = vld [vmem:[#allocation3 + $0xa48] sm:$0xf0]  ;;  %v13457_v56 = vld [vmem:[#allocation3 + $0xb24] sm:$0xf] }
 0x3a3   :  { %6224 = vmatpush.bf16.msrb.mxu0 %v11431_v54  ;;  %6190 = vmatmul.bf16.vlgmr.msra.gmra.mxu1 %v14365_v1  ;;  %v11596_v1 = vld [vmem:[#allocation3 + $0xbc8] sm:$0xf0]  ;;  %v11407_v4 = vor.u32 %v13429_v45, %v11404_v49  ;;  %v11503_v45 = vor.u32 %v13453_v0, %v11500_v38 }
 0x3a4   :  { %6238 = vmatpush.bf16.msrb.mxu1 %v11495_v57  ;;  %6204 = vmatmul.bf16.vlgmr.msra.gmra.mxu2 %v14369_v24  ;;  %v11532_v24 = vld [vmem:[#allocation3 + $0xb48] sm:$0xf0]  ;;  %v11599_v7 = vor.u32 %v13477_v6, %v11596_v1  ;;  %v11455_v57 = vor.u32 %v13441_v51, %v11452_v55 }
 0x3a5   :  { %6252 = vmatpush.bf16.msrb.mxu2 %v11559_v53  ;;  %6218 = vmatmul.bf16.vlgmr.msra.gmra.mxu3 %v14371_v34  ;;  %v11471_v34 = vor.u32 %v13445_v19, %v11468_v28  ;;  %v11535_v41 = vor.u32 %v13461_v20, %v11532_v24  ;;  %v11516_v54 = vld [vmem:[#allocation3 + $0xb28] sm:$0xf0]  ;;  %v5953_v19 = vpop.f32.mrf.mxu0 }
 0x3a6   :  { %6266 = vmatpush.bf16.msrb.mxu3 %v11623_v47  ;;  %v11519_v53 = vor.u32 %v13457_v56, %v11516_v54  ;;  %v13439_v47 = vld [vmem:[#allocation3 + $0xa94] sm:$0xf] }
 0x3a7   :  { %6225 = vmatpush.bf16.msrb.mxu0 %v11423_v10  ;;  %v11572_v10 = vld [vmem:[#allocation3 + $0xb98] sm:$0xf0]  ;;  %v5981_v28 = vpop.f32.mrf.mxu2 }
 0x3a8   :  { %6239 = vmatpush.bf16.msrb.mxu1 %v11487_v59  ;;  %v11383_v59 = vor.u32 %v13423_v60, %v11380_v13  ;;  %v11575_v3 = vor.u32 %v13471_v9, %v11572_v10  ;;  %v5995_v20 = vpop.f32.mrf.mxu3 }
 0x3a9   :  { %6253 = vmatpush.bf16.msrb.mxu2 %v11551_v14  ;;  %v11447_v14 = vor.u32 %v13439_v47, %v11444_v29 }
 0x3aa   :  { %6267 = vmatpush.bf16.msrb.mxu3 %v11615_v16  ;;  %v13437_v16 = vld [vmem:[#allocation3 + $0xa84] sm:$0xf] }
 0x3ab   :  { %6226 = vmatpush.bf16.msrb.mxu0 %v11415_v58  ;;  %v11564_v58 = vld [vmem:[#allocation3 + $0xb88] sm:$0xf0] }
 0x3ac   :  { %6240 = vmatpush.bf16.msrb.mxu1 %v11479_v25  ;;  %v11375_v25 = vor.u32 %v13421_v12, %v11372_v15  ;;  %v11567_v49 = vor.u32 %v13469_v18, %v11564_v58 }
 0x3ad   :  { %6254 = vmatpush.bf16.msrb.mxu2 %v11543_v61  ;;  %v11439_v61 = vor.u32 %v13437_v16, %v11436_v35  ;;  %v5955_v24 = vpop.f32.mrf.mxu0 }
 0x3ae   :  { %6268 = vmatpush.bf16.msrb.mxu3 %v11607_v17  ;;  %v5967_v17 = vpop.f32.mrf.mxu1 }
 0x3af   :  { %6227 = vmatpush.bf16.msrb.mxu0 %v11407_v4  ;;  %v5983_v1 = vpop.f32.mrf.mxu2 }
 0x3b0   :  { %6241 = vmatpush.bf16.msrb.mxu1 %v11471_v34  ;;  %v5997_v4 = vpop.f32.mrf.mxu3 }
 0x3b1   :  { %6255 = vmatpush.bf16.msrb.mxu2 %v11535_v41 }
 0x3b2   :  { %6269 = vmatpush.bf16.msrb.mxu3 %v11599_v7 }
 0x3b3   :  { %6228 = vmatpush.bf16.msrb.mxu0 %v11399_v32 }
 0x3b4   :  { %6242 = vmatpush.bf16.msrb.mxu1 %v11463_v50 }
 0x3b5   :  { %6256 = vmatpush.bf16.msrb.mxu2 %v11527_v43 }
 0x3b6   :  { %6270 = vmatpush.bf16.msrb.mxu3 %v11591_v22  ;;  %v5969_v6 = vpop.f32.mrf.mxu1 }
 0x3b7   :  { %6229 = vmatpush.bf16.msrb.mxu0 %v11391_v48 }
 0x3b8   :  { %6243 = vmatpush.bf16.msrb.mxu1 %v11455_v57 }
 0x3b9   :  { %6257 = vmatpush.bf16.msrb.mxu2 %v11519_v53 }
 0x3ba   :  { %6271 = vmatpush.bf16.msrb.mxu3 %v11583_v52 }
 0x3bb   :  { %6230 = vmatpush.bf16.msrb.mxu0 %v11383_v59 }
 0x3bc   :  { %6244 = vmatpush.bf16.msrb.mxu1 %v11447_v14 }
 0x3bd   :  { %6258 = vmatpush.bf16.msrb.mxu2 %v11511_v11 }
 0x3be   :  { %6272 = vmatpush.bf16.msrb.mxu3 %v11575_v3 }
 0x3bf   :  { %6231 = vmatpush.bf16.msrb.mxu0 %v11375_v25  ;;  %v6009_v34 = vpop.f32.mrf.mxu0 }
 0x3c0   :  { %6245 = vmatpush.bf16.msrb.mxu1 %v11439_v61  ;;  %v6023_v41 = vpop.f32.mrf.mxu1 }
 0x3c1   :  { %6259 = vmatpush.bf16.msrb.mxu2 %v11503_v45 }
 0x3c2   :  { %6273 = vmatpush.bf16.msrb.mxu3 %v11567_v49  ;;  %6232 = vmatmul.bf16.vlgmr.msrb.gmra.mxu0 %v14375_v62 }
 0x3c3   :  { %6246 = vmatmul.bf16.vlgmr.msrb.gmra.mxu1 %v14377_v8  ;;  %v5954_v8 = vadd.f32 %v5953_v19, %v3685_v30 }
 0x3c4   :  { %6260 = vmatmul.bf16.vlgmr.msrb.gmra.mxu2 %v14381_v5 }
 0x3c5   :  { %6274 = vmatmul.bf16.vlgmr.msrb.gmra.mxu3 %v14383_v40  ;;  %v5968_v5 = vadd.f32 %v5967_v17, %v5954_v8  ;;  %v5956_v40 = vadd.f32 %v5955_v24, %v3685_v30 }
 0x3c7   :  { %v6037_v46 = vpop.f32.mrf.mxu2  ;;  %v6011_v7 = vpop.f32.mrf.mxu0  ;;  %v5982_v39 = vadd.f32 %v5981_v28, %v5968_v5  ;;  %v5970_v50 = vadd.f32 %v5969_v6, %v5956_v40 }
 0x3c8   :  { %v6051_v62 = vpop.f32.mrf.mxu3  ;;  %v6025_v27 = vpop.f32.mrf.mxu1 }
 0x3c9   :  { %v5996_v43 = vadd.f32 %v5995_v20, %v5982_v39  ;;  %v5984_v44 = vadd.f32 %v5983_v1, %v5970_v50 }
 0x3cb   :  { %v6010_v22 = vadd.f32 %v6009_v34, %v5996_v43  ;;  %v5998_v56 = vadd.f32 %v5997_v4, %v5984_v44 }
 0x3cd   :  { %v6024_v36 = vadd.f32 %v6023_v41, %v6010_v22  ;;  %v6012_v42 = vadd.f32 %v6011_v7, %v5998_v56 }
 0x3cf   :  { %v6039_v21 = vpop.f32.mrf.mxu2  ;;  %v6038_v57 = vadd.f32 %v6037_v46, %v6024_v36  ;;  %v6026_v13 = vadd.f32 %v6025_v27, %v6012_v42 }
 0x3d0   :  { %v6053_v33 = vpop.f32.mrf.mxu3 }
 0x3d1   :  { %v6052_v52 = vadd.f32 %v6051_v62, %v6038_v57  ;;  %v6040_v29 = vadd.f32 %v6039_v21, %v6026_v13 }
 0x3d3   :  { %v6054_v9 = vadd.f32 %v6053_v33, %v6040_v29 }
 0x3df   :  { %v6065_v37 = vpop.f32.mrf.mxu0 }
 0x3e0   :  { %v6079_v32 = vpop.f32.mrf.mxu1  ;;  %v6066_v63 = vadd.f32 %v6065_v37, %v6052_v52 }
 0x3e2   :  { %v6080_v59 = vadd.f32 %v6079_v32, %v6066_v63 }
 0x3e7   :  { %v6093_v31 = vpop.f32.mrf.mxu2  ;;  %v6067_v55 = vpop.f32.mrf.mxu0 }
 0x3e8   :  { %v6107_v51 = vpop.f32.mrf.mxu3  ;;  %v6081_v54 = vpop.f32.mrf.mxu1  ;;  %v6068_v14 = vadd.f32 %v6067_v55, %v6054_v9  ;;  %v6094_v12 = vadd.f32 %v6093_v31, %v6080_v59 }
 0x3ea   :  { %v6082_v16 = vadd.f32 %v6081_v54, %v6068_v14  ;;  %v6108_v3 = vadd.f32 %v6107_v51, %v6094_v12 }
 0x3ef   :  { %v6095_v48 = vpop.f32.mrf.mxu2 }
 0x3f0   :  { %v6109_v53 = vpop.f32.mrf.mxu3  ;;  %v6096_v35 = vadd.f32 %v6095_v48, %v6082_v16 }
 0x3f2   :  { %v6110_v25 = vadd.f32 %v6109_v53, %v6096_v35 }
 0x3ff   :  { %v6121_v60 = vpop.f32.mrf.mxu0 }
 0x400   :  { %v6135_v47 = vpop.f32.mrf.mxu1  ;;  %v6122_v38 = vadd.f32 %v6121_v60, %v6108_v3 }
 0x402   :  { %v6136_v45 = vadd.f32 %v6135_v47, %v6122_v38 }
 0x407   :  { %v6149_v26 = vpop.f32.mrf.mxu2  ;;  %v6123_v11 = vpop.f32.mrf.mxu0 }
 0x408   :  { %v6163_v10 = vpop.f32.mrf.mxu3  ;;  %v6137_v15 = vpop.f32.mrf.mxu1  ;;  %v6124_v49 = vadd.f32 %v6123_v11, %v6110_v25  ;;  %v6150_v19 = vadd.f32 %v6149_v26, %v6136_v45 }
 0x40a   :  { %v6138_v28 = vadd.f32 %v6137_v15, %v6124_v49  ;;  %v6164_v24 = vadd.f32 %v6163_v10, %v6150_v19 }
 0x40f   :  { %v6151_v0 = vpop.f32.mrf.mxu2 }
 0x410   :  { %v6165_v18 = vpop.f32.mrf.mxu3  ;;  %v6152_v6 = vadd.f32 %v6151_v0, %v6138_v28 }
 0x412   :  { %v6166_v41 = vadd.f32 %v6165_v18, %v6152_v6 }
 0x41f   :  { %v6177_v58 = vpop.f32.mrf.mxu0 }
 0x420   :  { %v6191_v61 = vpop.f32.mrf.mxu1  ;;  %v6178_v4 = vadd.f32 %v6177_v58, %v6164_v24 }
 0x422   :  { %v6192_v46 = vadd.f32 %v6191_v61, %v6178_v4 }
 0x427   :  { %v6205_v17 = vpop.f32.mrf.mxu2  ;;  %v6179_v1 = vpop.f32.mrf.mxu0 }
 0x428   :  { %v6219_v20 = vpop.f32.mrf.mxu3  ;;  %v6193_v34 = vpop.f32.mrf.mxu1  ;;  %v6180_v23 = vadd.f32 %v6179_v1, %v6166_v41  ;;  %v6206_v62 = vadd.f32 %v6205_v17, %v6192_v46 }
 0x42a   :  { %v6194_v27 = vadd.f32 %v6193_v34, %v6180_v23  ;;  %v6220_v21 = vadd.f32 %v6219_v20, %v6206_v62 }
 0x42f   :  { %v6207_v30 = vpop.f32.mrf.mxu2 }
 0x430   :  { %v6221_v7 = vpop.f32.mrf.mxu3  ;;  %v6208_v40 = vadd.f32 %v6207_v30, %v6194_v27 }
 0x432   :  { %v6222_v39 = vadd.f32 %v6221_v7, %v6208_v40 }
 0x43f   :  { %v6233_v8 = vpop.f32.mrf.mxu0 }
 0x440   :  { %v6247_v5 = vpop.f32.mrf.mxu1  ;;  %v6234_v33 = vadd.f32 %v6233_v8, %v6220_v21 }
 0x442   :  { %v6248_v43 = vadd.f32 %v6247_v5, %v6234_v33 }
 0x447   :  { %v6261_v37 = vpop.f32.mrf.mxu2  ;;  %v6235_v50 = vpop.f32.mrf.mxu0 }
 0x448   :  { %v6275_v32 = vpop.f32.mrf.mxu3  ;;  %v6236_v31 = vadd.f32 %v6235_v50, %v6222_v39  ;;  %v6262_v44 = vadd.f32 %v6261_v37, %v6248_v43  ;;  %v6249_v51 = vpop.f32.mrf.mxu1 }
 0x44a   :  { %v6250_v22 = vadd.f32 %v6249_v51, %v6236_v31  ;;  %v6276_v56 = vadd.f32 %v6275_v32, %v6262_v44 }
 0x44c   :  { %v6281_v48 = vmax.f32 %v6276_v56, 0.0 }
 0x44f   :  { %v6263_v55 = vpop.f32.mrf.mxu2 }
 0x450   :  { %v6264_v54 = vadd.f32 %v6263_v55, %v6250_v22  ;;  %v6277_v36 = vpop.f32.mrf.mxu3 }
 0x452   :  { %v6278_v42 = vadd.f32 %v6277_v36, %v6264_v54 }
 0x454   :  { %v6283_v57 = vmax.f32 %v6278_v42, 0.0 }
 0x456   :  { %v14471_v53 = vpack.c.bf16 %v6283_v57, %v6281_v48 }
 0x457   :  { %14075 = dma.done.wait [#allocation7 + $0x2], 16384 }
 0x458   :  { %14076 = vsyncadd [#allocation7 + $0x2], 4294950912  ;;  %v11850_v60 = vld [vmem:[#allocation4 + $0x1c0] sm:$0xf]  ;;  %v13541_v63 = vld [vmem:[#allocation4 + $0x1c4] sm:$0xf] }
 0x459   :  { %v13545_v13 = vld [vmem:[#allocation4 + $0x1dc] sm:$0xf0]  ;;  %v11852_v26 = vld [vmem:[#allocation4 + $0x1e0] sm:$0xf0] }
 0x45a   :  { %v12106_v47 = vld [vmem:[#allocation4 + $0x3c0] sm:$0xf]  ;;  %v11851_v52 = vor.u32 %v13545_v13, %v11850_v60  ;;  %v11855_v10 = vor.u32 %v13541_v63, %v11852_v26  ;;  %v13605_v59 = vld [vmem:[#allocation4 + $0x3c4] sm:$0xf] }
 0x45b   :  { %v13609_v29 = vld [vmem:[#allocation4 + $0x3dc] sm:$0xf0]  ;;  %v12108_v14 = vld [vmem:[#allocation4 + $0x3e0] sm:$0xf0] }
 0x45c   :  { %v12107_v9 = vor.u32 %v13609_v29, %v12106_v47  ;;  %v11818_v11 = vld [vmem:[#allocation4 + $0x180] sm:$0xf]  ;;  %7075 = vmatpush.bf16.msra.mxu0 %v11851_v52  ;;  %v12111_v12 = vor.u32 %v13605_v59, %v12108_v14  ;;  %7103 = vmatpush.bf16.msra.mxu2 %v11855_v10  ;;  %v13533_v38 = vld [vmem:[#allocation4 + $0x184] sm:$0xf] }
 0x45d   :  { %v13537_v15 = vld [vmem:[#allocation4 + $0x19c] sm:$0xf0]  ;;  %v11820_v18 = vld [vmem:[#allocation4 + $0x1a0] sm:$0xf0] }
 0x45e   :  { %v12074_v16 = vld [vmem:[#allocation4 + $0x380] sm:$0xf]  ;;  %7089 = vmatpush.bf16.msra.mxu1 %v12107_v9  ;;  %v11819_v35 = vor.u32 %v13537_v15, %v11818_v11  ;;  %v13597_v58 = vld [vmem:[#allocation4 + $0x384] sm:$0xf]  ;;  %7117 = vmatpush.bf16.msra.mxu3 %v12111_v12  ;;  %v11823_v25 = vor.u32 %v13533_v38, %v11820_v18 }
 0x45f   :  { %v13601_v3 = vld [vmem:[#allocation4 + $0x39c] sm:$0xf0]  ;;  %v12076_v61 = vld [vmem:[#allocation4 + $0x3a0] sm:$0xf0] }
 0x460   :  { %v12075_v0 = vor.u32 %v13601_v3, %v12074_v16  ;;  %v11786_v45 = vld [vmem:[#allocation4 + $0x140] sm:$0xf]  ;;  %v12079_v19 = vor.u32 %v13597_v58, %v12076_v61  ;;  %v13525_v20 = vld [vmem:[#allocation4 + $0x144] sm:$0xf]  ;;  %7076 = vmatpush.bf16.msra.mxu0 %v11819_v35  ;;  %7104 = vmatpush.bf16.msra.mxu2 %v11823_v25 }
 0x461   :  { %v13529_v49 = vld [vmem:[#allocation4 + $0x15c] sm:$0xf0]  ;;  %v11788_v6 = vld [vmem:[#allocation4 + $0x160] sm:$0xf0] }
 0x462   :  { %v12042_v17 = vld [vmem:[#allocation4 + $0x340] sm:$0xf]  ;;  %v11787_v24 = vor.u32 %v13529_v49, %v11786_v45  ;;  %v13589_v1 = vld [vmem:[#allocation4 + $0x344] sm:$0xf]  ;;  %7090 = vmatpush.bf16.msra.mxu1 %v12075_v0  ;;  %v11791_v41 = vor.u32 %v13525_v20, %v11788_v6  ;;  %7118 = vmatpush.bf16.msra.mxu3 %v12079_v19  ;;  %v11858_v6 = vld [vmem:[#allocation4 + $0x1c8] sm:$0xf] }
 0x463   :  { %v13593_v28 = vld [vmem:[#allocation4 + $0x35c] sm:$0xf0]  ;;  %v12044_v4 = vld [vmem:[#allocation4 + $0x360] sm:$0xf0] }
 0x464   :  { %v12043_v34 = vor.u32 %v13593_v28, %v12042_v17  ;;  %v11754_v46 = vld [vmem:[#allocation4 + $0x100] sm:$0xf]  ;;  %v12047_v62 = vor.u32 %v13589_v1, %v12044_v4  ;;  %v13517_v8 = vld [vmem:[#allocation4 + $0x104] sm:$0xf]  ;;  %7077 = vmatpush.bf16.msra.mxu0 %v11787_v24  ;;  %7105 = vmatpush.bf16.msra.mxu2 %v11791_v41  ;;  %v13546_v1 = vld [vmem:[#allocation4 + $0x1e4] sm:$0xf0] }
 0x465   :  { %v13521_v23 = vld [vmem:[#allocation4 + $0x11c] sm:$0xf0]  ;;  %v11756_v27 = vld [vmem:[#allocation4 + $0x120] sm:$0xf0]  ;;  %v12114_v4 = vld [vmem:[#allocation4 + $0x3c8] sm:$0xf] }
 0x466   :  { %v12010_v30 = vld [vmem:[#allocation4 + $0x300] sm:$0xf]  ;;  %v13581_v5 = vld [vmem:[#allocation4 + $0x304] sm:$0xf]  ;;  %v11755_v40 = vor.u32 %v13521_v23, %v11754_v46  ;;  %7091 = vmatpush.bf16.msra.mxu1 %v12043_v34  ;;  %v11759_v37 = vor.u32 %v13517_v8, %v11756_v27  ;;  %7119 = vmatpush.bf16.msra.mxu3 %v12047_v62  ;;  %v13610_v41 = vld [vmem:[#allocation4 + $0x3e4] sm:$0xf0] }
 0x467   :  { %v13585_v7 = vld [vmem:[#allocation4 + $0x31c] sm:$0xf0]  ;;  %v12012_v21 = vld [vmem:[#allocation4 + $0x320] sm:$0xf0]  ;;  %v13542_v46 = vld [vmem:[#allocation4 + $0x1cc] sm:$0xf] }
 0x468   :  { %v12011_v33 = vor.u32 %v13585_v7, %v12010_v30  ;;  %v11722_v39 = vld [vmem:[#allocation4 + $0xc0] sm:$0xf]  ;;  %v12015_v43 = vor.u32 %v13581_v5, %v12012_v21  ;;  %v13509_v44 = vld [vmem:[#allocation4 + $0xc4] sm:$0xf]  ;;  %7078 = vmatpush.bf16.msra.mxu0 %v11755_v40  ;;  %7106 = vmatpush.bf16.msra.mxu2 %v11759_v37  ;;  %v11860_v23 = vld [vmem:[#allocation4 + $0x1e8] sm:$0xf0]  ;;  %v11859_v5 = vor.u32 %v13546_v1, %v11858_v6 }
 0x469   :  { %v13513_v32 = vld [vmem:[#allocation4 + $0xdc] sm:$0xf0]  ;;  %v11724_v51 = vld [vmem:[#allocation4 + $0xe0] sm:$0xf0]  ;;  %v13606_v7 = vld [vmem:[#allocation4 + $0x3cc] sm:$0xf]  ;;  %v12115_v21 = vor.u32 %v13610_v41, %v12114_v4  ;;  %v11863_v40 = vor.u32 %v13542_v46, %v11860_v23 }
 0x46a   :  { %v11978_v50 = vld [vmem:[#allocation4 + $0x2c0] sm:$0xf]  ;;  %v13573_v22 = vld [vmem:[#allocation4 + $0x2c4] sm:$0xf]  ;;  %v11723_v56 = vor.u32 %v13513_v32, %v11722_v39  ;;  %7092 = vmatpush.bf16.msra.mxu1 %v12011_v33  ;;  %v11727_v36 = vor.u32 %v13509_v44, %v11724_v51  ;;  %7120 = vmatpush.bf16.msra.mxu3 %v12015_v43  ;;  %v12116_v8 = vld [vmem:[#allocation4 + $0x3e8] sm:$0xf0] }
 0x46b   :  { %v13577_v31 = vld [vmem:[#allocation4 + $0x2dc] sm:$0xf0]  ;;  %v11980_v55 = vld [vmem:[#allocation4 + $0x2e0] sm:$0xf0]  ;;  %v11826_v33 = vld [vmem:[#allocation4 + $0x188] sm:$0xf]  ;;  %v12119_v32 = vor.u32 %v13606_v7, %v12116_v8 }
 0x46c   :  { %v11979_v54 = vor.u32 %v13577_v31, %v11978_v50  ;;  %v11690_v42 = vld [vmem:[#allocation4 + $0x80] sm:$0xf]  ;;  %v11983_v60 = vor.u32 %v13573_v22, %v11980_v55  ;;  %v13501_v47 = vld [vmem:[#allocation4 + $0x84] sm:$0xf]  ;;  %7079 = vmatpush.bf16.msra.mxu0 %v11723_v56  ;;  %7107 = vmatpush.bf16.msra.mxu2 %v11727_v36  ;;  %v13538_v37 = vld [vmem:[#allocation4 + $0x1a4] sm:$0xf0] }
 0x46d   :  { %v13505_v48 = vld [vmem:[#allocation4 + $0x9c] sm:$0xf0]  ;;  %v11692_v52 = vld [vmem:[#allocation4 + $0xa0] sm:$0xf0]  ;;  %v12082_v39 = vld [vmem:[#allocation4 + $0x388] sm:$0xf]  ;;  %v11827_v22 = vor.u32 %v13538_v37, %v11826_v33 }
 0x46e   :  { %v11946_v57 = vld [vmem:[#allocation4 + $0x280] sm:$0xf]  ;;  %v13565_v29 = vld [vmem:[#allocation4 + $0x284] sm:$0xf]  ;;  %v11691_v26 = vor.u32 %v13505_v48, %v11690_v42  ;;  %7093 = vmatpush.bf16.msra.mxu1 %v11979_v54  ;;  %v11695_v10 = vor.u32 %v13501_v47, %v11692_v52  ;;  %7121 = vmatpush.bf16.msra.mxu3 %v11983_v60  ;;  %v13602_v50 = vld [vmem:[#allocation4 + $0x3a4] sm:$0xf0] }
 0x46f   :  { %v13569_v13 = vld [vmem:[#allocation4 + $0x29c] sm:$0xf0]  ;;  %v11948_v63 = vld [vmem:[#allocation4 + $0x2a0] sm:$0xf0]  ;;  %v13534_v43 = vld [vmem:[#allocation4 + $0x18c] sm:$0xf]  ;;  %v12083_v55 = vor.u32 %v13602_v50, %v12082_v39 }
 0x470   :  { %v11947_v9 = vor.u32 %v13569_v13, %v11946_v57  ;;  %v11658_v59 = vld [vmem:[#allocation4 + $0x40] sm:$0xf]  ;;  %v11951_v12 = vor.u32 %v13565_v29, %v11948_v63  ;;  %v13493_v16 = vld [vmem:[#allocation4 + $0x44] sm:$0xf]  ;;  %7080 = vmatpush.bf16.msra.mxu0 %v11691_v26  ;;  %7108 = vmatpush.bf16.msra.mxu2 %v11695_v10  ;;  %v11828_v31 = vld [vmem:[#allocation4 + $0x1a8] sm:$0xf0] }
 0x471   :  { %v13497_v14 = vld [vmem:[#allocation4 + $0x5c] sm:$0xf0]  ;;  %v11660_v3 = vld [vmem:[#allocation4 + $0x60] sm:$0xf0]  ;;  %v13598_v44 = vld [vmem:[#allocation4 + $0x38c] sm:$0xf]  ;;  %v11831_v56 = vor.u32 %v13534_v43, %v11828_v31 }
 0x472   :  { %v11914_v11 = vld [vmem:[#allocation4 + $0x240] sm:$0xf]  ;;  %v13557_v35 = vld [vmem:[#allocation4 + $0x244] sm:$0xf]  ;;  %v11659_v38 = vor.u32 %v13497_v14, %v11658_v59  ;;  %7094 = vmatpush.bf16.msra.mxu1 %v11947_v9  ;;  %v11663_v61 = vor.u32 %v13493_v16, %v11660_v3  ;;  %7122 = vmatpush.bf16.msra.mxu3 %v11951_v12  ;;  %v12084_v51 = vld [vmem:[#allocation4 + $0x3a8] sm:$0xf0] }
 0x473   :  { %v13561_v15 = vld [vmem:[#allocation4 + $0x25c] sm:$0xf0]  ;;  %v11916_v0 = vld [vmem:[#allocation4 + $0x260] sm:$0xf0]  ;;  %v11794_v54 = vld [vmem:[#allocation4 + $0x148] sm:$0xf]  ;;  %v12087_v48 = vor.u32 %v13598_v44, %v12084_v51 }
 0x474   :  { %v11626_v18 = vld [vmem:[#allocation4] sm:$0xf]  ;;  %v11915_v25 = vor.u32 %v13561_v15, %v11914_v11  ;;  %v13485_v19 = vld [vmem:[#allocation4 + $0x4] sm:$0xf]  ;;  %v11919_v17 = vor.u32 %v13557_v35, %v11916_v0  ;;  %7081 = vmatpush.bf16.msra.mxu0 %v11659_v38  ;;  %7109 = vmatpush.bf16.msra.mxu2 %v11663_v61  ;;  %v13530_v36 = vld [vmem:[#allocation4 + $0x164] sm:$0xf0] }
 0x475   :  { %v13489_v58 = vld [vmem:[#allocation4 + $0x1c] sm:$0xf0]  ;;  %v11628_v28 = vld [vmem:[#allocation4 + $0x20] sm:$0xf0]  ;;  %v12050_v42 = vld [vmem:[#allocation4 + $0x348] sm:$0xf]  ;;  %v11795_v29 = vor.u32 %v13530_v36, %v11794_v54 }
 0x476   :  { %v11882_v45 = vld [vmem:[#allocation4 + $0x200] sm:$0xf]  ;;  %v13549_v20 = vld [vmem:[#allocation4 + $0x204] sm:$0xf]  ;;  %v11627_v34 = vor.u32 %v13489_v58, %v11626_v18  ;;  %7095 = vmatpush.bf16.msra.mxu1 %v11915_v25  ;;  %v11631_v62 = vor.u32 %v13485_v19, %v11628_v28  ;;  %7123 = vmatpush.bf16.msra.mxu3 %v11919_v17  ;;  %v13594_v57 = vld [vmem:[#allocation4 + $0x364] sm:$0xf0] }
 0x477   :  { %v13553_v49 = vld [vmem:[#allocation4 + $0x21c] sm:$0xf0]  ;;  %v11884_v24 = vld [vmem:[#allocation4 + $0x220] sm:$0xf0]  ;;  %v13526_v60 = vld [vmem:[#allocation4 + $0x14c] sm:$0xf]  ;;  %v12051_v63 = vor.u32 %v13594_v57, %v12050_v42 }
 0x478   :  { %v11883_v30 = vor.u32 %v13553_v49, %v11882_v45  ;;  %v11887_v27 = vor.u32 %v13549_v20, %v11884_v24  ;;  %7082 = vmatpush.bf16.msra.mxu0 %v11627_v34  ;;  %7110 = vmatpush.bf16.msra.mxu2 %v11631_v62  ;;  %v11796_v13 = vld [vmem:[#allocation4 + $0x168] sm:$0xf0]  ;;  %v11762_v9 = vld [vmem:[#allocation4 + $0x108] sm:$0xf] }
 0x479   :  { %v13590_v47 = vld [vmem:[#allocation4 + $0x34c] sm:$0xf]  ;;  %v11799_v26 = vor.u32 %v13526_v60, %v11796_v13  ;;  %v13522_v10 = vld [vmem:[#allocation4 + $0x124] sm:$0xf0] }
 0x47a   :  { %7096 = vmatpush.bf16.msra.mxu1 %v11883_v30  ;;  %7124 = vmatpush.bf16.msra.mxu3 %v11887_v27  ;;  %v12052_v52 = vld [vmem:[#allocation4 + $0x368] sm:$0xf0]  ;;  %v12018_v59 = vld [vmem:[#allocation4 + $0x308] sm:$0xf]  ;;  %v11763_v35 = vor.u32 %v13522_v10, %v11762_v9  ;;  %v13543_v9 = vld [vmem:[#allocation4 + $0x1d4] sm:$0xf] }
 0x47b   :  { %7111 = vmatmul.bf16.vlgmr.msra.gmra.mxu2 %v14461_v2  ;;  %7083 = vmatmul.bf16.vlgmr.msra.gmra.mxu0 %v14461_v2  ;;  %v12055_v14 = vor.u32 %v13590_v47, %v12052_v52  ;;  %v13586_v11 = vld [vmem:[#allocation4 + $0x324] sm:$0xf0]  ;;  %v13518_v12 = vld [vmem:[#allocation4 + $0x10c] sm:$0xf]  ;;  %v11866_v47 = vld [vmem:[#allocation4 + $0x1d0] sm:$0xf] }
 0x47c   :  { %7131 = vmatpush.bf16.msrb.mxu0 %v11859_v5  ;;  %7159 = vmatpush.bf16.msrb.mxu2 %v11863_v40  ;;  %v11764_v15 = vld [vmem:[#allocation4 + $0x128] sm:$0xf0]  ;;  %v12019_v0 = vor.u32 %v13586_v11, %v12018_v59  ;;  %v11730_v18 = vld [vmem:[#allocation4 + $0xc8] sm:$0xf]  ;;  %v13547_v52 = vld [vmem:[#allocation4 + $0x1ec] sm:$0xf0] }
 0x47d   :  { %7125 = vmatmul.bf16.vlgmr.msra.gmra.mxu3 %v14471_v53  ;;  %7097 = vmatmul.bf16.vlgmr.msra.gmra.mxu1 %v14471_v53  ;;  %v13582_v16 = vld [vmem:[#allocation4 + $0x30c] sm:$0xf]  ;;  %v11767_v38 = vor.u32 %v13518_v12, %v11764_v15  ;;  %v13514_v58 = vld [vmem:[#allocation4 + $0xe4] sm:$0xf0]  ;;  %v11868_v10 = vld [vmem:[#allocation4 + $0x1f0] sm:$0xf0] }
 0x47e   :  { %7145 = vmatpush.bf16.msrb.mxu1 %v12115_v21  ;;  %7173 = vmatpush.bf16.msrb.mxu3 %v12119_v32  ;;  %v12020_v3 = vld [vmem:[#allocation4 + $0x328] sm:$0xf0]  ;;  %v11986_v25 = vld [vmem:[#allocation4 + $0x2c8] sm:$0xf]  ;;  %v11731_v20 = vor.u32 %v13514_v58, %v11730_v18  ;;  %v13607_v11 = vld [vmem:[#allocation4 + $0x3d4] sm:$0xf] }
 0x47f   :  { %v12023_v61 = vor.u32 %v13582_v16, %v12020_v3  ;;  %v13578_v45 = vld [vmem:[#allocation4 + $0x2e4] sm:$0xf0]  ;;  %v13510_v49 = vld [vmem:[#allocation4 + $0xcc] sm:$0xf]  ;;  %v12124_v12 = vld [vmem:[#allocation4 + $0x3f0] sm:$0xf0]  ;;  %v11867_v16 = vor.u32 %v13547_v52, %v11866_v47 }
 0x480   :  { %7132 = vmatpush.bf16.msrb.mxu0 %v11827_v22  ;;  %7160 = vmatpush.bf16.msrb.mxu2 %v11831_v56  ;;  %v11732_v19 = vld [vmem:[#allocation4 + $0xe8] sm:$0xf0]  ;;  %v11987_v24 = vor.u32 %v13578_v45, %v11986_v25  ;;  %v11698_v1 = vld [vmem:[#allocation4 + $0x88] sm:$0xf]  ;;  %v12090_v18 = vld [vmem:[#allocation4 + $0x390] sm:$0xf]  ;;  %v12127_v58 = vor.u32 %v13607_v11, %v12124_v12 }
 0x481   :  { %v13574_v17 = vld [vmem:[#allocation4 + $0x2cc] sm:$0xf]  ;;  %v11735_v6 = vor.u32 %v13510_v49, %v11732_v19  ;;  %v13506_v4 = vld [vmem:[#allocation4 + $0xa4] sm:$0xf0]  ;;  %v13603_v25 = vld [vmem:[#allocation4 + $0x3ac] sm:$0xf0] }
 0x482   :  { %7146 = vmatpush.bf16.msrb.mxu1 %v12083_v55  ;;  %7174 = vmatpush.bf16.msrb.mxu3 %v12087_v48  ;;  %v11988_v28 = vld [vmem:[#allocation4 + $0x2e8] sm:$0xf0]  ;;  %v11954_v34 = vld [vmem:[#allocation4 + $0x288] sm:$0xf]  ;;  %v11699_v8 = vor.u32 %v13506_v4, %v11698_v1  ;;  %v11836_v45 = vld [vmem:[#allocation4 + $0x1b0] sm:$0xf0] }
 0x483   :  { %v11991_v41 = vor.u32 %v13574_v17, %v11988_v28  ;;  %v13570_v46 = vld [vmem:[#allocation4 + $0x2a4] sm:$0xf0]  ;;  %v13502_v23 = vld [vmem:[#allocation4 + $0x8c] sm:$0xf]  ;;  %v13599_v49 = vld [vmem:[#allocation4 + $0x394] sm:$0xf]  ;;  %v12091_v28 = vor.u32 %v13603_v25, %v12090_v18 }
 0x484   :  { %7133 = vmatpush.bf16.msrb.mxu0 %v11795_v29  ;;  %7161 = vmatpush.bf16.msrb.mxu2 %v11799_v26  ;;  %v11700_v30 = vld [vmem:[#allocation4 + $0xa8] sm:$0xf0]  ;;  %v11955_v27 = vor.u32 %v13570_v46, %v11954_v34  ;;  %v11666_v21 = vld [vmem:[#allocation4 + $0x48] sm:$0xf]  ;;  %v12122_v29 = vld [vmem:[#allocation4 + $0x3d0] sm:$0xf] }
 0x485   :  { %v13566_v62 = vld [vmem:[#allocation4 + $0x28c] sm:$0xf]  ;;  %v11703_v5 = vor.u32 %v13502_v23, %v11700_v30  ;;  %v13498_v40 = vld [vmem:[#allocation4 + $0x64] sm:$0xf0]  ;;  %v13611_v26 = vld [vmem:[#allocation4 + $0x3ec] sm:$0xf0] }
 0x486   :  { %7147 = vmatpush.bf16.msrb.mxu1 %v12051_v63  ;;  %7175 = vmatpush.bf16.msrb.mxu3 %v12055_v14  ;;  %v11956_v7 = vld [vmem:[#allocation4 + $0x2a8] sm:$0xf0]  ;;  %v11922_v33 = vld [vmem:[#allocation4 + $0x248] sm:$0xf]  ;;  %v11667_v44 = vor.u32 %v13498_v40, %v11666_v21  ;;  %v12123_v3 = vor.u32 %v13611_v26, %v12122_v29  ;;  %v12092_v19 = vld [vmem:[#allocation4 + $0x3b0] sm:$0xf0] }
 0x487   :  { %v11959_v37 = vor.u32 %v13566_v62, %v11956_v7  ;;  %v13562_v39 = vld [vmem:[#allocation4 + $0x264] sm:$0xf0]  ;;  %v13494_v32 = vld [vmem:[#allocation4 + $0x4c] sm:$0xf]  ;;  %v12058_v1 = vld [vmem:[#allocation4 + $0x350] sm:$0xf]  ;;  %v12095_v4 = vor.u32 %v13599_v49, %v12092_v19 }
 0x488   :  { %7134 = vmatpush.bf16.msrb.mxu0 %v11763_v35  ;;  %7162 = vmatpush.bf16.msrb.mxu2 %v11767_v38  ;;  %v11668_v50 = vld [vmem:[#allocation4 + $0x68] sm:$0xf0]  ;;  %v11634_v51 = vld [vmem:[#allocation4 + $0x8] sm:$0xf]  ;;  %v11923_v55 = vor.u32 %v13562_v39, %v11922_v33  ;;  %v11871_v35 = vor.u32 %v13543_v9, %v11868_v10  ;;  %v13539_v38 = vld [vmem:[#allocation4 + $0x1ac] sm:$0xf0] }
 0x489   :  { %v13558_v43 = vld [vmem:[#allocation4 + $0x24c] sm:$0xf]  ;;  %v13490_v22 = vld [vmem:[#allocation4 + $0x24] sm:$0xf0]  ;;  %v11671_v56 = vor.u32 %v13494_v32, %v11668_v50  ;;  %v13595_v34 = vld [vmem:[#allocation4 + $0x36c] sm:$0xf0] }
 0x48a   :  { %7148 = vmatpush.bf16.msrb.mxu1 %v12019_v0  ;;  %7176 = vmatpush.bf16.msrb.mxu3 %v12023_v61  ;;  %v11924_v31 = vld [vmem:[#allocation4 + $0x268] sm:$0xf0]  ;;  %v11890_v54 = vld [vmem:[#allocation4 + $0x208] sm:$0xf]  ;;  %v11635_v63 = vor.u32 %v13490_v22, %v11634_v51  ;;  %v11834_v0 = vld [vmem:[#allocation4 + $0x190] sm:$0xf]  ;;  %v12059_v7 = vor.u32 %v13595_v34, %v12058_v1 }
 0x48b   :  { %v13554_v36 = vld [vmem:[#allocation4 + $0x224] sm:$0xf0]  ;;  %v13486_v42 = vld [vmem:[#allocation4 + $0xc] sm:$0xf]  ;;  %v11927_v48 = vor.u32 %v13558_v43, %v11924_v31  ;;  %v13535_v61 = vld [vmem:[#allocation4 + $0x194] sm:$0xf]  ;;  %v11835_v17 = vor.u32 %v13539_v38, %v11834_v0 }
 0x48c   :  { %7135 = vmatpush.bf16.msrb.mxu0 %v11731_v20  ;;  %7163 = vmatpush.bf16.msrb.mxu2 %v11735_v6  ;;  %v11636_v57 = vld [vmem:[#allocation4 + $0x28] sm:$0xf0]  ;;  %v11891_v59 = vor.u32 %v13554_v36, %v11890_v54  ;;  %v11839_v20 = vor.u32 %v13535_v61, %v11836_v45  ;;  %v13531_v6 = vld [vmem:[#allocation4 + $0x16c] sm:$0xf0]  ;;  %v11804_v46 = vld [vmem:[#allocation4 + $0x170] sm:$0xf0] }
 0x48d   :  { %v13550_v60 = vld [vmem:[#allocation4 + $0x20c] sm:$0xf]  ;;  %v11639_v14 = vor.u32 %v13486_v42, %v11636_v57  ;;  %v13591_v23 = vld [vmem:[#allocation4 + $0x354] sm:$0xf]  ;;  %v12026_v21 = vld [vmem:[#allocation4 + $0x310] sm:$0xf] }
 0x48e   :  { %7149 = vmatpush.bf16.msrb.mxu1 %v11987_v24  ;;  %7177 = vmatpush.bf16.msrb.mxu3 %v11991_v41  ;;  %v11892_v13 = vld [vmem:[#allocation4 + $0x228] sm:$0xf0]  ;;  %v11802_v24 = vld [vmem:[#allocation4 + $0x150] sm:$0xf]  ;;  %v13527_v41 = vld [vmem:[#allocation4 + $0x154] sm:$0xf] }
 0x48f   :  { %v11895_v15 = vor.u32 %v13550_v60, %v11892_v13  ;;  %v12060_v30 = vld [vmem:[#allocation4 + $0x370] sm:$0xf0]  ;;  %v11803_v62 = vor.u32 %v13531_v6, %v11802_v24  ;;  %v13587_v33 = vld [vmem:[#allocation4 + $0x32c] sm:$0xf0] }
 0x490   :  { %7136 = vmatpush.bf16.msrb.mxu0 %v11699_v8  ;;  %7164 = vmatpush.bf16.msrb.mxu2 %v11703_v5  ;;  %v11807_v8 = vor.u32 %v13527_v41, %v11804_v46  ;;  %v13523_v5 = vld [vmem:[#allocation4 + $0x12c] sm:$0xf0]  ;;  %v12063_v40 = vor.u32 %v13591_v23, %v12060_v30  ;;  %v11772_v39 = vld [vmem:[#allocation4 + $0x130] sm:$0xf0]  ;;  %v12027_v31 = vor.u32 %v13587_v33, %v12026_v21  ;;  %v11874_v23 = vld [vmem:[#allocation4 + $0x1d8] sm:$0xf] }
 0x491   :  { %v13583_v32 = vld [vmem:[#allocation4 + $0x314] sm:$0xf]  ;;  %v11738_v51 = vld [vmem:[#allocation4 + $0xd0] sm:$0xf]  ;;  %v13548_v30 = vld [vmem:[#allocation4 + $0x1f4] sm:$0xf0] }
 0x492   :  { %7150 = vmatpush.bf16.msrb.mxu1 %v11955_v27  ;;  %7178 = vmatpush.bf16.msrb.mxu3 %v11959_v37  ;;  %v11770_v27 = vld [vmem:[#allocation4 + $0x110] sm:$0xf]  ;;  %v13519_v37 = vld [vmem:[#allocation4 + $0x114] sm:$0xf]  ;;  %v13608_v33 = vld [vmem:[#allocation4 + $0x3dc] sm:$0xf] }
 0x493   :  { %v12028_v50 = vld [vmem:[#allocation4 + $0x330] sm:$0xf0]  ;;  %v11771_v43 = vor.u32 %v13523_v5, %v11770_v27  ;;  %v13515_v22 = vld [vmem:[#allocation4 + $0xec] sm:$0xf0]  ;;  %v13544_v27 = vld [vmem:[#allocation4 + $0x1dc] sm:$0xf] }
 0x494   :  { %7137 = vmatpush.bf16.msrb.mxu0 %v11667_v44  ;;  %7165 = vmatpush.bf16.msrb.mxu2 %v11671_v56  ;;  %v11775_v44 = vor.u32 %v13519_v37, %v11772_v39  ;;  %v12031_v56 = vor.u32 %v13583_v32, %v12028_v50  ;;  %v13579_v54 = vld [vmem:[#allocation4 + $0x2ec] sm:$0xf0]  ;;  %v13511_v36 = vld [vmem:[#allocation4 + $0xd4] sm:$0xf]  ;;  %v11739_v60 = vor.u32 %v13515_v22, %v11738_v51  ;;  %v11876_v5 = vld [vmem:[#allocation4 + $0x1f8] sm:$0xf0] }
 0x495   :  { %v11740_v42 = vld [vmem:[#allocation4 + $0xf0] sm:$0xf0]  ;;  %v11706_v52 = vld [vmem:[#allocation4 + $0x90] sm:$0xf]  ;;  %v12132_v37 = vld [vmem:[#allocation4 + $0x3f8] sm:$0xf0]  ;;  %v11875_v32 = vor.u32 %v13548_v30, %v11874_v23 }
 0x496   :  { %7151 = vmatpush.bf16.msrb.mxu1 %v11923_v55  ;;  %7179 = vmatpush.bf16.msrb.mxu3 %v11927_v48  ;;  %v11994_v55 = vld [vmem:[#allocation4 + $0x2d0] sm:$0xf]  ;;  %v13575_v48 = vld [vmem:[#allocation4 + $0x2d4] sm:$0xf]  ;;  %v11743_v47 = vor.u32 %v13511_v36, %v11740_v42  ;;  %v12098_v51 = vld [vmem:[#allocation4 + $0x398] sm:$0xf]  ;;  %v12135_v22 = vor.u32 %v13608_v33, %v12132_v37 }
 0x497   :  { %v11996_v57 = vld [vmem:[#allocation4 + $0x2f0] sm:$0xf0]  ;;  %v11995_v13 = vor.u32 %v13579_v54, %v11994_v55  ;;  %v13507_v29 = vld [vmem:[#allocation4 + $0xac] sm:$0xf0]  ;;  %v13604_v55 = vld [vmem:[#allocation4 + $0x3b4] sm:$0xf0] }
 0x498   :  { %7138 = vmatpush.bf16.msrb.mxu0 %v11635_v63  ;;  %7166 = vmatpush.bf16.msrb.mxu2 %v11639_v14  ;;  %v11962_v63 = vld [vmem:[#allocation4 + $0x290] sm:$0xf]  ;;  %v11999_v26 = vor.u32 %v13575_v48, %v11996_v57  ;;  %v13503_v10 = vld [vmem:[#allocation4 + $0x94] sm:$0xf]  ;;  %v11707_v12 = vor.u32 %v13507_v29, %v11706_v52  ;;  %v11844_v54 = vld [vmem:[#allocation4 + $0x1b8] sm:$0xf0]  ;;  %v12099_v57 = vor.u32 %v13604_v55, %v12098_v51 }
 0x499   :  { %v13571_v9 = vld [vmem:[#allocation4 + $0x2ac] sm:$0xf0]  ;;  %v13567_v14 = vld [vmem:[#allocation4 + $0x294] sm:$0xf]  ;;  %v13600_v36 = vld [vmem:[#allocation4 + $0x39c] sm:$0xf] }
 0x49a   :  { %7152 = vmatpush.bf16.msrb.mxu1 %v11891_v59  ;;  %7180 = vmatpush.bf16.msrb.mxu3 %v11895_v15  ;;  %v11708_v59 = vld [vmem:[#allocation4 + $0xb0] sm:$0xf0]  ;;  %v11963_v15 = vor.u32 %v13571_v9, %v11962_v63  ;;  %v11930_v0 = vld [vmem:[#allocation4 + $0x250] sm:$0xf]  ;;  %v12100_v42 = vld [vmem:[#allocation4 + $0x3b8] sm:$0xf0] }
 0x49b   :  { %7167 = vmatmul.bf16.vlgmr.msrb.gmra.mxu2 %v14461_v2  ;;  %7139 = vmatmul.bf16.vlgmr.msrb.gmra.mxu0 %v14461_v2  ;;  %v11964_v11 = vld [vmem:[#allocation4 + $0x2b0] sm:$0xf0]  ;;  %v13563_v18 = vld [vmem:[#allocation4 + $0x26c] sm:$0xf0]  ;;  %v12066_v52 = vld [vmem:[#allocation4 + $0x358] sm:$0xf]  ;;  %v12103_v29 = vor.u32 %v13600_v36, %v12100_v42 }
 0x49c   :  { %7187 = vmatpush.bf16.msra.mxu0 %v11867_v16  ;;  %7215 = vmatpush.bf16.msra.mxu2 %v11871_v35  ;;  %v11711_v16 = vor.u32 %v13503_v10, %v11708_v59  ;;  %v13499_v35 = vld [vmem:[#allocation4 + $0x6c] sm:$0xf0]  ;;  %v11967_v38 = vor.u32 %v13567_v14, %v11964_v11  ;;  %v11676_v25 = vld [vmem:[#allocation4 + $0x70] sm:$0xf0]  ;;  %v13596_v63 = vld [vmem:[#allocation4 + $0x374] sm:$0xf0] }
 0x49d   :  { %7181 = vmatmul.bf16.vlgmr.msrb.gmra.mxu3 %v14471_v53  ;;  %7153 = vmatmul.bf16.vlgmr.msrb.gmra.mxu1 %v14471_v53  ;;  %v13559_v61 = vld [vmem:[#allocation4 + $0x254] sm:$0xf]  ;;  %v11642_v19 = vld [vmem:[#allocation4 + $0x10] sm:$0xf]  ;;  %v11812_v9 = vld [vmem:[#allocation4 + $0x178] sm:$0xf0]  ;;  %v12067_v11 = vor.u32 %v13596_v63, %v12066_v52 }
 0x49e   :  { %7201 = vmatpush.bf16.msra.mxu1 %v12123_v3  ;;  %7229 = vmatpush.bf16.msra.mxu3 %v12127_v58  ;;  %v11674_v3 = vld [vmem:[#allocation4 + $0x50] sm:$0xf]  ;;  %v13495_v58 = vld [vmem:[#allocation4 + $0x54] sm:$0xf]  ;;  %v13592_v10 = vld [vmem:[#allocation4 + $0x35c] sm:$0xf] }
 0x49f   :  { %v11932_v45 = vld [vmem:[#allocation4 + $0x270] sm:$0xf0]  ;;  %v11675_v49 = vor.u32 %v13499_v35, %v11674_v3  ;;  %v11898_v24 = vld [vmem:[#allocation4 + $0x210] sm:$0xf]  ;;  %v12068_v59 = vld [vmem:[#allocation4 + $0x378] sm:$0xf0] }
 0x4a0   :  { %7188 = vmatpush.bf16.msra.mxu0 %v11835_v17  ;;  %7216 = vmatpush.bf16.msra.mxu2 %v11839_v20  ;;  %v13491_v17 = vld [vmem:[#allocation4 + $0x2c] sm:$0xf0]  ;;  %v11679_v20 = vor.u32 %v13495_v58, %v11676_v25  ;;  %v13487_v1 = vld [vmem:[#allocation4 + $0x14] sm:$0xf]  ;;  %v12034_v3 = vld [vmem:[#allocation4 + $0x318] sm:$0xf]  ;;  %v12071_v35 = vor.u32 %v13592_v10, %v12068_v59 }
 0x4a1   :  { %v13555_v6 = vld [vmem:[#allocation4 + $0x22c] sm:$0xf0]  ;;  %v11644_v34 = vld [vmem:[#allocation4 + $0x30] sm:$0xf0]  ;;  %v13584_v58 = vld [vmem:[#allocation4 + $0x31c] sm:$0xf] }
 0x4a2   :  { %7202 = vmatpush.bf16.msra.mxu1 %v12091_v28  ;;  %7230 = vmatpush.bf16.msra.mxu3 %v12095_v4  ;;  %v11931_v28 = vor.u32 %v13563_v18, %v11930_v0  ;;  %v11935_v4 = vor.u32 %v13559_v61, %v11932_v45  ;;  %v13551_v41 = vld [vmem:[#allocation4 + $0x214] sm:$0xf]  ;;  %v11899_v21 = vor.u32 %v13555_v6, %v11898_v24  ;;  %v13588_v0 = vld [vmem:[#allocation4 + $0x334] sm:$0xf0]  ;;  %v11780_v18 = vld [vmem:[#allocation4 + $0x138] sm:$0xf0] }
 0x4a3   :  { %v11900_v46 = vld [vmem:[#allocation4 + $0x230] sm:$0xf0]  ;;  %v12036_v25 = vld [vmem:[#allocation4 + $0x338] sm:$0xf0]  ;;  %v12035_v45 = vor.u32 %v13588_v0, %v12034_v3  ;;  %v13580_v24 = vld [vmem:[#allocation4 + $0x2f4] sm:$0xf0] }
 0x4a4   :  { %7189 = vmatpush.bf16.msra.mxu0 %v11803_v62  ;;  %7217 = vmatpush.bf16.msra.mxu2 %v11807_v8  ;;  %v12130_v62 = vld [vmem:[#allocation4 + $0x3d8] sm:$0xf]  ;;  %v11903_v39 = vor.u32 %v13551_v41, %v11900_v46  ;;  %v13512_v6 = vld [vmem:[#allocation4 + $0xdc] sm:$0xf] }
 0x4a5   :  { %v13612_v8 = vld [vmem:[#allocation4 + $0x3f4] sm:$0xf0]  ;;  %v11972_v33 = vld [vmem:[#allocation4 + $0x2b8] sm:$0xf0] }
 0x4a6   :  { %7203 = vmatpush.bf16.msra.mxu1 %v12059_v7  ;;  %7231 = vmatpush.bf16.msra.mxu3 %v12063_v40  ;;  %v11643_v7 = vor.u32 %v13491_v17, %v11642_v19  ;;  %v11647_v40 = vor.u32 %v13487_v1, %v11644_v34  ;;  %v12131_v50 = vor.u32 %v13612_v8, %v12130_v62  ;;  %v11746_v19 = vld [vmem:[#allocation4 + $0xd8] sm:$0xf]  ;;  %v11748_v1 = vld [vmem:[#allocation4 + $0xf8] sm:$0xf0] }
 0x4a7   :  { %v13516_v17 = vld [vmem:[#allocation4 + $0xf4] sm:$0xf0]  ;;  %v12004_v34 = vld [vmem:[#allocation4 + $0x2f8] sm:$0xf0]  ;;  %v11751_v23 = vor.u32 %v13512_v6, %v11748_v1 }
 0x4a8   :  { %7190 = vmatpush.bf16.msra.mxu0 %v11771_v43  ;;  %7218 = vmatpush.bf16.msra.mxu2 %v11775_v44  ;;  %v11879_v43 = vor.u32 %v13544_v27, %v11876_v5  ;;  %v13540_v44 = vld [vmem:[#allocation4 + $0x1b4] sm:$0xf0]  ;;  %v11747_v41 = vor.u32 %v13516_v17, %v11746_v19  ;;  %v13504_v5 = vld [vmem:[#allocation4 + $0x9c] sm:$0xf] }
 0x4a9   :  { %v11714_v30 = vld [vmem:[#allocation4 + $0x98] sm:$0xf]  ;;  %v11684_v55 = vld [vmem:[#allocation4 + $0x78] sm:$0xf0] }
 0x4aa   :  { %7204 = vmatpush.bf16.msra.mxu1 %v12027_v31  ;;  %7232 = vmatpush.bf16.msra.mxu3 %v12031_v56  ;;  %v11842_v31 = vld [vmem:[#allocation4 + $0x198] sm:$0xf]  ;;  %v13536_v56 = vld [vmem:[#allocation4 + $0x19c] sm:$0xf] }
 0x4ab   :  { %v11843_v48 = vor.u32 %v13540_v44, %v11842_v31  ;;  %v13508_v62 = vld [vmem:[#allocation4 + $0xb4] sm:$0xf0]  ;;  %v11652_v63 = vld [vmem:[#allocation4 + $0x38] sm:$0xf0] }
 0x4ac   :  { %7191 = vmatpush.bf16.msra.mxu0 %v11739_v60  ;;  %7219 = vmatpush.bf16.msra.mxu2 %v11743_v47  ;;  %v11847_v60 = vor.u32 %v13536_v56, %v11844_v54  ;;  %v13532_v47 = vld [vmem:[#allocation4 + $0x174] sm:$0xf0]  ;;  %v11715_v37 = vor.u32 %v13508_v62, %v11714_v30  ;;  %v13560_v56 = vld [vmem:[#allocation4 + $0x25c] sm:$0xf] }
 0x4ad   :  { %v13572_v27 = vld [vmem:[#allocation4 + $0x2b4] sm:$0xf0]  ;;  %v11940_v54 = vld [vmem:[#allocation4 + $0x278] sm:$0xf0] }
 0x4ae   :  { %7205 = vmatpush.bf16.msra.mxu1 %v11995_v13  ;;  %7233 = vmatpush.bf16.msra.mxu3 %v11999_v26  ;;  %v11810_v13 = vld [vmem:[#allocation4 + $0x158] sm:$0xf]  ;;  %v13528_v26 = vld [vmem:[#allocation4 + $0x15c] sm:$0xf] }
 0x4af   :  { %v11811_v14 = vor.u32 %v13532_v47, %v11810_v13  ;;  %v11938_v31 = vld [vmem:[#allocation4 + $0x258] sm:$0xf]  ;;  %v11943_v47 = vor.u32 %v13560_v56, %v11940_v54 }
 0x4b0   :  { %7192 = vmatpush.bf16.msra.mxu0 %v11707_v12  ;;  %7220 = vmatpush.bf16.msra.mxu2 %v11711_v16  ;;  %v11815_v12 = vor.u32 %v13528_v26, %v11812_v9  ;;  %v13524_v16 = vld [vmem:[#allocation4 + $0x134] sm:$0xf0]  ;;  %v13552_v26 = vld [vmem:[#allocation4 + $0x21c] sm:$0xf] }
 0x4b1   :  { %v13564_v51 = vld [vmem:[#allocation4 + $0x274] sm:$0xf0]  ;;  %v11908_v9 = vld [vmem:[#allocation4 + $0x238] sm:$0xf0] }
 0x4b2   :  { %7206 = vmatpush.bf16.msra.mxu1 %v11963_v15  ;;  %7234 = vmatpush.bf16.msra.mxu3 %v11967_v38  ;;  %v11778_v15 = vld [vmem:[#allocation4 + $0x118] sm:$0xf]  ;;  %v13520_v38 = vld [vmem:[#allocation4 + $0x11c] sm:$0xf]  ;;  %v11939_v42 = vor.u32 %v13564_v51, %v11938_v31 }
 0x4b3   :  { %v11779_v61 = vor.u32 %v13524_v16, %v11778_v15  ;;  %v11906_v13 = vld [vmem:[#allocation4 + $0x218] sm:$0xf] }
 0x4b4   :  { %7193 = vmatpush.bf16.msra.mxu0 %v11675_v49  ;;  %7221 = vmatpush.bf16.msra.mxu2 %v11679_v20  ;;  %v11783_v49 = vor.u32 %v13520_v38, %v11780_v18  ;;  %v12039_v20 = vor.u32 %v13584_v58, %v12036_v25  ;;  %v13556_v52 = vld [vmem:[#allocation4 + $0x234] sm:$0xf0] }
 0x4b5   :  { %v11907_v59 = vor.u32 %v13556_v52, %v11906_v13 }
 0x4b6   :  { %7207 = vmatpush.bf16.msra.mxu1 %v11931_v28  ;;  %7235 = vmatpush.bf16.msra.mxu3 %v11935_v4  ;;  %v12002_v28 = vld [vmem:[#allocation4 + $0x2d8] sm:$0xf]  ;;  %v13576_v4 = vld [vmem:[#allocation4 + $0x2dc] sm:$0xf] }
 0x4b7   :  { %v12003_v46 = vor.u32 %v13580_v24, %v12002_v28  ;;  %v12007_v8 = vor.u32 %v13576_v4, %v12004_v34 }
 0x4b8   :  { %7194 = vmatpush.bf16.msra.mxu0 %v11643_v7  ;;  %7222 = vmatpush.bf16.msra.mxu2 %v11647_v40  ;;  %v11970_v7 = vld [vmem:[#allocation4 + $0x298] sm:$0xf]  ;;  %v13568_v40 = vld [vmem:[#allocation4 + $0x29c] sm:$0xf] }
 0x4b9   :  { %v11975_v44 = vor.u32 %v13568_v40, %v11972_v33 }
 0x4ba   :  { %7208 = vmatpush.bf16.msra.mxu1 %v11899_v21  ;;  %7236 = vmatpush.bf16.msra.mxu3 %v11903_v39  ;;  %v11716_v21 = vld [vmem:[#allocation4 + $0xb8] sm:$0xf0]  ;;  %v11971_v39 = vor.u32 %v13572_v27, %v11970_v7 }
 0x4bb   :  { %7223 = vmatmul.bf16.vlgmr.msra.gmra.mxu2 %v14461_v2  ;;  %7195 = vmatmul.bf16.vlgmr.msra.gmra.mxu0 %v14461_v2 }
 0x4bc   :  { %7243 = vmatpush.bf16.msrb.mxu0 %v11875_v32  ;;  %7271 = vmatpush.bf16.msrb.mxu2 %v11879_v43  ;;  %v11719_v32 = vor.u32 %v13504_v5, %v11716_v21  ;;  %v13500_v43 = vld [vmem:[#allocation4 + $0x74] sm:$0xf0] }
 0x4bd   :  { %7237 = vmatmul.bf16.vlgmr.msra.gmra.mxu3 %v14471_v53  ;;  %7209 = vmatmul.bf16.vlgmr.msra.gmra.mxu1 %v14471_v53 }
 0x4be   :  { %7257 = vmatpush.bf16.msrb.mxu1 %v12131_v50  ;;  %7285 = vmatpush.bf16.msrb.mxu3 %v12135_v22  ;;  %v11682_v50 = vld [vmem:[#allocation4 + $0x58] sm:$0xf]  ;;  %v13496_v22 = vld [vmem:[#allocation4 + $0x5c] sm:$0xf] }
 0x4bf   :  { %v11683_v36 = vor.u32 %v13500_v43, %v11682_v50 }
 0x4c0   :  { %7244 = vmatpush.bf16.msrb.mxu0 %v11843_v48  ;;  %7272 = vmatpush.bf16.msrb.mxu2 %v11847_v60  ;;  %v11687_v48 = vor.u32 %v13496_v22, %v11684_v55  ;;  %v13492_v60 = vld [vmem:[#allocation4 + $0x34] sm:$0xf0] }
 0x4c2   :  { %7258 = vmatpush.bf16.msrb.mxu1 %v12099_v57  ;;  %7286 = vmatpush.bf16.msrb.mxu3 %v12103_v29  ;;  %v11650_v57 = vld [vmem:[#allocation4 + $0x18] sm:$0xf]  ;;  %v13488_v29 = vld [vmem:[#allocation4 + $0x1c] sm:$0xf] }
 0x4c3   :  { %v11651_v10 = vor.u32 %v13492_v60, %v11650_v57 }
 0x4c4   :  { %7245 = vmatpush.bf16.msrb.mxu0 %v11811_v14  ;;  %7273 = vmatpush.bf16.msrb.mxu2 %v11815_v12  ;;  %v11655_v14 = vor.u32 %v13488_v29, %v11652_v63  ;;  %v14489_v12 = vld [vmem:[#allocation14] sm:$0xff] }
 0x4c5   :  { %v6419_v15 = vperm.slane %v14489_v12, 0  ;;  %v6420_v0 = vperm.slane %v14489_v12, 1  ;;  %v6422_v7 = vperm.slane %v14489_v12, 3  ;;  %v6424_v13 = vperm.slane %v14489_v12, 5 }
 0x4c6   :  { %7259 = vmatpush.bf16.msrb.mxu1 %v12067_v11  ;;  %7287 = vmatpush.bf16.msrb.mxu3 %v12071_v35  ;;  %v11911_v11 = vor.u32 %v13552_v26, %v11908_v9 }
 0x4c8   :  { %7246 = vmatpush.bf16.msrb.mxu0 %v11779_v61  ;;  %7274 = vmatpush.bf16.msrb.mxu2 %v11783_v49 }
 0x4ca   :  { %7260 = vmatpush.bf16.msrb.mxu1 %v12035_v45  ;;  %7288 = vmatpush.bf16.msrb.mxu3 %v12039_v20 }
 0x4cc   :  { %7247 = vmatpush.bf16.msrb.mxu0 %v11747_v41  ;;  %7275 = vmatpush.bf16.msrb.mxu2 %v11751_v23 }
 0x4ce   :  { %7261 = vmatpush.bf16.msrb.mxu1 %v12003_v46  ;;  %7289 = vmatpush.bf16.msrb.mxu3 %v12007_v8  ;;  %v6421_v46 = vperm.slane %v14489_v12, 2 }
 0x4d0   :  { %7248 = vmatpush.bf16.msrb.mxu0 %v11715_v37  ;;  %7276 = vmatpush.bf16.msrb.mxu2 %v11719_v32 }
 0x4d2   :  { %7262 = vmatpush.bf16.msrb.mxu1 %v11971_v39  ;;  %7290 = vmatpush.bf16.msrb.mxu3 %v11975_v44 }
 0x4d4   :  { %7249 = vmatpush.bf16.msrb.mxu0 %v11683_v36  ;;  %7277 = vmatpush.bf16.msrb.mxu2 %v11687_v48 }
 0x4d6   :  { %7263 = vmatpush.bf16.msrb.mxu1 %v11939_v42  ;;  %7291 = vmatpush.bf16.msrb.mxu3 %v11943_v47  ;;  %v6423_v42 = vperm.slane %v14489_v12, 4 }
 0x4d8   :  { %7250 = vmatpush.bf16.msrb.mxu0 %v11651_v10  ;;  %7278 = vmatpush.bf16.msrb.mxu2 %v11655_v14 }
 0x4da   :  { %7264 = vmatpush.bf16.msrb.mxu1 %v11907_v59  ;;  %7292 = vmatpush.bf16.msrb.mxu3 %v11911_v11 }
 0x4db   :  { %7251 = vmatmul.bf16.vlgmr.msrb.gmra.mxu0 %v14461_v2  ;;  %7279 = vmatmul.bf16.vlgmr.msrb.gmra.mxu2 %v14461_v2 }
 0x4dd   :  { %7265 = vmatmul.bf16.vlgmr.msrb.gmra.mxu1 %v14471_v53  ;;  %7293 = vmatmul.bf16.vlgmr.msrb.gmra.mxu3 %v14471_v53 }
 0x4f8   :  { %v7084_v16 = vpop.f32.mrf.mxu0 }
 0x4f9   :  { %v7085_v35 = vadd.f32 %v7084_v16, %v6419_v15 }
 0x4fa   :  { %v7098_v3 = vpop.f32.mrf.mxu1 }
 0x4fb   :  { %v7099_v58 = vadd.f32 %v7098_v3, %v7085_v35 }
 0x4fd   :  { %v7299_v19 = vmax.f32 %v7099_v58, 0.0 }
 0x4fe   :  { %v7112_v38 = vpop.f32.mrf.mxu2 }
 0x4ff   :  { %v7113_v25 = vadd.f32 %v7112_v38, %v6420_v0 }
 0x500   :  { %v7126_v18 = vpop.f32.mrf.mxu3  ;;  %v7086_v61 = vpop.f32.mrf.mxu0 }
 0x501   :  { %v7087_v45 = vadd.f32 %v7086_v61, %v6419_v15  ;;  %v7127_v17 = vadd.f32 %v7126_v18, %v7113_v25 }
 0x502   :  { %v7100_v49 = vpop.f32.mrf.mxu1 }
 0x503   :  { %v7101_v2 = vadd.f32 %v7100_v49, %v7087_v45  ;;  %v7300_v1 = vmax.f32 %v7127_v17, 0.0  ;;  %v6425_v45 = vperm.slane %v14489_v12, 6  ;;  %v6426_v17 = vperm.slane %v14489_v12, 7 }
 0x505   :  { %v7307_v28 = vmax.f32 %v7101_v2, 0.0 }
 0x506   :  { %v7114_v53 = vpop.f32.mrf.mxu2 }
 0x507   :  { %v7115_v20 = vadd.f32 %v7114_v53, %v6420_v0  ;;  %v14493_v6 = vpack.c.bf16 %v7307_v28, %v7299_v19 }
 0x508   :  { %v7128_v24 = vpop.f32.mrf.mxu3 }
 0x509   :  { %v7129_v4 = vadd.f32 %v7128_v24, %v7115_v20 }
 0x50b   :  { %v7308_v34 = vmax.f32 %v7129_v4, 0.0 }
 0x50d   :  { %v14495_v41 = vpack.c.bf16 %v7308_v34, %v7300_v1 }
 0x518   :  { %v7140_v23 = vpop.f32.mrf.mxu0 }
 0x519   :  { %v7141_v62 = vadd.f32 %v7140_v23, %v6421_v46 }
 0x51a   :  { %v7154_v30 = vpop.f32.mrf.mxu1 }
 0x51b   :  { %v7155_v5 = vadd.f32 %v7154_v30, %v7141_v62 }
 0x51d   :  { %v7301_v39 = vmax.f32 %v7155_v5, 0.0 }
 0x51e   :  { %v7168_v8 = vpop.f32.mrf.mxu2 }
 0x51f   :  { %v7169_v21 = vadd.f32 %v7168_v8, %v6422_v7 }
 0x520   :  { %v7182_v27 = vpop.f32.mrf.mxu3  ;;  %v7142_v40 = vpop.f32.mrf.mxu0 }
 0x521   :  { %v7143_v33 = vadd.f32 %v7142_v40, %v6421_v46  ;;  %v7183_v50 = vadd.f32 %v7182_v27, %v7169_v21 }
 0x522   :  { %v7156_v37 = vpop.f32.mrf.mxu1 }
 0x523   :  { %v7157_v32 = vadd.f32 %v7156_v37, %v7143_v33  ;;  %v7302_v55 = vmax.f32 %v7183_v50, 0.0 }
 0x525   :  { %v7309_v31 = vmax.f32 %v7157_v32, 0.0 }
 0x526   :  { %v7170_v43 = vpop.f32.mrf.mxu2 }
 0x527   :  { %v7171_v44 = vadd.f32 %v7170_v43, %v6422_v7  ;;  %v14499_v22 = vpack.c.bf16 %v7309_v31, %v7301_v39 }
 0x528   :  { %v7184_v51 = vpop.f32.mrf.mxu3 }
 0x529   :  { %v7185_v56 = vadd.f32 %v7184_v51, %v7171_v44 }
 0x52b   :  { %v7310_v54 = vmax.f32 %v7185_v56, 0.0 }
 0x52d   :  { %v14501_v36 = vpack.c.bf16 %v7310_v54, %v7302_v55 }
 0x538   :  { %v7196_v48 = vpop.f32.mrf.mxu0 }
 0x539   :  { %v7197_v60 = vadd.f32 %v7196_v48, %v6423_v42 }
 0x53a   :  { %v7210_v57 = vpop.f32.mrf.mxu1 }
 0x53b   :  { %v7211_v29 = vadd.f32 %v7210_v57, %v7197_v60 }
 0x53d   :  { %v7303_v59 = vmax.f32 %v7211_v29, 0.0 }
 0x53e   :  { %v7224_v47 = vpop.f32.mrf.mxu2 }
 0x53f   :  { %v7225_v63 = vadd.f32 %v7224_v47, %v6424_v13 }
 0x540   :  { %v7238_v52 = vpop.f32.mrf.mxu3  ;;  %v7198_v26 = vpop.f32.mrf.mxu0 }
 0x541   :  { %v7199_v9 = vadd.f32 %v7198_v26, %v6423_v42  ;;  %v7239_v11 = vadd.f32 %v7238_v52, %v7225_v63 }
 0x542   :  { %v7212_v10 = vpop.f32.mrf.mxu1 }
 0x543   :  { %v7213_v14 = vadd.f32 %v7212_v10, %v7199_v9  ;;  %v7304_v38 = vmax.f32 %v7239_v11, 0.0 }
 0x545   :  { %v7311_v16 = vmax.f32 %v7213_v14, 0.0 }
 0x546   :  { %v7226_v15 = vpop.f32.mrf.mxu2 }
 0x547   :  { %v7227_v3 = vadd.f32 %v7226_v15, %v6424_v13  ;;  %v14505_v0 = vpack.c.bf16 %v7311_v16, %v7303_v59 }
 0x548   :  { %v7240_v35 = vpop.f32.mrf.mxu3 }
 0x549   :  { %v7241_v18 = vadd.f32 %v7240_v35, %v7227_v3 }
 0x54b   :  { %v7312_v58 = vmax.f32 %v7241_v18, 0.0 }
 0x54d   :  { %v14507_v25 = vpack.c.bf16 %v7312_v58, %v7304_v38 }
 0x558   :  { %v7252_v61 = vpop.f32.mrf.mxu0 }
 0x559   :  { %v7253_v19 = vadd.f32 %v7252_v61, %v6425_v45 }
 0x55a   :  { %v7266_v49 = vpop.f32.mrf.mxu1 }
 0x55b   :  { %v7267_v20 = vadd.f32 %v7266_v49, %v7253_v19 }
 0x55d   :  { %v7305_v46 = vmax.f32 %v7267_v20, 0.0 }
 0x55e   :  { %v7280_v2 = vpop.f32.mrf.mxu2 }
 0x55f   :  { %v7281_v34 = vadd.f32 %v7280_v2, %v6426_v17 }
 0x560   :  { %v7294_v53 = vpop.f32.mrf.mxu3  ;;  %v7254_v28 = vpop.f32.mrf.mxu0 }
 0x561   :  { %v7255_v24 = vadd.f32 %v7254_v28, %v6425_v45  ;;  %v7295_v7 = vadd.f32 %v7294_v53, %v7281_v34 }
 0x562   :  { %v7268_v1 = vpop.f32.mrf.mxu1 }
 0x563   :  { %v7269_v4 = vadd.f32 %v7268_v1, %v7255_v24  ;;  %v7306_v21 = vmax.f32 %v7295_v7, 0.0 }
 0x565   :  { %v7313_v23 = vmax.f32 %v7269_v4, 0.0 }
 0x566   :  { %v7282_v62 = vpop.f32.mrf.mxu2 }
 0x567   :  { %v14511_v30 = vpack.c.bf16 %v7313_v23, %v7305_v46  ;;  %v7283_v8 = vadd.f32 %v7282_v62, %v6426_v17 }
 0x568   :  { %v7296_v27 = vpop.f32.mrf.mxu3 }
 0x569   :  { %v7297_v5 = vadd.f32 %v7296_v27, %v7283_v8 }
 0x56b   :  { %v7314_v40 = vmax.f32 %v7297_v5, 0.0 }
 0x56d   :  { %v14513_v33 = vpack.c.bf16 %v7314_v40, %v7306_v21 }
 0x56e   :  { %14077 = dma.done.wait [#allocation7 + $0x3], 16384 }
 0x56f   :  { %14078 = vsyncadd [#allocation7 + $0x3], 4294950912  ;;  %v12194_v12 = vld [vmem:[#allocation5 + $0x70] sm:$0xf]  ;;  %v13628_v37 = vld [vmem:[#allocation5 + $0x74] sm:$0xf0] }
 0x570   :  { %v12258_v39 = vld [vmem:[#allocation5 + $0xf0] sm:$0xf]  ;;  %v12195_v32 = vor.u32 %v13628_v37, %v12194_v12  ;;  %v13644_v50 = vld [vmem:[#allocation5 + $0xf4] sm:$0xf0]  ;;  %v12186_v54 = vld [vmem:[#allocation5 + $0x60] sm:$0xf] }
 0x571   :  { %v12322_v43 = vld [vmem:[#allocation5 + $0x170] sm:$0xf]  ;;  %v13660_v31 = vld [vmem:[#allocation5 + $0x174] sm:$0xf0]  ;;  %v12259_v44 = vor.u32 %v13644_v50, %v12258_v39  ;;  %v13626_v48 = vld [vmem:[#allocation5 + $0x64] sm:$0xf0] }
 0x572   :  { %v12323_v51 = vor.u32 %v13660_v31, %v12322_v43  ;;  %v12386_v55 = vld [vmem:[#allocation5 + $0x1f0] sm:$0xf]  ;;  %v13676_v56 = vld [vmem:[#allocation5 + $0x1f4] sm:$0xf0]  ;;  %8101 = vmatpush.bf16.msra.mxu0 %v12195_v32  ;;  %v12250_v57 = vld [vmem:[#allocation5 + $0xe0] sm:$0xf]  ;;  %v12187_v13 = vor.u32 %v13626_v48, %v12186_v54 }
 0x573   :  { %v12387_v42 = vor.u32 %v13676_v56, %v12386_v55  ;;  %v13642_v60 = vld [vmem:[#allocation5 + $0xe4] sm:$0xf0]  ;;  %8115 = vmatpush.bf16.msra.mxu1 %v12259_v44  ;;  %v12314_v52 = vld [vmem:[#allocation5 + $0x160] sm:$0xf]  ;;  %v12178_v10 = vld [vmem:[#allocation5 + $0x50] sm:$0xf] }
 0x574   :  { %8129 = vmatpush.bf16.msra.mxu2 %v12323_v51  ;;  %v12251_v47 = vor.u32 %v13642_v60, %v12250_v57  ;;  %v13658_v29 = vld [vmem:[#allocation5 + $0x164] sm:$0xf0]  ;;  %v12378_v63 = vld [vmem:[#allocation5 + $0x1e0] sm:$0xf]  ;;  %v13624_v59 = vld [vmem:[#allocation5 + $0x54] sm:$0xf0] }
 0x575   :  { %8143 = vmatpush.bf16.msra.mxu3 %v12387_v42  ;;  %v12315_v26 = vor.u32 %v13658_v29, %v12314_v52  ;;  %v13674_v9 = vld [vmem:[#allocation5 + $0x1e4] sm:$0xf0]  ;;  %v12242_v11 = vld [vmem:[#allocation5 + $0xd0] sm:$0xf]  ;;  %v13640_v15 = vld [vmem:[#allocation5 + $0xd4] sm:$0xf0]  ;;  %v12179_v3 = vor.u32 %v13624_v59, %v12178_v10 }
 0x576   :  { %v12379_v14 = vor.u32 %v13674_v9, %v12378_v63  ;;  %v12306_v16 = vld [vmem:[#allocation5 + $0x150] sm:$0xf]  ;;  %8102 = vmatpush.bf16.msra.mxu0 %v12187_v13  ;;  %v13656_v35 = vld [vmem:[#allocation5 + $0x154] sm:$0xf0]  ;;  %v12243_v58 = vor.u32 %v13640_v15, %v12242_v11  ;;  %v12170_v45 = vld [vmem:[#allocation5 + $0x40] sm:$0xf] }
 0x577   :  { %v12370_v38 = vld [vmem:[#allocation5 + $0x1d0] sm:$0xf]  ;;  %v13672_v18 = vld [vmem:[#allocation5 + $0x1d4] sm:$0xf0]  ;;  %8116 = vmatpush.bf16.msra.mxu1 %v12251_v47  ;;  %v12307_v61 = vor.u32 %v13656_v35, %v12306_v16  ;;  %v13622_v49 = vld [vmem:[#allocation5 + $0x44] sm:$0xf0] }
 0x578   :  { %8130 = vmatpush.bf16.msra.mxu2 %v12315_v26  ;;  %v12234_v19 = vld [vmem:[#allocation5 + $0xc0] sm:$0xf]  ;;  %v12371_v2 = vor.u32 %v13672_v18, %v12370_v38  ;;  %v13638_v17 = vld [vmem:[#allocation5 + $0xc4] sm:$0xf0]  ;;  %v12171_v1 = vor.u32 %v13622_v49, %v12170_v45  ;;  %v12162_v46 = vld [vmem:[#allocation5 + $0x30] sm:$0xf] }
 0x579   :  { %8144 = vmatpush.bf16.msra.mxu3 %v12379_v14  ;;  %v12298_v53 = vld [vmem:[#allocation5 + $0x140] sm:$0xf]  ;;  %v13654_v28 = vld [vmem:[#allocation5 + $0x144] sm:$0xf0]  ;;  %v12235_v4 = vor.u32 %v13638_v17, %v12234_v19  ;;  %v13620_v23 = vld [vmem:[#allocation5 + $0x34] sm:$0xf0] }
 0x57a   :  { %v12362_v20 = vld [vmem:[#allocation5 + $0x1c0] sm:$0xf]  ;;  %v13670_v24 = vld [vmem:[#allocation5 + $0x1c4] sm:$0xf0]  ;;  %8103 = vmatpush.bf16.msra.mxu0 %v12179_v3  ;;  %v12299_v34 = vor.u32 %v13654_v28, %v12298_v53  ;;  %v12226_v62 = vld [vmem:[#allocation5 + $0xb0] sm:$0xf]  ;;  %v12163_v12 = vor.u32 %v13620_v23, %v12162_v46 }
 0x57b   :  { %8117 = vmatpush.bf16.msra.mxu1 %v12243_v58  ;;  %v12363_v7 = vor.u32 %v13670_v24, %v12362_v20  ;;  %v13636_v8 = vld [vmem:[#allocation5 + $0xb4] sm:$0xf0]  ;;  %v12290_v27 = vld [vmem:[#allocation5 + $0x130] sm:$0xf]  ;;  %v12154_v32 = vld [vmem:[#allocation5 + $0x20] sm:$0xf] }
 0x57c   :  { %8131 = vmatpush.bf16.msra.mxu2 %v12307_v61  ;;  %v13652_v5 = vld [vmem:[#allocation5 + $0x134] sm:$0xf0]  ;;  %v12354_v21 = vld [vmem:[#allocation5 + $0x1b0] sm:$0xf]  ;;  %v12227_v37 = vor.u32 %v13636_v8, %v12226_v62  ;;  %v13618_v50 = vld [vmem:[#allocation5 + $0x24] sm:$0xf0] }
 0x57d   :  { %8145 = vmatpush.bf16.msra.mxu3 %v12371_v2  ;;  %v13668_v40 = vld [vmem:[#allocation5 + $0x1b4] sm:$0xf0]  ;;  %v12291_v39 = vor.u32 %v13652_v5, %v12290_v27  ;;  %v12218_v43 = vld [vmem:[#allocation5 + $0xa0] sm:$0xf]  ;;  %v13634_v44 = vld [vmem:[#allocation5 + $0xa4] sm:$0xf0]  ;;  %v12155_v42 = vor.u32 %v13618_v50, %v12154_v32 }
 0x57e   :  { %8104 = vmatpush.bf16.msra.mxu0 %v12171_v1  ;;  %v12355_v31 = vor.u32 %v13668_v40, %v12354_v21  ;;  %v12282_v51 = vld [vmem:[#allocation5 + $0x120] sm:$0xf]  ;;  %v13650_v55 = vld [vmem:[#allocation5 + $0x124] sm:$0xf0]  ;;  %v12219_v48 = vor.u32 %v13634_v44, %v12218_v43  ;;  %v12146_v60 = vld [vmem:[#allocation5 + $0x10] sm:$0xf] }
 0x57f   :  { %8118 = vmatpush.bf16.msra.mxu1 %v12235_v4  ;;  %v12346_v56 = vld [vmem:[#allocation5 + $0x1a0] sm:$0xf]  ;;  %v13666_v54 = vld [vmem:[#allocation5 + $0x1a4] sm:$0xf0]  ;;  %v12283_v57 = vor.u32 %v13650_v55, %v12282_v51  ;;  %v13616_v13 = vld [vmem:[#allocation5 + $0x14] sm:$0xf0] }
 0x580   :  { %8132 = vmatpush.bf16.msra.mxu2 %v12299_v34  ;;  %v12210_v47 = vld [vmem:[#allocation5 + $0x90] sm:$0xf]  ;;  %v12347_v52 = vor.u32 %v13666_v54, %v12346_v56  ;;  %v13632_v29 = vld [vmem:[#allocation5 + $0x94] sm:$0xf0]  ;;  %v12147_v59 = vor.u32 %v13616_v13, %v12146_v60  ;;  %v12138_v14 = vld [vmem:[#allocation5] sm:$0xf] }
 0x581   :  { %8146 = vmatpush.bf16.msra.mxu3 %v12363_v7  ;;  %v12274_v63 = vld [vmem:[#allocation5 + $0x110] sm:$0xf]  ;;  %v13648_v26 = vld [vmem:[#allocation5 + $0x114] sm:$0xf0]  ;;  %v13614_v11 = vld [vmem:[#allocation5 + $0x4] sm:$0xf0]  ;;  %v12211_v15 = vor.u32 %v13632_v29, %v12210_v47 }
 0x582   :  { %8105 = vmatpush.bf16.msra.mxu0 %v12163_v12  ;;  %v12338_v9 = vld [vmem:[#allocation5 + $0x190] sm:$0xf]  ;;  %v13664_v10 = vld [vmem:[#allocation5 + $0x194] sm:$0xf0]  ;;  %v12275_v16 = vor.u32 %v13648_v26, %v12274_v63  ;;  %v12202_v3 = vld [vmem:[#allocation5 + $0x80] sm:$0xf]  ;;  %v12139_v17 = vor.u32 %v13614_v11, %v12138_v14 }
 0x583   :  { %8119 = vmatpush.bf16.msra.mxu1 %v12227_v37  ;;  %v13630_v35 = vld [vmem:[#allocation5 + $0x84] sm:$0xf0]  ;;  %v12266_v38 = vld [vmem:[#allocation5 + $0x100] sm:$0xf]  ;;  %v12339_v18 = vor.u32 %v13664_v10, %v12338_v9  ;;  %v12450_v49 = vld [vmem:[#allocation5 + $0x270] sm:$0xf] }
 0x584   :  { %8133 = vmatpush.bf16.msra.mxu2 %v12291_v39  ;;  %v13646_v58 = vld [vmem:[#allocation5 + $0x104] sm:$0xf0]  ;;  %v12330_v61 = vld [vmem:[#allocation5 + $0x180] sm:$0xf]  ;;  %v13692_v19 = vld [vmem:[#allocation5 + $0x274] sm:$0xf0]  ;;  %v12203_v24 = vor.u32 %v13630_v35, %v12202_v3 }
 0x585   :  { %8147 = vmatpush.bf16.msra.mxu3 %v12355_v31  ;;  %v13662_v45 = vld [vmem:[#allocation5 + $0x184] sm:$0xf0]  ;;  %v12514_v2 = vld [vmem:[#allocation5 + $0x2f0] sm:$0xf]  ;;  %v13708_v53 = vld [vmem:[#allocation5 + $0x2f4] sm:$0xf0]  ;;  %v12267_v1 = vor.u32 %v13646_v58, %v12266_v38  ;;  %v12451_v23 = vor.u32 %v13692_v19, %v12450_v49 }
 0x586   :  { %8106 = vmatpush.bf16.msra.mxu0 %v12155_v42  ;;  %v12578_v28 = vld [vmem:[#allocation5 + $0x370] sm:$0xf]  ;;  %v13724_v20 = vld [vmem:[#allocation5 + $0x374] sm:$0xf0]  ;;  %v12331_v46 = vor.u32 %v13662_v45, %v12330_v61  ;;  %v12515_v62 = vor.u32 %v13708_v53, %v12514_v2  ;;  %v12442_v8 = vld [vmem:[#allocation5 + $0x260] sm:$0xf] }
 0x587   :  { %8120 = vmatpush.bf16.msra.mxu1 %v12219_v48  ;;  %v12642_v4 = vld [vmem:[#allocation5 + $0x3f0] sm:$0xf]  ;;  %v13740_v34 = vld [vmem:[#allocation5 + $0x3f4] sm:$0xf0]  ;;  %v12579_v7 = vor.u32 %v13724_v20, %v12578_v28  ;;  %v13690_v27 = vld [vmem:[#allocation5 + $0x264] sm:$0xf0] }
 0x588   :  { %8134 = vmatpush.bf16.msra.mxu2 %v12283_v57  ;;  %v12506_v5 = vld [vmem:[#allocation5 + $0x2e0] sm:$0xf]  ;;  %v12643_v21 = vor.u32 %v13740_v34, %v12642_v4  ;;  %v13706_v40 = vld [vmem:[#allocation5 + $0x2e4] sm:$0xf0]  ;;  %v12443_v50 = vor.u32 %v13690_v27, %v12442_v8  ;;  %v12434_v44 = vld [vmem:[#allocation5 + $0x250] sm:$0xf] }
 0x589   :  { %8148 = vmatpush.bf16.msra.mxu3 %v12347_v52  ;;  %v12570_v12 = vld [vmem:[#allocation5 + $0x360] sm:$0xf]  ;;  %v13722_v37 = vld [vmem:[#allocation5 + $0x364] sm:$0xf0]  ;;  %v12507_v43 = vor.u32 %v13706_v40, %v12506_v5  ;;  %v13688_v51 = vld [vmem:[#allocation5 + $0x254] sm:$0xf0] }
 0x58a   :  { %8107 = vmatpush.bf16.msra.mxu0 %v12147_v59  ;;  %v12634_v39 = vld [vmem:[#allocation5 + $0x3e0] sm:$0xf]  ;;  %v13738_v32 = vld [vmem:[#allocation5 + $0x3e4] sm:$0xf0]  ;;  %v12571_v31 = vor.u32 %v13722_v37, %v12570_v12  ;;  %v12498_v55 = vld [vmem:[#allocation5 + $0x2d0] sm:$0xf]  ;;  %v12435_v13 = vor.u32 %v13688_v51, %v12434_v44 }
 0x58b   :  { %8121 = vmatpush.bf16.msra.mxu1 %v12211_v15  ;;  %v12635_v56 = vor.u32 %v13738_v32, %v12634_v39  ;;  %v13704_v54 = vld [vmem:[#allocation5 + $0x2d4] sm:$0xf0]  ;;  %v12562_v42 = vld [vmem:[#allocation5 + $0x350] sm:$0xf]  ;;  %v12426_v29 = vld [vmem:[#allocation5 + $0x240] sm:$0xf] }
 0x58c   :  { %8135 = vmatpush.bf16.msra.mxu2 %v12275_v16  ;;  %v13720_v48 = vld [vmem:[#allocation5 + $0x354] sm:$0xf0]  ;;  %v12626_v57 = vld [vmem:[#allocation5 + $0x3d0] sm:$0xf]  ;;  %v12499_v47 = vor.u32 %v13704_v54, %v12498_v55  ;;  %v13686_v63 = vld [vmem:[#allocation5 + $0x244] sm:$0xf0] }
 0x58d   :  { %8149 = vmatpush.bf16.msra.mxu3 %v12339_v18  ;;  %v13736_v60 = vld [vmem:[#allocation5 + $0x3d4] sm:$0xf0]  ;;  %v12563_v52 = vor.u32 %v13720_v48, %v12562_v42  ;;  %v12490_v26 = vld [vmem:[#allocation5 + $0x2c0] sm:$0xf]  ;;  %v13702_v10 = vld [vmem:[#allocation5 + $0x2c4] sm:$0xf0]  ;;  %v12427_v16 = vor.u32 %v13686_v63, %v12426_v29 }
 0x58e   :  { %8108 = vmatpush.bf16.msra.mxu0 %v12139_v17  ;;  %v12627_v9 = vor.u32 %v13736_v60, %v12626_v57  ;;  %v12554_v59 = vld [vmem:[#allocation5 + $0x340] sm:$0xf]  ;;  %v13718_v14 = vld [vmem:[#allocation5 + $0x344] sm:$0xf0]  ;;  %v12491_v3 = vor.u32 %v13702_v10, %v12490_v26  ;;  %v12418_v38 = vld [vmem:[#allocation5 + $0x230] sm:$0xf] }
 0x58f   :  { %8122 = vmatpush.bf16.msra.mxu1 %v12203_v24  ;;  %v12618_v11 = vld [vmem:[#allocation5 + $0x3c0] sm:$0xf]  ;;  %v13734_v15 = vld [vmem:[#allocation5 + $0x3c4] sm:$0xf0]  ;;  %v12555_v35 = vor.u32 %v13718_v14, %v12554_v59  ;;  %v13684_v18 = vld [vmem:[#allocation5 + $0x234] sm:$0xf0] }
 0x590   :  { %8136 = vmatpush.bf16.msra.mxu2 %v12267_v1  ;;  %v12482_v58 = vld [vmem:[#allocation5 + $0x2b0] sm:$0xf]  ;;  %v12619_v61 = vor.u32 %v13734_v15, %v12618_v11  ;;  %v13700_v45 = vld [vmem:[#allocation5 + $0x2b4] sm:$0xf0]  ;;  %v12419_v53 = vor.u32 %v13684_v18, %v12418_v38  ;;  %v12410_v24 = vld [vmem:[#allocation5 + $0x220] sm:$0xf] }
 0x591   :  { %8150 = vmatpush.bf16.msra.mxu3 %v12331_v46  ;;  %8109 = vmatmul.bf16.vlgmr.msra.gmra.mxu0 %v14493_v6  ;;  %v12546_v49 = vld [vmem:[#allocation5 + $0x330] sm:$0xf]  ;;  %v13716_v19 = vld [vmem:[#allocation5 + $0x334] sm:$0xf0]  ;;  %v12483_v28 = vor.u32 %v13700_v45, %v12482_v58  ;;  %v13682_v1 = vld [vmem:[#allocation5 + $0x224] sm:$0xf0] }
 0x592   :  { %8157 = vmatpush.bf16.msrb.mxu0 %v12451_v23  ;;  %8123 = vmatmul.bf16.vlgmr.msra.gmra.mxu1 %v14495_v41  ;;  %v12610_v2 = vld [vmem:[#allocation5 + $0x3b0] sm:$0xf]  ;;  %v13732_v17 = vld [vmem:[#allocation5 + $0x3b4] sm:$0xf0]  ;;  %v12547_v20 = vor.u32 %v13716_v19, %v12546_v49  ;;  %v12474_v4 = vld [vmem:[#allocation5 + $0x2a0] sm:$0xf]  ;;  %v12411_v27 = vor.u32 %v13682_v1, %v12410_v24 }
 0x593   :  { %8171 = vmatpush.bf16.msrb.mxu1 %v12515_v62  ;;  %8137 = vmatmul.bf16.vlgmr.msra.gmra.mxu2 %v14499_v22  ;;  %v12611_v34 = vor.u32 %v13732_v17, %v12610_v2  ;;  %v13698_v46 = vld [vmem:[#allocation5 + $0x2a4] sm:$0xf0]  ;;  %v12538_v23 = vld [vmem:[#allocation5 + $0x320] sm:$0xf]  ;;  %v12402_v40 = vld [vmem:[#allocation5 + $0x210] sm:$0xf] }
 0x594   :  { %8185 = vmatpush.bf16.msrb.mxu2 %v12579_v7  ;;  %8151 = vmatmul.bf16.vlgmr.msra.gmra.mxu3 %v14501_v36  ;;  %v13714_v62 = vld [vmem:[#allocation5 + $0x324] sm:$0xf0]  ;;  %v12602_v7 = vld [vmem:[#allocation5 + $0x3a0] sm:$0xf]  ;;  %v12475_v5 = vor.u32 %v13698_v46, %v12474_v4  ;;  %v13680_v12 = vld [vmem:[#allocation5 + $0x214] sm:$0xf0] }
 0x595   :  { %8199 = vmatpush.bf16.msrb.mxu3 %v12643_v21  ;;  %v13730_v8 = vld [vmem:[#allocation5 + $0x3a4] sm:$0xf0]  ;;  %v12539_v21 = vor.u32 %v13714_v62, %v12538_v23  ;;  %v12466_v37 = vld [vmem:[#allocation5 + $0x290] sm:$0xf]  ;;  %v13696_v32 = vld [vmem:[#allocation5 + $0x294] sm:$0xf0]  ;;  %v12403_v51 = vor.u32 %v13680_v12, %v12402_v40 }
 0x596   :  { %8158 = vmatpush.bf16.msrb.mxu0 %v12443_v50  ;;  %v12603_v39 = vor.u32 %v13730_v8, %v12602_v7  ;;  %v12530_v50 = vld [vmem:[#allocation5 + $0x310] sm:$0xf]  ;;  %v13728_v44 = vld [vmem:[#allocation5 + $0x394] sm:$0xf0]  ;;  %v12394_v55 = vld [vmem:[#allocation5 + $0x200] sm:$0xf]  ;;  %v12467_v54 = vor.u32 %v13696_v32, %v12466_v37 }
 0x597   :  { %8172 = vmatpush.bf16.msrb.mxu1 %v12507_v43  ;;  %v13712_v43 = vld [vmem:[#allocation5 + $0x314] sm:$0xf0]  ;;  %v12458_v48 = vld [vmem:[#allocation5 + $0x280] sm:$0xf]  ;;  %v13694_v57 = vld [vmem:[#allocation5 + $0x284] sm:$0xf0] }
 0x598   :  { %8186 = vmatpush.bf16.msrb.mxu2 %v12571_v31  ;;  %v12594_v31 = vld [vmem:[#allocation5 + $0x390] sm:$0xf]  ;;  %v12531_v42 = vor.u32 %v13712_v43, %v12530_v50  ;;  %v12522_v60 = vld [vmem:[#allocation5 + $0x300] sm:$0xf]  ;;  %v13726_v29 = vld [vmem:[#allocation5 + $0x384] sm:$0xf0]  ;;  %v12459_v15 = vor.u32 %v13694_v57, %v12458_v48 }
 0x599   :  { %8200 = vmatpush.bf16.msrb.mxu3 %v12635_v56  ;;  %v13678_v56 = vld [vmem:[#allocation5 + $0x204] sm:$0xf0]  ;;  %v13627_v63 = vld [vmem:[#allocation5 + $0x74] sm:$0xf]  ;;  %v12196_v26 = vld [vmem:[#allocation5 + $0x78] sm:$0xf0] }
 0x59a   :  { %8159 = vmatpush.bf16.msrb.mxu0 %v12435_v13  ;;  %v12595_v13 = vor.u32 %v13728_v44, %v12594_v31  ;;  %v12395_v10 = vor.u32 %v13678_v56, %v12394_v55  ;;  %v12260_v59 = vld [vmem:[#allocation5 + $0xf8] sm:$0xf0]  ;;  %v13659_v14 = vld [vmem:[#allocation5 + $0x174] sm:$0xf]  ;;  %v12199_v18 = vor.u32 %v13627_v63, %v12196_v26  ;;  %v13625_v45 = vld [vmem:[#allocation5 + $0x64] sm:$0xf] }
 0x59b   :  { %8173 = vmatpush.bf16.msrb.mxu1 %v12499_v47  ;;  %v13710_v47 = vld [vmem:[#allocation5 + $0x304] sm:$0xf0]  ;;  %v12324_v11 = vld [vmem:[#allocation5 + $0x178] sm:$0xf0]  ;;  %v12188_v49 = vld [vmem:[#allocation5 + $0x68] sm:$0xf0] }
 0x59c   :  { %8187 = vmatpush.bf16.msrb.mxu2 %v12563_v52  ;;  %v12586_v52 = vld [vmem:[#allocation5 + $0x380] sm:$0xf]  ;;  %v13641_v19 = vld [vmem:[#allocation5 + $0xe4] sm:$0xf]  ;;  %v12252_v17 = vld [vmem:[#allocation5 + $0xe8] sm:$0xf0]  ;;  %v12191_v1 = vor.u32 %v13625_v45, %v12188_v49 }
 0x59d   :  { %8201 = vmatpush.bf16.msrb.mxu3 %v12627_v9  ;;  %v13643_v9 = vld [vmem:[#allocation5 + $0xf4] sm:$0xf]  ;;  %v12587_v38 = vor.u32 %v13726_v29, %v12586_v52  ;;  %v12380_v24 = vld [vmem:[#allocation5 + $0x1e8] sm:$0xf0]  ;;  %v12255_v4 = vor.u32 %v13641_v19, %v12252_v17  ;;  %v12180_v23 = vld [vmem:[#allocation5 + $0x58] sm:$0xf0] }
 0x59e   :  { %8160 = vmatpush.bf16.msrb.mxu0 %v12427_v16  ;;  %v12523_v16 = vor.u32 %v13710_v47, %v12522_v60  ;;  %v12263_v58 = vor.u32 %v13643_v9, %v12260_v59  ;;  %v13623_v46 = vld [vmem:[#allocation5 + $0x54] sm:$0xf]  ;;  %v12244_v8 = vld [vmem:[#allocation5 + $0xd8] sm:$0xf0]  ;;  %v13621_v32 = vld [vmem:[#allocation5 + $0x44] sm:$0xf] }
 0x59f   :  { %8174 = vmatpush.bf16.msrb.mxu1 %v12491_v3  ;;  %v13675_v3 = vld [vmem:[#allocation5 + $0x1f4] sm:$0xf]  ;;  %v12372_v40 = vld [vmem:[#allocation5 + $0x1d8] sm:$0xf0]  ;;  %v12183_v12 = vor.u32 %v13623_v46, %v12180_v23  ;;  %v12172_v50 = vld [vmem:[#allocation5 + $0x48] sm:$0xf0] }
 0x5a0   :  { %8188 = vmatpush.bf16.msrb.mxu2 %v12555_v35  ;;  %v12388_v35 = vld [vmem:[#allocation5 + $0x1f8] sm:$0xf0]  ;;  %v13639_v62 = vld [vmem:[#allocation5 + $0xd4] sm:$0xf]  ;;  %v13637_v43 = vld [vmem:[#allocation5 + $0xc4] sm:$0xf] }
 0x5a1   :  { %8202 = vmatpush.bf16.msrb.mxu3 %v12619_v61  ;;  %v12327_v61 = vor.u32 %v13659_v14, %v12324_v11  ;;  %v12391_v2 = vor.u32 %v13675_v3, %v12388_v35  ;;  %v12247_v37 = vor.u32 %v13639_v62, %v12244_v8  ;;  %v12236_v44 = vld [vmem:[#allocation5 + $0xc8] sm:$0xf0]  ;;  %v13669_v56 = vld [vmem:[#allocation5 + $0x1c4] sm:$0xf]  ;;  %v13619_v60 = vld [vmem:[#allocation5 + $0x34] sm:$0xf] }
 0x5a2   :  { %8161 = vmatpush.bf16.msrb.mxu0 %v12419_v53  ;;  %v13657_v53 = vld [vmem:[#allocation5 + $0x164] sm:$0xf]  ;;  %v12300_v55 = vld [vmem:[#allocation5 + $0x148] sm:$0xf0]  ;;  %v12239_v48 = vor.u32 %v13637_v43, %v12236_v44  ;;  %v13635_v47 = vld [vmem:[#allocation5 + $0xb4] sm:$0xf] }
 0x5a3   :  { %8175 = vmatpush.bf16.msrb.mxu1 %v12483_v28  ;;  %v12316_v28 = vld [vmem:[#allocation5 + $0x168] sm:$0xf0]  ;;  %v12228_v29 = vld [vmem:[#allocation5 + $0xb8] sm:$0xf0]  ;;  %v13651_v63 = vld [vmem:[#allocation5 + $0x134] sm:$0xf] }
 0x5a4   :  { %8189 = vmatpush.bf16.msrb.mxu2 %v12547_v20  ;;  %v13673_v20 = vld [vmem:[#allocation5 + $0x1e4] sm:$0xf]  ;;  %v12292_v26 = vld [vmem:[#allocation5 + $0x138] sm:$0xf0]  ;;  %v13667_v9 = vld [vmem:[#allocation5 + $0x1b4] sm:$0xf]  ;;  %v12231_v14 = vor.u32 %v13635_v47, %v12228_v29 }
 0x5a5   :  { %8203 = vmatpush.bf16.msrb.mxu3 %v12611_v34  ;;  %v12319_v34 = vor.u32 %v13657_v53, %v12316_v28  ;;  %v12383_v7 = vor.u32 %v13673_v20, %v12380_v24  ;;  %v12295_v11 = vor.u32 %v13651_v63, %v12292_v26  ;;  %v13633_v3 = vld [vmem:[#allocation5 + $0xa4] sm:$0xf]  ;;  %v12348_v45 = vld [vmem:[#allocation5 + $0x1a8] sm:$0xf0]  ;;  %v13615_v17 = vld [vmem:[#allocation5 + $0x14] sm:$0xf] }
 0x5a6   :  { %8162 = vmatpush.bf16.msrb.mxu0 %v12411_v27  ;;  %v13655_v27 = vld [vmem:[#allocation5 + $0x154] sm:$0xf]  ;;  %v12148_v53 = vld [vmem:[#allocation5 + $0x18] sm:$0xf0]  ;;  %v13613_v62 = vld [vmem:[#allocation5 + $0x4] sm:$0xf] }
 0x5a7   :  { %8176 = vmatpush.bf16.msrb.mxu1 %v12475_v5  ;;  %v12308_v5 = vld [vmem:[#allocation5 + $0x158] sm:$0xf0]  ;;  %v13631_v28 = vld [vmem:[#allocation5 + $0x94] sm:$0xf]  ;;  %v12151_v23 = vor.u32 %v13615_v17, %v12148_v53  ;;  %v13689_v29 = vld [vmem:[#allocation5 + $0x264] sm:$0xf] }
 0x5a8   :  { %8190 = vmatpush.bf16.msrb.mxu2 %v12539_v21  ;;  %v13671_v21 = vld [vmem:[#allocation5 + $0x1d4] sm:$0xf]  ;;  %v12212_v24 = vld [vmem:[#allocation5 + $0x98] sm:$0xf0]  ;;  %v12444_v63 = vld [vmem:[#allocation5 + $0x268] sm:$0xf0] }
 0x5a9   :  { %8204 = vmatpush.bf16.msrb.mxu3 %v12603_v39  ;;  %v12311_v39 = vor.u32 %v13655_v27, %v12308_v5  ;;  %v12375_v31 = vor.u32 %v13671_v21, %v12372_v40  ;;  %v12340_v46 = vld [vmem:[#allocation5 + $0x198] sm:$0xf0]  ;;  %v12215_v8 = vor.u32 %v13631_v28, %v12212_v24  ;;  %v13629_v5 = vld [vmem:[#allocation5 + $0x84] sm:$0xf]  ;;  %v12204_v21 = vld [vmem:[#allocation5 + $0x88] sm:$0xf0] }
 0x5aa   :  { %8163 = vmatpush.bf16.msrb.mxu0 %v12403_v51  ;;  %v13653_v51 = vld [vmem:[#allocation5 + $0x144] sm:$0xf]  ;;  %v12452_v43 = vld [vmem:[#allocation5 + $0x278] sm:$0xf0] }
 0x5ab   :  { %8177 = vmatpush.bf16.msrb.mxu1 %v12467_v54  ;;  %v12364_v54 = vld [vmem:[#allocation5 + $0x1c8] sm:$0xf0]  ;;  %v12303_v57 = vor.u32 %v13653_v51, %v12300_v55  ;;  %v13645_v40 = vld [vmem:[#allocation5 + $0x104] sm:$0xf]  ;;  %v12516_v51 = vld [vmem:[#allocation5 + $0x2f8] sm:$0xf0] }
 0x5ac   :  { %8191 = vmatpush.bf16.msrb.mxu2 %v12531_v42  ;;  %v12175_v42 = vor.u32 %v13621_v32, %v12172_v50  ;;  %v12367_v52 = vor.u32 %v13669_v56, %v12364_v54  ;;  %v12332_v32 = vld [vmem:[#allocation5 + $0x188] sm:$0xf0]  ;;  %v13691_v50 = vld [vmem:[#allocation5 + $0x274] sm:$0xf]  ;;  %v12580_v56 = vld [vmem:[#allocation5 + $0x378] sm:$0xf0]  ;;  %v12207_v54 = vor.u32 %v13629_v5, %v12204_v21 }
 0x5ad   :  { %8205 = vmatpush.bf16.msrb.mxu3 %v12595_v13  ;;  %v12164_v13 = vld [vmem:[#allocation5 + $0x38] sm:$0xf0]  ;;  %v13723_v55 = vld [vmem:[#allocation5 + $0x374] sm:$0xf]  ;;  %v13705_v26 = vld [vmem:[#allocation5 + $0x2e4] sm:$0xf] }
 0x5ae   :  { %8164 = vmatpush.bf16.msrb.mxu0 %v12395_v10  ;;  %v12356_v10 = vld [vmem:[#allocation5 + $0x1b8] sm:$0xf0]  ;;  %v12167_v59 = vor.u32 %v13619_v60, %v12164_v13  ;;  %v12455_v13 = vor.u32 %v13691_v50, %v12452_v43  ;;  %v13685_v24 = vld [vmem:[#allocation5 + $0x244] sm:$0xf]  ;;  %v13699_v5 = vld [vmem:[#allocation5 + $0x2b4] sm:$0xf] }
 0x5af   :  { %8178 = vmatpush.bf16.msrb.mxu1 %v12459_v15  ;;  %v13617_v15 = vld [vmem:[#allocation5 + $0x24] sm:$0xf]  ;;  %v12359_v35 = vor.u32 %v13667_v9, %v12356_v10  ;;  %v12508_v10 = vld [vmem:[#allocation5 + $0x2e8] sm:$0xf0]  ;;  %v12628_v17 = vld [vmem:[#allocation5 + $0x3d8] sm:$0xf0] }
 0x5b0   :  { %8192 = vmatpush.bf16.msrb.mxu2 %v12523_v16  ;;  %v12156_v16 = vld [vmem:[#allocation5 + $0x28] sm:$0xf0] }
 0x5b1   :  { %8206 = vmatpush.bf16.msrb.mxu3 %v12587_v38  ;;  %8165 = vmatmul.bf16.vlgmr.msrb.gmra.mxu0 %v14505_v0  ;;  %v12220_v38 = vld [vmem:[#allocation5 + $0xa8] sm:$0xf0]  ;;  %v12159_v49 = vor.u32 %v13617_v15, %v12156_v16  ;;  %v12447_v16 = vor.u32 %v13689_v29, %v12444_v63  ;;  %v13679_v29 = vld [vmem:[#allocation5 + $0x214] sm:$0xf]  ;;  %v12404_v63 = vld [vmem:[#allocation5 + $0x218] sm:$0xf0] }
 0x5b2   :  { %8213 = vmatpush.bf16.msra.mxu0 %v12199_v18  ;;  %8179 = vmatmul.bf16.vlgmr.msrb.gmra.mxu1 %v14507_v25  ;;  %v13649_v18 = vld [vmem:[#allocation5 + $0x124] sm:$0xf]  ;;  %v12223_v19 = vor.u32 %v13633_v3, %v12220_v38  ;;  %v12636_v15 = vld [vmem:[#allocation5 + $0x3e8] sm:$0xf0]  ;;  %v12511_v3 = vor.u32 %v13705_v26, %v12508_v10  ;;  %v13687_v38 = vld [vmem:[#allocation5 + $0x254] sm:$0xf] }
 0x5b3   :  { %8227 = vmatpush.bf16.msra.mxu1 %v12263_v58  ;;  %8193 = vmatmul.bf16.vlgmr.msrb.gmra.mxu2 %v14511_v30  ;;  %v12284_v58 = vld [vmem:[#allocation5 + $0x128] sm:$0xf0]  ;;  %v13695_v26 = vld [vmem:[#allocation5 + $0x294] sm:$0xf]  ;;  %v12468_v10 = vld [vmem:[#allocation5 + $0x298] sm:$0xf0] }
 0x5b4   :  { %8241 = vmatpush.bf16.msra.mxu2 %v12327_v61  ;;  %8207 = vmatmul.bf16.vlgmr.msrb.gmra.mxu3 %v14513_v33  ;;  %v13665_v61 = vld [vmem:[#allocation5 + $0x1a4] sm:$0xf] }
 0x5b5   :  { %8255 = vmatpush.bf16.msra.mxu3 %v12391_v2  ;;  %v12287_v2 = vor.u32 %v13649_v18, %v12284_v58  ;;  %v12351_v20 = vor.u32 %v13665_v61, %v12348_v45  ;;  %v12436_v18 = vld [vmem:[#allocation5 + $0x258] sm:$0xf0]  ;;  %v13703_v58 = vld [vmem:[#allocation5 + $0x2d4] sm:$0xf] }
 0x5b6   :  { %8214 = vmatpush.bf16.msra.mxu0 %v12191_v1  ;;  %v13647_v1 = vld [vmem:[#allocation5 + $0x114] sm:$0xf]  ;;  %v12500_v45 = vld [vmem:[#allocation5 + $0x2d8] sm:$0xf0]  ;;  %v12439_v53 = vor.u32 %v13687_v38, %v12436_v18  ;;  %v13677_v38 = vld [vmem:[#allocation5 + $0x204] sm:$0xf] }
 0x5b7   :  { %8228 = vmatpush.bf16.msra.mxu1 %v12255_v4  ;;  %v12276_v4 = vld [vmem:[#allocation5 + $0x118] sm:$0xf0]  ;;  %v12503_v28 = vor.u32 %v13703_v58, %v12500_v45  ;;  %v12396_v18 = vld [vmem:[#allocation5 + $0x208] sm:$0xf0]  ;;  %v13693_v58 = vld [vmem:[#allocation5 + $0x284] sm:$0xf] }
 0x5b8   :  { %8242 = vmatpush.bf16.msra.mxu2 %v12319_v34  ;;  %v13663_v34 = vld [vmem:[#allocation5 + $0x194] sm:$0xf]  ;;  %v12279_v27 = vor.u32 %v13647_v1, %v12276_v4  ;;  %v12428_v1 = vld [vmem:[#allocation5 + $0x248] sm:$0xf0] }
 0x5b9   :  { %8256 = vmatpush.bf16.msra.mxu3 %v12383_v7  ;;  %v12140_v7 = vld [vmem:[#allocation5 + $0x8] sm:$0xf0] }
 0x5ba   :  { %8215 = vmatpush.bf16.msra.mxu0 %v12183_v12  ;;  %v12343_v12 = vor.u32 %v13663_v34, %v12340_v46  ;;  %v12143_v44 = vor.u32 %v13613_v62, %v12140_v7  ;;  %v12492_v34 = vld [vmem:[#allocation5 + $0x2c8] sm:$0xf0]  ;;  %v13717_v46 = vld [vmem:[#allocation5 + $0x344] sm:$0xf] }
 0x5bb   :  { %8229 = vmatpush.bf16.msra.mxu1 %v12247_v37  ;;  %v12268_v37 = vld [vmem:[#allocation5 + $0x108] sm:$0xf0]  ;;  %v13733_v62 = vld [vmem:[#allocation5 + $0x3c4] sm:$0xf] }
 0x5bc   :  { %8243 = vmatpush.bf16.msra.mxu2 %v12311_v39  ;;  %v13661_v39 = vld [vmem:[#allocation5 + $0x184] sm:$0xf]  ;;  %v12460_v45 = vld [vmem:[#allocation5 + $0x288] sm:$0xf0] }
 0x5bd   :  { %8257 = vmatpush.bf16.msra.mxu3 %v12375_v31  ;;  %v13707_v31 = vld [vmem:[#allocation5 + $0x2f4] sm:$0xf]  ;;  %v12335_v60 = vor.u32 %v13661_v39, %v12332_v32  ;;  %v12612_v32 = vld [vmem:[#allocation5 + $0x3b8] sm:$0xf0] }
 0x5be   :  { %8216 = vmatpush.bf16.msra.mxu0 %v12175_v42  ;;  %v12271_v42 = vor.u32 %v13645_v40, %v12268_v37  ;;  %v12519_v47 = vor.u32 %v13707_v31, %v12516_v51  ;;  %v12484_v40 = vld [vmem:[#allocation5 + $0x2b8] sm:$0xf0]  ;;  %v13731_v39 = vld [vmem:[#allocation5 + $0x3b4] sm:$0xf]  ;;  %v12412_v51 = vld [vmem:[#allocation5 + $0x228] sm:$0xf0] }
 0x5bf   :  { %8230 = vmatpush.bf16.msra.mxu1 %v12239_v48  ;;  %v13739_v48 = vld [vmem:[#allocation5 + $0x3f4] sm:$0xf]  ;;  %v12548_v37 = vld [vmem:[#allocation5 + $0x338] sm:$0xf0]  ;;  %v12487_v43 = vor.u32 %v13699_v5, %v12484_v40 }
 0x5c0   :  { %8244 = vmatpush.bf16.msra.mxu2 %v12303_v57  ;;  %v12644_v57 = vld [vmem:[#allocation5 + $0x3f8] sm:$0xf0] }
 0x5c1   :  { %8258 = vmatpush.bf16.msra.mxu3 %v12367_v52  ;;  %v12583_v52 = vor.u32 %v13723_v55, %v12580_v56  ;;  %v12647_v9 = vor.u32 %v13739_v48, %v12644_v57  ;;  %v13697_v55 = vld [vmem:[#allocation5 + $0x2a4] sm:$0xf]  ;;  %v12615_v56 = vor.u32 %v13731_v39, %v12612_v32  ;;  %v12540_v48 = vld [vmem:[#allocation5 + $0x328] sm:$0xf0] }
 0x5c2   :  { %8217 = vmatpush.bf16.msra.mxu0 %v12167_v59  ;;  %v13721_v59 = vld [vmem:[#allocation5 + $0x364] sm:$0xf] }
 0x5c3   :  { %8231 = vmatpush.bf16.msra.mxu1 %v12231_v14  ;;  %v12572_v14 = vld [vmem:[#allocation5 + $0x368] sm:$0xf0]  ;;  %v13729_v57 = vld [vmem:[#allocation5 + $0x3a4] sm:$0xf] }
 0x5c4   :  { %8245 = vmatpush.bf16.msra.mxu2 %v12295_v11  ;;  %v13737_v11 = vld [vmem:[#allocation5 + $0x3e4] sm:$0xf] }
 0x5c5   :  { %8259 = vmatpush.bf16.msra.mxu3 %v12359_v35  ;;  %v12575_v35 = vor.u32 %v13721_v59, %v12572_v14  ;;  %v12639_v61 = vor.u32 %v13737_v11, %v12636_v15  ;;  %v13711_v59 = vld [vmem:[#allocation5 + $0x314] sm:$0xf]  ;;  %v12532_v14 = vld [vmem:[#allocation5 + $0x318] sm:$0xf0] }
 0x5c6   :  { %8218 = vmatpush.bf16.msra.mxu0 %v12159_v49  ;;  %v13719_v49 = vld [vmem:[#allocation5 + $0x354] sm:$0xf]  ;;  %v12596_v15 = vld [vmem:[#allocation5 + $0x398] sm:$0xf0] }
 0x5c7   :  { %8232 = vmatpush.bf16.msra.mxu1 %v12223_v19  ;;  %v12564_v19 = vld [vmem:[#allocation5 + $0x358] sm:$0xf0]  ;;  %v13727_v11 = vld [vmem:[#allocation5 + $0x394] sm:$0xf] }
 0x5c8   :  { %8246 = vmatpush.bf16.msra.mxu2 %v12287_v2  ;;  %v13735_v2 = vld [vmem:[#allocation5 + $0x3d4] sm:$0xf] }
 0x5c9   :  { %8260 = vmatpush.bf16.msra.mxu3 %v12351_v20  ;;  %v12567_v20 = vor.u32 %v13719_v49, %v12564_v19  ;;  %v12631_v4 = vor.u32 %v13735_v2, %v12628_v17  ;;  %v13709_v49 = vld [vmem:[#allocation5 + $0x304] sm:$0xf]  ;;  %v12524_v19 = vld [vmem:[#allocation5 + $0x308] sm:$0xf0] }
 0x5ca   :  { %8219 = vmatpush.bf16.msra.mxu0 %v12151_v23  ;;  %v12556_v23 = vld [vmem:[#allocation5 + $0x348] sm:$0xf0]  ;;  %v13725_v2 = vld [vmem:[#allocation5 + $0x384] sm:$0xf] }
 0x5cb   :  { %8233 = vmatpush.bf16.msra.mxu1 %v12215_v8  ;;  %v13683_v8 = vld [vmem:[#allocation5 + $0x234] sm:$0xf]  ;;  %v12588_v17 = vld [vmem:[#allocation5 + $0x388] sm:$0xf0] }
 0x5cc   :  { %8247 = vmatpush.bf16.msra.mxu2 %v12279_v27  ;;  %v12420_v27 = vld [vmem:[#allocation5 + $0x238] sm:$0xf0] }
 0x5cd   :  { %8261 = vmatpush.bf16.msra.mxu3 %v12343_v12  ;;  %v13715_v12 = vld [vmem:[#allocation5 + $0x334] sm:$0xf]  ;;  %v12423_v50 = vor.u32 %v13683_v8, %v12420_v27 }
 0x5ce   :  { %8220 = vmatpush.bf16.msra.mxu0 %v12143_v44  ;;  %v12551_v31 = vor.u32 %v13715_v12, %v12548_v37  ;;  %v13681_v44 = vld [vmem:[#allocation5 + $0x224] sm:$0xf] }
 0x5cf   :  { %8234 = vmatpush.bf16.msra.mxu1 %v12207_v54  ;;  %v12476_v54 = vld [vmem:[#allocation5 + $0x2a8] sm:$0xf0] }
 0x5d0   :  { %8248 = vmatpush.bf16.msra.mxu2 %v12271_v42  ;;  %v13713_v42 = vld [vmem:[#allocation5 + $0x324] sm:$0xf] }
 0x5d1   :  { %8262 = vmatpush.bf16.msra.mxu3 %v12335_v60  ;;  %8221 = vmatmul.bf16.vlgmr.msra.gmra.mxu0 %v14493_v6  ;;  %v12620_v6 = vld [vmem:[#allocation5 + $0x3c8] sm:$0xf0] }
 0x5d2   :  { %8269 = vmatpush.bf16.msrb.mxu0 %v12455_v13  ;;  %8235 = vmatmul.bf16.vlgmr.msra.gmra.mxu1 %v14495_v41  ;;  %v12559_v41 = vor.u32 %v13717_v46, %v12556_v23  ;;  %v12623_v21 = vor.u32 %v13733_v62, %v12620_v6  ;;  %v12604_v60 = vld [vmem:[#allocation5 + $0x3a8] sm:$0xf0]  ;;  %v12415_v13 = vor.u32 %v13681_v44, %v12412_v51 }
 0x5d3   :  { %8283 = vmatpush.bf16.msrb.mxu1 %v12519_v47  ;;  %8249 = vmatmul.bf16.vlgmr.msra.gmra.mxu2 %v14499_v22  ;;  %v13701_v22 = vld [vmem:[#allocation5 + $0x2c4] sm:$0xf]  ;;  %v12479_v47 = vor.u32 %v13697_v55, %v12476_v54 }
 0x5d4   :  { %8297 = vmatpush.bf16.msrb.mxu2 %v12583_v52  ;;  %8263 = vmatmul.bf16.vlgmr.msra.gmra.mxu3 %v14501_v36  ;;  %v12431_v36 = vor.u32 %v13685_v24, %v12428_v1  ;;  %v12495_v7 = vor.u32 %v13701_v22, %v12492_v34  ;;  %v12543_v52 = vor.u32 %v13713_v42, %v12540_v48  ;;  %v7455_v22 = vld [vmem:[#allocation16] sm:$0x3] }
 0x5d5   :  { %8311 = vmatpush.bf16.msrb.mxu3 %v12647_v9  ;;  %v12607_v9 = vor.u32 %v13729_v57, %v12604_v60  ;;  %v12591_v24 = vor.u32 %v13725_v2, %v12588_v17  ;;  %v7457_v34 = vperm.slane %v7455_v22, 0 }
 0x5d6   :  { %8270 = vmatpush.bf16.msrb.mxu0 %v12447_v16  ;;  %v12407_v16 = vor.u32 %v13679_v29, %v12404_v63  ;;  %v7458_v29 = vperm.slane %v7455_v22, 1 }
 0x5d7   :  { %8284 = vmatpush.bf16.msrb.mxu1 %v12511_v3  ;;  %v12471_v3 = vor.u32 %v13695_v26, %v12468_v10 }
 0x5d8   :  { %8298 = vmatpush.bf16.msrb.mxu2 %v12575_v35  ;;  %v12535_v35 = vor.u32 %v13711_v59, %v12532_v14 }
 0x5d9   :  { %8312 = vmatpush.bf16.msrb.mxu3 %v12639_v61  ;;  %v12599_v61 = vor.u32 %v13727_v11, %v12596_v15 }
 0x5da   :  { %8271 = vmatpush.bf16.msrb.mxu0 %v12439_v53  ;;  %v12399_v53 = vor.u32 %v13677_v38, %v12396_v18 }
 0x5db   :  { %8285 = vmatpush.bf16.msrb.mxu1 %v12503_v28  ;;  %v12463_v28 = vor.u32 %v13693_v58, %v12460_v45 }
 0x5dc   :  { %8299 = vmatpush.bf16.msrb.mxu2 %v12567_v20  ;;  %v12527_v20 = vor.u32 %v13709_v49, %v12524_v19 }
 0x5dd   :  { %8313 = vmatpush.bf16.msrb.mxu3 %v12631_v4 }
 0x5de   :  { %8272 = vmatpush.bf16.msrb.mxu0 %v12431_v36 }
 0x5df   :  { %8286 = vmatpush.bf16.msrb.mxu1 %v12495_v7 }
 0x5e0   :  { %8300 = vmatpush.bf16.msrb.mxu2 %v12559_v41 }
 0x5e1   :  { %8314 = vmatpush.bf16.msrb.mxu3 %v12623_v21 }
 0x5e2   :  { %8273 = vmatpush.bf16.msrb.mxu0 %v12423_v50 }
 0x5e3   :  { %8287 = vmatpush.bf16.msrb.mxu1 %v12487_v43 }
 0x5e4   :  { %8301 = vmatpush.bf16.msrb.mxu2 %v12551_v31 }
 0x5e5   :  { %8315 = vmatpush.bf16.msrb.mxu3 %v12615_v56 }
 0x5e6   :  { %8274 = vmatpush.bf16.msrb.mxu0 %v12415_v13 }
 0x5e7   :  { %8288 = vmatpush.bf16.msrb.mxu1 %v12479_v47 }
 0x5e8   :  { %8302 = vmatpush.bf16.msrb.mxu2 %v12543_v52 }
 0x5e9   :  { %8316 = vmatpush.bf16.msrb.mxu3 %v12607_v9 }
 0x5ea   :  { %8275 = vmatpush.bf16.msrb.mxu0 %v12407_v16 }
 0x5eb   :  { %8289 = vmatpush.bf16.msrb.mxu1 %v12471_v3 }
 0x5ec   :  { %8303 = vmatpush.bf16.msrb.mxu2 %v12535_v35 }
 0x5ed   :  { %8317 = vmatpush.bf16.msrb.mxu3 %v12599_v61 }
 0x5ee   :  { %8276 = vmatpush.bf16.msrb.mxu0 %v12399_v53 }
 0x5ef   :  { %8290 = vmatpush.bf16.msrb.mxu1 %v12463_v28 }
 0x5f0   :  { %8304 = vmatpush.bf16.msrb.mxu2 %v12527_v20 }
 0x5f1   :  { %8318 = vmatpush.bf16.msrb.mxu3 %v12591_v24  ;;  %8277 = vmatmul.bf16.vlgmr.msrb.gmra.mxu0 %v14505_v0 }
 0x5f2   :  { %8291 = vmatmul.bf16.vlgmr.msrb.gmra.mxu1 %v14507_v25 }
 0x5f3   :  { %8305 = vmatmul.bf16.vlgmr.msrb.gmra.mxu2 %v14511_v30 }
 0x5f4   :  { %8319 = vmatmul.bf16.vlgmr.msrb.gmra.mxu3 %v14513_v33 }
 0x60e   :  { %v8110_v1 = vpop.f32.mrf.mxu0 }
 0x60f   :  { %v8124_v4 = vpop.f32.mrf.mxu1  ;;  %v8111_v23 = vadd.f32 %v8110_v1, %v7457_v34 }
 0x611   :  { %v8125_v7 = vadd.f32 %v8124_v4, %v8111_v23 }
 0x616   :  { %v8138_v46 = vpop.f32.mrf.mxu2  ;;  %v8112_v6 = vpop.f32.mrf.mxu0 }
 0x617   :  { %v8152_v62 = vpop.f32.mrf.mxu3  ;;  %v8126_v36 = vpop.f32.mrf.mxu1  ;;  %v8113_v41 = vadd.f32 %v8112_v6, %v7457_v34  ;;  %v8139_v8 = vadd.f32 %v8138_v46, %v8125_v7 }
 0x619   :  { %v8127_v0 = vadd.f32 %v8126_v36, %v8113_v41  ;;  %v8153_v25 = vadd.f32 %v8152_v62, %v8139_v8 }
 0x61e   :  { %v8140_v27 = vpop.f32.mrf.mxu2 }
 0x61f   :  { %v8154_v5 = vpop.f32.mrf.mxu3  ;;  %v8141_v40 = vadd.f32 %v8140_v27, %v8127_v0 }
 0x621   :  { %v8155_v12 = vadd.f32 %v8154_v5, %v8141_v40 }
 0x62e   :  { %v8166_v21 = vpop.f32.mrf.mxu0 }
 0x62f   :  { %v8180_v30 = vpop.f32.mrf.mxu1  ;;  %v8167_v33 = vadd.f32 %v8166_v21, %v8153_v25 }
 0x631   :  { %v8181_v39 = vadd.f32 %v8180_v30, %v8167_v33 }
 0x636   :  { %v8194_v37 = vpop.f32.mrf.mxu2  ;;  %v8168_v32 = vpop.f32.mrf.mxu0 }
 0x637   :  { %v8208_v50 = vpop.f32.mrf.mxu3  ;;  %v8169_v43 = vadd.f32 %v8168_v32, %v8155_v12  ;;  %v8182_v31 = vpop.f32.mrf.mxu1  ;;  %v8195_v44 = vadd.f32 %v8194_v37, %v8181_v39 }
 0x639   :  { %v8183_v51 = vadd.f32 %v8182_v31, %v8169_v43  ;;  %v8209_v56 = vadd.f32 %v8208_v50, %v8195_v44 }
 0x63b   :  { %v8325_v57 = vmax.f32 %v8209_v56, 0.0 }
 0x63e   :  { %v8196_v55 = vpop.f32.mrf.mxu2 }
 0x63f   :  { %v8197_v54 = vadd.f32 %v8196_v55, %v8183_v51  ;;  %v8210_v42 = vpop.f32.mrf.mxu3 }
 0x641   :  { %v8211_v48 = vadd.f32 %v8210_v42, %v8197_v54 }
 0x643   :  { %v8327_v60 = vmax.f32 %v8211_v48, 0.0 }
 0x645   :  { %v14531_v13 = vpack.c.bf16 %v8327_v60, %v8325_v57 }
 0x64e   :  { %v8222_v47 = vpop.f32.mrf.mxu0 }
 0x64f   :  { %v8236_v52 = vpop.f32.mrf.mxu1  ;;  %v8223_v9 = vadd.f32 %v8222_v47, %v7458_v29 }
 0x651   :  { %v8237_v14 = vadd.f32 %v8236_v52, %v8223_v9 }
 0x656   :  { %v8250_v63 = vpop.f32.mrf.mxu2  ;;  %v8224_v10 = vpop.f32.mrf.mxu0 }
 0x657   :  { %v8264_v26 = vpop.f32.mrf.mxu3  ;;  %v8238_v59 = vpop.f32.mrf.mxu1  ;;  %v8225_v11 = vadd.f32 %v8224_v10, %v7458_v29  ;;  %v8251_v16 = vadd.f32 %v8250_v63, %v8237_v14 }
 0x659   :  { %v8239_v3 = vadd.f32 %v8238_v59, %v8225_v11  ;;  %v8265_v58 = vadd.f32 %v8264_v26, %v8251_v16 }
 0x65e   :  { %v8252_v15 = vpop.f32.mrf.mxu2 }
 0x65f   :  { %v8266_v35 = vpop.f32.mrf.mxu3  ;;  %v8253_v61 = vadd.f32 %v8252_v15, %v8239_v3 }
 0x661   :  { %v8267_v19 = vadd.f32 %v8266_v35, %v8253_v61 }
 0x66e   :  { %v8278_v38 = vpop.f32.mrf.mxu0 }
 0x66f   :  { %v8292_v18 = vpop.f32.mrf.mxu1  ;;  %v8279_v45 = vadd.f32 %v8278_v38, %v8265_v58 }
 0x671   :  { %v8293_v53 = vadd.f32 %v8292_v18, %v8279_v45 }
 0x676   :  { %v8306_v49 = vpop.f32.mrf.mxu2  ;;  %v8280_v17 = vpop.f32.mrf.mxu0 }
 0x677   :  { %v8320_v2 = vpop.f32.mrf.mxu3  ;;  %v8281_v28 = vadd.f32 %v8280_v17, %v8267_v19  ;;  %v8307_v20 = vadd.f32 %v8306_v49, %v8293_v53  ;;  %v8294_v24 = vpop.f32.mrf.mxu1 }
 0x679   :  { %v8295_v1 = vadd.f32 %v8294_v24, %v8281_v28  ;;  %v8321_v4 = vadd.f32 %v8320_v2, %v8307_v20 }
 0x67b   :  { %v8326_v62 = vmax.f32 %v8321_v4, 0.0 }
 0x67e   :  { %v8308_v22 = vpop.f32.mrf.mxu2 }
 0x67f   :  { %v8309_v34 = vadd.f32 %v8308_v22, %v8295_v1  ;;  %v8322_v46 = vpop.f32.mrf.mxu3 }
 0x681   :  { %v8323_v23 = vadd.f32 %v8322_v46, %v8309_v34 }
 0x683   :  { %v8328_v6 = vmax.f32 %v8323_v23, 0.0 }
 0x685   :  { %v8330_v36 = vpack.c.bf16 %v8328_v6, %v8326_v62 }
 0x686   :  { %14079 = dma.done.wait [#allocation7 + $0x4], 2048 }
 0x687   :  { %14080 = vsyncadd [#allocation7 + $0x4], 4294965248  ;;  %v13748_v7 = vld [vmem:[#allocation6 + $0x38] sm:$0xff]  ;;  %v13747_v8 = vld [vmem:[#allocation6 + $0x30] sm:$0xff]  ;;  %s14096_s4 = smov [#allocation19]   ;;  %s8502_s25 = sshll.u32 %s14548_s11, 4  ;;  %s8503_s25 = int_to_ptr.hbm [resolvable:$true] %s8502_s25 }
 0x688   :  { %v13756_v41 = vld [vmem:[#allocation6 + $0x78] sm:$0xff]  ;;  %8466 = vmatpush.bf16.msra.mxu0 %v13748_v7  ;;  %v13755_v27 = vld [vmem:[#allocation6 + $0x70] sm:$0xff]  ;;  %v13746_v0 = vld [vmem:[#allocation6 + $0x28] sm:$0xff]  ;;  %s8500_s5 = sshll.u32 %s14096_s4, 4  ;;  %s14097_s9 = smov 128   ;;  %s8501_s5 = int_to_ptr.vmem [resolvable:$true] %s8500_s5 }
 0x689   :  { %8480 = vmatpush.bf16.msra.mxu1 %v13756_v41  ;;  %v13754_v5 = vld [vmem:[#allocation6 + $0x68] sm:$0xff]  ;;  %v13745_v25 = vld [vmem:[#allocation6 + $0x20] sm:$0xff]  ;;  %v13744_v30 = vld [vmem:[#allocation6 + $0x18] sm:$0xff]  ;;  %s14098_s26 = smov 8  }
 0x68a   :  { %v13753_v21 = vld [vmem:[#allocation6 + $0x60] sm:$0xff]  ;;  %v13752_v40 = vld [vmem:[#allocation6 + $0x58] sm:$0xff]  ;;  %v13743_v33 = vld [vmem:[#allocation6 + $0x10] sm:$0xff] }
 0x68b   :  { %v13751_v12 = vld [vmem:[#allocation6 + $0x50] sm:$0xff]  ;;  %v13742_v37 = vld [vmem:[#allocation6 + $0x8] sm:$0xff]  ;;  %v13741_v32 = vld [vmem:[#allocation6] sm:$0xff] }
 0x68c   :  { %8467 = vmatpush.bf16.msra.mxu0 %v13747_v8  ;;  %v13750_v39 = vld [vmem:[#allocation6 + $0x48] sm:$0xff]  ;;  %v13749_v50 = vld [vmem:[#allocation6 + $0x40] sm:$0xff] }
 0x68d   :  { %8481 = vmatpush.bf16.msra.mxu1 %v13755_v27  ;;  %v13774_v43 = vld [vmem:[#allocation17] ss:$0 sm:$0xff] }
 0x690   :  { %8468 = vmatpush.bf16.msra.mxu0 %v13746_v0 }
 0x691   :  { %8482 = vmatpush.bf16.msra.mxu1 %v13754_v5 }
 0x694   :  { %8469 = vmatpush.bf16.msra.mxu0 %v13745_v25 }
 0x695   :  { %8483 = vmatpush.bf16.msra.mxu1 %v13753_v21 }
 0x698   :  { %8470 = vmatpush.bf16.msra.mxu0 %v13744_v30 }
 0x699   :  { %8484 = vmatpush.bf16.msra.mxu1 %v13752_v40 }
 0x69c   :  { %8471 = vmatpush.bf16.msra.mxu0 %v13743_v33 }
 0x69d   :  { %8485 = vmatpush.bf16.msra.mxu1 %v13751_v12 }
 0x6a0   :  { %8472 = vmatpush.bf16.msra.mxu0 %v13742_v37 }
 0x6a1   :  { %8486 = vmatpush.bf16.msra.mxu1 %v13750_v39 }
 0x6a4   :  { %8473 = vmatpush.bf16.msra.mxu0 %v13741_v32 }
 0x6a5   :  { %8487 = vmatpush.bf16.msra.mxu1 %v13749_v50 }
 0x6a7   :  { %8474 = vmatmul.bf16.vlgmr.msra.gmra.mxu0 %v14531_v13 }
 0x6a8   :  { %8488 = vmatmul.bf16.vlgmr.msra.gmra.mxu1 %v8330_v36 }
 0x724   :  { %v8475_v31 = vpop.f32.mrf.mxu0 }
 0x725   :  { %v8489_v44 = vpop.f32.mrf.mxu1  ;;  %v8476_v51 = vadd.f32 %v13774_v43, %v8475_v31 }
 0x727   :  { %v8490_v55 = vadd.f32 %v8489_v44, %v8476_v51 }
 0x729   :  { %8494 = vst [vmem:[#allocation19] sm:$0xff] %v8490_v55 }
 0x72c   :  { %v8477_v56 = vpop.f32.mrf.mxu0 }
 0x72d   :  { %v8478_v54 = vadd.f32 %v13774_v43, %v8477_v56  ;;  %v8491_v42 = vpop.f32.mrf.mxu1 }
 0x72f   :  { %v8492_v48 = vadd.f32 %v8491_v42, %v8478_v54 }
 0x731   :  { %8495 = vst [vmem:[#allocation19 + $0x8] sm:$0xff] %v8492_v48 }
 0x732   :  { %8508 = dma.vmem_to_hbm [thread:$0]  %s8501_s5, 256, %s8503_s25, [#allocation10], %s14097_s9, %s14097_s9, %s14098_s26  }
 0x733   :  { %14081 = dma.done.wait [#allocation10], 256  }
 0x734   :  { %14082 = vsyncadd [#allocation10], 4294967040 }
 0x735   :  { %8513 = vsyncpa [#allocation9], 1 }
 0x736   :  { %8514 = vsyncpa [#allocation12], 1 }
 0x737   :  { %8515 = vsyncpa [#allocation15], 1 }
 0x738   :  { %8516 = vsyncpa [#allocation18], 1 }
 0x739   :  { %8517 = vsyncpa [#allocation10], 1 }
 0x73a   :  { %8518 = vsyncmov [#allocation7] }
 0x73d   :  { %s8519_s10 = vpop.sfrf %8518 }
 0x73e   :  { %p12712_p0 = scmp.ne.s32.totalorder %s8519_s10, 0 }
 0x740   :  { %8523 = shalt.err (%p12712_p0)  }
 0x741   :  { %8525 = vsyncmov [#allocation7 + $0x1] }
 0x744   :  { %s8526_s11 = vpop.sfrf %8525 }
 0x745   :  { %p12713_p1 = scmp.ne.s32.totalorder %s8526_s11, 0 }
 0x747   :  { %8530 = shalt.err (%p12713_p1)  }
 0x748   :  { %8532 = vsyncmov [#allocation7 + $0x2] }
 0x74b   :  { %s8533_s27 = vpop.sfrf %8532 }
 0x74c   :  { %p12714_p2 = scmp.ne.s32.totalorder %s8533_s27, 0 }
 0x74e   :  { %8537 = shalt.err (%p12714_p2)  }
 0x74f   :  { %8539 = vsyncmov [#allocation7 + $0x3] }
 0x752   :  { %s8540_s28 = vpop.sfrf %8539 }
 0x753   :  { %p12715_p3 = scmp.ne.s32.totalorder %s8540_s28, 0 }
 0x755   :  { %8544 = shalt.err (%p12715_p3)  }
 0x756   :  { %8546 = vsyncmov [#allocation7 + $0x4] }
 0x759   :  { %s8547_s29 = vpop.sfrf %8546 }
 0x75a   :  { %p12716_p4 = scmp.ne.s32.totalorder %s8547_s29, 0 }
 0x75c   :  { %8551 = shalt.err (%p12716_p4)  }

</bundles_post_ra>
